<compile_context>
chip_gen: v5e
topology: v5e:2x2
jax: 0.10.0
libtpu: 0.0.40
codegen_flags: <defaults>
</compile_context>

<pallas_src>
import functools

import jax
import jax.numpy as jnp
from jax.experimental import pallas as pl
from jax.experimental.pallas import tpu as pltpu

IN_DIM = 6
OUT_DIM = 4
HIDDEN = 256
N_FEATURE_LAYERS = 7

IN_PAD = 8      # pad features 6 -> 8 (clean sublane/K handling for the first matmul)
OUT_PAD = 128   # lane-dense output block; real Q-values live in lanes 0..3


# --------------------------------------------------------------------------- #
# kernel
# --------------------------------------------------------------------------- #
def dueling_dqn_kernel(x_ref, w1_ref, b1_ref, wf_ref, bf_ref,
                       ws_ref, bs_ref, wh_ref, bh_ref, out_ref,
                       *, bf16_epilogue):
    """One batch tile (TM rows) of the full dueling-DQN forward pass."""
    act = jnp.bfloat16 if bf16_epilogue else jnp.float32

    # layer 1: (TM, 8) x (8, 256), bf16 MXU pass, f32 accumulation; bias/ReLU on VPU.
    acc = jnp.dot(x_ref[...], w1_ref[...], preferred_element_type=jnp.float32)
    h = jnp.maximum(acc.astype(act) + b1_ref[...], 0.0)

    # layers 2..7: six (256, 256) layers from the stacked weight tensor.
    for l in range(N_FEATURE_LAYERS - 1):
        acc = jnp.dot(h.astype(jnp.bfloat16), wf_ref[l],
                      preferred_element_type=jnp.float32)
        h = jnp.maximum(acc.astype(act) + bf_ref[l], 0.0)

    # fused first layers of the value & advantage streams: (256, 512).
    acc = jnp.dot(h.astype(jnp.bfloat16), ws_ref[...],
                  preferred_element_type=jnp.float32)
    hva = jnp.maximum(acc.astype(act) + bs_ref[...], 0.0)

    # folded dueling head: q = v + (a - mean a) expressed as one bf16 (512, 128)
    # matmul with f32 accumulation (lanes >= OUT_DIM are zero padding).
    out_ref[...] = jnp.dot(hva.astype(jnp.bfloat16), wh_ref[...],
                           preferred_element_type=jnp.float32) + bh_ref[...]


# --------------------------------------------------------------------------- #
# wrapper
# --------------------------------------------------------------------------- #
def _default_bf16_epilogue():
    """bf16 bias/ReLU epilogue on chips with bf16 VPU ALUs; f32 on v5e."""
    try:
        kind = jax.devices()[0].device_kind.lower()
    except Exception:
        return True
    if "v5" in kind and "v5p" not in kind:   # v5e / v5 lite: no bf16 VALU
        return False
    return True


def _choose_block_m(b_pad, target):
    """Largest multiple of 256 dividing b_pad, <= target, preferring >= 2 grid
    steps so both TensorCores are used on v7x (dimension_semantics=parallel)."""
    candidates = [m for m in range(256, min(target, b_pad) + 1, 256)
                  if b_pad % m == 0]
    if not candidates:
        return b_pad
    multi_step = [m for m in candidates if b_pad // m >= 2]
    return max(multi_step) if multi_step else max(candidates)


def dueling_dqn_forward(x, packed, *, block_m_target=1024, bf16_epilogue=None):
    """x: (B, 6) f32.  packed: tuple from pack_params().  Returns (B, 4) f32."""
    if bf16_epilogue is None:
        bf16_epilogue = _default_bf16_epilogue()
    w1, b1, wf, bf, ws, bs, wh, bh = packed
    B = x.shape[0]
    B_pad = ((B + 255) // 256) * 256
    block_m = _choose_block_m(B_pad, block_m_target)

    # pre-cast padded input to bf16 (halves x DMA, removes in-kernel cast).
    x_pad = jnp.zeros((B_pad, IN_PAD), jnp.bfloat16)
    x_pad = x_pad.at[:B, :IN_DIM].set(x.astype(jnp.bfloat16))

    params = (w1, b1, wf, bf, ws, bs, wh, bh)
    flops = int(2 * B_pad * (IN_PAD * HIDDEN
                             + (N_FEATURE_LAYERS - 1) * HIDDEN * HIDDEN
                             + HIDDEN * 2 * HIDDEN
                             + 2 * HIDDEN * OUT_PAD))
    bytes_accessed = int(sum(int(p.size) * p.dtype.itemsize for p in params)
                         + B_pad * IN_PAD * 2 + B_pad * OUT_PAD * 4)

    const2 = lambda i: (0, 0)
    const3 = lambda i: (0, 0, 0)

    kernel = functools.partial(dueling_dqn_kernel, bf16_epilogue=bf16_epilogue)

    q_pad = pl.pallas_call(
        kernel,
        out_shape=jax.ShapeDtypeStruct((B_pad, OUT_PAD), jnp.float32),
        grid=(B_pad // block_m,),
        in_specs=[
            pl.BlockSpec((block_m, IN_PAD), lambda i: (i, 0)),              # x tile
            pl.BlockSpec((IN_PAD, HIDDEN), const2),                         # w1
            pl.BlockSpec((1, HIDDEN), const2),                              # b1
            pl.BlockSpec((N_FEATURE_LAYERS - 1, HIDDEN, HIDDEN), const3),   # stacked W
            pl.BlockSpec((N_FEATURE_LAYERS - 1, 1, HIDDEN), const3),        # stacked b
            pl.BlockSpec((HIDDEN, 2 * HIDDEN), const2),                     # fused streams W
            pl.BlockSpec((1, 2 * HIDDEN), const2),                          # fused streams b
            pl.BlockSpec((2 * HIDDEN, OUT_PAD), const2),                    # folded head W
            pl.BlockSpec((1, OUT_PAD), const2),                             # folded head b
        ],
        out_specs=pl.BlockSpec((block_m, OUT_PAD), lambda i: (i, 0)),
        compiler_params=pltpu.CompilerParams(
            dimension_semantics=("parallel",)),
        cost_estimate=pl.CostEstimate(
            flops=flops, transcendentals=0, bytes_accessed=bytes_accessed),
    )(x_pad, *params)

    return q_pad[:B, :OUT_DIM]


# --------------------------------------------------------------------------- #
# parameters
# --------------------------------------------------------------------------- #
def kaiming_uniform(key, fan_in, fan_out):
    # PyTorch kaiming_uniform_(nonlinearity='relu'): bound = sqrt(6 / fan_in).
    bound = (6.0 / fan_in) ** 0.5
    # stored (in, out) == transpose of PyTorch's (out, in)
    return jax.random.uniform(key, (fan_in, fan_out), jnp.float32, -bound, bound)


def init_raw_params(key, bias_scale=0.0):
    """Per-layer (weight, bias) in (in, out) layout.

    bias_scale=0.0 matches the module's zero-bias init; a nonzero value is used
    in the self-test to exercise the bias / folded-bias paths.
    """
    dims = ([(IN_DIM, HIDDEN)] + [(HIDDEN, HIDDEN)] * (N_FEATURE_LAYERS - 1)
            + [(HIDDEN, HIDDEN), (HIDDEN, 1),           # value stream
               (HIDDEN, HIDDEN), (HIDDEN, OUT_DIM)])    # advantage stream
    keys = jax.random.split(key, 2 * len(dims))
    raw = []
    for n, (fi, fo) in enumerate(dims):
        w = kaiming_uniform(keys[2 * n], fi, fo)
        b = bias_scale * jax.random.normal(keys[2 * n + 1], (1, fo), jnp.float32)
        raw.append((w, b))
    return raw


def pack_params(raw, *, bf16_epilogue=True):
    """Pad / stack / fuse / fold / quantize parameters into the kernel layout."""
    act = jnp.bfloat16 if bf16_epilogue else jnp.float32

    feat = raw[:N_FEATURE_LAYERS]
    (wv1, bv1), (wv2, bv2) = raw[N_FEATURE_LAYERS], raw[N_FEATURE_LAYERS + 1]
    (wa1, ba1), (wa2, ba2) = raw[N_FEATURE_LAYERS + 2], raw[N_FEATURE_LAYERS + 3]

    # first layer, padded 6 -> 8 input features.
    w1 = jnp.zeros((IN_PAD, HIDDEN), jnp.float32).at[:IN_DIM].set(feat[0][0])
    w1 = w1.astype(jnp.bfloat16)
    b1 = feat[0][1].astype(act)

    # layers 2..7 stacked.
    wf = jnp.stack([w for w, _ in feat[1:]]).astype(jnp.bfloat16)      # (6,256,256)
    bf = jnp.stack([b for _, b in feat[1:]]).astype(act)               # (6,1,256)

    # fuse the value / advantage first layers.
    ws = jnp.concatenate([wv1, wa1], axis=1).astype(jnp.bfloat16)      # (256,512)
    bs = jnp.concatenate([bv1, ba1], axis=1).astype(act)               # (1,512)

    # fold q = v + (a - mean a) into a single head (applied on the OUTPUT side
    # of wa2):  q = hv @ (wv2 @ 1_{1x4}) + ha @ (wa2 @ C) + (bv2 @ 1 + ba2 @ C)
    # with C = I4 - ones(4,4)/4.  Stored bf16 (single-pass MXU).
    center = jnp.eye(OUT_DIM, dtype=jnp.float32) - 1.0 / OUT_DIM        # (4,4)
    ones_row = jnp.ones((1, OUT_DIM), jnp.float32)
    wh_small = jnp.concatenate([wv2 @ ones_row, wa2 @ center], axis=0)  # (512,4)
    bh_small = bv2 @ ones_row + ba2 @ center                            # (1,4)
    wh = jnp.zeros((2 * HIDDEN, OUT_PAD), jnp.float32)
    wh = wh.at[:, :OUT_DIM].set(wh_small).astype(jnp.bfloat16)
    bh = jnp.zeros((1, OUT_PAD), jnp.float32).at[:, :OUT_DIM].set(bh_small)  # f32

    return (w1, b1, wf, bf, ws, bs, wh, bh)


# --------------------------------------------------------------------------- #
# reference (module structure: separate streams + explicit mean), mirroring the
# kernel's bf16 quantization (bf16 weights/activations, f32 accumulation).
# --------------------------------------------------------------------------- #
def reference_forward(x, raw, *, bf16_epilogue=True):
    bf16, f32 = jnp.bfloat16, jnp.float32
    act = bf16 if bf16_epilogue else f32

    def hidden(h, w, b):
        acc = jnp.dot(h.astype(bf16), w.astype(bf16), preferred_element_type=f32)
        return jnp.maximum(acc.astype(act) + b.astype(act), 0.0)

    def head(h, w, b):
        return jnp.dot(h.astype(bf16), w.astype(bf16),
                       preferred_element_type=f32) + b

    h = x.astype(f32)
    for w, b in raw[:N_FEATURE_LAYERS]:
        h = hidden(h, w, b)
    (wv1, bv1), (wv2, bv2) = raw[N_FEATURE_LAYERS], raw[N_FEATURE_LAYERS + 1]
    (wa1, ba1), (wa2, ba2) = raw[N_FEATURE_LAYERS + 2], raw[N_FEATURE_LAYERS + 3]
    hv = hidden(h, wv1, bv1)
    ha = hidden(h, wa1, ba1)
    v = head(hv, wv2, bv2)                               # (B, 1)
    a = head(ha, wa2, ba2)                               # (B, 4)
    return (v + (a - a.mean(axis=1, keepdims=True))).astype(f32)


# --------------------------------------------------------------------------- #
if __name__ == "__main__":
    key = jax.random.PRNGKey(0)
    k_params, k_x = jax.random.split(key)

    bf16_epilogue = _default_bf16_epilogue()

    # nonzero biases so the self-test exercises the bias / folded-bias paths
    # (the module itself zero-inits biases).
    raw = init_raw_params(k_params, bias_scale=0.05)
    packed = pack_params(raw, bf16_epilogue=bf16_epilogue)

    B = 384   # exercises batch padding (384 -> 512) and a 2-step batch grid
    x = jax.random.normal(k_x, (B, IN_DIM), jnp.float32)

    q = dueling_dqn_forward(x, packed, block_m_target=1024,
                            bf16_epilogue=bf16_epilogue)
    q = jax.block_until_ready(q)

    q_ref = reference_forward(x, raw, bf16_epilogue=bf16_epilogue)
    assert q.shape == (B, OUT_DIM)
    max_err = float(jnp.max(jnp.abs(q - q_ref)))
    assert jnp.allclose(q, q_ref, atol=2e-2, rtol=2e-2), max_err

    print("KERNEL_OK")
</pallas_src>

<mosaic_0001>
module attributes {stable_mosaic.version = 11 : i64} {
  func.func @dueling_dqn_kernel(%arg0: i32, %arg1: memref<256x8xbf16, #tpu.memory_space<vmem>>, %arg2: memref<8x256xbf16, #tpu.memory_space<vmem>>, %arg3: memref<1x256xbf16, #tpu.memory_space<vmem>>, %arg4: memref<6x256x256xbf16, #tpu.memory_space<vmem>>, %arg5: memref<6x1x256xbf16, #tpu.memory_space<vmem>>, %arg6: memref<256x512xbf16, #tpu.memory_space<vmem>>, %arg7: memref<1x512xbf16, #tpu.memory_space<vmem>>, %arg8: memref<512x128xbf16, #tpu.memory_space<vmem>>, %arg9: memref<1x128xf32, #tpu.memory_space<vmem>>, %arg10: memref<256x128xf32, #tpu.memory_space<vmem>>) attributes {dimension_semantics = [#tpu.dimension_semantics<parallel>], iteration_bounds = array<i64: 2>, scalar_prefetch = 0 : i64, scratch_operands = 0 : i64, tpu.core_type = #tpu.core_type<tc>, window_params = [{transform_indices = @transform_0, window_bounds = array<i64: 256, 8>}, {pipeline_mode = #tpu.pipeline_mode<synchronous>, transform_indices = @transform_1, window_bounds = array<i64: 8, 256>}, {pipeline_mode = #tpu.pipeline_mode<synchronous>, transform_indices = @transform_2, window_bounds = array<i64: 1, 256>}, {pipeline_mode = #tpu.pipeline_mode<synchronous>, transform_indices = @transform_3, window_bounds = array<i64: 6, 256, 256>}, {pipeline_mode = #tpu.pipeline_mode<synchronous>, transform_indices = @transform_4, window_bounds = array<i64: 6, 1, 256>}, {pipeline_mode = #tpu.pipeline_mode<synchronous>, transform_indices = @transform_5, window_bounds = array<i64: 256, 512>}, {pipeline_mode = #tpu.pipeline_mode<synchronous>, transform_indices = @transform_6, window_bounds = array<i64: 1, 512>}, {pipeline_mode = #tpu.pipeline_mode<synchronous>, transform_indices = @transform_7, window_bounds = array<i64: 512, 128>}, {pipeline_mode = #tpu.pipeline_mode<synchronous>, transform_indices = @transform_8, window_bounds = array<i64: 1, 128>}, {transform_indices = @transform_9, window_bounds = array<i64: 256, 128>}]} {
    %c0 = arith.constant 0 : index
    %c0_0 = arith.constant 0 : index
    %0 = vector.load %arg1[%c0, %c0_0] : memref<256x8xbf16, #tpu.memory_space<vmem>>, vector<256x8xbf16>
    %c0_1 = arith.constant 0 : index
    %c0_2 = arith.constant 0 : index
    %1 = vector.load %arg2[%c0_1, %c0_2] : memref<8x256xbf16, #tpu.memory_space<vmem>>, vector<8x256xbf16>
    %cst = arith.constant dense<0.000000e+00> : vector<256x256xf32>
    %2 = tpu.matmul %0, %1, %cst {dimension_numbers = #tpu.dot_dimension_numbers<[1], [0], [0], [1], [0, 0, 1, 1], [], []>} : vector<256x8xbf16>, vector<8x256xbf16>, vector<256x256xf32> -> vector<256x256xf32>
    %3 = arith.truncf %2 : vector<256x256xf32> to vector<256x256xbf16>
    %c0_3 = arith.constant 0 : index
    %c0_4 = arith.constant 0 : index
    %4 = vector.load %arg3[%c0_3, %c0_4] : memref<1x256xbf16, #tpu.memory_space<vmem>>, vector<1x256xbf16>
    %5 = vector.broadcast %4 : vector<1x256xbf16> to vector<256x256xbf16>
    %6 = arith.addf %3, %5 : vector<256x256xbf16>
    %cst_5 = arith.constant 0.000000e+00 : bf16
    %7 = vector.broadcast %cst_5 : bf16 to vector<256x256xbf16>
    %8 = arith.maximumf %6, %7 : vector<256x256xbf16>
    %c0_6 = arith.constant 0 : index
    %c0_7 = arith.constant 0 : index
    %c0_8 = arith.constant 0 : index
    %9 = vector.load %arg4[%c0_6, %c0_7, %c0_8] : memref<6x256x256xbf16, #tpu.memory_space<vmem>>, vector<1x256x256xbf16>
    %10 = vector.shape_cast %9 : vector<1x256x256xbf16> to vector<256x256xbf16>
    %cst_9 = arith.constant dense<0.000000e+00> : vector<256x256xf32>
    %11 = tpu.matmul %8, %10, %cst_9 {dimension_numbers = #tpu.dot_dimension_numbers<[1], [0], [0], [1], [0, 0, 1, 1], [], []>} : vector<256x256xbf16>, vector<256x256xbf16>, vector<256x256xf32> -> vector<256x256xf32>
    %12 = arith.truncf %11 : vector<256x256xf32> to vector<256x256xbf16>
    %c0_10 = arith.constant 0 : index
    %c0_11 = arith.constant 0 : index
    %c0_12 = arith.constant 0 : index
    %13 = vector.load %arg5[%c0_10, %c0_11, %c0_12] : memref<6x1x256xbf16, #tpu.memory_space<vmem>>, vector<1x1x256xbf16>
    %14 = vector.shape_cast %13 : vector<1x1x256xbf16> to vector<1x256xbf16>
    %15 = vector.broadcast %14 : vector<1x256xbf16> to vector<256x256xbf16>
    %16 = arith.addf %12, %15 : vector<256x256xbf16>
    %cst_13 = arith.constant 0.000000e+00 : bf16
    %17 = vector.broadcast %cst_13 : bf16 to vector<256x256xbf16>
    %18 = arith.maximumf %16, %17 : vector<256x256xbf16>
    %c1 = arith.constant 1 : index
    %c0_14 = arith.constant 0 : index
    %c0_15 = arith.constant 0 : index
    %19 = vector.load %arg4[%c1, %c0_14, %c0_15] : memref<6x256x256xbf16, #tpu.memory_space<vmem>>, vector<1x256x256xbf16>
    %20 = vector.shape_cast %19 : vector<1x256x256xbf16> to vector<256x256xbf16>
    %cst_16 = arith.constant dense<0.000000e+00> : vector<256x256xf32>
    %21 = tpu.matmul %18, %20, %cst_16 {dimension_numbers = #tpu.dot_dimension_numbers<[1], [0], [0], [1], [0, 0, 1, 1], [], []>} : vector<256x256xbf16>, vector<256x256xbf16>, vector<256x256xf32> -> vector<256x256xf32>
    %22 = arith.truncf %21 : vector<256x256xf32> to vector<256x256xbf16>
    %c1_17 = arith.constant 1 : index
    %c0_18 = arith.constant 0 : index
    %c0_19 = arith.constant 0 : index
    %23 = vector.load %arg5[%c1_17, %c0_18, %c0_19] : memref<6x1x256xbf16, #tpu.memory_space<vmem>>, vector<1x1x256xbf16>
    %24 = vector.shape_cast %23 : vector<1x1x256xbf16> to vector<1x256xbf16>
    %25 = vector.broadcast %24 : vector<1x256xbf16> to vector<256x256xbf16>
    %26 = arith.addf %22, %25 : vector<256x256xbf16>
    %cst_20 = arith.constant 0.000000e+00 : bf16
    %27 = vector.broadcast %cst_20 : bf16 to vector<256x256xbf16>
    %28 = arith.maximumf %26, %27 : vector<256x256xbf16>
    %c2 = arith.constant 2 : index
    %c0_21 = arith.constant 0 : index
    %c0_22 = arith.constant 0 : index
    %29 = vector.load %arg4[%c2, %c0_21, %c0_22] : memref<6x256x256xbf16, #tpu.memory_space<vmem>>, vector<1x256x256xbf16>
    %30 = vector.shape_cast %29 : vector<1x256x256xbf16> to vector<256x256xbf16>
    %cst_23 = arith.constant dense<0.000000e+00> : vector<256x256xf32>
    %31 = tpu.matmul %28, %30, %cst_23 {dimension_numbers = #tpu.dot_dimension_numbers<[1], [0], [0], [1], [0, 0, 1, 1], [], []>} : vector<256x256xbf16>, vector<256x256xbf16>, vector<256x256xf32> -> vector<256x256xf32>
    %32 = arith.truncf %31 : vector<256x256xf32> to vector<256x256xbf16>
    %c2_24 = arith.constant 2 : index
    %c0_25 = arith.constant 0 : index
    %c0_26 = arith.constant 0 : index
    %33 = vector.load %arg5[%c2_24, %c0_25, %c0_26] : memref<6x1x256xbf16, #tpu.memory_space<vmem>>, vector<1x1x256xbf16>
    %34 = vector.shape_cast %33 : vector<1x1x256xbf16> to vector<1x256xbf16>
    %35 = vector.broadcast %34 : vector<1x256xbf16> to vector<256x256xbf16>
    %36 = arith.addf %32, %35 : vector<256x256xbf16>
    %cst_27 = arith.constant 0.000000e+00 : bf16
    %37 = vector.broadcast %cst_27 : bf16 to vector<256x256xbf16>
    %38 = arith.maximumf %36, %37 : vector<256x256xbf16>
    %c3 = arith.constant 3 : index
    %c0_28 = arith.constant 0 : index
    %c0_29 = arith.constant 0 : index
    %39 = vector.load %arg4[%c3, %c0_28, %c0_29] : memref<6x256x256xbf16, #tpu.memory_space<vmem>>, vector<1x256x256xbf16>
    %40 = vector.shape_cast %39 : vector<1x256x256xbf16> to vector<256x256xbf16>
    %cst_30 = arith.constant dense<0.000000e+00> : vector<256x256xf32>
    %41 = tpu.matmul %38, %40, %cst_30 {dimension_numbers = #tpu.dot_dimension_numbers<[1], [0], [0], [1], [0, 0, 1, 1], [], []>} : vector<256x256xbf16>, vector<256x256xbf16>, vector<256x256xf32> -> vector<256x256xf32>
    %42 = arith.truncf %41 : vector<256x256xf32> to vector<256x256xbf16>
    %c3_31 = arith.constant 3 : index
    %c0_32 = arith.constant 0 : index
    %c0_33 = arith.constant 0 : index
    %43 = vector.load %arg5[%c3_31, %c0_32, %c0_33] : memref<6x1x256xbf16, #tpu.memory_space<vmem>>, vector<1x1x256xbf16>
    %44 = vector.shape_cast %43 : vector<1x1x256xbf16> to vector<1x256xbf16>
    %45 = vector.broadcast %44 : vector<1x256xbf16> to vector<256x256xbf16>
    %46 = arith.addf %42, %45 : vector<256x256xbf16>
    %cst_34 = arith.constant 0.000000e+00 : bf16
    %47 = vector.broadcast %cst_34 : bf16 to vector<256x256xbf16>
    %48 = arith.maximumf %46, %47 : vector<256x256xbf16>
    %c4 = arith.constant 4 : index
    %c0_35 = arith.constant 0 : index
    %c0_36 = arith.constant 0 : index
    %49 = vector.load %arg4[%c4, %c0_35, %c0_36] : memref<6x256x256xbf16, #tpu.memory_space<vmem>>, vector<1x256x256xbf16>
    %50 = vector.shape_cast %49 : vector<1x256x256xbf16> to vector<256x256xbf16>
    %cst_37 = arith.constant dense<0.000000e+00> : vector<256x256xf32>
    %51 = tpu.matmul %48, %50, %cst_37 {dimension_numbers = #tpu.dot_dimension_numbers<[1], [0], [0], [1], [0, 0, 1, 1], [], []>} : vector<256x256xbf16>, vector<256x256xbf16>, vector<256x256xf32> -> vector<256x256xf32>
    %52 = arith.truncf %51 : vector<256x256xf32> to vector<256x256xbf16>
    %c4_38 = arith.constant 4 : index
    %c0_39 = arith.constant 0 : index
    %c0_40 = arith.constant 0 : index
    %53 = vector.load %arg5[%c4_38, %c0_39, %c0_40] : memref<6x1x256xbf16, #tpu.memory_space<vmem>>, vector<1x1x256xbf16>
    %54 = vector.shape_cast %53 : vector<1x1x256xbf16> to vector<1x256xbf16>
    %55 = vector.broadcast %54 : vector<1x256xbf16> to vector<256x256xbf16>
    %56 = arith.addf %52, %55 : vector<256x256xbf16>
    %cst_41 = arith.constant 0.000000e+00 : bf16
    %57 = vector.broadcast %cst_41 : bf16 to vector<256x256xbf16>
    %58 = arith.maximumf %56, %57 : vector<256x256xbf16>
    %c5 = arith.constant 5 : index
    %c0_42 = arith.constant 0 : index
    %c0_43 = arith.constant 0 : index
    %59 = vector.load %arg4[%c5, %c0_42, %c0_43] : memref<6x256x256xbf16, #tpu.memory_space<vmem>>, vector<1x256x256xbf16>
    %60 = vector.shape_cast %59 : vector<1x256x256xbf16> to vector<256x256xbf16>
    %cst_44 = arith.constant dense<0.000000e+00> : vector<256x256xf32>
    %61 = tpu.matmul %58, %60, %cst_44 {dimension_numbers = #tpu.dot_dimension_numbers<[1], [0], [0], [1], [0, 0, 1, 1], [], []>} : vector<256x256xbf16>, vector<256x256xbf16>, vector<256x256xf32> -> vector<256x256xf32>
    %62 = arith.truncf %61 : vector<256x256xf32> to vector<256x256xbf16>
    %c5_45 = arith.constant 5 : index
    %c0_46 = arith.constant 0 : index
    %c0_47 = arith.constant 0 : index
    %63 = vector.load %arg5[%c5_45, %c0_46, %c0_47] : memref<6x1x256xbf16, #tpu.memory_space<vmem>>, vector<1x1x256xbf16>
    %64 = vector.shape_cast %63 : vector<1x1x256xbf16> to vector<1x256xbf16>
    %65 = vector.broadcast %64 : vector<1x256xbf16> to vector<256x256xbf16>
    %66 = arith.addf %62, %65 : vector<256x256xbf16>
    %cst_48 = arith.constant 0.000000e+00 : bf16
    %67 = vector.broadcast %cst_48 : bf16 to vector<256x256xbf16>
    %68 = arith.maximumf %66, %67 : vector<256x256xbf16>
    %c0_49 = arith.constant 0 : index
    %c0_50 = arith.constant 0 : index
    %69 = vector.load %arg6[%c0_49, %c0_50] : memref<256x512xbf16, #tpu.memory_space<vmem>>, vector<256x512xbf16>
    %cst_51 = arith.constant dense<0.000000e+00> : vector<256x512xf32>
    %70 = tpu.matmul %68, %69, %cst_51 {dimension_numbers = #tpu.dot_dimension_numbers<[1], [0], [0], [1], [0, 0, 1, 1], [], []>} : vector<256x256xbf16>, vector<256x512xbf16>, vector<256x512xf32> -> vector<256x512xf32>
    %71 = arith.truncf %70 : vector<256x512xf32> to vector<256x512xbf16>
    %c0_52 = arith.constant 0 : index
    %c0_53 = arith.constant 0 : index
    %72 = vector.load %arg7[%c0_52, %c0_53] : memref<1x512xbf16, #tpu.memory_space<vmem>>, vector<1x512xbf16>
    %73 = vector.broadcast %72 : vector<1x512xbf16> to vector<256x512xbf16>
    %74 = arith.addf %71, %73 : vector<256x512xbf16>
    %cst_54 = arith.constant 0.000000e+00 : bf16
    %75 = vector.broadcast %cst_54 : bf16 to vector<256x512xbf16>
    %76 = arith.maximumf %74, %75 : vector<256x512xbf16>
    %c0_55 = arith.constant 0 : index
    %c0_56 = arith.constant 0 : index
    %77 = vector.load %arg8[%c0_55, %c0_56] : memref<512x128xbf16, #tpu.memory_space<vmem>>, vector<512x128xbf16>
    %cst_57 = arith.constant dense<0.000000e+00> : vector<256x128xf32>
    %78 = tpu.matmul %76, %77, %cst_57 {dimension_numbers = #tpu.dot_dimension_numbers<[1], [0], [0], [1], [0, 0, 1, 1], [], []>} : vector<256x512xbf16>, vector<512x128xbf16>, vector<256x128xf32> -> vector<256x128xf32>
    %c0_58 = arith.constant 0 : index
    %c0_59 = arith.constant 0 : index
    %79 = vector.load %arg9[%c0_58, %c0_59] : memref<1x128xf32, #tpu.memory_space<vmem>>, vector<1x128xf32>
    %80 = vector.broadcast %79 : vector<1x128xf32> to vector<256x128xf32>
    %81 = arith.addf %78, %80 : vector<256x128xf32>
    %c0_60 = arith.constant 0 : index
    %c0_61 = arith.constant 0 : index
    %82 = vector.load %arg10[%c0_60, %c0_61] : memref<256x128xf32, #tpu.memory_space<vmem>>, vector<256x128xf32>
    tpu.vector_store %arg10[%c0_60, %c0_61], %81 {strides = array<i32>} : memref<256x128xf32, #tpu.memory_space<vmem>>, vector<256x128xf32>,
    return
  }
  func.func @transform_0(%arg0: i32) -> (i32, i32) {
    %c0_i32 = arith.constant 0 : i32
    %c0_i32_0 = arith.constant 0 : i32
    return %arg0, %c0_i32 : i32, i32
  }
  func.func @transform_1(%arg0: i32) -> (i32, i32) {
    %c0_i32 = arith.constant 0 : i32
    %c0_i32_0 = arith.constant 0 : i32
    %c0_i32_1 = arith.constant 0 : i32
    return %c0_i32, %c0_i32_0 : i32, i32
  }
  func.func @transform_2(%arg0: i32) -> (i32, i32) {
    %c0_i32 = arith.constant 0 : i32
    %c0_i32_0 = arith.constant 0 : i32
    %c0_i32_1 = arith.constant 0 : i32
    return %c0_i32, %c0_i32_0 : i32, i32
  }
  func.func @transform_3(%arg0: i32) -> (i32, i32, i32) {
    %c0_i32 = arith.constant 0 : i32
    %c0_i32_0 = arith.constant 0 : i32
    %c0_i32_1 = arith.constant 0 : i32
    %c0_i32_2 = arith.constant 0 : i32
    return %c0_i32, %c0_i32_0, %c0_i32_1 : i32, i32, i32
  }
  func.func @transform_4(%arg0: i32) -> (i32, i32, i32) {
    %c0_i32 = arith.constant 0 : i32
    %c0_i32_0 = arith.constant 0 : i32
    %c0_i32_1 = arith.constant 0 : i32
    %c0_i32_2 = arith.constant 0 : i32
    return %c0_i32, %c0_i32_0, %c0_i32_1 : i32, i32, i32
  }
  func.func @transform_5(%arg0: i32) -> (i32, i32) {
    %c0_i32 = arith.constant 0 : i32
    %c0_i32_0 = arith.constant 0 : i32
    %c0_i32_1 = arith.constant 0 : i32
    return %c0_i32, %c0_i32_0 : i32, i32
  }
  func.func @transform_6(%arg0: i32) -> (i32, i32) {
    %c0_i32 = arith.constant 0 : i32
    %c0_i32_0 = arith.constant 0 : i32
    %c0_i32_1 = arith.constant 0 : i32
    return %c0_i32, %c0_i32_0 : i32, i32
  }
  func.func @transform_7(%arg0: i32) -> (i32, i32) {
    %c0_i32 = arith.constant 0 : i32
    %c0_i32_0 = arith.constant 0 : i32
    %c0_i32_1 = arith.constant 0 : i32
    return %c0_i32, %c0_i32_0 : i32, i32
  }
  func.func @transform_8(%arg0: i32) -> (i32, i32) {
    %c0_i32 = arith.constant 0 : i32
    %c0_i32_0 = arith.constant 0 : i32
    %c0_i32_1 = arith.constant 0 : i32
    return %c0_i32, %c0_i32_0 : i32, i32
  }
  func.func @transform_9(%arg0: i32) -> (i32, i32) {
    %c0_i32 = arith.constant 0 : i32
    %c0_i32_0 = arith.constant 0 : i32
    return %arg0, %c0_i32 : i32, i32
  }
}

</mosaic_0001>

<bundles_post_ra>
// kernel: tpu_custom_call.1
= control target key start
LH: loop header
LB: loop body
LE: loop exit
PB: predicated region body
PF: predicated region fallthrough
CT: control target
= control target key end

     0   :  { %s13084_s0 = inlined_call_operand.vmem [shape: bf16[512,8], index: 0, kind: input, shape index: {}]   ;;  %s13085_s1 = inlined_call_operand.vmem [shape: bf16[8,256], index: 1, kind: input, shape index: {}]   ;;  %s13086_s2 = inlined_call_operand.vmem [shape: bf16[1,256], index: 2, kind: input, shape index: {}]   ;;  %s13087_s3 = inlined_call_operand.hbm [shape: bf16[6,256,256], index: 3, kind: input, shape index: {}]   ;;  %s13088_s4 = inlined_call_operand.vmem [shape: bf16[6,1,256], index: 4, kind: input, shape index: {}]   ;;  %s13089_s5 = inlined_call_operand.hbm [shape: bf16[256,512], index: 5, kind: input, shape index: {}]   ;;  %s13090_s6 = inlined_call_operand.vmem [shape: bf16[1,512], index: 6, kind: input, shape index: {}]   ;;  %s13091_s7 = inlined_call_operand.vmem [shape: bf16[512,128], index: 7, kind: input, shape index: {}]   ;;  %s13092_s8 = inlined_call_operand.vmem [shape: f32[1,128], index: 8, kind: input, shape index: {}]   ;;  %s13093_s9 = inlined_call_operand.hbm [shape: f32[512,128], index: 9, kind: output, shape index: {}]  }
   0x1   :  { %13094 = sst [smem:[#allocation21_spill]] %s13087_s3 }
   0x2   :  { %14 = vsyncpa [#allocation3], 0 }
   0x3   :  { %15 = vsyncpa [#allocation6], 0 }
   0x4   :  { %16 = vsyncpa [#allocation4], 0 }
   0x5   :  { %18 = vsyncpa [#allocation4 + $0x1], 0  ;;  %s10986_s30 = smov 0   ;;  %s10988_s10 = smov 0  }
   0x6   :  { %s10990_s11 = smov 0   ;;  %s10992_s12 = smov 0  }
   0x7 LB: > { %s11007_s13 = sadd.s32 4294967295, %s10926_s12   ;;  %s9145_s14 = sadd.s32 4294967294, %s10926_s12   ;;  %s10926_s12 = sphi %s10992_s12, %s13122_s12   ;;  %s10922_s11 = sphi %s10990_s11, %s13121_s11   ;;  %s10918_s10 = sphi %s10988_s10, %s13120_s10   ;;  %s10914_s30 = sphi %s10986_s30, %s13119_s30  }
   0x8   : > { %s11011_s15 = sadd.s32 1, %s10926_s12   ;;  %s225_s16 = sadd.s32 1, %s10922_s11 }
   0x9   : > { %s222_s17 = ssub.s32 %s10926_s12, %s11011_s15  ;;  %p235_p0 = scmp.ne.s32.totalorder %s10922_s11, %s10918_s10 }
   0xa   : > { %p223_p1 = scmp.eq.s32.totalorder %s222_s17, 0  ;;  %p236_p2 = scmp.eq.s32.totalorder %s11007_s13, 1 }
   0xb   : > { %p241_p3 = scmp.ne.s32.totalorder %s10918_s10, %s10914_s30  ;;  %p242_p4 = scmp.eq.s32.totalorder %s9145_s14, 1 }
   0xc   : > { %s11022_s18 = scalar_select %p223_p1, %s10922_s11, %s225_s16  }
   0xd   : > { %p11024_p5 = por %p236_p2, %p235_p0  ;;  %p11028_p6 = por %p242_p4, %p241_p3 }
   0xe   : > { %p9146_p7 = scmp.ge.s32.totalorder %s10926_s12, 1  ;;  %p249_p8 = scmp.lt.s32.totalorder %s10926_s12, 3 }
   0xf   : > { %p10750_p9 = scmp.eq.s32.totalorder %s11007_s13, 0  ;;  %s13098_s3 = sld [smem:[#allocation21_spill]] }
  0x10   : > { %p11035_p10 = pnand %p9146_p7, %p249_p8  ;;  %s10928_s25 = smov [#allocation2]  }
  0x11   : > { %s268_s26 = sshll.u32 %s10928_s25, 4  ;;  %s283_s29 = sshll.u32 %s13089_s5, 4  ;;  %s269_s26 = int_to_ptr.vmem [resolvable:$true] %s268_s26  ;;  %s284_s29 = int_to_ptr.hbm [resolvable:$true] %s283_s29 }
  0x12   : > { %p10739_p11 = pneg %p11035_p10  ;;  %s10929_s14 = smov 128  }
  0x13   : > { %s10930_s16 = smov 8   ;;  %s10931_s17 = smov [#allocation5]  }
  0x14   : > { %p10740_p12 = pnand %p10750_p9, %p10739_p11  ;;  %s285_s22 = sshll.u32 %s10931_s17, 4  ;;  %s286_s22 = int_to_ptr.vmem [resolvable:$true] %s285_s22 }
  0x15   : > { %s266_s24 = sshll.u32 %s13098_s3, 4  ;;  %s10932_s23 = smov 256   ;;  %s267_s24 = int_to_ptr.hbm [resolvable:$true] %s266_s24 }
  0x16   : > { %10742 = dma.hbm_to_vmem [thread:$0]  (!%p10740_p12), %s267_s24, 24576, %s269_s26, [#allocation3], %s10929_s14, %s10929_s14, %s10930_s16  }
  0x17   : > { %s10933_s3 = smov 16   ;;  %319 = sbr.rel (%p11035_p10) target bundleno = 2636 (0xa4c), region = 56 }
  0x18   : > { %10745 = dma.hbm_to_vmem [thread:$0]  (!%p10740_p12), %s284_s29, 8192, %s286_s22, [#allocation6], %s10932_s23, %s10932_s23, %s10933_s3  }
  0x1c   : > { %10901 = dma.done.wait (%p10750_p9), [#allocation3], 24576  }
  0x1d   : > { %10903 = vsyncadd (%p10750_p9), [#allocation3], 4294942720 }
  0x1e   : > { %10905 = dma.done.wait (%p10750_p9), [#allocation6], 8192  }
  0x1f   : > { %10907 = vsyncadd (%p10750_p9), [#allocation6], 4294959104  ;;  %s9154_s24 = sshll.u32 %s11007_s13, 5  ;;  %v401_v0 = vld [vmem:[%s13085_s1] sm:$0xff]  ;;  %v9374_v3 = vld [vmem:[#allocation2 + $0xf0] sm:$0xf] }
  0x20   : > { %p362_p13 = scmp.lt.s32.totalorder %s9154_s24, 63  ;;  %v483_v1 = vunpack.c.l.b16 %v401_v0  ;;  %v484_v2 = vunpack.c.h.b16 %v401_v0  ;;  %vm536_vm0 = vcmask 1043456   ;;  %v10461_v4 = vld [vmem:[#allocation2 + $0xf4] sm:$0xf0]  ;;  %vm487_vm1 = vcmask 64512   ;;  %s358_s22 = sand.u32 1, %s10918_s10  }
  0x21   : > { %v9375_v7 = vor.u32 %v10461_v4, %v9374_v3  ;;  %v9310_v13 = vld [vmem:[#allocation2 + $0x70] sm:$0xf]  ;;  %v10445_v14 = vld [vmem:[#allocation2 + $0x74] sm:$0xf0]  ;;  %v10444_v15 = vld [vmem:[#allocation2 + $0x74] sm:$0xf] }
  0x22   : > { %s13124_s24 = smov (!%p362_p13, %s9154_s24), 63  ;;  %v485_v5 = vpack.c.b16 %v483_v1, %v483_v1  ;;  %v486_v6 = vpack.c.b16 %v484_v2, %v484_v2  ;;  %v9311_v16 = vor.u32 %v10445_v14, %v9310_v13  ;;  %v9312_v17 = vld [vmem:[#allocation2 + $0x78] sm:$0xf0]  ;;  %v10460_v18 = vld [vmem:[#allocation2 + $0xf4] sm:$0xf]  ;;  %s9153_s23 = sshll.u32 %s358_s22, 8 }
  0x23   : > { %s9155_s3 = sshll.u32 %s13124_s24, 2  ;;  %v9315_v19 = vor.u32 %v10444_v15, %v9312_v17  ;;  %v9376_v20 = vld [vmem:[#allocation2 + $0xf8] sm:$0xf0]  ;;  %v9302_v21 = vld [vmem:[#allocation2 + $0x60] sm:$0xf]  ;;  %s12957_s24 = scalar_lea.vmem [#allocation7], %s9153_s23 }
  0x24   : > { %s11066_s28 = scalar_lea.vmem %s13084_s0, %s9155_s3  ;;  %v538_v8 = vsel %vm536_vm0, %v485_v5, 0  ;;  %v541_v9 = vsel %vm536_vm0, %v486_v6, 0  ;;  %v10443_v22 = vld [vmem:[#allocation2 + $0x64] sm:$0xf0]  ;;  %v9379_v23 = vor.u32 %v10460_v18, %v9376_v20  ;;  %v9366_v25 = vld [vmem:[#allocation2 + $0xe0] sm:$0xf] }
  0x25   : > { %v10414_v10 = vld [vmem:[%s11066_s28] sm:$0xff]  ;;  %550 = vmatpush.bf16.msra.mxu0 %v538_v8  ;;  %639 = vmatpush.bf16.msra.mxu1 %v541_v9  ;;  %v10423_v12 = vld [vmem:[%s11066_s28 + $0x48] sm:$0xff]  ;;  %v9303_v24 = vor.u32 %v10443_v22, %v9302_v21  ;;  %v10459_v26 = vld [vmem:[#allocation2 + $0xe4] sm:$0xf0]  ;;  %s10718_s3 = sshll.u32 %s11007_s13, 8  ;;  %s9058_s27 = sshll.u32 %s12957_s24, 4  ;;  %s9059_s27 = int_to_ptr.vmem [resolvable:$true] %s9058_s27 }
  0x26   : > { %v11070_v11 = vld [vmem:[%s11066_s28 + $0x40] sm:$0xff]  ;;  %10720 = vmatpush.bf16.msra.mxu3 %v541_v9  ;;  %10719 = vmatpush.bf16.msra.mxu2 %v538_v8  ;;  %v9367_v27 = vor.u32 %v10459_v26, %v9366_v25  ;;  %v10415_v28 = vld [vmem:[%s11066_s28 + $0x8] sm:$0xff]  ;;  %v10424_v29 = vld [vmem:[%s11066_s28 + $0x50] sm:$0xff]  ;;  %s9057_s26 = scalar_lea.hbm %s13093_s9, %s10718_s3  ;;  %s9046_s13 = scalar_lea.sflag [#allocation4], %s358_s22 }
  0x27   : > { %v10442_v30 = vld [vmem:[#allocation2 + $0x64] sm:$0xf]  ;;  %v9304_v31 = vld [vmem:[#allocation2 + $0x68] sm:$0xf0]  ;;  %v9294_v35 = vld [vmem:[#allocation2 + $0x50] sm:$0xf] }
  0x28   : > { %9220 = vmatmul.msk.bf16.vlgmr.msra.gmra.mxu0 %vm487_vm1, %v10414_v10  ;;  %9236 = vmatmul.msk.bf16.vlgmr.msra.gmra.mxu1 %vm487_vm1, %v10414_v10  ;;  %v10458_v32 = vld [vmem:[#allocation2 + $0xe4] sm:$0xf]  ;;  %v9307_v33 = vor.u32 %v10442_v30, %v9304_v31  ;;  %v9368_v34 = vld [vmem:[#allocation2 + $0xe8] sm:$0xf0]  ;;  %v10441_v36 = vld [vmem:[#allocation2 + $0x54] sm:$0xf0] }
  0x29   : > { %9244 = vmatmul.msk.bf16.vlgmr.msra.gmra.mxu3 %vm487_vm1, %v11070_v11  ;;  %9229 = vmatmul.msk.bf16.vlgmr.msra.gmra.mxu2 %vm487_vm1, %v10423_v12  ;;  %v9371_v37 = vor.u32 %v10458_v32, %v9368_v34  ;;  %v9295_v38 = vor.u32 %v10441_v36, %v9294_v35  ;;  %v9358_v39 = vld [vmem:[#allocation2 + $0xd0] sm:$0xf]  ;;  %v10457_v40 = vld [vmem:[#allocation2 + $0xd4] sm:$0xf0]  ;;  %v10416_v42 = vld [vmem:[%s11066_s28 + $0x10] sm:$0xff]  ;;  %s10876_s23 = scalar_lea.hbm %s13093_s9, 512 }
  0x2a   : > { %1367 = vmatpush.bf16.msrb.mxu3 %v9375_v7  ;;  %1278 = vmatpush.bf16.msrb.mxu2 %v9311_v16  ;;  %v9359_v41 = vor.u32 %v10457_v40, %v9358_v39  ;;  %v10425_v43 = vld [vmem:[%s11066_s28 + $0x58] sm:$0xff]  ;;  %v9360_v45 = vld [vmem:[#allocation2 + $0xd8] sm:$0xf0]  ;;  %v9286_v46 = vld [vmem:[#allocation2 + $0x40] sm:$0xf] }
  0x2b   : > { %1456 = vmatpush.bf16.msrb.mxu0 %v9315_v19  ;;  %1545 = vmatpush.bf16.msrb.mxu1 %v9379_v23  ;;  %v10456_v44 = vld [vmem:[#allocation2 + $0xd4] sm:$0xf]  ;;  %v10439_v48 = vld [vmem:[#allocation2 + $0x44] sm:$0xf0]  ;;  %v9296_v50 = vld [vmem:[#allocation2 + $0x58] sm:$0xf0] }
  0x2c   : > { %v9363_v47 = vor.u32 %v10456_v44, %v9360_v45  ;;  %v10440_v49 = vld [vmem:[#allocation2 + $0x54] sm:$0xf]  ;;  %v9287_v51 = vor.u32 %v10439_v48, %v9286_v46  ;;  %v9350_v53 = vld [vmem:[#allocation2 + $0xc0] sm:$0xf]  ;;  %v10455_v54 = vld [vmem:[#allocation2 + $0xc4] sm:$0xf0] }
  0x2d   : > { %v9299_v52 = vor.u32 %v10440_v49, %v9296_v50  ;;  %v9351_v55 = vor.u32 %v10455_v54, %v9350_v53  ;;  %v10417_v56 = vld [vmem:[%s11066_s28 + $0x18] sm:$0xff]  ;;  %v10426_v57 = vld [vmem:[%s11066_s28 + $0x60] sm:$0xff]  ;;  %v10454_v60 = vld [vmem:[#allocation2 + $0xc4] sm:$0xf] }
  0x2e   : > { %1368 = vmatpush.bf16.msrb.mxu3 %v9367_v27  ;;  %1279 = vmatpush.bf16.msrb.mxu2 %v9303_v24  ;;  %v9278_v58 = vld [vmem:[#allocation2 + $0x30] sm:$0xf]  ;;  %v10437_v59 = vld [vmem:[#allocation2 + $0x34] sm:$0xf0]  ;;  %v9352_v62 = vld [vmem:[#allocation2 + $0xc8] sm:$0xf0] }
  0x2f   : > { %1457 = vmatpush.bf16.msrb.mxu0 %v9307_v33  ;;  %1546 = vmatpush.bf16.msrb.mxu1 %v9371_v37  ;;  %v9279_v61 = vor.u32 %v10437_v59, %v9278_v58  ;;  %v10438_v63 = vld [vmem:[#allocation2 + $0x44] sm:$0xf]  ;;  %v9288_v0 = vld [vmem:[#allocation2 + $0x48] sm:$0xf0]  ;;  %v9355_v1 = vor.u32 %v10454_v60, %v9352_v62  ;;  %v9342_v3 = vld [vmem:[#allocation2 + $0xb0] sm:$0xf] }
  0x30   : > { %v9291_v2 = vor.u32 %v10438_v63, %v9288_v0  ;;  %v10453_v4 = vld [vmem:[#allocation2 + $0xb4] sm:$0xf0]  ;;  %v10427_v7 = vld [vmem:[%s11066_s28 + $0x68] sm:$0xff]  ;;  %v10435_v9 = vld [vmem:[#allocation2 + $0x24] sm:$0xf0] }
  0x31   : > { %v9343_v5 = vor.u32 %v10453_v4, %v9342_v3  ;;  %v10418_v6 = vld [vmem:[%s11066_s28 + $0x20] sm:$0xff]  ;;  %v9270_v8 = vld [vmem:[#allocation2 + $0x20] sm:$0xf]  ;;  %v10451_v16 = vld [vmem:[#allocation2 + $0xa4] sm:$0xf0] }
  0x32   : > { %1280 = vmatpush.bf16.msrb.mxu2 %v9295_v38  ;;  %1369 = vmatpush.bf16.msrb.mxu3 %v9359_v41  ;;  %v9271_v10 = vor.u32 %v10435_v9, %v9270_v8  ;;  %v9344_v13 = vld [vmem:[#allocation2 + $0xb8] sm:$0xf0]  ;;  %v9334_v14 = vld [vmem:[#allocation2 + $0xa0] sm:$0xf]  ;;  %v10436_v17 = vld [vmem:[#allocation2 + $0x34] sm:$0xf] }
  0x33   : > { %1547 = vmatpush.bf16.msrb.mxu1 %v9363_v47  ;;  %1458 = vmatpush.bf16.msrb.mxu0 %v9299_v52  ;;  %v9280_v18 = vld [vmem:[#allocation2 + $0x38] sm:$0xf0]  ;;  %v9335_v19 = vor.u32 %v10451_v16, %v9334_v14  ;;  %v10419_v21 = vld [vmem:[%s11066_s28 + $0x28] sm:$0xff]  ;;  %v10428_v22 = vld [vmem:[%s11066_s28 + $0x70] sm:$0xff] }
  0x34   : > { %v9283_v20 = vor.u32 %v10436_v17, %v9280_v18  ;;  %v9262_v23 = vld [vmem:[#allocation2 + $0x10] sm:$0xf]  ;;  %v10433_v24 = vld [vmem:[#allocation2 + $0x14] sm:$0xf0]  ;;  %v10450_v26 = vld [vmem:[#allocation2 + $0xa4] sm:$0xf] }
  0x35   : > { %v9263_v25 = vor.u32 %v10433_v24, %v9262_v23  ;;  %v9336_v27 = vld [vmem:[#allocation2 + $0xa8] sm:$0xf0]  ;;  %v10429_v31 = vld [vmem:[%s11066_s28 + $0x78] sm:$0xff]  ;;  %v10434_v32 = vld [vmem:[#allocation2 + $0x24] sm:$0xf] }
  0x36   : > { %1281 = vmatpush.bf16.msrb.mxu2 %v9287_v51  ;;  %1370 = vmatpush.bf16.msrb.mxu3 %v9351_v55  ;;  %v10420_v30 = vld [vmem:[%s11066_s28 + $0x30] sm:$0xff]  ;;  %v9326_v35 = vld [vmem:[#allocation2 + $0x90] sm:$0xf]  ;;  %v10449_v36 = vld [vmem:[#allocation2 + $0x94] sm:$0xf0] }
  0x37   : > { %1548 = vmatpush.bf16.msrb.mxu1 %v9355_v1  ;;  %1459 = vmatpush.bf16.msrb.mxu0 %v9291_v2  ;;  %v9272_v33 = vld [vmem:[#allocation2 + $0x28] sm:$0xf0]  ;;  %v9254_v37 = vld [vmem:[#allocation2] sm:$0xf]  ;;  %v9327_v38 = vor.u32 %v10449_v36, %v9326_v35  ;;  %v10431_v39 = vld [vmem:[#allocation2 + $0x4] sm:$0xf0] }
  0x38   : > { %9221 = vmatmul.msk.bf16.gmra.mxu0 %vm487_vm1, %v10415_v28  ;;  %9237 = vmatmul.msk.bf16.gmra.mxu1 %vm487_vm1, %v10415_v28  ;;  %v9339_v28 = vor.u32 %v10450_v26, %v9336_v27  ;;  %v9275_v34 = vor.u32 %v10434_v32, %v9272_v33  ;;  %v9255_v40 = vor.u32 %v10431_v39, %v9254_v37  ;;  %v10448_v41 = vld [vmem:[#allocation2 + $0x94] sm:$0xf]  ;;  %v9264_v45 = vld [vmem:[#allocation2 + $0x18] sm:$0xf0]  ;;  %v9318_v47 = vld [vmem:[#allocation2 + $0x80] sm:$0xf] }
  0x39   : > { %9245 = vmatmul.msk.bf16.gmra.mxu3 %vm487_vm1, %v10423_v12  ;;  %9230 = vmatmul.msk.bf16.gmra.mxu2 %vm487_vm1, %v10424_v29  ;;  %v10452_v12 = vld [vmem:[#allocation2 + $0xb4] sm:$0xf]  ;;  %v10447_v48 = vld [vmem:[#allocation2 + $0x84] sm:$0xf0]  ;;  %v10430_v49 = vld [vmem:[#allocation2 + $0x4] sm:$0xf] }
  0x3a   : > { %1282 = vmatpush.bf16.msrb.mxu2 %v9279_v61  ;;  %1371 = vmatpush.bf16.msrb.mxu3 %v9343_v5  ;;  %v9347_v15 = vor.u32 %v10452_v12, %v9344_v13  ;;  %v9319_v50 = vor.u32 %v10447_v48, %v9318_v47  ;;  %v9256_v51 = vld [vmem:[#allocation2 + $0x8] sm:$0xf0]  ;;  %v10446_v52 = vld [vmem:[#allocation2 + $0x84] sm:$0xf]  ;;  %v10421_v54 = vld [vmem:[%s11066_s28 + $0x38] sm:$0xff]  ;;  %s9060_s28 = sshll.u32 %s9057_s26, 4  ;;  %s9061_s28 = int_to_ptr.hbm [resolvable:$true] %s9060_s28 }
  0x3b   : > { %1460 = vmatpush.bf16.msrb.mxu0 %v9283_v20  ;;  %v9320_v53 = vld [vmem:[#allocation2 + $0x88] sm:$0xf0]  ;;  %v9259_v55 = vor.u32 %v10430_v49, %v9256_v51  ;;  %v1666_v59 = vld [vmem:[%s13088_s4] sm:$0x3]  ;;  %v9438_v60 = vld [vmem:[#allocation2 + $0x170] sm:$0xf] }
  0x3c   : > { %1549 = vmatpush.bf16.msrb.mxu1 %v9347_v15  ;;  %v10477_v61 = vld [vmem:[#allocation2 + $0x174] sm:$0xf0]  ;;  %v9504_v23 = vld [vmem:[#allocation2 + $0x1f8] sm:$0xf0]  ;;  %v10475_v39 = vld [vmem:[#allocation2 + $0x164] sm:$0xf0] }
  0x3d   : > { %v9439_v62 = vor.u32 %v10477_v61, %v9438_v60  ;;  %s10870_s29 = sshra.s32 %s9061_s28, 4  ;;  %s10871_s29 = int_to_ptr.hbm [resolvable:$true] %s10870_s29 }
  0x3e   : > { %1283 = vmatpush.bf16.msrb.mxu2 %v9271_v10  ;;  %1372 = vmatpush.bf16.msrb.mxu3 %v9335_v19  ;;  %s10872_s14 = scalar_lea.hbm %s10871_s29, 256  ;;  %p10877_p3 = scmp.lt.s32.totalorder %s10871_s29, %s13093_s9 }
  0x3f   : > { %1461 = vmatpush.bf16.msrb.mxu0 %v9275_v34  ;;  %p10873_p0 = scmp.ne.s32.totalorder %s10871_s29, %s10872_s14  ;;  %p10878_p4 = scmp.lt.s32.totalorder %s10876_s23, %s10872_s14 }
  0x40   : > { %1550 = vmatpush.bf16.msrb.mxu1 %v9339_v28 }
  0x41   : > { %p10874_p1 = pnand %p10873_p0, %p11024_p5  ;;  %p10879_p7 = por %p10878_p4, %p10877_p3 }
  0x42   : > { %1284 = vmatpush.bf16.msrb.mxu2 %v9263_v25  ;;  %1373 = vmatpush.bf16.msrb.mxu3 %v9327_v38  ;;  %v9430_v38 = vld [vmem:[#allocation2 + $0x160] sm:$0xf] }
  0x43   : > { %p10875_p2 = pneg %p10874_p1 }
  0x45   : > { %p10880_p8 = pnand %p10879_p7, %p10875_p2 }
  0x46   : > { %1285 = vmatpush.bf16.msrb.mxu2 %v9255_v40  ;;  %1374 = vmatpush.bf16.msrb.mxu3 %v9319_v50  ;;  %v9431_v40 = vor.u32 %v10475_v39, %v9430_v38 }
  0x48   : > { %9222 = vmatmul.msk.bf16.gmra.mxu0 %vm487_vm1, %v10416_v42  ;;  %9238 = vmatmul.msk.bf16.gmra.mxu1 %vm487_vm1, %v10416_v42  ;;  %v9328_v42 = vld [vmem:[#allocation2 + $0x98] sm:$0xf0] }
  0x49   : > { %9246 = vmatmul.msk.bf16.gmra.mxu3 %vm487_vm1, %v10424_v29  ;;  %9231 = vmatmul.msk.bf16.gmra.mxu2 %vm487_vm1, %v10425_v43  ;;  %v753_v29 = vld [vmem:[%s13086_s2] sm:$0x3]  ;;  %v9331_v44 = vor.u32 %v10448_v41, %v9328_v42 }
  0x4a   : > { %755 = vst [vmem:[#allocation1] ss:$9 sm:$0xff] %v753_v29  ;;  %2192 = vmatpush.bf16.msra.mxu2 %v9439_v62 }
  0x4b   : > { %1551 = vmatpush.bf16.msrb.mxu1 %v9331_v44 }
  0x4e   : > { %2193 = vmatpush.bf16.msra.mxu2 %v9431_v40 }
  0x51   : > { %v757_v58 = vld [vmem:[#allocation1 + $0x9] sm:$0xff] }
  0x52   : > { %v761_v0 = vpack.i.b16 %v757_v58, %v757_v58 }
  0x54   : > { %v763_v5 = vperm.slane %v761_v0, 0 }
  0x56   : > { %v11128_v13 = vunpack.c.l.bf16 %v763_v5 }
  0x58   : > { %9223 = vmatmul.msk.bf16.gmra.mxu0 %vm487_vm1, %v10417_v56  ;;  %9239 = vmatmul.msk.bf16.gmra.mxu1 %vm487_vm1, %v10417_v56  ;;  %v9323_v56 = vor.u32 %v10446_v52, %v9320_v53  ;;  %v10476_v53 = vld [vmem:[#allocation2 + $0x174] sm:$0xf] }
  0x59   : > { %9247 = vmatmul.msk.bf16.gmra.mxu3 %vm487_vm1, %v10425_v43  ;;  %9232 = vmatmul.msk.bf16.gmra.mxu2 %vm487_vm1, %v10426_v57  ;;  %v10432_v43 = vld [vmem:[#allocation2 + $0x14] sm:$0xf] }
  0x5a   : > { %v9267_v46 = vor.u32 %v10432_v43, %v9264_v45  ;;  %1552 = vmatpush.bf16.msrb.mxu1 %v9323_v56 }
  0x5c   : > { %1462 = vmatpush.bf16.msrb.mxu0 %v9267_v46 }
  0x60   : > { %1463 = vmatpush.bf16.msrb.mxu0 %v9259_v55 }
  0x68   : > { %9224 = vmatmul.msk.bf16.gmra.mxu0 %vm487_vm1, %v10418_v6  ;;  %9240 = vmatmul.msk.bf16.gmra.mxu1 %vm487_vm1, %v10418_v6  ;;  %v9502_v6 = vld [vmem:[#allocation2 + $0x1f0] sm:$0xf] }
  0x69   : > { %9248 = vmatmul.msk.bf16.gmra.mxu3 %vm487_vm1, %v10426_v57  ;;  %9233 = vmatmul.msk.bf16.gmra.mxu2 %vm487_vm1, %v10427_v7  ;;  %v756_v57 = vld [vmem:[#allocation1] sm:$0xff] }
  0x6a   : > { %1668 = vst [vmem:[#allocation1] ss:$9 sm:$0xff] %v1666_v59  ;;  %v758_v63 = vpack.i.b16 %v756_v57, %v756_v57 }
  0x6c   : > { %v760_v4 = vperm.slane %v758_v63, 0 }
  0x6e   : > { %v11126_v12 = vunpack.c.l.bf16 %v760_v4 }
  0x78   : > { %9225 = vmatmul.msk.bf16.gmra.mxu0 %vm487_vm1, %v10419_v21  ;;  %9241 = vmatmul.msk.bf16.gmra.mxu1 %vm487_vm1, %v10419_v21 }
  0x79   : > { %9249 = vmatmul.msk.bf16.gmra.mxu3 %vm487_vm1, %v10427_v7  ;;  %9234 = vmatmul.msk.bf16.gmra.mxu2 %vm487_vm1, %v10428_v22  ;;  %v10493_v7 = vld [vmem:[#allocation2 + $0x1f4] sm:$0xf0] }
  0x7a   : > { %v9503_v8 = vor.u32 %v10493_v7, %v9502_v6 }
  0x7c   : > { %2281 = vmatpush.bf16.msra.mxu3 %v9503_v8 }
  0x88   : > { %9226 = vmatmul.msk.bf16.gmra.mxu0 %vm487_vm1, %v10420_v30  ;;  %9242 = vmatmul.msk.bf16.gmra.mxu1 %vm487_vm1, %v10420_v30 }
  0x89   : > { %9250 = vmatmul.msk.bf16.gmra.mxu3 %vm487_vm1, %v10428_v22  ;;  %9235 = vmatmul.msk.bf16.gmra.mxu2 %vm487_vm1, %v10429_v31  ;;  %v10492_v22 = vld [vmem:[#allocation2 + $0x1f4] sm:$0xf] }
  0x8a   : > { %v9507_v24 = vor.u32 %v10492_v22, %v9504_v23 }
  0x8c   : > { %2459 = vmatpush.bf16.msra.mxu1 %v9507_v24 }
  0x98   : > { %9227 = vmatmul.msk.bf16.gmra.mxu0 %vm487_vm1, %v10421_v54  ;;  %9243 = vmatmul.msk.bf16.gmra.mxu1 %vm487_vm1, %v10421_v54  ;;  %v9440_v54 = vld [vmem:[#allocation2 + $0x178] sm:$0xf0] }
  0x99   : > { %9251 = vmatmul.msk.bf16.gmra.mxu3 %vm487_vm1, %v10429_v31  ;;  %v9443_v55 = vor.u32 %v10476_v53, %v9440_v54 }
  0x9b   : > { %2370 = vmatpush.bf16.msra.mxu0 %v9443_v55 }
  0xa5   : > { %v552_v1 = vpop.f32.mrf.mxu0  ;;  %v641_v2 = vpop.f32.mrf.mxu1 }
  0xa6   : > { %v721_v3 = vpack.c.bf16 %v641_v2, %v552_v1 }
  0xa8   : > { %9228 = vmatmul.msk.bf16.gmra.mxu0 %vm487_vm1, %v11070_v11  ;;  %v764_v9 = vunpack.c.l.bf16 %v721_v3  ;;  %v765_v10 = vunpack.c.h.bf16 %v721_v3 }
  0xaa   : > { %v830_v19 = vadd.f32 %v11126_v12, %v764_v9  ;;  %v831_v11 = vadd.f32 %v11128_v13, %v765_v10  ;;  %v9494_v9 = vld [vmem:[#allocation2 + $0x1e0] sm:$0xf]  ;;  %v10491_v10 = vld [vmem:[#allocation2 + $0x1e4] sm:$0xf0] }
  0xac   : > { %v11130_v14 = vpop.f32.mrf.mxu3  ;;  %v597_v15 = vpop.f32.mrf.mxu2  ;;  %v990_v27 = vmax.f32 %v830_v19, 0.0  ;;  %v991_v28 = vmax.f32 %v831_v11, 0.0 }
  0xad   : > { %v554_v16 = vpop.f32.mrf.mxu0  ;;  %v643_v17 = vpop.f32.mrf.mxu1 }
  0xae   : > { %v722_v18 = vpack.c.bf16 %v643_v17, %v554_v16 }
  0xb0   : > { %v766_v20 = vunpack.c.l.bf16 %v722_v18  ;;  %v767_v21 = vunpack.c.h.bf16 %v722_v18  ;;  %v9495_v18 = vor.u32 %v10491_v10, %v9494_v9 }
  0xb2   : > { %v832_v25 = vadd.f32 %v11126_v12, %v766_v20  ;;  %v833_v26 = vadd.f32 %v11128_v13, %v767_v21  ;;  %2282 = vmatpush.bf16.msra.mxu3 %v9495_v18 }
  0xb4   : > { %v992_v29 = vmax.f32 %v832_v25, 0.0  ;;  %v993_v30 = vmax.f32 %v833_v26, 0.0  ;;  %v11136_v31 = vpop.f32.mrf.mxu3  ;;  %v11138_v32 = vpop.f32.mrf.mxu2  ;;  %v10490_v25 = vld [vmem:[#allocation2 + $0x1e4] sm:$0xf]  ;;  %v9496_v26 = vld [vmem:[#allocation2 + $0x1e8] sm:$0xf0] }
  0xb5   : > { %v557_v33 = vpop.f32.mrf.mxu0  ;;  %v646_v34 = vpop.f32.mrf.mxu1 }
  0xb6   : > { %v1054_v35 = vpack.c.bf16 %v992_v29, %v990_v27  ;;  %v1055_v36 = vpack.c.bf16 %v993_v30, %v991_v28  ;;  %v723_v37 = vpack.c.bf16 %v646_v34, %v557_v33  ;;  %v9499_v27 = vor.u32 %v10490_v25, %v9496_v26 }
  0xb8   : > { %1286 = vmatmul.bf16.vlgmr.msrb.gmra.mxu2 %v1054_v35  ;;  %1375 = vmatmul.bf16.vlgmr.msrb.gmra.mxu3 %v1055_v36  ;;  %v768_v41 = vunpack.c.l.bf16 %v723_v37  ;;  %v769_v42 = vunpack.c.h.bf16 %v723_v37 }
  0xb9   : > { %1464 = vmatmul.bf16.vlgmr.msrb.gmra.mxu0 %v1054_v35  ;;  %1553 = vmatmul.bf16.vlgmr.msrb.gmra.mxu1 %v1055_v36 }
  0xba   : > { %v834_v51 = vadd.f32 %v11126_v12, %v768_v41  ;;  %v835_v52 = vadd.f32 %v11128_v13, %v769_v42  ;;  %2460 = vmatpush.bf16.msra.mxu1 %v9499_v27 }
  0xbc   : > { %v686_v43 = vpop.f32.mrf.mxu3  ;;  %v602_v44 = vpop.f32.mrf.mxu2  ;;  %v994_v58 = vmax.f32 %v834_v51, 0.0  ;;  %v995_v60 = vmax.f32 %v835_v52, 0.0 }
  0xbd   : > { %v559_v45 = vpop.f32.mrf.mxu0  ;;  %v648_v46 = vpop.f32.mrf.mxu1  ;;  %v11140_v47 = vpack.c.bf16 %v686_v43, %v597_v15 }
  0xbe   : > { %v724_v48 = vpack.c.bf16 %v648_v46, %v559_v45  ;;  %v10473_v45 = vld [vmem:[#allocation2 + $0x154] sm:$0xf0] }
  0xc0   : > { %v770_v49 = vunpack.c.l.bf16 %v724_v48  ;;  %v771_v50 = vunpack.c.h.bf16 %v724_v48 }
  0xc2   : > { %v836_v56 = vadd.f32 %v11126_v12, %v770_v49  ;;  %v837_v57 = vadd.f32 %v11128_v13, %v771_v50 }
  0xc4   : > { %v996_v59 = vmax.f32 %v836_v56, 0.0  ;;  %v997_v61 = vmax.f32 %v837_v57, 0.0  ;;  %v11146_v62 = vpop.f32.mrf.mxu3  ;;  %v11148_v63 = vpop.f32.mrf.mxu2 }
  0xc5   : > { %v562_v0 = vpop.f32.mrf.mxu0  ;;  %v651_v1 = vpop.f32.mrf.mxu1 }
  0xc6   : > { %v1056_v2 = vpack.c.bf16 %v996_v59, %v994_v58  ;;  %v1057_v3 = vpack.c.bf16 %v997_v61, %v995_v60  ;;  %v725_v4 = vpack.c.bf16 %v651_v1, %v562_v0  ;;  %v10474_v59 = vld [vmem:[#allocation2 + $0x164] sm:$0xf]  ;;  %v9432_v60 = vld [vmem:[#allocation2 + $0x168] sm:$0xf0] }
  0xc7   : > { %v9435_v61 = vor.u32 %v10474_v59, %v9432_v60 }
  0xc8   : > { %1291 = vmatmul.bf16.gmra.mxu2 %v1056_v2  ;;  %1380 = vmatmul.bf16.gmra.mxu3 %v1057_v3  ;;  %v772_v5 = vunpack.c.l.bf16 %v725_v4  ;;  %v773_v6 = vunpack.c.h.bf16 %v725_v4 }
  0xc9   : > { %1469 = vmatmul.bf16.gmra.mxu0 %v1056_v2  ;;  %1558 = vmatmul.bf16.gmra.mxu1 %v1057_v3 }
  0xca   : > { %v838_v21 = vadd.f32 %v11126_v12, %v772_v5  ;;  %v839_v22 = vadd.f32 %v11128_v13, %v773_v6  ;;  %2371 = vmatpush.bf16.msra.mxu0 %v9435_v61 }
  0xcc   : > { %v691_v7 = vpop.f32.mrf.mxu3  ;;  %v607_v8 = vpop.f32.mrf.mxu2  ;;  %v998_v28 = vmax.f32 %v838_v21, 0.0  ;;  %v999_v30 = vmax.f32 %v839_v22, 0.0 }
  0xcd   : > { %v564_v15 = vpop.f32.mrf.mxu0  ;;  %v653_v16 = vpop.f32.mrf.mxu1  ;;  %v11150_v17 = vpack.c.bf16 %v691_v7, %v602_v44  ;;  %v9422_v44 = vld [vmem:[#allocation2 + $0x150] sm:$0xf] }
  0xce   : > { %v726_v19 = vpack.c.bf16 %v653_v16, %v564_v15  ;;  %v9423_v50 = vor.u32 %v10473_v45, %v9422_v44 }
  0xd0   : > { %v774_v11 = vunpack.c.l.bf16 %v726_v19  ;;  %v775_v20 = vunpack.c.h.bf16 %v726_v19  ;;  %2194 = vmatpush.bf16.msra.mxu2 %v9423_v50  ;;  %v9486_v19 = vld [vmem:[#allocation2 + $0x1d0] sm:$0xf] }
  0xd2   : > { %v840_v23 = vadd.f32 %v11126_v12, %v774_v11  ;;  %v841_v24 = vadd.f32 %v11128_v13, %v775_v20  ;;  %v10489_v11 = vld [vmem:[#allocation2 + $0x1d4] sm:$0xf0] }
  0xd4   : > { %v1000_v29 = vmax.f32 %v840_v23, 0.0  ;;  %v1001_v33 = vmax.f32 %v841_v24, 0.0  ;;  %v11156_v34 = vpop.f32.mrf.mxu3  ;;  %v11158_v39 = vpop.f32.mrf.mxu2  ;;  %v9487_v23 = vor.u32 %v10489_v11, %v9486_v19 }
  0xd5   : > { %v567_v35 = vpop.f32.mrf.mxu0  ;;  %v656_v36 = vpop.f32.mrf.mxu1 }
  0xd6   : > { %v1058_v37 = vpack.c.bf16 %v1000_v29, %v998_v28  ;;  %v1059_v38 = vpack.c.bf16 %v1001_v33, %v999_v30  ;;  %v727_v40 = vpack.c.bf16 %v656_v36, %v567_v35  ;;  %2283 = vmatpush.bf16.msra.mxu3 %v9487_v23  ;;  %v10488_v33 = vld [vmem:[#allocation2 + $0x1d4] sm:$0xf]  ;;  %v9488_v35 = vld [vmem:[#allocation2 + $0x1d8] sm:$0xf0] }
  0xd7   : > { %v9491_v36 = vor.u32 %v10488_v33, %v9488_v35  ;;  %v10487_v33 = vld [vmem:[#allocation2 + $0x1c4] sm:$0xf0] }
  0xd8   : > { %1296 = vmatmul.bf16.gmra.mxu2 %v1058_v37  ;;  %1385 = vmatmul.bf16.gmra.mxu3 %v1059_v38  ;;  %v776_v41 = vunpack.c.l.bf16 %v727_v40  ;;  %v777_v42 = vunpack.c.h.bf16 %v727_v40 }
  0xd9   : > { %1474 = vmatmul.bf16.gmra.mxu0 %v1058_v37  ;;  %1563 = vmatmul.bf16.gmra.mxu1 %v1059_v38 }
  0xda   : > { %v842_v54 = vadd.f32 %v11126_v12, %v776_v41  ;;  %v843_v55 = vadd.f32 %v11128_v13, %v777_v42  ;;  %2461 = vmatpush.bf16.msra.mxu1 %v9491_v36 }
  0xdc   : > { %v696_v43 = vpop.f32.mrf.mxu3  ;;  %v612_v56 = vpop.f32.mrf.mxu2  ;;  %v1002_v0 = vmax.f32 %v842_v54, 0.0  ;;  %v1003_v2 = vmax.f32 %v843_v55, 0.0  ;;  %v9414_v54 = vld [vmem:[#allocation2 + $0x140] sm:$0xf]  ;;  %v10471_v55 = vld [vmem:[#allocation2 + $0x144] sm:$0xf0] }
  0xdd   : > { %v569_v46 = vpop.f32.mrf.mxu0  ;;  %v658_v48 = vpop.f32.mrf.mxu1  ;;  %v11160_v49 = vpack.c.bf16 %v696_v43, %v607_v8  ;;  %v9415_v59 = vor.u32 %v10471_v55, %v9414_v54 }
  0xde   : > { %v728_v51 = vpack.c.bf16 %v658_v48, %v569_v46 }
  0xdf   : > { %2195 = vmatpush.bf16.msra.mxu2 %v9415_v59 }
  0xe0   : > { %v778_v52 = vunpack.c.l.bf16 %v728_v51  ;;  %v779_v53 = vunpack.c.h.bf16 %v728_v51 }
  0xe2   : > { %v844_v57 = vadd.f32 %v11126_v12, %v778_v52  ;;  %v845_v58 = vadd.f32 %v11128_v13, %v779_v53 }
  0xe4   : > { %v1004_v1 = vmax.f32 %v844_v57, 0.0  ;;  %v1005_v3 = vmax.f32 %v845_v58, 0.0  ;;  %v11166_v4 = vpop.f32.mrf.mxu3  ;;  %v11168_v10 = vpop.f32.mrf.mxu2 }
  0xe5   : > { %v572_v5 = vpop.f32.mrf.mxu0  ;;  %v661_v6 = vpop.f32.mrf.mxu1 }
  0xe6   : > { %v1060_v7 = vpack.c.bf16 %v1004_v1, %v1002_v0  ;;  %v1061_v8 = vpack.c.bf16 %v1005_v3, %v1003_v2  ;;  %v729_v9 = vpack.c.bf16 %v661_v6, %v572_v5 }
  0xe8   : > { %1301 = vmatmul.bf16.gmra.mxu2 %v1060_v7  ;;  %1390 = vmatmul.bf16.gmra.mxu3 %v1061_v8  ;;  %v780_v15 = vunpack.c.l.bf16 %v729_v9  ;;  %v781_v16 = vunpack.c.h.bf16 %v729_v9 }
  0xe9   : > { %1479 = vmatmul.bf16.gmra.mxu0 %v1060_v7  ;;  %1568 = vmatmul.bf16.gmra.mxu1 %v1061_v8  ;;  %v10472_v7 = vld [vmem:[#allocation2 + $0x154] sm:$0xf]  ;;  %v9424_v8 = vld [vmem:[#allocation2 + $0x158] sm:$0xf0] }
  0xea   : > { %v847_v25 = vadd.f32 %v11128_v13, %v781_v16  ;;  %v846_v28 = vadd.f32 %v11126_v12, %v780_v15  ;;  %v9427_v9 = vor.u32 %v10472_v7, %v9424_v8 }
  0xec   : > { %v701_v18 = vpop.f32.mrf.mxu3  ;;  %v1007_v37 = vmax.f32 %v847_v25, 0.0  ;;  %v1006_v38 = vmax.f32 %v846_v28, 0.0  ;;  %v617_v43 = vpop.f32.mrf.mxu2  ;;  %2372 = vmatpush.bf16.msra.mxu0 %v9427_v9 }
  0xed   : > { %v574_v20 = vpop.f32.mrf.mxu0  ;;  %v663_v21 = vpop.f32.mrf.mxu1  ;;  %v11170_v22 = vpack.c.bf16 %v701_v18, %v612_v56 }
  0xee   : > { %v730_v24 = vpack.c.bf16 %v663_v21, %v574_v20 }
  0xf0   : > { %v782_v26 = vunpack.c.l.bf16 %v730_v24  ;;  %v783_v27 = vunpack.c.h.bf16 %v730_v24 }
  0xf2   : > { %v849_v29 = vadd.f32 %v11128_v13, %v783_v27  ;;  %v848_v30 = vadd.f32 %v11126_v12, %v782_v26 }
  0xf4   : > { %v1008_v40 = vmax.f32 %v848_v30, 0.0  ;;  %v1009_v41 = vmax.f32 %v849_v29, 0.0  ;;  %v11176_v42 = vpop.f32.mrf.mxu3  ;;  %v11180_v61 = vpop.f32.mrf.mxu2  ;;  %v9478_v30 = vld [vmem:[#allocation2 + $0x1c0] sm:$0xf] }
  0xf5   : > { %v577_v44 = vpop.f32.mrf.mxu0  ;;  %v666_v45 = vpop.f32.mrf.mxu1 }
  0xf6   : > { %v1062_v46 = vpack.c.bf16 %v1008_v40, %v1006_v38  ;;  %v1063_v48 = vpack.c.bf16 %v1009_v41, %v1007_v37  ;;  %v731_v50 = vpack.c.bf16 %v666_v45, %v577_v44  ;;  %v9479_v38 = vor.u32 %v10487_v33, %v9478_v30 }
  0xf8   : > { %1306 = vmatmul.bf16.gmra.mxu2 %v1062_v46  ;;  %1395 = vmatmul.bf16.gmra.mxu3 %v1063_v48  ;;  %v784_v51 = vunpack.c.l.bf16 %v731_v50  ;;  %v785_v52 = vunpack.c.h.bf16 %v731_v50 }
  0xf9   : > { %1484 = vmatmul.bf16.gmra.mxu0 %v1062_v46  ;;  %1573 = vmatmul.bf16.gmra.mxu1 %v1063_v48 }
  0xfa   : > { %v850_v0 = vadd.f32 %v11126_v12, %v784_v51  ;;  %v851_v1 = vadd.f32 %v11128_v13, %v785_v52  ;;  %2284 = vmatpush.bf16.msra.mxu3 %v9479_v38  ;;  %v10486_v51 = vld [vmem:[#allocation2 + $0x1c4] sm:$0xf]  ;;  %v9480_v52 = vld [vmem:[#allocation2 + $0x1c8] sm:$0xf0] }
  0xfb   : > { %v9416_v38 = vld [vmem:[#allocation2 + $0x148] sm:$0xf0] }
  0xfc   : > { %v706_v53 = vpop.f32.mrf.mxu3  ;;  %v1010_v15 = vmax.f32 %v850_v0, 0.0  ;;  %v1011_v16 = vmax.f32 %v851_v1, 0.0  ;;  %v622_v26 = vpop.f32.mrf.mxu2 }
  0xfd   : > { %v579_v56 = vpop.f32.mrf.mxu0  ;;  %v668_v57 = vpop.f32.mrf.mxu1  ;;  %v11178_v58 = vpack.c.bf16 %v706_v53, %v617_v43  ;;  %v9483_v53 = vor.u32 %v10486_v51, %v9480_v52 }
  0xfe   : > { %v732_v60 = vpack.c.bf16 %v668_v57, %v579_v56 }
  0xff   : > { %2462 = vmatpush.bf16.msra.mxu1 %v9483_v53  ;;  %v9470_v53 = vld [vmem:[#allocation2 + $0x1b0] sm:$0xf] }
 0x100   : > { %v786_v2 = vunpack.c.l.bf16 %v732_v60  ;;  %v787_v3 = vunpack.c.h.bf16 %v732_v60 }
 0x102   : > { %v852_v5 = vadd.f32 %v11126_v12, %v786_v2  ;;  %v853_v6 = vadd.f32 %v11128_v13, %v787_v3 }
 0x104   : > { %v1012_v18 = vmax.f32 %v852_v5, 0.0  ;;  %v1013_v19 = vmax.f32 %v853_v6, 0.0  ;;  %v11186_v11 = vpop.f32.mrf.mxu3  ;;  %v11194_v50 = vpop.f32.mrf.mxu2  ;;  %v9406_v5 = vld [vmem:[#allocation2 + $0x130] sm:$0xf]  ;;  %v10469_v6 = vld [vmem:[#allocation2 + $0x134] sm:$0xf0] }
 0x105   : > { %v582_v20 = vpop.f32.mrf.mxu0  ;;  %v671_v21 = vpop.f32.mrf.mxu1  ;;  %v9407_v7 = vor.u32 %v10469_v6, %v9406_v5 }
 0x106   : > { %v1064_v23 = vpack.c.bf16 %v1012_v18, %v1010_v15  ;;  %v1065_v24 = vpack.c.bf16 %v1013_v19, %v1011_v16  ;;  %v733_v25 = vpack.c.bf16 %v671_v21, %v582_v20 }
 0x107   : > { %2196 = vmatpush.bf16.msra.mxu2 %v9407_v7 }
 0x108   : > { %1311 = vmatmul.bf16.gmra.mxu2 %v1064_v23  ;;  %1400 = vmatmul.bf16.gmra.mxu3 %v1065_v24  ;;  %v788_v27 = vunpack.c.l.bf16 %v733_v25  ;;  %v789_v28 = vunpack.c.h.bf16 %v733_v25 }
 0x109   : > { %1489 = vmatmul.bf16.gmra.mxu0 %v1064_v23  ;;  %1578 = vmatmul.bf16.gmra.mxu1 %v1065_v24 }
 0x10a   : > { %v854_v41 = vadd.f32 %v11126_v12, %v788_v27  ;;  %v855_v43 = vadd.f32 %v11128_v13, %v789_v28 }
 0x10c   : > { %v711_v29 = vpop.f32.mrf.mxu3  ;;  %v1014_v54 = vmax.f32 %v854_v41, 0.0  ;;  %v1015_v55 = vmax.f32 %v855_v43, 0.0  ;;  %v627_v15 = vpop.f32.mrf.mxu2 }
 0x10d   : > { %v584_v35 = vpop.f32.mrf.mxu0  ;;  %v673_v36 = vpop.f32.mrf.mxu1  ;;  %v11188_v37 = vpack.c.bf16 %v711_v29, %v622_v26 }
 0x10e   : > { %v734_v40 = vpack.c.bf16 %v673_v36, %v584_v35  ;;  %v10470_v36 = vld [vmem:[#allocation2 + $0x144] sm:$0xf] }
 0x10f   : > { %v9419_v41 = vor.u32 %v10470_v36, %v9416_v38 }
 0x110   : > { %v790_v44 = vunpack.c.l.bf16 %v734_v40  ;;  %v791_v45 = vunpack.c.h.bf16 %v734_v40 }
 0x111   : > { %2373 = vmatpush.bf16.msra.mxu0 %v9419_v41 }
 0x112   : > { %v856_v46 = vadd.f32 %v11126_v12, %v790_v44  ;;  %v857_v48 = vadd.f32 %v11128_v13, %v791_v45 }
 0x114   : > { %v1016_v56 = vmax.f32 %v856_v46, 0.0  ;;  %v1017_v57 = vmax.f32 %v857_v48, 0.0  ;;  %v11196_v59 = vpop.f32.mrf.mxu3  ;;  %v11210_v6 = vpop.f32.mrf.mxu2 }
 0x115   : > { %v587_v60 = vpop.f32.mrf.mxu0  ;;  %v676_v0 = vpop.f32.mrf.mxu1 }
 0x116   : > { %v1066_v1 = vpack.c.bf16 %v1016_v56, %v1014_v54  ;;  %v1067_v2 = vpack.c.bf16 %v1017_v57, %v1015_v55  ;;  %v735_v3 = vpack.c.bf16 %v676_v0, %v587_v60  ;;  %v10485_v54 = vld [vmem:[#allocation2 + $0x1b4] sm:$0xf0] }
 0x117   : > { %v9471_v55 = vor.u32 %v10485_v54, %v9470_v53 }
 0x118   : > { %1316 = vmatmul.bf16.gmra.mxu2 %v1066_v1  ;;  %1405 = vmatmul.bf16.gmra.mxu3 %v1067_v2  ;;  %v792_v8 = vunpack.c.l.bf16 %v735_v3  ;;  %v793_v9 = vunpack.c.h.bf16 %v735_v3 }
 0x119   : > { %1494 = vmatmul.bf16.gmra.mxu0 %v1066_v1  ;;  %1583 = vmatmul.bf16.gmra.mxu1 %v1067_v2  ;;  %v10484_v1 = vld [vmem:[#allocation2 + $0x1b4] sm:$0xf] }
 0x11a   : > { %v858_v23 = vadd.f32 %v11126_v12, %v792_v8  ;;  %v859_v24 = vadd.f32 %v11128_v13, %v793_v9  ;;  %2285 = vmatpush.bf16.msra.mxu3 %v9471_v55  ;;  %v10468_v55 = vld [vmem:[#allocation2 + $0x134] sm:$0xf] }
 0x11c   : > { %v716_v16 = vpop.f32.mrf.mxu3  ;;  %v1018_v29 = vmax.f32 %v858_v23, 0.0  ;;  %v1019_v30 = vmax.f32 %v859_v24, 0.0 }
 0x11d   : > { %v589_v18 = vpop.f32.mrf.mxu0  ;;  %v678_v19 = vpop.f32.mrf.mxu1  ;;  %v11198_v20 = vpack.c.bf16 %v716_v16, %v627_v15  ;;  %v740_v16 = vpack.c.bf16 %v11146_v62, %v11138_v32 }
 0x11e   : > { %v736_v21 = vpack.c.bf16 %v678_v19, %v589_v18 }
 0x120   : > { %v794_v25 = vunpack.c.l.bf16 %v736_v21  ;;  %v795_v26 = vunpack.c.h.bf16 %v736_v21 }
 0x122   : > { %v860_v27 = vadd.f32 %v11126_v12, %v794_v25  ;;  %v861_v28 = vadd.f32 %v11128_v13, %v795_v26  ;;  %v1669_v25 = vld [vmem:[#allocation1] sm:$0xff]  ;;  %v800_v26 = vunpack.c.l.bf16 %v11140_v47 }
 0x123   : > { %v1671_v38 = vpack.i.b16 %v1669_v25, %v1669_v25 }
 0x124   : > { %v1020_v33 = vmax.f32 %v860_v27, 0.0  ;;  %v1021_v35 = vmax.f32 %v861_v28, 0.0  ;;  %v1670_v27 = vld [vmem:[#allocation1 + $0x9] sm:$0xff] }
 0x125   : > { %v592_v40 = vpop.f32.mrf.mxu0  ;;  %v9398_v28 = vld [vmem:[#allocation2 + $0x120] sm:$0xf]  ;;  %v1674_v41 = vpack.i.b16 %v1670_v27, %v1670_v27 }
 0x126   : > { %v1068_v43 = vpack.c.bf16 %v1020_v33, %v1018_v29  ;;  %v1069_v44 = vpack.c.bf16 %v1021_v35, %v1019_v30  ;;  %v737_v45 = vpack.c.bf16 %v11130_v14, %v592_v40  ;;  %v9472_v14 = vld [vmem:[#allocation2 + $0x1b8] sm:$0xf0]  ;;  %v10467_v29 = vld [vmem:[#allocation2 + $0x124] sm:$0xf0]  ;;  %v801_v30 = vunpack.c.h.bf16 %v11140_v47 }
 0x127   : > { %v9475_v2 = vor.u32 %v10484_v1, %v9472_v14  ;;  %v802_v33 = vunpack.c.l.bf16 %v740_v16  ;;  %v803_v35 = vunpack.c.h.bf16 %v740_v16  ;;  %v9399_v32 = vor.u32 %v10467_v29, %v9398_v28 }
 0x128   : > { %1321 = vmatmul.bf16.gmra.mxu2 %v1068_v43  ;;  %1410 = vmatmul.bf16.gmra.mxu3 %v1069_v44  ;;  %v796_v46 = vunpack.c.l.bf16 %v737_v45  ;;  %v797_v48 = vunpack.c.h.bf16 %v737_v45  ;;  %v1676_v54 = vperm.slane %v1674_v41, 0  ;;  %v742_v16 = vpack.c.bf16 %v11156_v34, %v11148_v63 }
 0x129   : > { %1499 = vmatmul.bf16.gmra.mxu0 %v1068_v43  ;;  %1588 = vmatmul.bf16.gmra.mxu1 %v1069_v44  ;;  %v866_v43 = vadd.f32 %v11126_v12, %v800_v26  ;;  %v867_v44 = vadd.f32 %v11128_v13, %v801_v30  ;;  %v868_v45 = vadd.f32 %v11126_v12, %v802_v33  ;;  %v9462_v30 = vld [vmem:[#allocation2 + $0x1a0] sm:$0xf]  ;;  %v10483_v33 = vld [vmem:[#allocation2 + $0x1a4] sm:$0xf0]  ;;  %v805_v63 = vunpack.c.h.bf16 %v11150_v17 }
 0x12a   : > { %v862_v56 = vadd.f32 %v11126_v12, %v796_v46  ;;  %v863_v57 = vadd.f32 %v11128_v13, %v797_v48  ;;  %2463 = vmatpush.bf16.msra.mxu1 %v9475_v2  ;;  %2197 = vmatpush.bf16.msra.mxu2 %v9399_v32  ;;  %v869_v46 = vadd.f32 %v11128_v13, %v803_v35  ;;  %v804_v35 = vunpack.c.l.bf16 %v11150_v17 }
 0x12b   : > { %v1028_v1 = vmax.f32 %v868_v45, 0.0  ;;  %v806_v34 = vunpack.c.l.bf16 %v742_v16  ;;  %v9463_v32 = vor.u32 %v10483_v33, %v9462_v30  ;;  %v871_v17 = vadd.f32 %v11128_v13, %v805_v63 }
 0x12c   : > { %v1022_v7 = vmax.f32 %v862_v56, 0.0  ;;  %v1023_v8 = vmax.f32 %v863_v57, 0.0  ;;  %v9408_v56 = vld [vmem:[#allocation2 + $0x138] sm:$0xf0]  ;;  %v1029_v14 = vmax.f32 %v869_v46, 0.0 }
 0x12d   : > { %v594_v51 = vpop.f32.mrf.mxu0  ;;  %v9411_v57 = vor.u32 %v10468_v55, %v9408_v56  ;;  %2286 = vmatpush.bf16.msra.mxu3 %v9463_v32  ;;  %v809_v32 = vunpack.c.h.bf16 %v11160_v49 }
 0x12e   : > { %v738_v52 = vpack.c.bf16 %v11136_v31, %v594_v51  ;;  %v11212_v31 = vpop.f32.mrf.mxu3 }
 0x12f   : > { %2374 = vmatpush.bf16.msra.mxu0 %v9411_v57 }
 0x130   : > { %v798_v60 = vunpack.c.l.bf16 %v738_v52  ;;  %v799_v0 = vunpack.c.h.bf16 %v738_v52  ;;  %v1673_v52 = vperm.slane %v1671_v38, 0 }
 0x132   : > { %v864_v3 = vadd.f32 %v11126_v12, %v798_v60  ;;  %v865_v5 = vadd.f32 %v11128_v13, %v799_v0  ;;  %v1026_v60 = vmax.f32 %v866_v43, 0.0  ;;  %v1027_v0 = vmax.f32 %v867_v44, 0.0 }
 0x134   : > { %v1024_v9 = vmax.f32 %v864_v3, 0.0  ;;  %v1025_v15 = vmax.f32 %v865_v5, 0.0  ;;  %v11222_v3 = vunpack.c.l.bf16 %v1673_v52 }
 0x136   : > { %v1465_v18 = vpop.f32.mrf.mxu0  ;;  %v1554_v19 = vpop.f32.mrf.mxu1  ;;  %v1070_v21 = vpack.c.bf16 %v1024_v9, %v1022_v7  ;;  %v1071_v23 = vpack.c.bf16 %v1025_v15, %v1023_v8  ;;  %v11224_v9 = vunpack.c.l.bf16 %v1676_v54 }
 0x137   : > { %v1555_v24 = vadd.f32 %v1554_v19, %v1465_v18 }
 0x138   : > { %1326 = vmatmul.bf16.gmra.mxu2 %v1070_v21  ;;  %1415 = vmatmul.bf16.gmra.mxu3 %v1071_v23 }
 0x139   : > { %1504 = vmatmul.bf16.gmra.mxu0 %v1070_v21  ;;  %1593 = vmatmul.bf16.gmra.mxu1 %v1071_v23  ;;  %v1072_v23 = vpack.c.bf16 %v1028_v1, %v1026_v60  ;;  %v9464_v1 = vld [vmem:[#allocation2 + $0x1a8] sm:$0xf0] }
 0x13b   : > { %v1287_v62 = vpop.f32.mrf.mxu2  ;;  %v1376_v36 = vpop.f32.mrf.mxu3 }
 0x13c   : > { %v1377_v40 = vadd.f32 %v1376_v36, %v1287_v62  ;;  %v807_v62 = vunpack.c.h.bf16 %v742_v16 }
 0x13e   : > { %v1634_v48 = vpack.c.bf16 %v1555_v24, %v1377_v40  ;;  %v1467_v51 = vpop.f32.mrf.mxu0  ;;  %v1556_v47 = vpop.f32.mrf.mxu1  ;;  %v1073_v24 = vpack.c.bf16 %v1029_v14, %v1027_v0  ;;  %v873_v52 = vadd.f32 %v11128_v13, %v807_v62  ;;  %v10482_v0 = vld [vmem:[#allocation2 + $0x1a4] sm:$0xf] }
 0x13f   : > { %v1557_v53 = vadd.f32 %v1556_v47, %v1467_v51  ;;  %v870_v51 = vadd.f32 %v11126_v12, %v804_v35  ;;  %v872_v47 = vadd.f32 %v11126_v12, %v806_v34  ;;  %v9467_v14 = vor.u32 %v10482_v0, %v9464_v1 }
 0x140   : > { %v1677_v2 = vunpack.c.l.bf16 %v1634_v48  ;;  %v1678_v8 = vunpack.c.h.bf16 %v1634_v48  ;;  %v808_v34 = vunpack.c.l.bf16 %v11160_v49 }
 0x141   : > { %2464 = vmatpush.bf16.msra.mxu1 %v9467_v14 }
 0x142   : > { %v1743_v25 = vadd.f32 %v11222_v3, %v1677_v2  ;;  %v1744_v27 = vadd.f32 %v11224_v9, %v1678_v8  ;;  %v1030_v2 = vmax.f32 %v870_v51, 0.0  ;;  %v1033_v8 = vmax.f32 %v873_v52, 0.0 }
 0x143   : > { %v1289_v5 = vpop.f32.mrf.mxu2  ;;  %v1378_v7 = vpop.f32.mrf.mxu3  ;;  %v874_v49 = vadd.f32 %v11126_v12, %v808_v34 }
 0x144   : > { %v1379_v15 = vadd.f32 %v1378_v7, %v1289_v5  ;;  %v1903_v40 = vmax.f32 %v1743_v25, 0.0  ;;  %v1904_v44 = vmax.f32 %v1744_v27, 0.0  ;;  %v1031_v5 = vmax.f32 %v871_v17, 0.0 }
 0x145   : > { %v1032_v7 = vmax.f32 %v872_v47, 0.0  ;;  %v875_v47 = vadd.f32 %v11128_v13, %v809_v32 }
 0x146   : > { %v1635_v18 = vpack.c.bf16 %v1557_v53, %v1379_v15  ;;  %v1470_v19 = vpop.f32.mrf.mxu0  ;;  %v1559_v21 = vpop.f32.mrf.mxu1 }
 0x147   : > { %v1560_v26 = vadd.f32 %v1559_v21, %v1470_v19  ;;  %v1074_v27 = vpack.c.bf16 %v1032_v7, %v1030_v2  ;;  %v10466_v2 = vld [vmem:[#allocation2 + $0x124] sm:$0xf] }
 0x148   : > { %v1679_v28 = vunpack.c.l.bf16 %v1635_v18  ;;  %v1680_v29 = vunpack.c.h.bf16 %v1635_v18  ;;  %1331 = vmatmul.bf16.gmra.mxu2 %v1072_v23  ;;  %1420 = vmatmul.bf16.gmra.mxu3 %v1073_v24 }
 0x149   : > { %1509 = vmatmul.bf16.gmra.mxu0 %v1072_v23  ;;  %1598 = vmatmul.bf16.gmra.mxu1 %v1073_v24  ;;  %v744_v23 = vpack.c.bf16 %v11166_v4, %v11158_v39  ;;  %v9390_v39 = vld [vmem:[#allocation2 + $0x110] sm:$0xf]  ;;  %v10465_v4 = vld [vmem:[#allocation2 + $0x114] sm:$0xf0] }
 0x14a   : > { %v1745_v36 = vadd.f32 %v11222_v3, %v1679_v28  ;;  %v1746_v38 = vadd.f32 %v11224_v9, %v1680_v29  ;;  %v1075_v28 = vpack.c.bf16 %v1033_v8, %v1031_v5  ;;  %v9400_v5 = vld [vmem:[#allocation2 + $0x128] sm:$0xf0]  ;;  %v1034_v8 = vmax.f32 %v874_v49, 0.0 }
 0x14b   : > { %v1292_v41 = vpop.f32.mrf.mxu2  ;;  %v1381_v43 = vpop.f32.mrf.mxu3  ;;  %v810_v62 = vunpack.c.l.bf16 %v744_v23  ;;  %v9403_v7 = vor.u32 %v10466_v2, %v9400_v5 }
 0x14c   : > { %v1905_v45 = vmax.f32 %v1745_v36, 0.0  ;;  %v1906_v46 = vmax.f32 %v1746_v38, 0.0  ;;  %v1382_v48 = vadd.f32 %v1381_v43, %v1292_v41  ;;  %v811_v36 = vunpack.c.h.bf16 %v744_v23 }
 0x14d   : > { %v9391_v38 = vor.u32 %v10465_v4, %v9390_v39  ;;  %v876_v52 = vadd.f32 %v11126_v12, %v810_v62  ;;  %2375 = vmatpush.bf16.msra.mxu0 %v9403_v7  ;;  %v9454_v62 = vld [vmem:[#allocation2 + $0x190] sm:$0xf]  ;;  %v10481_v39 = vld [vmem:[#allocation2 + $0x194] sm:$0xf0]  ;;  %v10480_v7 = vld [vmem:[#allocation2 + $0x194] sm:$0xf] }
 0x14e   : > { %v11238_v53 = vpack.c.bf16 %v1905_v45, %v1903_v40  ;;  %v11240_v54 = vpack.c.bf16 %v1906_v46, %v1904_v44  ;;  %v1636_v55 = vpack.c.bf16 %v1560_v26, %v1382_v48  ;;  %v1472_v56 = vpop.f32.mrf.mxu0  ;;  %v1561_v57 = vpop.f32.mrf.mxu1 }
 0x14f   : > { %v1562_v60 = vadd.f32 %v1561_v57, %v1472_v56  ;;  %2198 = vmatpush.bf16.msra.mxu2 %v9391_v38  ;;  %v9455_v38 = vor.u32 %v10481_v39, %v9454_v62 }
 0x150   : > { %v1681_v15 = vunpack.c.l.bf16 %v1636_v55  ;;  %v1682_v19 = vunpack.c.h.bf16 %v1636_v55  ;;  %v877_v55 = vadd.f32 %v11128_v13, %v811_v36  ;;  %v812_v36 = vunpack.c.l.bf16 %v11170_v22 }
 0x151   : > { %2287 = vmatpush.bf16.msra.mxu3 %v9455_v38 }
 0x152   : > { %v1747_v30 = vadd.f32 %v11222_v3, %v1681_v15  ;;  %v1748_v63 = vadd.f32 %v11224_v9, %v1682_v19  ;;  %v1035_v15 = vmax.f32 %v875_v47, 0.0  ;;  %v878_v47 = vadd.f32 %v11126_v12, %v812_v36 }
 0x153   : > { %v1294_v16 = vpop.f32.mrf.mxu2  ;;  %v1383_v18 = vpop.f32.mrf.mxu3  ;;  %v816_v36 = vunpack.c.l.bf16 %v11178_v58 }
 0x154   : > { %v1384_v21 = vadd.f32 %v1383_v18, %v1294_v16  ;;  %v1907_v45 = vmax.f32 %v1747_v30, 0.0  ;;  %v1908_v51 = vmax.f32 %v1748_v63, 0.0  ;;  %v1036_v16 = vmax.f32 %v876_v52, 0.0 }
 0x155   : > { %v1037_v18 = vmax.f32 %v877_v55, 0.0 }
 0x156   : > { %v1637_v24 = vpack.c.bf16 %v1562_v60, %v1384_v21  ;;  %v1475_v25 = vpop.f32.mrf.mxu0  ;;  %v1564_v26 = vpop.f32.mrf.mxu1  ;;  %v1076_v30 = vpack.c.bf16 %v1036_v16, %v1034_v8  ;;  %v9456_v8 = vld [vmem:[#allocation2 + $0x198] sm:$0xf0]  ;;  %v1038_v16 = vmax.f32 %v878_v47, 0.0 }
 0x157   : > { %v1565_v29 = vadd.f32 %v1564_v26, %v1475_v25  ;;  %v746_v26 = vpack.c.bf16 %v11176_v42, %v11168_v10  ;;  %v813_v10 = vunpack.c.h.bf16 %v11170_v22 }
 0x158   : > { %v1683_v33 = vunpack.c.l.bf16 %v1637_v24  ;;  %v1684_v35 = vunpack.c.h.bf16 %v1637_v24  ;;  %1336 = vmatmul.bf16.gmra.mxu2 %v1074_v27  ;;  %1425 = vmatmul.bf16.gmra.mxu3 %v1075_v28 }
 0x159   : > { %1514 = vmatmul.bf16.gmra.mxu0 %v1074_v27  ;;  %1603 = vmatmul.bf16.gmra.mxu1 %v1075_v28  ;;  %v814_v42 = vunpack.c.l.bf16 %v746_v26  ;;  %v879_v22 = vadd.f32 %v11128_v13, %v813_v10  ;;  %v817_v10 = vunpack.c.h.bf16 %v11178_v58  ;;  %v882_v58 = vadd.f32 %v11126_v12, %v816_v36  ;;  %v9446_v36 = vld [vmem:[#allocation2 + $0x180] sm:$0xf] }
 0x15a   : > { %v1749_v40 = vadd.f32 %v11222_v3, %v1683_v33  ;;  %v1750_v41 = vadd.f32 %v11224_v9, %v1684_v35  ;;  %v1077_v33 = vpack.c.bf16 %v1037_v18, %v1035_v15  ;;  %v9459_v15 = vor.u32 %v10480_v7, %v9456_v8  ;;  %v10464_v8 = vld [vmem:[#allocation2 + $0x114] sm:$0xf] }
 0x15b   : > { %v1297_v43 = vpop.f32.mrf.mxu2  ;;  %v1386_v44 = vpop.f32.mrf.mxu3  ;;  %v880_v52 = vadd.f32 %v11126_v12, %v814_v42  ;;  %v1039_v18 = vmax.f32 %v879_v22, 0.0  ;;  %v883_v47 = vadd.f32 %v11128_v13, %v817_v10  ;;  %v10479_v10 = vld [vmem:[#allocation2 + $0x184] sm:$0xf0] }
 0x15c   : > { %v1387_v46 = vadd.f32 %v1386_v44, %v1297_v43  ;;  %v1909_v48 = vmax.f32 %v1749_v40, 0.0  ;;  %v1910_v17 = vmax.f32 %v1750_v41, 0.0  ;;  %v815_v40 = vunpack.c.h.bf16 %v746_v26  ;;  %2465 = vmatpush.bf16.msra.mxu1 %v9459_v15  ;;  %v9392_v15 = vld [vmem:[#allocation2 + $0x118] sm:$0xf0] }
 0x15e   : > { %v1638_v56 = vpack.c.bf16 %v1565_v29, %v1387_v46  ;;  %v1477_v57 = vpop.f32.mrf.mxu0  ;;  %v1566_v60 = vpop.f32.mrf.mxu1  ;;  %v11254_v0 = vpack.c.bf16 %v1909_v48, %v1907_v45  ;;  %v11256_v1 = vpack.c.bf16 %v1910_v17, %v1908_v51  ;;  %v881_v55 = vadd.f32 %v11128_v13, %v815_v40 }
 0x15f   : > { %v1567_v14 = vadd.f32 %v1566_v60, %v1477_v57 }
 0x160   : > { %v1685_v19 = vunpack.c.l.bf16 %v1638_v56  ;;  %v1686_v24 = vunpack.c.h.bf16 %v1638_v56 }
 0x162   : > { %v1751_v63 = vadd.f32 %v11222_v3, %v1685_v19  ;;  %v1752_v4 = vadd.f32 %v11224_v9, %v1686_v24  ;;  %v1040_v19 = vmax.f32 %v880_v52, 0.0 }
 0x163   : > { %v1299_v21 = vpop.f32.mrf.mxu2  ;;  %v1388_v23 = vpop.f32.mrf.mxu3 }
 0x164   : > { %v1389_v25 = vadd.f32 %v1388_v23, %v1299_v21  ;;  %v1911_v46 = vmax.f32 %v1751_v63, 0.0  ;;  %v1912_v17 = vmax.f32 %v1752_v4, 0.0  ;;  %v1041_v21 = vmax.f32 %v881_v55, 0.0 }
 0x166   : > { %v1639_v27 = vpack.c.bf16 %v1567_v14, %v1389_v25  ;;  %v1480_v28 = vpop.f32.mrf.mxu0  ;;  %v1569_v29 = vpop.f32.mrf.mxu1  ;;  %v1079_v63 = vpack.c.bf16 %v1041_v21, %v1039_v18  ;;  %v1042_v18 = vmax.f32 %v882_v58, 0.0 }
 0x167   : > { %v1570_v35 = vadd.f32 %v1569_v29, %v1480_v28  ;;  %v748_v28 = vpack.c.bf16 %v11186_v11, %v11180_v61  ;;  %v9382_v61 = vld [vmem:[#allocation2 + $0x100] sm:$0xf]  ;;  %v10463_v11 = vld [vmem:[#allocation2 + $0x104] sm:$0xf0] }
 0x168   : > { %v1687_v34 = vunpack.c.l.bf16 %v1639_v27  ;;  %v1688_v32 = vunpack.c.h.bf16 %v1639_v27  ;;  %1341 = vmatmul.bf16.gmra.mxu2 %v1076_v30  ;;  %1430 = vmatmul.bf16.gmra.mxu3 %v1077_v33  ;;  %v9383_v40 = vor.u32 %v10463_v11, %v9382_v61  ;;  %v820_v61 = vunpack.c.l.bf16 %v11188_v37 }
 0x169   : > { %1519 = vmatmul.bf16.gmra.mxu0 %v1076_v30  ;;  %1608 = vmatmul.bf16.gmra.mxu1 %v1077_v33  ;;  %v818_v42 = vunpack.c.l.bf16 %v748_v28  ;;  %v819_v38 = vunpack.c.h.bf16 %v748_v28  ;;  %v9447_v11 = vor.u32 %v10479_v10, %v9446_v36 }
 0x16a   : > { %v1753_v41 = vadd.f32 %v11222_v3, %v1687_v34  ;;  %v1754_v43 = vadd.f32 %v11224_v9, %v1688_v32  ;;  %2199 = vmatpush.bf16.msra.mxu2 %v9383_v40 }
 0x16b   : > { %v1302_v44 = vpop.f32.mrf.mxu2  ;;  %v1391_v45 = vpop.f32.mrf.mxu3  ;;  %v884_v22 = vadd.f32 %v11126_v12, %v818_v42  ;;  %v885_v52 = vadd.f32 %v11128_v13, %v819_v38  ;;  %2288 = vmatpush.bf16.msra.mxu3 %v9447_v11  ;;  %v9567_v11 = vld [vmem:[#allocation2 + $0x270] sm:$0xf] }
 0x16c   : > { %v1392_v48 = vadd.f32 %v1391_v45, %v1302_v44  ;;  %v1913_v51 = vmax.f32 %v1753_v41, 0.0  ;;  %v1914_v49 = vmax.f32 %v1754_v43, 0.0 }
 0x16d   : > { %v1044_v21 = vmax.f32 %v884_v22, 0.0 }
 0x16e   : > { %v1640_v56 = vpack.c.bf16 %v1570_v35, %v1392_v48  ;;  %v1482_v57 = vpop.f32.mrf.mxu0  ;;  %v1571_v60 = vpop.f32.mrf.mxu1  ;;  %v11270_v14 = vpack.c.bf16 %v1913_v51, %v1911_v46  ;;  %v11272_v2 = vpack.c.bf16 %v1914_v49, %v1912_v17  ;;  %v1078_v35 = vpack.c.bf16 %v1040_v19, %v1038_v16 }
 0x16f   : > { %v1572_v5 = vadd.f32 %v1571_v60, %v1482_v57  ;;  %v9395_v16 = vor.u32 %v10464_v8, %v9392_v15  ;;  %v1043_v19 = vmax.f32 %v883_v47, 0.0  ;;  %v10478_v8 = vld [vmem:[#allocation2 + $0x184] sm:$0xf]  ;;  %v9448_v15 = vld [vmem:[#allocation2 + $0x188] sm:$0xf0] }
 0x170   : > { %v1689_v23 = vunpack.c.l.bf16 %v1640_v56  ;;  %v1690_v26 = vunpack.c.h.bf16 %v1640_v56 }
 0x171   : > { %2376 = vmatpush.bf16.msra.mxu0 %v9395_v16  ;;  %v9451_v16 = vor.u32 %v10478_v8, %v9448_v15 }
 0x172   : > { %v1755_v32 = vadd.f32 %v11222_v3, %v1689_v23  ;;  %v1756_v4 = vadd.f32 %v11224_v9, %v1690_v26  ;;  %v1045_v23 = vmax.f32 %v885_v52, 0.0 }
 0x173   : > { %v1304_v24 = vpop.f32.mrf.mxu2  ;;  %v1393_v25 = vpop.f32.mrf.mxu3  ;;  %2466 = vmatpush.bf16.msra.mxu1 %v9451_v16 }
 0x174   : > { %v1394_v27 = vadd.f32 %v1393_v25, %v1304_v24  ;;  %v1915_v46 = vmax.f32 %v1755_v32, 0.0  ;;  %v1916_v17 = vmax.f32 %v1756_v4, 0.0 }
 0x176   : > { %v1641_v29 = vpack.c.bf16 %v1572_v5, %v1394_v27  ;;  %v1485_v30 = vpop.f32.mrf.mxu0  ;;  %v1574_v33 = vpop.f32.mrf.mxu1 }
 0x177   : > { %v1575_v34 = vadd.f32 %v1574_v33, %v1485_v30 }
 0x178   : > { %v1691_v62 = vunpack.c.l.bf16 %v1641_v29  ;;  %v1692_v39 = vunpack.c.h.bf16 %v1641_v29  ;;  %1346 = vmatmul.bf16.gmra.mxu2 %v1078_v35  ;;  %1435 = vmatmul.bf16.gmra.mxu3 %v1079_v63  ;;  %v750_v29 = vpack.c.bf16 %v11196_v59, %v11194_v50  ;;  %v821_v50 = vunpack.c.h.bf16 %v11188_v37 }
 0x179   : > { %1524 = vmatmul.bf16.gmra.mxu0 %v1078_v35  ;;  %1613 = vmatmul.bf16.gmra.mxu1 %v1079_v63  ;;  %v1080_v63 = vpack.c.bf16 %v1044_v21, %v1042_v18 }
 0x17a   : > { %v1757_v41 = vadd.f32 %v11222_v3, %v1691_v62  ;;  %v1758_v43 = vadd.f32 %v11224_v9, %v1692_v39  ;;  %v822_v59 = vunpack.c.l.bf16 %v750_v29  ;;  %v823_v38 = vunpack.c.h.bf16 %v750_v29 }
 0x17b   : > { %v1307_v44 = vpop.f32.mrf.mxu2  ;;  %v1396_v45 = vpop.f32.mrf.mxu3  ;;  %v887_v37 = vadd.f32 %v11128_v13, %v821_v50 }
 0x17c   : > { %v1397_v48 = vadd.f32 %v1396_v45, %v1307_v44  ;;  %v1917_v51 = vmax.f32 %v1757_v41, 0.0  ;;  %v1918_v49 = vmax.f32 %v1758_v43, 0.0  ;;  %v888_v58 = vadd.f32 %v11126_v12, %v822_v59 }
 0x17d   : > { %v889_v47 = vadd.f32 %v11128_v13, %v823_v38  ;;  %v10509_v38 = vld [vmem:[#allocation2 + $0x274] sm:$0xf0] }
 0x17e   : > { %v1642_v55 = vpack.c.bf16 %v1575_v34, %v1397_v48  ;;  %v1487_v56 = vpop.f32.mrf.mxu0  ;;  %v1576_v57 = vpop.f32.mrf.mxu1  ;;  %v11286_v60 = vpack.c.bf16 %v1917_v51, %v1915_v46  ;;  %v11288_v5 = vpack.c.bf16 %v1918_v49, %v1916_v17  ;;  %v1081_v34 = vpack.c.bf16 %v1045_v23, %v1043_v19 }
 0x17f   : > { %v1577_v7 = vadd.f32 %v1576_v57, %v1487_v56  ;;  %v886_v49 = vadd.f32 %v11126_v12, %v820_v61  ;;  %v1047_v19 = vmax.f32 %v887_v37, 0.0  ;;  %v1048_v21 = vmax.f32 %v888_v58, 0.0  ;;  %v9508_v61 = vld [vmem:[%s13088_s4 + $0x2] sm:$0x3] }
 0x180   : > { %v1693_v24 = vunpack.c.l.bf16 %v1642_v55  ;;  %v1694_v27 = vunpack.c.h.bf16 %v1642_v55  ;;  %v1049_v23 = vmax.f32 %v889_v47, 0.0  ;;  %2583 = vst [vmem:[#allocation1] ss:$9 sm:$0xff] %v9508_v61 }
 0x181   : > { %v1046_v18 = vmax.f32 %v886_v49, 0.0 }
 0x182   : > { %v1759_v62 = vadd.f32 %v11222_v3, %v1693_v24  ;;  %v1760_v42 = vadd.f32 %v11224_v9, %v1694_v27  ;;  %v10462_v27 = vld [vmem:[#allocation2 + $0x104] sm:$0xf] }
 0x183   : > { %v1309_v25 = vpop.f32.mrf.mxu2  ;;  %v1398_v26 = vpop.f32.mrf.mxu3 }
 0x184   : > { %v1399_v28 = vadd.f32 %v1398_v26, %v1309_v25  ;;  %v1919_v45 = vmax.f32 %v1759_v62, 0.0  ;;  %v1920_v51 = vmax.f32 %v1760_v42, 0.0  ;;  %v1082_v62 = vpack.c.bf16 %v1048_v21, %v1046_v18 }
 0x186   : > { %v1643_v30 = vpack.c.bf16 %v1577_v7, %v1399_v28  ;;  %v1490_v33 = vpop.f32.mrf.mxu0  ;;  %v1579_v35 = vpop.f32.mrf.mxu1  ;;  %v9384_v28 = vld [vmem:[#allocation2 + $0x108] sm:$0xf0] }
 0x187   : > { %v1580_v32 = vadd.f32 %v1579_v35, %v1490_v33  ;;  %v9387_v33 = vor.u32 %v10462_v27, %v9384_v28  ;;  %v752_v35 = vpack.c.bf16 %v11212_v31, %v11210_v6  ;;  %v824_v6 = vunpack.c.l.bf16 %v11198_v20 }
 0x188   : > { %v1695_v39 = vunpack.c.l.bf16 %v1643_v30  ;;  %v1696_v4 = vunpack.c.h.bf16 %v1643_v30  ;;  %1351 = vmatmul.bf16.gmra.mxu2 %v1080_v63  ;;  %1440 = vmatmul.bf16.gmra.mxu3 %v1081_v34  ;;  %v825_v31 = vunpack.c.h.bf16 %v11198_v20 }
 0x189   : > { %1529 = vmatmul.bf16.gmra.mxu0 %v1080_v63  ;;  %1618 = vmatmul.bf16.gmra.mxu1 %v1081_v34  ;;  %v826_v59 = vunpack.c.l.bf16 %v752_v35  ;;  %v890_v37 = vadd.f32 %v11126_v12, %v824_v6 }
 0x18a   : > { %v1761_v40 = vadd.f32 %v11222_v3, %v1695_v39  ;;  %v1762_v41 = vadd.f32 %v11224_v9, %v1696_v4  ;;  %v1083_v39 = vpack.c.bf16 %v1049_v23, %v1047_v19  ;;  %2377 = vmatpush.bf16.msra.mxu0 %v9387_v33  ;;  %v891_v58 = vadd.f32 %v11128_v13, %v825_v31 }
 0x18b   : > { %v1312_v43 = vpop.f32.mrf.mxu2  ;;  %v1401_v44 = vpop.f32.mrf.mxu3  ;;  %v892_v47 = vadd.f32 %v11126_v12, %v826_v59  ;;  %v1050_v18 = vmax.f32 %v890_v37, 0.0 }
 0x18c   : > { %v1402_v46 = vadd.f32 %v1401_v44, %v1312_v43  ;;  %v1921_v48 = vmax.f32 %v1761_v40, 0.0  ;;  %v1922_v17 = vmax.f32 %v1762_v41, 0.0  ;;  %v827_v40 = vunpack.c.h.bf16 %v752_v35 }
 0x18d   : > { %v9568_v41 = vor.u32 %v10509_v38, %v9567_v11  ;;  %v1051_v19 = vmax.f32 %v891_v58, 0.0  ;;  %v1052_v21 = vmax.f32 %v892_v47, 0.0 }
 0x18e   : > { %v1644_v22 = vpack.c.bf16 %v1580_v32, %v1402_v46  ;;  %v1492_v52 = vpop.f32.mrf.mxu0  ;;  %v1581_v55 = vpop.f32.mrf.mxu1  ;;  %v11302_v56 = vpack.c.bf16 %v1921_v48, %v1919_v45  ;;  %v11304_v57 = vpack.c.bf16 %v1922_v17, %v1920_v51 }
 0x18f   : > { %v1582_v7 = vadd.f32 %v1581_v55, %v1492_v52  ;;  %3107 = vmatpush.bf16.msrb.mxu2 %v9568_v41 }
 0x190   : > { %v1697_v24 = vunpack.c.l.bf16 %v1644_v22  ;;  %v1698_v29 = vunpack.c.h.bf16 %v1644_v22  ;;  %v893_v22 = vadd.f32 %v11128_v13, %v827_v40 }
 0x192   : > { %v1763_v36 = vadd.f32 %v11222_v3, %v1697_v24  ;;  %v1764_v50 = vadd.f32 %v11224_v9, %v1698_v29  ;;  %v1053_v23 = vmax.f32 %v893_v22, 0.0 }
 0x193   : > { %v1314_v25 = vpop.f32.mrf.mxu2  ;;  %v1403_v26 = vpop.f32.mrf.mxu3 }
 0x194   : > { %v1404_v30 = vadd.f32 %v1403_v26, %v1314_v25  ;;  %v1923_v48 = vmax.f32 %v1763_v36, 0.0  ;;  %v1924_v49 = vmax.f32 %v1764_v50, 0.0  ;;  %v1085_v33 = vpack.c.bf16 %v1053_v23, %v1051_v19  ;;  %v9559_v23 = vld [vmem:[#allocation2 + $0x260] sm:$0xf] }
 0x196   : > { %v1645_v63 = vpack.c.bf16 %v1582_v7, %v1404_v30  ;;  %v1495_v34 = vpop.f32.mrf.mxu0  ;;  %v1584_v32 = vpop.f32.mrf.mxu1  ;;  %v1084_v30 = vpack.c.bf16 %v1052_v21, %v1050_v18 }
 0x197   : > { %v1585_v4 = vadd.f32 %v1584_v32, %v1495_v34 }
 0x198   : > { %v1699_v10 = vunpack.c.l.bf16 %v1645_v63  ;;  %v1700_v42 = vunpack.c.h.bf16 %v1645_v63  ;;  %1356 = vmatmul.bf16.gmra.mxu2 %v1082_v62  ;;  %1445 = vmatmul.bf16.gmra.mxu3 %v1083_v39 }
 0x199   : > { %1534 = vmatmul.bf16.gmra.mxu0 %v1082_v62  ;;  %1623 = vmatmul.bf16.gmra.mxu1 %v1083_v39  ;;  %v9631_v62 = vld [vmem:[#allocation2 + $0x2f0] sm:$0xf]  ;;  %v10525_v39 = vld [vmem:[#allocation2 + $0x2f4] sm:$0xf0] }
 0x19a   : > { %v1765_v43 = vadd.f32 %v11222_v3, %v1699_v10  ;;  %v1766_v44 = vadd.f32 %v11224_v9, %v1700_v42  ;;  %v9632_v36 = vor.u32 %v10525_v39, %v9631_v62  ;;  %v10508_v39 = vld [vmem:[#allocation2 + $0x274] sm:$0xf] }
 0x19b   : > { %v1317_v45 = vpop.f32.mrf.mxu2  ;;  %v1406_v46 = vpop.f32.mrf.mxu3 }
 0x19c   : > { %v1407_v51 = vadd.f32 %v1406_v46, %v1317_v45  ;;  %v1925_v17 = vmax.f32 %v1765_v43, 0.0  ;;  %v1926_v20 = vmax.f32 %v1766_v44, 0.0  ;;  %3196 = vmatpush.bf16.msrb.mxu3 %v9632_v36 }
 0x19e   : > { %v1646_v52 = vpack.c.bf16 %v1585_v4, %v1407_v51  ;;  %v1497_v55 = vpop.f32.mrf.mxu0  ;;  %v1586_v7 = vpop.f32.mrf.mxu1  ;;  %v11321_v8 = vpack.c.bf16 %v1925_v17, %v1923_v48  ;;  %v11323_v15 = vpack.c.bf16 %v1926_v20, %v1924_v49  ;;  %v10524_v48 = vld [vmem:[#allocation2 + $0x2f4] sm:$0xf]  ;;  %v9633_v51 = vld [vmem:[#allocation2 + $0x2f8] sm:$0xf0] }
 0x19f   : > { %v1587_v16 = vadd.f32 %v1586_v7, %v1497_v55  ;;  %v9636_v17 = vor.u32 %v10524_v48, %v9633_v51  ;;  %v10523_v48 = vld [vmem:[#allocation2 + $0x2e4] sm:$0xf0] }
 0x1a0   : > { %v1701_v24 = vunpack.c.l.bf16 %v1646_v52  ;;  %v1702_v27 = vunpack.c.h.bf16 %v1646_v52 }
 0x1a1   : > { %3374 = vmatpush.bf16.msrb.mxu1 %v9636_v17 }
 0x1a2   : > { %v1767_v63 = vadd.f32 %v11222_v3, %v1701_v24  ;;  %v1768_v4 = vadd.f32 %v11224_v9, %v1702_v27  ;;  %v10507_v24 = vld [vmem:[#allocation2 + $0x264] sm:$0xf0] }
 0x1a3   : > { %v1319_v25 = vpop.f32.mrf.mxu2  ;;  %v1408_v26 = vpop.f32.mrf.mxu3 }
 0x1a4   : > { %v1409_v28 = vadd.f32 %v1408_v26, %v1319_v25  ;;  %v1927_v6 = vmax.f32 %v1767_v63, 0.0  ;;  %v1928_v11 = vmax.f32 %v1768_v4, 0.0  ;;  %v9560_v25 = vor.u32 %v10507_v24, %v9559_v23  ;;  %v9569_v4 = vld [vmem:[#allocation2 + $0x278] sm:$0xf0]  ;;  %v10522_v23 = vld [vmem:[#allocation2 + $0x2e4] sm:$0xf] }
 0x1a5   : > { %v9572_v36 = vor.u32 %v10508_v39, %v9569_v4  ;;  %v9625_v24 = vld [vmem:[#allocation2 + $0x2e8] sm:$0xf0]  ;;  %v9551_v39 = vld [vmem:[#allocation2 + $0x250] sm:$0xf]  ;;  %v10505_v4 = vld [vmem:[#allocation2 + $0x254] sm:$0xf0] }
 0x1a6   : > { %v1647_v12 = vpack.c.bf16 %v1587_v16, %v1409_v28  ;;  %v1500_v29 = vpop.f32.mrf.mxu0  ;;  %v1589_v13 = vpop.f32.mrf.mxu1  ;;  %3108 = vmatpush.bf16.msrb.mxu2 %v9560_v25  ;;  %v9628_v25 = vor.u32 %v10522_v23, %v9625_v24  ;;  %v10521_v23 = vld [vmem:[#allocation2 + $0x2d4] sm:$0xf0] }
 0x1a7   : > { %v1590_v35 = vadd.f32 %v1589_v13, %v1500_v29  ;;  %3285 = vmatpush.bf16.msrb.mxu0 %v9572_v36  ;;  %v9552_v36 = vor.u32 %v10505_v4, %v9551_v39  ;;  %v10520_v39 = vld [vmem:[#allocation2 + $0x2d4] sm:$0xf]  ;;  %v9617_v4 = vld [vmem:[#allocation2 + $0x2d8] sm:$0xf0] }
 0x1a8   : > { %v1703_v34 = vunpack.c.l.bf16 %v1647_v12  ;;  %v1704_v32 = vunpack.c.h.bf16 %v1647_v12  ;;  %1361 = vmatmul.bf16.gmra.mxu2 %v1084_v30  ;;  %1450 = vmatmul.bf16.gmra.mxu3 %v1085_v33 }
 0x1a9   : > { %1539 = vmatmul.bf16.gmra.mxu0 %v1084_v30  ;;  %1628 = vmatmul.bf16.gmra.mxu1 %v1085_v33 }
 0x1aa   : > { %v1769_v10 = vadd.f32 %v11222_v3, %v1703_v34  ;;  %v1770_v42 = vadd.f32 %v11224_v9, %v1704_v32  ;;  %3375 = vmatpush.bf16.msrb.mxu1 %v9628_v25  ;;  %3109 = vmatpush.bf16.msrb.mxu2 %v9552_v36  ;;  %v9620_v36 = vor.u32 %v10520_v39, %v9617_v4  ;;  %v10519_v39 = vld [vmem:[#allocation2 + $0x2c4] sm:$0xf0] }
 0x1ab   : > { %v1322_v61 = vpop.f32.mrf.mxu2  ;;  %v1411_v50 = vpop.f32.mrf.mxu3 }
 0x1ac   : > { %v1412_v31 = vadd.f32 %v1411_v50, %v1322_v61  ;;  %v1929_v59 = vmax.f32 %v1769_v10, 0.0  ;;  %v1930_v38 = vmax.f32 %v1770_v42, 0.0 }
 0x1ae   : > { %v1648_v40 = vpack.c.bf16 %v1590_v35, %v1412_v31  ;;  %v1502_v41 = vpop.f32.mrf.mxu0  ;;  %v1591_v43 = vpop.f32.mrf.mxu1  ;;  %v11329_v44 = vpack.c.bf16 %v1929_v59, %v1927_v6  ;;  %v11331_v45 = vpack.c.bf16 %v1930_v38, %v1928_v11  ;;  %3376 = vmatpush.bf16.msrb.mxu1 %v9620_v36 }
 0x1af   : > { %v1592_v46 = vadd.f32 %v1591_v43, %v1502_v41 }
 0x1b0   : > { %v1705_v49 = vunpack.c.l.bf16 %v1648_v40  ;;  %v1706_v58 = vunpack.c.h.bf16 %v1648_v40 }
 0x1b2   : > { %v1771_v16 = vadd.f32 %v11222_v3, %v1705_v49  ;;  %v1772_v21 = vadd.f32 %v11224_v9, %v1706_v58 }
 0x1b3   : > { %v1324_v20 = vpop.f32.mrf.mxu2  ;;  %v1413_v37 = vpop.f32.mrf.mxu3 }
 0x1b4   : > { %v1414_v47 = vadd.f32 %v1413_v37, %v1324_v20  ;;  %v1931_v29 = vmax.f32 %v1771_v16, 0.0  ;;  %v1932_v33 = vmax.f32 %v1772_v21, 0.0 }
 0x1b6   : > { %v1649_v22 = vpack.c.bf16 %v1592_v46, %v1414_v47  ;;  %v1505_v52 = vpop.f32.mrf.mxu0  ;;  %v1594_v55 = vpop.f32.mrf.mxu1  ;;  %v9623_v46 = vld [vmem:[#allocation2 + $0x2e0] sm:$0xf] }
 0x1b7   : > { %v1595_v7 = vadd.f32 %v1594_v55, %v1505_v52  ;;  %v9624_v17 = vor.u32 %v10523_v48, %v9623_v46  ;;  %v10506_v48 = vld [vmem:[#allocation2 + $0x264] sm:$0xf] }
 0x1b8   : > { %v1707_v18 = vunpack.c.l.bf16 %v1649_v22  ;;  %v1708_v19 = vunpack.c.h.bf16 %v1649_v22  ;;  %2200 = vmatmul.bf16.vlgmr.msra.gmra.mxu2 %v11238_v53  ;;  %2289 = vmatmul.bf16.vlgmr.msra.gmra.mxu3 %v11240_v54 }
 0x1b9   : > { %2378 = vmatmul.bf16.vlgmr.msra.gmra.mxu0 %v11238_v53  ;;  %2467 = vmatmul.bf16.vlgmr.msra.gmra.mxu1 %v11240_v54 }
 0x1ba   : > { %v1773_v26 = vadd.f32 %v11222_v3, %v1707_v18  ;;  %v1774_v27 = vadd.f32 %v11224_v9, %v1708_v19  ;;  %3197 = vmatpush.bf16.msrb.mxu3 %v9624_v17 }
 0x1bb   : > { %v1327_v28 = vpop.f32.mrf.mxu2  ;;  %v1416_v12 = vpop.f32.mrf.mxu3 }
 0x1bc   : > { %v1417_v13 = vadd.f32 %v1416_v12, %v1327_v28  ;;  %v1933_v30 = vmax.f32 %v1773_v26, 0.0  ;;  %v1934_v35 = vmax.f32 %v1774_v27, 0.0 }
 0x1be   : > { %v1650_v63 = vpack.c.bf16 %v1595_v7, %v1417_v13  ;;  %v1507_v34 = vpop.f32.mrf.mxu0  ;;  %v1596_v53 = vpop.f32.mrf.mxu1  ;;  %v11341_v32 = vpack.c.bf16 %v1933_v30, %v1931_v29  ;;  %v11343_v54 = vpack.c.bf16 %v1934_v35, %v1932_v33 }
 0x1bf   : > { %v1597_v62 = vadd.f32 %v1596_v53, %v1507_v34 }
 0x1c0   : > { %v1709_v10 = vunpack.c.l.bf16 %v1650_v63  ;;  %v1710_v50 = vunpack.c.h.bf16 %v1650_v63 }
 0x1c2   : > { %v1775_v40 = vadd.f32 %v11222_v3, %v1709_v10  ;;  %v1776_v51 = vadd.f32 %v11224_v9, %v1710_v50 }
 0x1c3   : > { %v1329_v42 = vpop.f32.mrf.mxu2  ;;  %v1418_v61 = vpop.f32.mrf.mxu3 }
 0x1c4   : > { %v1419_v6 = vadd.f32 %v1418_v61, %v1329_v42  ;;  %v1935_v47 = vmax.f32 %v1775_v40, 0.0  ;;  %v1936_v55 = vmax.f32 %v1776_v51, 0.0  ;;  %v9561_v51 = vld [vmem:[#allocation2 + $0x268] sm:$0xf0] }
 0x1c5   : > { %v9564_v17 = vor.u32 %v10506_v48, %v9561_v51  ;;  %v9543_v48 = vld [vmem:[#allocation2 + $0x240] sm:$0xf]  ;;  %v10503_v51 = vld [vmem:[#allocation2 + $0x244] sm:$0xf0] }
 0x1c6   : > { %v1651_v31 = vpack.c.bf16 %v1597_v62, %v1419_v6  ;;  %v1510_v59 = vpop.f32.mrf.mxu0  ;;  %v1599_v11 = vpop.f32.mrf.mxu1 }
 0x1c7   : > { %v1600_v38 = vadd.f32 %v1599_v11, %v1510_v59  ;;  %3286 = vmatpush.bf16.msrb.mxu0 %v9564_v17  ;;  %v9544_v17 = vor.u32 %v10503_v51, %v9543_v48  ;;  %v10518_v48 = vld [vmem:[#allocation2 + $0x2c4] sm:$0xf]  ;;  %v9609_v51 = vld [vmem:[#allocation2 + $0x2c8] sm:$0xf0] }
 0x1c8   : > { %v1711_v41 = vunpack.c.l.bf16 %v1651_v31  ;;  %v1712_v43 = vunpack.c.h.bf16 %v1651_v31  ;;  %2205 = vmatmul.bf16.gmra.mxu2 %v11254_v0  ;;  %2294 = vmatmul.bf16.gmra.mxu3 %v11256_v1 }
 0x1c9   : > { %2383 = vmatmul.bf16.gmra.mxu0 %v11254_v0  ;;  %2472 = vmatmul.bf16.gmra.mxu1 %v11256_v1 }
 0x1ca   : > { %v1777_v49 = vadd.f32 %v11222_v3, %v1711_v41  ;;  %v1778_v20 = vadd.f32 %v11224_v9, %v1712_v43  ;;  %3110 = vmatpush.bf16.msrb.mxu2 %v9544_v17  ;;  %v9612_v17 = vor.u32 %v10518_v48, %v9609_v51 }
 0x1cb   : > { %v1332_v37 = vpop.f32.mrf.mxu2  ;;  %v1421_v58 = vpop.f32.mrf.mxu3 }
 0x1cc   : > { %v1422_v22 = vadd.f32 %v1421_v58, %v1332_v37  ;;  %v1937_v52 = vmax.f32 %v1777_v49, 0.0  ;;  %v1938_v7 = vmax.f32 %v1778_v20, 0.0  ;;  %3377 = vmatpush.bf16.msrb.mxu1 %v9612_v17 }
 0x1ce   : > { %v1652_v16 = vpack.c.bf16 %v1600_v38, %v1422_v22  ;;  %v1512_v18 = vpop.f32.mrf.mxu0  ;;  %v1601_v19 = vpop.f32.mrf.mxu1  ;;  %v11353_v21 = vpack.c.bf16 %v1937_v52, %v1935_v47  ;;  %v11355_v0 = vpack.c.bf16 %v1938_v7, %v1936_v55 }
 0x1cf   : > { %v1602_v1 = vadd.f32 %v1601_v19, %v1512_v18 }
 0x1d0   : > { %v1713_v26 = vunpack.c.l.bf16 %v1652_v16  ;;  %v1714_v12 = vunpack.c.h.bf16 %v1652_v16 }
 0x1d2   : > { %v1779_v63 = vadd.f32 %v11222_v3, %v1713_v26  ;;  %v1780_v62 = vadd.f32 %v11224_v9, %v1714_v12 }
 0x1d3   : > { %v1334_v27 = vpop.f32.mrf.mxu2  ;;  %v1423_v28 = vpop.f32.mrf.mxu3 }
 0x1d4   : > { %v1424_v29 = vadd.f32 %v1423_v28, %v1334_v27  ;;  %v1939_v6 = vmax.f32 %v1779_v63, 0.0  ;;  %v1940_v11 = vmax.f32 %v1780_v62, 0.0 }
 0x1d6   : > { %v1653_v13 = vpack.c.bf16 %v1602_v1, %v1424_v29  ;;  %v1515_v30 = vpop.f32.mrf.mxu0  ;;  %v1604_v33 = vpop.f32.mrf.mxu1  ;;  %v9615_v1 = vld [vmem:[#allocation2 + $0x2d0] sm:$0xf] }
 0x1d7   : > { %v1605_v35 = vadd.f32 %v1604_v33, %v1515_v30  ;;  %v9616_v25 = vor.u32 %v10521_v23, %v9615_v1  ;;  %v10504_v23 = vld [vmem:[#allocation2 + $0x254] sm:$0xf] }
 0x1d8   : > { %v1715_v34 = vunpack.c.l.bf16 %v1653_v13  ;;  %v1716_v53 = vunpack.c.h.bf16 %v1653_v13  ;;  %2210 = vmatmul.bf16.gmra.mxu2 %v11270_v14  ;;  %2299 = vmatmul.bf16.gmra.mxu3 %v11272_v2 }
 0x1d9   : > { %2388 = vmatmul.bf16.gmra.mxu0 %v11270_v14  ;;  %2477 = vmatmul.bf16.gmra.mxu1 %v11272_v2 }
 0x1da   : > { %v1781_v10 = vadd.f32 %v11222_v3, %v1715_v34  ;;  %v1782_v42 = vadd.f32 %v11224_v9, %v1716_v53  ;;  %3198 = vmatpush.bf16.msrb.mxu3 %v9616_v25 }
 0x1db   : > { %v1337_v61 = vpop.f32.mrf.mxu2  ;;  %v1426_v50 = vpop.f32.mrf.mxu3 }
 0x1dc   : > { %v1427_v31 = vadd.f32 %v1426_v50, %v1337_v61  ;;  %v1941_v59 = vmax.f32 %v1781_v10, 0.0  ;;  %v1942_v38 = vmax.f32 %v1782_v42, 0.0 }
 0x1de   : > { %v1654_v40 = vpack.c.bf16 %v1605_v35, %v1427_v31  ;;  %v1517_v41 = vpop.f32.mrf.mxu0  ;;  %v1606_v14 = vpop.f32.mrf.mxu1  ;;  %v11365_v43 = vpack.c.bf16 %v1941_v59, %v1939_v6  ;;  %v11367_v2 = vpack.c.bf16 %v1942_v38, %v1940_v11 }
 0x1df   : > { %v1607_v46 = vadd.f32 %v1606_v14, %v1517_v41 }
 0x1e0   : > { %v1717_v49 = vunpack.c.l.bf16 %v1654_v40  ;;  %v1718_v58 = vunpack.c.h.bf16 %v1654_v40 }
 0x1e2   : > { %v1783_v16 = vadd.f32 %v11222_v3, %v1717_v49  ;;  %v1784_v24 = vadd.f32 %v11224_v9, %v1718_v58 }
 0x1e3   : > { %v1339_v20 = vpop.f32.mrf.mxu2  ;;  %v1428_v37 = vpop.f32.mrf.mxu3 }
 0x1e4   : > { %v1429_v47 = vadd.f32 %v1428_v37, %v1339_v20  ;;  %v1943_v29 = vmax.f32 %v1783_v16, 0.0  ;;  %v1944_v33 = vmax.f32 %v1784_v24, 0.0  ;;  %v9553_v24 = vld [vmem:[#allocation2 + $0x258] sm:$0xf0] }
 0x1e5   : > { %v9556_v25 = vor.u32 %v10504_v23, %v9553_v24  ;;  %v9535_v23 = vld [vmem:[#allocation2 + $0x230] sm:$0xf]  ;;  %v10501_v24 = vld [vmem:[#allocation2 + $0x234] sm:$0xf0] }
 0x1e6   : > { %v1655_v22 = vpack.c.bf16 %v1607_v46, %v1429_v47  ;;  %v1520_v52 = vpop.f32.mrf.mxu0  ;;  %v1609_v55 = vpop.f32.mrf.mxu1 }
 0x1e7   : > { %v1610_v7 = vadd.f32 %v1609_v55, %v1520_v52  ;;  %3287 = vmatpush.bf16.msrb.mxu0 %v9556_v25  ;;  %v9536_v25 = vor.u32 %v10501_v24, %v9535_v23  ;;  %v10516_v23 = vld [vmem:[#allocation2 + $0x2b4] sm:$0xf]  ;;  %v9601_v24 = vld [vmem:[#allocation2 + $0x2b8] sm:$0xf0] }
 0x1e8   : > { %v1719_v18 = vunpack.c.l.bf16 %v1655_v22  ;;  %v1720_v19 = vunpack.c.h.bf16 %v1655_v22  ;;  %2215 = vmatmul.bf16.gmra.mxu2 %v11286_v60  ;;  %2304 = vmatmul.bf16.gmra.mxu3 %v11288_v5 }
 0x1e9   : > { %2393 = vmatmul.bf16.gmra.mxu0 %v11286_v60  ;;  %2482 = vmatmul.bf16.gmra.mxu1 %v11288_v5 }
 0x1ea   : > { %v1785_v26 = vadd.f32 %v11222_v3, %v1719_v18  ;;  %v1786_v27 = vadd.f32 %v11224_v9, %v1720_v19  ;;  %3111 = vmatpush.bf16.msrb.mxu2 %v9536_v25  ;;  %v9604_v25 = vor.u32 %v10516_v23, %v9601_v24 }
 0x1eb   : > { %v1342_v28 = vpop.f32.mrf.mxu2  ;;  %v1431_v12 = vpop.f32.mrf.mxu3 }
 0x1ec   : > { %v1432_v13 = vadd.f32 %v1431_v12, %v1342_v28  ;;  %v1945_v30 = vmax.f32 %v1785_v26, 0.0  ;;  %v1946_v35 = vmax.f32 %v1786_v27, 0.0  ;;  %3378 = vmatpush.bf16.msrb.mxu1 %v9604_v25 }
 0x1ee   : > { %v1656_v63 = vpack.c.bf16 %v1610_v7, %v1432_v13  ;;  %v1522_v34 = vpop.f32.mrf.mxu0  ;;  %v1611_v53 = vpop.f32.mrf.mxu1  ;;  %v11377_v62 = vpack.c.bf16 %v1945_v30, %v1943_v29  ;;  %v11379_v60 = vpack.c.bf16 %v1946_v35, %v1944_v33 }
 0x1ef   : > { %v1612_v5 = vadd.f32 %v1611_v53, %v1522_v34 }
 0x1f0   : > { %v1721_v10 = vunpack.c.l.bf16 %v1656_v63  ;;  %v1722_v50 = vunpack.c.h.bf16 %v1656_v63 }
 0x1f2   : > { %v1787_v40 = vadd.f32 %v11222_v3, %v1721_v10  ;;  %v1788_v46 = vadd.f32 %v11224_v9, %v1722_v50 }
 0x1f3   : > { %v1344_v42 = vpop.f32.mrf.mxu2  ;;  %v1433_v61 = vpop.f32.mrf.mxu3 }
 0x1f4   : > { %v1434_v6 = vadd.f32 %v1433_v61, %v1344_v42  ;;  %v1947_v47 = vmax.f32 %v1787_v40, 0.0  ;;  %v1948_v55 = vmax.f32 %v1788_v46, 0.0 }
 0x1f6   : > { %v1657_v31 = vpack.c.bf16 %v1612_v5, %v1434_v6  ;;  %v1525_v59 = vpop.f32.mrf.mxu0  ;;  %v1614_v11 = vpop.f32.mrf.mxu1  ;;  %v9607_v5 = vld [vmem:[#allocation2 + $0x2c0] sm:$0xf] }
 0x1f7   : > { %v1615_v38 = vadd.f32 %v1614_v11, %v1525_v59  ;;  %v9608_v36 = vor.u32 %v10519_v39, %v9607_v5 }
 0x1f8   : > { %v1723_v41 = vunpack.c.l.bf16 %v1657_v31  ;;  %v1724_v14 = vunpack.c.h.bf16 %v1657_v31  ;;  %2220 = vmatmul.bf16.gmra.mxu2 %v11302_v56  ;;  %2309 = vmatmul.bf16.gmra.mxu3 %v11304_v57 }
 0x1f9   : > { %2398 = vmatmul.bf16.gmra.mxu0 %v11302_v56  ;;  %2487 = vmatmul.bf16.gmra.mxu1 %v11304_v57 }
 0x1fa   : > { %v1789_v49 = vadd.f32 %v11222_v3, %v1723_v41  ;;  %v1790_v20 = vadd.f32 %v11224_v9, %v1724_v14  ;;  %3199 = vmatpush.bf16.msrb.mxu3 %v9608_v36 }
 0x1fb   : > { %v1347_v37 = vpop.f32.mrf.mxu2  ;;  %v1436_v58 = vpop.f32.mrf.mxu3 }
 0x1fc   : > { %v1437_v22 = vadd.f32 %v1436_v58, %v1347_v37  ;;  %v1949_v52 = vmax.f32 %v1789_v49, 0.0  ;;  %v1950_v7 = vmax.f32 %v1790_v20, 0.0 }
 0x1fe   : > { %v1658_v16 = vpack.c.bf16 %v1615_v38, %v1437_v22  ;;  %v1527_v18 = vpop.f32.mrf.mxu0  ;;  %v1616_v56 = vpop.f32.mrf.mxu1  ;;  %v11389_v19 = vpack.c.bf16 %v1949_v52, %v1947_v47  ;;  %v11391_v57 = vpack.c.bf16 %v1950_v7, %v1948_v55 }
 0x1ff   : > { %v1617_v1 = vadd.f32 %v1616_v56, %v1527_v18 }
 0x200   : > { %v1725_v26 = vunpack.c.l.bf16 %v1658_v16  ;;  %v1726_v12 = vunpack.c.h.bf16 %v1658_v16 }
 0x202   : > { %v1791_v63 = vadd.f32 %v11222_v3, %v1725_v26  ;;  %v1792_v4 = vadd.f32 %v11224_v9, %v1726_v12 }
 0x203   : > { %v1349_v27 = vpop.f32.mrf.mxu2  ;;  %v1438_v28 = vpop.f32.mrf.mxu3 }
 0x204   : > { %v1439_v29 = vadd.f32 %v1438_v28, %v1349_v27  ;;  %v1951_v6 = vmax.f32 %v1791_v63, 0.0  ;;  %v1952_v11 = vmax.f32 %v1792_v4, 0.0 }
 0x206   : > { %v1659_v13 = vpack.c.bf16 %v1617_v1, %v1439_v29  ;;  %v1530_v30 = vpop.f32.mrf.mxu0  ;;  %v1619_v33 = vpop.f32.mrf.mxu1 }
 0x207   : > { %v1620_v35 = vadd.f32 %v1619_v33, %v1530_v30 }
 0x208   : > { %v1727_v34 = vunpack.c.l.bf16 %v1659_v13  ;;  %v1728_v53 = vunpack.c.h.bf16 %v1659_v13  ;;  %2225 = vmatmul.bf16.gmra.mxu2 %v11321_v8  ;;  %2314 = vmatmul.bf16.gmra.mxu3 %v11323_v15 }
 0x209   : > { %2403 = vmatmul.bf16.gmra.mxu0 %v11321_v8  ;;  %2492 = vmatmul.bf16.gmra.mxu1 %v11323_v15 }
 0x20a   : > { %v1793_v10 = vadd.f32 %v11222_v3, %v1727_v34  ;;  %v1794_v42 = vadd.f32 %v11224_v9, %v1728_v53 }
 0x20b   : > { %v1352_v61 = vpop.f32.mrf.mxu2  ;;  %v1441_v50 = vpop.f32.mrf.mxu3 }
 0x20c   : > { %v1442_v31 = vadd.f32 %v1441_v50, %v1352_v61  ;;  %v1953_v59 = vmax.f32 %v1793_v10, 0.0  ;;  %v1954_v38 = vmax.f32 %v1794_v42, 0.0  ;;  %v10502_v61 = vld [vmem:[#allocation2 + $0x244] sm:$0xf]  ;;  %v9545_v50 = vld [vmem:[#allocation2 + $0x248] sm:$0xf0] }
 0x20e   : > { %v1660_v40 = vpack.c.bf16 %v1620_v35, %v1442_v31  ;;  %v1532_v41 = vpop.f32.mrf.mxu0  ;;  %v1621_v14 = vpop.f32.mrf.mxu1  ;;  %v11401_v46 = vpack.c.bf16 %v1953_v59, %v1951_v6  ;;  %v11403_v8 = vpack.c.bf16 %v1954_v38, %v1952_v11  ;;  %v9548_v6 = vor.u32 %v10502_v61, %v9545_v50 }
 0x20f   : > { %v1622_v15 = vadd.f32 %v1621_v14, %v1532_v41 }
 0x210   : > { %v1729_v49 = vunpack.c.l.bf16 %v1660_v40  ;;  %v1730_v58 = vunpack.c.h.bf16 %v1660_v40  ;;  %3288 = vmatpush.bf16.msrb.mxu0 %v9548_v6 }
 0x212   : > { %v1795_v16 = vadd.f32 %v11222_v3, %v1729_v49  ;;  %v1796_v1 = vadd.f32 %v11224_v9, %v1730_v58 }
 0x213   : > { %v1354_v20 = vpop.f32.mrf.mxu2  ;;  %v1443_v37 = vpop.f32.mrf.mxu3 }
 0x214   : > { %v1444_v47 = vadd.f32 %v1443_v37, %v1354_v20  ;;  %v1955_v29 = vmax.f32 %v1795_v16, 0.0  ;;  %v1956_v33 = vmax.f32 %v1796_v1, 0.0  ;;  %v9599_v16 = vld [vmem:[#allocation2 + $0x2b0] sm:$0xf] }
 0x216   : > { %v1661_v22 = vpack.c.bf16 %v1622_v15, %v1444_v47  ;;  %v1535_v52 = vpop.f32.mrf.mxu0  ;;  %v1624_v55 = vpop.f32.mrf.mxu1 }
 0x217   : > { %v1625_v7 = vadd.f32 %v1624_v55, %v1535_v52 }
 0x218   : > { %v1731_v18 = vunpack.c.l.bf16 %v1661_v22  ;;  %v1732_v56 = vunpack.c.h.bf16 %v1661_v22  ;;  %2230 = vmatmul.bf16.gmra.mxu2 %v11329_v44  ;;  %2319 = vmatmul.bf16.gmra.mxu3 %v11331_v45 }
 0x219   : > { %2408 = vmatmul.bf16.gmra.mxu0 %v11329_v44  ;;  %2497 = vmatmul.bf16.gmra.mxu1 %v11331_v45 }
 0x21a   : > { %v1797_v26 = vadd.f32 %v11222_v3, %v1731_v18  ;;  %v1798_v27 = vadd.f32 %v11224_v9, %v1732_v56  ;;  %v10517_v18 = vld [vmem:[#allocation2 + $0x2b4] sm:$0xf0] }
 0x21b   : > { %v1357_v28 = vpop.f32.mrf.mxu2  ;;  %v1446_v12 = vpop.f32.mrf.mxu3  ;;  %v9600_v1 = vor.u32 %v10517_v18, %v9599_v16 }
 0x21c   : > { %v1447_v13 = vadd.f32 %v1446_v12, %v1357_v28  ;;  %v1957_v30 = vmax.f32 %v1797_v26, 0.0  ;;  %v1958_v35 = vmax.f32 %v1798_v27, 0.0 }
 0x21d   : > { %3200 = vmatpush.bf16.msrb.mxu3 %v9600_v1 }
 0x21e   : > { %v1662_v63 = vpack.c.bf16 %v1625_v7, %v1447_v13  ;;  %v1537_v34 = vpop.f32.mrf.mxu0  ;;  %v1626_v44 = vpop.f32.mrf.mxu1  ;;  %v11413_v53 = vpack.c.bf16 %v1957_v30, %v1955_v29  ;;  %v11415_v45 = vpack.c.bf16 %v1958_v35, %v1956_v33 }
 0x21f   : > { %v1627_v5 = vadd.f32 %v1626_v44, %v1537_v34 }
 0x220   : > { %v1733_v39 = vunpack.c.l.bf16 %v1662_v63  ;;  %v1734_v10 = vunpack.c.h.bf16 %v1662_v63 }
 0x222   : > { %v1799_v40 = vadd.f32 %v11222_v3, %v1733_v39  ;;  %v1800_v15 = vadd.f32 %v11224_v9, %v1734_v10  ;;  %v2585_v39 = vld [vmem:[#allocation1 + $0x9] sm:$0xff] }
 0x223   : > { %v1359_v4 = vpop.f32.mrf.mxu2  ;;  %v1448_v36 = vpop.f32.mrf.mxu3  ;;  %v10499_v10 = vld [vmem:[#allocation2 + $0x224] sm:$0xf0] }
 0x224   : > { %v1449_v42 = vadd.f32 %v1448_v36, %v1359_v4  ;;  %v1959_v20 = vmax.f32 %v1799_v40, 0.0  ;;  %v1960_v47 = vmax.f32 %v1800_v15, 0.0  ;;  %v9527_v36 = vld [vmem:[#allocation2 + $0x220] sm:$0xf] }
 0x226   : > { %v1663_v31 = vpack.c.bf16 %v1627_v5, %v1449_v42  ;;  %v1540_v59 = vpop.f32.mrf.mxu0  ;;  %v1629_v11 = vpop.f32.mrf.mxu1  ;;  %v2584_v5 = vld [vmem:[#allocation1] sm:$0xff]  ;;  %v9528_v42 = vor.u32 %v10499_v10, %v9527_v36 }
 0x227   : > { %v1630_v38 = vadd.f32 %v1629_v11, %v1540_v59  ;;  %v2586_v59 = vpack.i.b16 %v2584_v5, %v2584_v5  ;;  %v2589_v11 = vpack.i.b16 %v2585_v39, %v2585_v39 }
 0x228   : > { %v1735_v41 = vunpack.c.l.bf16 %v1663_v31  ;;  %v1736_v14 = vunpack.c.h.bf16 %v1663_v31  ;;  %2235 = vmatmul.bf16.gmra.mxu2 %v11341_v32  ;;  %2324 = vmatmul.bf16.gmra.mxu3 %v11343_v54 }
 0x229   : > { %2413 = vmatmul.bf16.gmra.mxu0 %v11341_v32  ;;  %2502 = vmatmul.bf16.gmra.mxu1 %v11343_v54 }
 0x22a   : > { %v1801_v48 = vadd.f32 %v11222_v3, %v1735_v41  ;;  %v1802_v51 = vadd.f32 %v11224_v9, %v1736_v14  ;;  %3112 = vmatpush.bf16.msrb.mxu2 %v9528_v42 }
 0x22b   : > { %v1362_v17 = vpop.f32.mrf.mxu2  ;;  %v1451_v49 = vpop.f32.mrf.mxu3 }
 0x22c   : > { %v1452_v37 = vadd.f32 %v1451_v49, %v1362_v17  ;;  %v1961_v58 = vmax.f32 %v1801_v48, 0.0  ;;  %v1962_v22 = vmax.f32 %v1802_v51, 0.0 }
 0x22e   : > { %v1664_v52 = vpack.c.bf16 %v1630_v38, %v1452_v37  ;;  %v1542_v55 = vpop.f32.mrf.mxu0  ;;  %v1631_v7 = vpop.f32.mrf.mxu1  ;;  %v11425_v56 = vpack.c.bf16 %v1961_v58, %v1959_v20  ;;  %v11427_v32 = vpack.c.bf16 %v1962_v22, %v1960_v47  ;;  %v10500_v20 = vld [vmem:[#allocation2 + $0x234] sm:$0xf]  ;;  %v9537_v37 = vld [vmem:[#allocation2 + $0x238] sm:$0xf0] }
 0x22f   : > { %v1632_v54 = vadd.f32 %v1631_v7, %v1542_v55  ;;  %v9540_v58 = vor.u32 %v10500_v20, %v9537_v37  ;;  %v9519_v20 = vld [vmem:[#allocation2 + $0x210] sm:$0xf]  ;;  %v10497_v37 = vld [vmem:[#allocation2 + $0x214] sm:$0xf0] }
 0x230   : > { %v1737_v26 = vunpack.c.l.bf16 %v1664_v52  ;;  %v1738_v12 = vunpack.c.h.bf16 %v1664_v52 }
 0x231   : > { %3289 = vmatpush.bf16.msrb.mxu0 %v9540_v58  ;;  %v9520_v58 = vor.u32 %v10497_v37, %v9519_v20  ;;  %v10512_v20 = vld [vmem:[#allocation2 + $0x294] sm:$0xf]  ;;  %v9585_v37 = vld [vmem:[#allocation2 + $0x298] sm:$0xf0] }
 0x232   : > { %v1803_v63 = vadd.f32 %v11222_v3, %v1737_v26  ;;  %v1804_v4 = vadd.f32 %v11224_v9, %v1738_v12  ;;  %v9591_v12 = vld [vmem:[#allocation2 + $0x2a0] sm:$0xf] }
 0x233   : > { %v1364_v27 = vpop.f32.mrf.mxu2  ;;  %v1453_v28 = vpop.f32.mrf.mxu3  ;;  %3113 = vmatpush.bf16.msrb.mxu2 %v9520_v58  ;;  %v9588_v58 = vor.u32 %v10512_v20, %v9585_v37  ;;  %v10511_v20 = vld [vmem:[#allocation2 + $0x284] sm:$0xf0] }
 0x234   : > { %v1454_v29 = vadd.f32 %v1453_v28, %v1364_v27  ;;  %v1963_v38 = vmax.f32 %v1803_v63, 0.0  ;;  %v1964_v14 = vmax.f32 %v1804_v4, 0.0 }
 0x236   : > { %v1665_v13 = vpack.c.bf16 %v1632_v54, %v1454_v29  ;;  %v2379_v30 = vpop.f32.mrf.mxu0  ;;  %v2468_v33 = vpop.f32.mrf.mxu1  ;;  %v10515_v29 = vld [vmem:[#allocation2 + $0x2a4] sm:$0xf0] }
 0x237   : > { %v2469_v35 = vadd.f32 %v2468_v33, %v2379_v30 }
 0x238   : > { %v1739_v34 = vunpack.c.l.bf16 %v1665_v13  ;;  %v1740_v44 = vunpack.c.h.bf16 %v1665_v13  ;;  %2240 = vmatmul.bf16.gmra.mxu2 %v11353_v21  ;;  %2329 = vmatmul.bf16.gmra.mxu3 %v11355_v0  ;;  %v9592_v13 = vor.u32 %v10515_v29, %v9591_v12  ;;  %v10498_v12 = vld [vmem:[#allocation2 + $0x224] sm:$0xf]  ;;  %v9529_v29 = vld [vmem:[#allocation2 + $0x228] sm:$0xf0] }
 0x239   : > { %2418 = vmatmul.bf16.gmra.mxu0 %v11353_v21  ;;  %2507 = vmatmul.bf16.gmra.mxu1 %v11355_v0 }
 0x23a   : > { %v1805_v61 = vadd.f32 %v11222_v3, %v1739_v34  ;;  %v1806_v50 = vadd.f32 %v11224_v9, %v1740_v44  ;;  %v2588_v3 = vperm.slane %v2586_v59, 0  ;;  %v2591_v9 = vperm.slane %v2589_v11, 0  ;;  %3201 = vmatpush.bf16.msrb.mxu3 %v9592_v13 }
 0x23b   : > { %v2201_v6 = vpop.f32.mrf.mxu2  ;;  %v2290_v31 = vpop.f32.mrf.mxu3  ;;  %v9532_v13 = vor.u32 %v10498_v12, %v9529_v29  ;;  %v9511_v12 = vld [vmem:[#allocation2 + $0x200] sm:$0xf]  ;;  %v10495_v29 = vld [vmem:[#allocation2 + $0x204] sm:$0xf0] }
 0x23c   : > { %v2291_v40 = vadd.f32 %v2290_v31, %v2201_v6  ;;  %v1965_v41 = vmax.f32 %v1805_v61, 0.0  ;;  %v1966_v15 = vmax.f32 %v1806_v50, 0.0  ;;  %v11441_v22 = vunpack.c.l.bf16 %v2588_v3  ;;  %v10514_v50 = vld [vmem:[#allocation2 + $0x2a4] sm:$0xf]  ;;  %v9593_v6 = vld [vmem:[#allocation2 + $0x2a8] sm:$0xf0] }
 0x23d   : > { %v11443_v16 = vunpack.c.l.bf16 %v2591_v9  ;;  %v9596_v31 = vor.u32 %v10514_v50, %v9593_v6  ;;  %3290 = vmatpush.bf16.msrb.mxu0 %v9532_v13  ;;  %v10513_v50 = vld [vmem:[#allocation2 + $0x294] sm:$0xf0]  ;;  %v9512_v13 = vor.u32 %v10495_v29, %v9511_v12  ;;  %v10510_v12 = vld [vmem:[#allocation2 + $0x284] sm:$0xf]  ;;  %v9577_v29 = vld [vmem:[#allocation2 + $0x288] sm:$0xf0] }
 0x23e   : > { %v2548_v21 = vpack.c.bf16 %v2469_v35, %v2291_v40  ;;  %v2381_v48 = vpop.f32.mrf.mxu0  ;;  %v2470_v0 = vpop.f32.mrf.mxu1  ;;  %v11437_v51 = vpack.c.bf16 %v1965_v41, %v1963_v38  ;;  %v11439_v17 = vpack.c.bf16 %v1966_v15, %v1964_v14 }
 0x23f   : > { %v2471_v49 = vadd.f32 %v2470_v0, %v2381_v48  ;;  %3379 = vmatpush.bf16.msrb.mxu1 %v9596_v31  ;;  %3114 = vmatpush.bf16.msrb.mxu2 %v9512_v13  ;;  %v9580_v13 = vor.u32 %v10510_v12, %v9577_v29  ;;  %v9760_v12 = vld [vmem:[#allocation2 + $0x3f0] sm:$0xf]  ;;  %v10557_v29 = vld [vmem:[#allocation2 + $0x3f4] sm:$0xf0] }
 0x240   : > { %v2592_v47 = vunpack.c.l.bf16 %v2548_v21  ;;  %v2593_v7 = vunpack.c.h.bf16 %v2548_v21 }
 0x242   : > { %v2658_v24 = vadd.f32 %v11441_v22, %v2592_v47  ;;  %v2659_v26 = vadd.f32 %v11443_v16, %v2593_v7 }
 0x243   : > { %v2203_v52 = vpop.f32.mrf.mxu2  ;;  %v2292_v55 = vpop.f32.mrf.mxu3  ;;  %3380 = vmatpush.bf16.msrb.mxu1 %v9588_v58 }
 0x244   : > { %v2293_v18 = vadd.f32 %v2292_v55, %v2203_v52  ;;  %v2818_v35 = vmax.f32 %v2658_v24, 0.0  ;;  %v2819_v44 = vmax.f32 %v2659_v26, 0.0 }
 0x246   : > { %v2549_v54 = vpack.c.bf16 %v2471_v49, %v2293_v18  ;;  %v2384_v1 = vpop.f32.mrf.mxu0  ;;  %v2473_v23 = vpop.f32.mrf.mxu1 }
 0x247   : > { %v2474_v25 = vadd.f32 %v2473_v23, %v2384_v1  ;;  %3381 = vmatpush.bf16.msrb.mxu1 %v9580_v13 }
 0x248   : > { %v2594_v27 = vunpack.c.l.bf16 %v2549_v54  ;;  %v2595_v28 = vunpack.c.h.bf16 %v2549_v54  ;;  %2245 = vmatmul.bf16.gmra.mxu2 %v11365_v43  ;;  %2334 = vmatmul.bf16.gmra.mxu3 %v11367_v2 }
 0x249   : > { %2423 = vmatmul.bf16.gmra.mxu0 %v11365_v43  ;;  %2512 = vmatmul.bf16.gmra.mxu1 %v11367_v2 }
 0x24a   : > { %v2660_v30 = vadd.f32 %v11441_v22, %v2594_v27  ;;  %v2661_v33 = vadd.f32 %v11443_v16, %v2595_v28 }
 0x24b   : > { %v2206_v63 = vpop.f32.mrf.mxu2  ;;  %v2295_v34 = vpop.f32.mrf.mxu3 }
 0x24c   : > { %v2820_v5 = vmax.f32 %v2660_v30, 0.0  ;;  %v2821_v39 = vmax.f32 %v2661_v33, 0.0  ;;  %v2296_v4 = vadd.f32 %v2295_v34, %v2206_v63 }
 0x24e   : > { %v11453_v36 = vpack.c.bf16 %v2820_v5, %v2818_v35  ;;  %v11455_v10 = vpack.c.bf16 %v2821_v39, %v2819_v44  ;;  %v2550_v43 = vpack.c.bf16 %v2474_v25, %v2296_v4  ;;  %v2386_v42 = vpop.f32.mrf.mxu0  ;;  %v2475_v2 = vpop.f32.mrf.mxu1 }
 0x24f   : > { %v2476_v61 = vadd.f32 %v2475_v2, %v2386_v42 }
 0x250   : > { %v2596_v59 = vunpack.c.l.bf16 %v2550_v43  ;;  %v2597_v40 = vunpack.c.h.bf16 %v2550_v43 }
 0x252   : > { %v2662_v0 = vadd.f32 %v11441_v22, %v2596_v59  ;;  %v2663_v9 = vadd.f32 %v11443_v16, %v2597_v40 }
 0x253   : > { %v2208_v11 = vpop.f32.mrf.mxu2  ;;  %v2297_v38 = vpop.f32.mrf.mxu3 }
 0x254   : > { %v2298_v41 = vadd.f32 %v2297_v38, %v2208_v11  ;;  %v2822_v18 = vmax.f32 %v2662_v0, 0.0  ;;  %v2823_v23 = vmax.f32 %v2663_v9, 0.0 }
 0x256   : > { %v2551_v14 = vpack.c.bf16 %v2476_v61, %v2298_v41  ;;  %v2389_v15 = vpop.f32.mrf.mxu0  ;;  %v2478_v21 = vpop.f32.mrf.mxu1  ;;  %v9583_v61 = vld [vmem:[#allocation2 + $0x290] sm:$0xf] }
 0x257   : > { %v2479_v48 = vadd.f32 %v2478_v21, %v2389_v15  ;;  %v9584_v31 = vor.u32 %v10513_v50, %v9583_v61  ;;  %v10496_v50 = vld [vmem:[#allocation2 + $0x214] sm:$0xf] }
 0x258   : > { %v2598_v3 = vunpack.c.l.bf16 %v2551_v14  ;;  %v2599_v49 = vunpack.c.h.bf16 %v2551_v14  ;;  %2250 = vmatmul.bf16.gmra.mxu2 %v11377_v62  ;;  %2339 = vmatmul.bf16.gmra.mxu3 %v11379_v60 }
 0x259   : > { %2428 = vmatmul.bf16.gmra.mxu0 %v11377_v62  ;;  %2517 = vmatmul.bf16.gmra.mxu1 %v11379_v60 }
 0x25a   : > { %v2664_v47 = vadd.f32 %v11441_v22, %v2598_v3  ;;  %v2665_v52 = vadd.f32 %v11443_v16, %v2599_v49  ;;  %3202 = vmatpush.bf16.msrb.mxu3 %v9584_v31 }
 0x25b   : > { %v2211_v55 = vpop.f32.mrf.mxu2  ;;  %v2300_v7 = vpop.f32.mrf.mxu3 }
 0x25c   : > { %v2301_v54 = vadd.f32 %v2300_v7, %v2211_v55  ;;  %v2824_v1 = vmax.f32 %v2664_v47, 0.0  ;;  %v2825_v24 = vmax.f32 %v2665_v52, 0.0 }
 0x25e   : > { %v2552_v25 = vpack.c.bf16 %v2479_v48, %v2301_v54  ;;  %v2391_v26 = vpop.f32.mrf.mxu0  ;;  %v2480_v62 = vpop.f32.mrf.mxu1  ;;  %v11465_v27 = vpack.c.bf16 %v2824_v1, %v2822_v18  ;;  %v11467_v60 = vpack.c.bf16 %v2825_v24, %v2823_v23 }
 0x25f   : > { %v2481_v28 = vadd.f32 %v2480_v62, %v2391_v26 }
 0x260   : > { %v2600_v30 = vunpack.c.l.bf16 %v2552_v25  ;;  %v2601_v63 = vunpack.c.h.bf16 %v2552_v25 }
 0x262   : > { %v2666_v43 = vadd.f32 %v11441_v22, %v2600_v30  ;;  %v2667_v6 = vadd.f32 %v11443_v16, %v2601_v63 }
 0x263   : > { %v2213_v33 = vpop.f32.mrf.mxu2  ;;  %v2302_v35 = vpop.f32.mrf.mxu3 }
 0x264   : > { %v2303_v34 = vadd.f32 %v2302_v35, %v2213_v33  ;;  %v2826_v41 = vmax.f32 %v2666_v43, 0.0  ;;  %v2827_v21 = vmax.f32 %v2667_v6, 0.0  ;;  %v9521_v6 = vld [vmem:[#allocation2 + $0x218] sm:$0xf0] }
 0x265   : > { %v9524_v31 = vor.u32 %v10496_v50, %v9521_v6 }
 0x266   : > { %v2553_v44 = vpack.c.bf16 %v2481_v28, %v2303_v34  ;;  %v2394_v5 = vpop.f32.mrf.mxu0  ;;  %v2483_v39 = vpop.f32.mrf.mxu1 }
 0x267   : > { %v2484_v4 = vadd.f32 %v2483_v39, %v2394_v5  ;;  %3291 = vmatpush.bf16.msrb.mxu0 %v9524_v31  ;;  %v9637_v31 = vld [vmem:[%s13088_s4 + $0x4] sm:$0x3] }
 0x268   : > { %v2602_v42 = vunpack.c.l.bf16 %v2553_v44  ;;  %v2603_v2 = vunpack.c.h.bf16 %v2553_v44  ;;  %2255 = vmatmul.bf16.gmra.mxu2 %v11389_v19  ;;  %2344 = vmatmul.bf16.gmra.mxu3 %v11391_v57  ;;  %3498 = vst [vmem:[#allocation1] ss:$9 sm:$0xff] %v9637_v31  ;;  %v9762_v31 = vld [vmem:[#allocation2 + $0x3f8] sm:$0xf0] }
 0x269   : > { %2433 = vmatmul.bf16.gmra.mxu0 %v11389_v19  ;;  %2522 = vmatmul.bf16.gmra.mxu1 %v11391_v57 }
 0x26a   : > { %v2668_v59 = vadd.f32 %v11441_v22, %v2602_v42  ;;  %v2669_v11 = vadd.f32 %v11443_v16, %v2603_v2 }
 0x26b   : > { %v2216_v38 = vpop.f32.mrf.mxu2  ;;  %v2305_v40 = vpop.f32.mrf.mxu3 }
 0x26c   : > { %v2306_v14 = vadd.f32 %v2305_v40, %v2216_v38  ;;  %v2828_v15 = vmax.f32 %v2668_v59, 0.0  ;;  %v2829_v48 = vmax.f32 %v2669_v11, 0.0 }
 0x26e   : > { %v2554_v0 = vpack.c.bf16 %v2484_v4, %v2306_v14  ;;  %v2396_v3 = vpop.f32.mrf.mxu0  ;;  %v2485_v49 = vpop.f32.mrf.mxu1  ;;  %v11477_v9 = vpack.c.bf16 %v2828_v15, %v2826_v41  ;;  %v11479_v19 = vpack.c.bf16 %v2829_v48, %v2827_v21 }
 0x26f   : > { %v2486_v57 = vadd.f32 %v2485_v49, %v2396_v3 }
 0x270   : > { %v2604_v47 = vunpack.c.l.bf16 %v2554_v0  ;;  %v2605_v7 = vunpack.c.h.bf16 %v2554_v0 }
 0x272   : > { %v2670_v25 = vadd.f32 %v11441_v22, %v2604_v47  ;;  %v2671_v28 = vadd.f32 %v11443_v16, %v2605_v7 }
 0x273   : > { %v2218_v52 = vpop.f32.mrf.mxu2  ;;  %v2307_v55 = vpop.f32.mrf.mxu3 }
 0x274   : > { %v2308_v18 = vadd.f32 %v2307_v55, %v2218_v52  ;;  %v2830_v34 = vmax.f32 %v2670_v25, 0.0  ;;  %v2831_v39 = vmax.f32 %v2671_v28, 0.0 }
 0x276   : > { %v2555_v54 = vpack.c.bf16 %v2486_v57, %v2308_v18  ;;  %v2399_v1 = vpop.f32.mrf.mxu0  ;;  %v2488_v23 = vpop.f32.mrf.mxu1  ;;  %v9575_v57 = vld [vmem:[#allocation2 + $0x280] sm:$0xf] }
 0x277   : > { %v2489_v24 = vadd.f32 %v2488_v23, %v2399_v1  ;;  %v9576_v58 = vor.u32 %v10511_v20, %v9575_v57 }
 0x278   : > { %v2606_v26 = vunpack.c.l.bf16 %v2555_v54  ;;  %v2607_v62 = vunpack.c.h.bf16 %v2555_v54  ;;  %2260 = vmatmul.bf16.gmra.mxu2 %v11401_v46  ;;  %2349 = vmatmul.bf16.gmra.mxu3 %v11403_v8 }
 0x279   : > { %2438 = vmatmul.bf16.gmra.mxu0 %v11401_v46  ;;  %2527 = vmatmul.bf16.gmra.mxu1 %v11403_v8 }
 0x27a   : > { %v2672_v30 = vadd.f32 %v11441_v22, %v2606_v26  ;;  %v2673_v33 = vadd.f32 %v11443_v16, %v2607_v62  ;;  %3203 = vmatpush.bf16.msrb.mxu3 %v9576_v58 }
 0x27b   : > { %v2221_v35 = vpop.f32.mrf.mxu2  ;;  %v2310_v63 = vpop.f32.mrf.mxu3 }
 0x27c   : > { %v2311_v44 = vadd.f32 %v2310_v63, %v2221_v35  ;;  %v2832_v5 = vmax.f32 %v2672_v30, 0.0  ;;  %v2833_v4 = vmax.f32 %v2673_v33, 0.0  ;;  %v10494_v63 = vld [vmem:[#allocation2 + $0x204] sm:$0xf] }
 0x27e   : > { %v2556_v43 = vpack.c.bf16 %v2489_v24, %v2311_v44  ;;  %v2401_v42 = vpop.f32.mrf.mxu0  ;;  %v2490_v46 = vpop.f32.mrf.mxu1  ;;  %v11489_v2 = vpack.c.bf16 %v2832_v5, %v2830_v34  ;;  %v11491_v8 = vpack.c.bf16 %v2833_v4, %v2831_v39  ;;  %v9513_v34 = vld [vmem:[#allocation2 + $0x208] sm:$0xf0] }
 0x27f   : > { %v2491_v61 = vadd.f32 %v2490_v46, %v2401_v42  ;;  %v9516_v39 = vor.u32 %v10494_v63, %v9513_v34 }
 0x280   : > { %v2608_v59 = vunpack.c.l.bf16 %v2556_v43  ;;  %v2609_v40 = vunpack.c.h.bf16 %v2556_v43 }
 0x281   : > { %3292 = vmatpush.bf16.msrb.mxu0 %v9516_v39 }
 0x282   : > { %v2674_v0 = vadd.f32 %v11441_v22, %v2608_v59  ;;  %v2675_v37 = vadd.f32 %v11443_v16, %v2609_v40 }
 0x283   : > { %v2223_v11 = vpop.f32.mrf.mxu2  ;;  %v2312_v38 = vpop.f32.mrf.mxu3 }
 0x284   : > { %v2313_v41 = vadd.f32 %v2312_v38, %v2223_v11  ;;  %v2834_v18 = vmax.f32 %v2674_v0, 0.0  ;;  %v2835_v23 = vmax.f32 %v2675_v37, 0.0  ;;  %v9696_v11 = vld [vmem:[#allocation2 + $0x370] sm:$0xf]  ;;  %v10541_v38 = vld [vmem:[#allocation2 + $0x374] sm:$0xf0] }
 0x285   : > { %v9697_v40 = vor.u32 %v10541_v38, %v9696_v11 }
 0x286   : > { %v2557_v14 = vpack.c.bf16 %v2491_v61, %v2313_v41  ;;  %v2404_v15 = vpop.f32.mrf.mxu0  ;;  %v2493_v21 = vpop.f32.mrf.mxu1 }
 0x287   : > { %v2494_v48 = vadd.f32 %v2493_v21, %v2404_v15  ;;  %4022 = vmatpush.bf16.msra.mxu2 %v9697_v40 }
 0x288   : > { %v2610_v3 = vunpack.c.l.bf16 %v2557_v14  ;;  %v2611_v49 = vunpack.c.h.bf16 %v2557_v14  ;;  %2265 = vmatmul.bf16.gmra.mxu2 %v11413_v53  ;;  %2354 = vmatmul.bf16.gmra.mxu3 %v11415_v45 }
 0x289   : > { %2443 = vmatmul.bf16.gmra.mxu0 %v11413_v53  ;;  %2532 = vmatmul.bf16.gmra.mxu1 %v11415_v45 }
 0x28a   : > { %v2676_v47 = vadd.f32 %v11441_v22, %v2610_v3  ;;  %v2677_v52 = vadd.f32 %v11443_v16, %v2611_v49 }
 0x28b   : > { %v2226_v55 = vpop.f32.mrf.mxu2  ;;  %v2315_v7 = vpop.f32.mrf.mxu3 }
 0x28c   : > { %v2316_v54 = vadd.f32 %v2315_v7, %v2226_v55  ;;  %v2836_v1 = vmax.f32 %v2676_v47, 0.0  ;;  %v2837_v24 = vmax.f32 %v2677_v52, 0.0 }
 0x28e   : > { %v2558_v25 = vpack.c.bf16 %v2494_v48, %v2316_v54  ;;  %v2406_v26 = vpop.f32.mrf.mxu0  ;;  %v2495_v62 = vpop.f32.mrf.mxu1  ;;  %v11501_v28 = vpack.c.bf16 %v2836_v1, %v2834_v18  ;;  %v11503_v53 = vpack.c.bf16 %v2837_v24, %v2835_v23 }
 0x28f   : > { %v2496_v45 = vadd.f32 %v2495_v62, %v2406_v26 }
 0x290   : > { %v2612_v30 = vunpack.c.l.bf16 %v2558_v25  ;;  %v2613_v44 = vunpack.c.h.bf16 %v2558_v25 }
 0x292   : > { %v2678_v61 = vadd.f32 %v11441_v22, %v2612_v30  ;;  %v2679_v59 = vadd.f32 %v11443_v16, %v2613_v44  ;;  %v9761_v30 = vor.u32 %v10557_v29, %v9760_v12  ;;  %v10540_v29 = vld [vmem:[#allocation2 + $0x374] sm:$0xf] }
 0x293   : > { %v2228_v33 = vpop.f32.mrf.mxu2  ;;  %v2317_v35 = vpop.f32.mrf.mxu3 }
 0x294   : > { %v2318_v5 = vadd.f32 %v2317_v35, %v2228_v33  ;;  %v2838_v48 = vmax.f32 %v2678_v61, 0.0  ;;  %v2839_v49 = vmax.f32 %v2679_v59, 0.0  ;;  %4111 = vmatpush.bf16.msra.mxu3 %v9761_v30 }
 0x296   : > { %v2559_v4 = vpack.c.bf16 %v2496_v45, %v2318_v5  ;;  %v2409_v43 = vpop.f32.mrf.mxu0  ;;  %v2498_v42 = vpop.f32.mrf.mxu1 }
 0x297   : > { %v2499_v46 = vadd.f32 %v2498_v42, %v2409_v43 }
 0x298   : > { %v2614_v50 = vunpack.c.l.bf16 %v2559_v4  ;;  %v2615_v6 = vunpack.c.h.bf16 %v2559_v4  ;;  %2270 = vmatmul.bf16.gmra.mxu2 %v11425_v56  ;;  %2359 = vmatmul.bf16.gmra.mxu3 %v11427_v32 }
 0x299   : > { %2448 = vmatmul.bf16.gmra.mxu0 %v11425_v56  ;;  %2537 = vmatmul.bf16.gmra.mxu1 %v11427_v32 }
 0x29a   : > { %v2680_v41 = vadd.f32 %v11441_v22, %v2614_v50  ;;  %v2681_v14 = vadd.f32 %v11443_v16, %v2615_v6  ;;  %v10556_v6 = vld [vmem:[#allocation2 + $0x3f4] sm:$0xf] }
 0x29b   : > { %v2231_v15 = vpop.f32.mrf.mxu2  ;;  %v2320_v21 = vpop.f32.mrf.mxu3  ;;  %v9765_v59 = vor.u32 %v10556_v6, %v9762_v31  ;;  %v10555_v6 = vld [vmem:[#allocation2 + $0x3e4] sm:$0xf0] }
 0x29c   : > { %v2321_v0 = vadd.f32 %v2320_v21, %v2231_v15  ;;  %v2840_v3 = vmax.f32 %v2680_v41, 0.0  ;;  %v2841_v57 = vmax.f32 %v2681_v14, 0.0 }
 0x29d   : > { %4289 = vmatpush.bf16.msra.mxu1 %v9765_v59 }
 0x29e   : > { %v2560_v20 = vpack.c.bf16 %v2499_v46, %v2321_v0  ;;  %v2411_v56 = vpop.f32.mrf.mxu0  ;;  %v2500_v37 = vpop.f32.mrf.mxu1  ;;  %v11516_v32 = vpack.c.bf16 %v2840_v3, %v2838_v48  ;;  %v11518_v58 = vpack.c.bf16 %v2841_v57, %v2839_v49 }
 0x29f   : > { %v2501_v47 = vadd.f32 %v2500_v37, %v2411_v56  ;;  %v9688_v56 = vld [vmem:[#allocation2 + $0x360] sm:$0xf]  ;;  %v10539_v37 = vld [vmem:[#allocation2 + $0x364] sm:$0xf0] }
 0x2a0   : > { %v2616_v52 = vunpack.c.l.bf16 %v2560_v20  ;;  %v2617_v18 = vunpack.c.h.bf16 %v2560_v20 }
 0x2a2   : > { %v2682_v26 = vadd.f32 %v11441_v22, %v2616_v52  ;;  %v2683_v13 = vadd.f32 %v11443_v16, %v2617_v18 }
 0x2a3   : > { %v2233_v55 = vpop.f32.mrf.mxu2  ;;  %v2322_v7 = vpop.f32.mrf.mxu3 }
 0x2a4   : > { %v2323_v54 = vadd.f32 %v2322_v7, %v2233_v55  ;;  %v2842_v44 = vmax.f32 %v2682_v26, 0.0  ;;  %v2843_v4 = vmax.f32 %v2683_v13, 0.0  ;;  %v9698_v13 = vld [vmem:[#allocation2 + $0x378] sm:$0xf0] }
 0x2a5   : > { %v9701_v30 = vor.u32 %v10540_v29, %v9698_v13  ;;  %v9680_v29 = vld [vmem:[#allocation2 + $0x350] sm:$0xf]  ;;  %v10537_v13 = vld [vmem:[#allocation2 + $0x354] sm:$0xf0] }
 0x2a6   : > { %v2561_v1 = vpack.c.bf16 %v2501_v47, %v2323_v54  ;;  %v2414_v23 = vpop.f32.mrf.mxu0  ;;  %v2503_v24 = vpop.f32.mrf.mxu1  ;;  %v9689_v47 = vor.u32 %v10539_v37, %v9688_v56  ;;  %v10554_v56 = vld [vmem:[#allocation2 + $0x3e4] sm:$0xf]  ;;  %v9754_v37 = vld [vmem:[#allocation2 + $0x3e8] sm:$0xf0] }
 0x2a7   : > { %v2504_v25 = vadd.f32 %v2503_v24, %v2414_v23  ;;  %4200 = vmatpush.bf16.msra.mxu0 %v9701_v30  ;;  %v9681_v30 = vor.u32 %v10537_v13, %v9680_v29  ;;  %v10552_v29 = vld [vmem:[#allocation2 + $0x3d4] sm:$0xf]  ;;  %v9746_v13 = vld [vmem:[#allocation2 + $0x3d8] sm:$0xf0] }
 0x2a8   : > { %v2618_v62 = vunpack.c.l.bf16 %v2561_v1  ;;  %v2619_v45 = vunpack.c.h.bf16 %v2561_v1  ;;  %2275 = vmatmul.bf16.gmra.mxu2 %v11437_v51  ;;  %2364 = vmatmul.bf16.gmra.mxu3 %v11439_v17 }
 0x2a9   : > { %2453 = vmatmul.bf16.gmra.mxu0 %v11437_v51  ;;  %2542 = vmatmul.bf16.gmra.mxu1 %v11439_v17 }
 0x2aa   : > { %v2684_v33 = vadd.f32 %v11441_v22, %v2618_v62  ;;  %v2685_v35 = vadd.f32 %v11443_v16, %v2619_v45  ;;  %4023 = vmatpush.bf16.msra.mxu2 %v9689_v47  ;;  %v9757_v47 = vor.u32 %v10554_v56, %v9754_v37  ;;  %v10553_v56 = vld [vmem:[#allocation2 + $0x3d4] sm:$0xf0] }
 0x2ab   : > { %v2236_v63 = vpop.f32.mrf.mxu2  ;;  %v2325_v34 = vpop.f32.mrf.mxu3 }
 0x2ac   : > { %v2326_v5 = vadd.f32 %v2325_v34, %v2236_v63  ;;  %v2844_v39 = vmax.f32 %v2684_v33, 0.0  ;;  %v2845_v43 = vmax.f32 %v2685_v35, 0.0  ;;  %4290 = vmatpush.bf16.msra.mxu1 %v9757_v47 }
 0x2ae   : > { %v2562_v42 = vpack.c.bf16 %v2504_v25, %v2326_v5  ;;  %v2416_v46 = vpop.f32.mrf.mxu0  ;;  %v2505_v61 = vpop.f32.mrf.mxu1  ;;  %v11528_v50 = vpack.c.bf16 %v2844_v39, %v2842_v44  ;;  %v11530_v51 = vpack.c.bf16 %v2845_v43, %v2843_v4  ;;  %4024 = vmatpush.bf16.msra.mxu2 %v9681_v30  ;;  %v9749_v30 = vor.u32 %v10552_v29, %v9746_v13  ;;  %v10551_v29 = vld [vmem:[#allocation2 + $0x3c4] sm:$0xf0] }
 0x2af   : > { %v2506_v17 = vadd.f32 %v2505_v61, %v2416_v46 }
 0x2b0   : > { %v2620_v11 = vunpack.c.l.bf16 %v2562_v42  ;;  %v2621_v41 = vunpack.c.h.bf16 %v2562_v42  ;;  %4291 = vmatpush.bf16.msra.mxu1 %v9749_v30 }
 0x2b2   : > { %v2686_v3 = vadd.f32 %v11441_v22, %v2620_v11  ;;  %v2687_v20 = vadd.f32 %v11443_v16, %v2621_v41 }
 0x2b3   : > { %v2238_v38 = vpop.f32.mrf.mxu2  ;;  %v2327_v40 = vpop.f32.mrf.mxu3 }
 0x2b4   : > { %v2328_v14 = vadd.f32 %v2327_v40, %v2238_v38  ;;  %v2846_v54 = vmax.f32 %v2686_v3, 0.0  ;;  %v2847_v24 = vmax.f32 %v2687_v20, 0.0 }
 0x2b6   : > { %v2563_v15 = vpack.c.bf16 %v2506_v17, %v2328_v14  ;;  %v2419_v21 = vpop.f32.mrf.mxu0  ;;  %v2508_v48 = vpop.f32.mrf.mxu1  ;;  %v9752_v17 = vld [vmem:[#allocation2 + $0x3e0] sm:$0xf] }
 0x2b7   : > { %v2509_v0 = vadd.f32 %v2508_v48, %v2419_v21  ;;  %v9753_v59 = vor.u32 %v10555_v6, %v9752_v17  ;;  %v10538_v6 = vld [vmem:[#allocation2 + $0x364] sm:$0xf] }
 0x2b8   : > { %v2622_v49 = vunpack.c.l.bf16 %v2563_v15  ;;  %v2623_v57 = vunpack.c.h.bf16 %v2563_v15  ;;  %3115 = vmatmul.bf16.vlgmr.msrb.gmra.mxu2 %v11453_v36  ;;  %3204 = vmatmul.bf16.vlgmr.msrb.gmra.mxu3 %v11455_v10 }
 0x2b9   : > { %3293 = vmatmul.bf16.vlgmr.msrb.gmra.mxu0 %v11453_v36  ;;  %3382 = vmatmul.bf16.vlgmr.msrb.gmra.mxu1 %v11455_v10 }
 0x2ba   : > { %v2688_v52 = vadd.f32 %v11441_v22, %v2622_v49  ;;  %v2689_v55 = vadd.f32 %v11443_v16, %v2623_v57  ;;  %4112 = vmatpush.bf16.msra.mxu3 %v9753_v59 }
 0x2bb   : > { %v2241_v7 = vpop.f32.mrf.mxu2  ;;  %v2330_v18 = vpop.f32.mrf.mxu3 }
 0x2bc   : > { %v2331_v1 = vadd.f32 %v2330_v18, %v2241_v7  ;;  %v2848_v23 = vmax.f32 %v2688_v52, 0.0  ;;  %v2849_v25 = vmax.f32 %v2689_v55, 0.0 }
 0x2be   : > { %v2564_v26 = vpack.c.bf16 %v2509_v0, %v2331_v1  ;;  %v2421_v62 = vpop.f32.mrf.mxu0  ;;  %v2510_v36 = vpop.f32.mrf.mxu1  ;;  %v11540_v45 = vpack.c.bf16 %v2848_v23, %v2846_v54  ;;  %v11542_v10 = vpack.c.bf16 %v2849_v25, %v2847_v24 }
 0x2bf   : > { %v2511_v12 = vadd.f32 %v2510_v36, %v2421_v62 }
 0x2c0   : > { %v2624_v33 = vunpack.c.l.bf16 %v2564_v26  ;;  %v2625_v34 = vunpack.c.h.bf16 %v2564_v26 }
 0x2c2   : > { %v2690_v42 = vadd.f32 %v11441_v22, %v2624_v33  ;;  %v2691_v31 = vadd.f32 %v11443_v16, %v2625_v34 }
 0x2c3   : > { %v2243_v35 = vpop.f32.mrf.mxu2  ;;  %v2332_v63 = vpop.f32.mrf.mxu3 }
 0x2c4   : > { %v2333_v44 = vadd.f32 %v2332_v63, %v2243_v35  ;;  %v2850_v14 = vmax.f32 %v2690_v42, 0.0  ;;  %v2851_v48 = vmax.f32 %v2691_v31, 0.0  ;;  %v9690_v31 = vld [vmem:[#allocation2 + $0x368] sm:$0xf0] }
 0x2c5   : > { %v9693_v59 = vor.u32 %v10538_v6, %v9690_v31  ;;  %v9672_v6 = vld [vmem:[#allocation2 + $0x340] sm:$0xf]  ;;  %v10535_v31 = vld [vmem:[#allocation2 + $0x344] sm:$0xf0] }
 0x2c6   : > { %v2565_v5 = vpack.c.bf16 %v2511_v12, %v2333_v44  ;;  %v2424_v39 = vpop.f32.mrf.mxu0  ;;  %v2513_v4 = vpop.f32.mrf.mxu1 }
 0x2c7   : > { %v2514_v43 = vadd.f32 %v2513_v4, %v2424_v39  ;;  %4201 = vmatpush.bf16.msra.mxu0 %v9693_v59  ;;  %v9673_v59 = vor.u32 %v10535_v31, %v9672_v6  ;;  %v10550_v6 = vld [vmem:[#allocation2 + $0x3c4] sm:$0xf]  ;;  %v9738_v31 = vld [vmem:[#allocation2 + $0x3c8] sm:$0xf0] }
 0x2c8   : > { %v2626_v46 = vunpack.c.l.bf16 %v2565_v5  ;;  %v2627_v61 = vunpack.c.h.bf16 %v2565_v5  ;;  %3120 = vmatmul.bf16.gmra.mxu2 %v11465_v27  ;;  %3209 = vmatmul.bf16.gmra.mxu3 %v11467_v60 }
 0x2c9   : > { %3298 = vmatmul.bf16.gmra.mxu0 %v11465_v27  ;;  %3387 = vmatmul.bf16.gmra.mxu1 %v11467_v60 }
 0x2ca   : > { %v2692_v11 = vadd.f32 %v11441_v22, %v2626_v46  ;;  %v2693_v38 = vadd.f32 %v11443_v16, %v2627_v61  ;;  %4025 = vmatpush.bf16.msra.mxu2 %v9673_v59  ;;  %v9741_v59 = vor.u32 %v10550_v6, %v9738_v31 }
 0x2cb   : > { %v2246_v40 = vpop.f32.mrf.mxu2  ;;  %v2335_v41 = vpop.f32.mrf.mxu3 }
 0x2cc   : > { %v2336_v15 = vadd.f32 %v2335_v41, %v2246_v40  ;;  %v2852_v21 = vmax.f32 %v2692_v11, 0.0  ;;  %v2853_v0 = vmax.f32 %v2693_v38, 0.0  ;;  %4292 = vmatpush.bf16.msra.mxu1 %v9741_v59 }
 0x2ce   : > { %v2566_v3 = vpack.c.bf16 %v2514_v43, %v2336_v15  ;;  %v2426_v49 = vpop.f32.mrf.mxu0  ;;  %v2515_v57 = vpop.f32.mrf.mxu1  ;;  %v11552_v20 = vpack.c.bf16 %v2852_v21, %v2850_v14  ;;  %v11554_v27 = vpack.c.bf16 %v2853_v0, %v2851_v48 }
 0x2cf   : > { %v2516_v60 = vadd.f32 %v2515_v57, %v2426_v49 }
 0x2d0   : > { %v2628_v52 = vunpack.c.l.bf16 %v2566_v3  ;;  %v2629_v18 = vunpack.c.h.bf16 %v2566_v3 }
 0x2d2   : > { %v2694_v26 = vadd.f32 %v11441_v22, %v2628_v52  ;;  %v2695_v12 = vadd.f32 %v11443_v16, %v2629_v18 }
 0x2d3   : > { %v2248_v55 = vpop.f32.mrf.mxu2  ;;  %v2337_v7 = vpop.f32.mrf.mxu3 }
 0x2d4   : > { %v2338_v54 = vadd.f32 %v2337_v7, %v2248_v55  ;;  %v2854_v44 = vmax.f32 %v2694_v26, 0.0  ;;  %v2855_v4 = vmax.f32 %v2695_v12, 0.0 }
 0x2d6   : > { %v2567_v1 = vpack.c.bf16 %v2516_v60, %v2338_v54  ;;  %v2429_v23 = vpop.f32.mrf.mxu0  ;;  %v2518_v24 = vpop.f32.mrf.mxu1  ;;  %v9744_v60 = vld [vmem:[#allocation2 + $0x3d0] sm:$0xf] }
 0x2d7   : > { %v2519_v25 = vadd.f32 %v2518_v24, %v2429_v23  ;;  %v9745_v47 = vor.u32 %v10553_v56, %v9744_v60  ;;  %v10536_v56 = vld [vmem:[#allocation2 + $0x354] sm:$0xf] }
 0x2d8   : > { %v2630_v62 = vunpack.c.l.bf16 %v2567_v1  ;;  %v2631_v36 = vunpack.c.h.bf16 %v2567_v1  ;;  %3125 = vmatmul.bf16.gmra.mxu2 %v11477_v9  ;;  %3214 = vmatmul.bf16.gmra.mxu3 %v11479_v19 }
 0x2d9   : > { %3303 = vmatmul.bf16.gmra.mxu0 %v11477_v9  ;;  %3392 = vmatmul.bf16.gmra.mxu1 %v11479_v19 }
 0x2da   : > { %v2696_v33 = vadd.f32 %v11441_v22, %v2630_v62  ;;  %v2697_v35 = vadd.f32 %v11443_v16, %v2631_v36  ;;  %4113 = vmatpush.bf16.msra.mxu3 %v9745_v47 }
 0x2db   : > { %v2251_v63 = vpop.f32.mrf.mxu2  ;;  %v2340_v34 = vpop.f32.mrf.mxu3 }
 0x2dc   : > { %v2341_v5 = vadd.f32 %v2340_v34, %v2251_v63  ;;  %v2856_v39 = vmax.f32 %v2696_v33, 0.0  ;;  %v2857_v43 = vmax.f32 %v2697_v35, 0.0 }
 0x2de   : > { %v2568_v42 = vpack.c.bf16 %v2519_v25, %v2341_v5  ;;  %v2431_v46 = vpop.f32.mrf.mxu0  ;;  %v2520_v9 = vpop.f32.mrf.mxu1  ;;  %v11564_v61 = vpack.c.bf16 %v2856_v39, %v2854_v44  ;;  %v11566_v19 = vpack.c.bf16 %v2857_v43, %v2855_v4 }
 0x2df   : > { %v2521_v17 = vadd.f32 %v2520_v9, %v2431_v46 }
 0x2e0   : > { %v2632_v11 = vunpack.c.l.bf16 %v2568_v42  ;;  %v2633_v41 = vunpack.c.h.bf16 %v2568_v42 }
 0x2e2   : > { %v2698_v3 = vadd.f32 %v11441_v22, %v2632_v11  ;;  %v2699_v37 = vadd.f32 %v11443_v16, %v2633_v41 }
 0x2e3   : > { %v2253_v38 = vpop.f32.mrf.mxu2  ;;  %v2342_v40 = vpop.f32.mrf.mxu3 }
 0x2e4   : > { %v2343_v14 = vadd.f32 %v2342_v40, %v2253_v38  ;;  %v2858_v54 = vmax.f32 %v2698_v3, 0.0  ;;  %v2859_v24 = vmax.f32 %v2699_v37, 0.0  ;;  %v9682_v37 = vld [vmem:[#allocation2 + $0x358] sm:$0xf0] }
 0x2e5   : > { %v9685_v47 = vor.u32 %v10536_v56, %v9682_v37  ;;  %v9664_v56 = vld [vmem:[#allocation2 + $0x330] sm:$0xf]  ;;  %v10533_v37 = vld [vmem:[#allocation2 + $0x334] sm:$0xf0] }
 0x2e6   : > { %v2569_v15 = vpack.c.bf16 %v2521_v17, %v2343_v14  ;;  %v2434_v21 = vpop.f32.mrf.mxu0  ;;  %v2523_v48 = vpop.f32.mrf.mxu1 }
 0x2e7   : > { %v2524_v0 = vadd.f32 %v2523_v48, %v2434_v21  ;;  %4202 = vmatpush.bf16.msra.mxu0 %v9685_v47  ;;  %v9665_v47 = vor.u32 %v10533_v37, %v9664_v56  ;;  %v10548_v56 = vld [vmem:[#allocation2 + $0x3b4] sm:$0xf]  ;;  %v9730_v37 = vld [vmem:[#allocation2 + $0x3b8] sm:$0xf0] }
 0x2e8   : > { %v2634_v49 = vunpack.c.l.bf16 %v2569_v15  ;;  %v2635_v57 = vunpack.c.h.bf16 %v2569_v15  ;;  %3130 = vmatmul.bf16.gmra.mxu2 %v11489_v2  ;;  %3219 = vmatmul.bf16.gmra.mxu3 %v11491_v8 }
 0x2e9   : > { %3308 = vmatmul.bf16.gmra.mxu0 %v11489_v2  ;;  %3397 = vmatmul.bf16.gmra.mxu1 %v11491_v8 }
 0x2ea   : > { %v2700_v52 = vadd.f32 %v11441_v22, %v2634_v49  ;;  %v2701_v55 = vadd.f32 %v11443_v16, %v2635_v57  ;;  %4026 = vmatpush.bf16.msra.mxu2 %v9665_v47  ;;  %v9733_v47 = vor.u32 %v10548_v56, %v9730_v37 }
 0x2eb   : > { %v2256_v7 = vpop.f32.mrf.mxu2  ;;  %v2345_v18 = vpop.f32.mrf.mxu3 }
 0x2ec   : > { %v2346_v1 = vadd.f32 %v2345_v18, %v2256_v7  ;;  %v2860_v23 = vmax.f32 %v2700_v52, 0.0  ;;  %v2861_v25 = vmax.f32 %v2701_v55, 0.0  ;;  %4293 = vmatpush.bf16.msra.mxu1 %v9733_v47 }
 0x2ee   : > { %v2570_v26 = vpack.c.bf16 %v2524_v0, %v2346_v1  ;;  %v2436_v62 = vpop.f32.mrf.mxu0  ;;  %v2525_v36 = vpop.f32.mrf.mxu1  ;;  %v11576_v12 = vpack.c.bf16 %v2860_v23, %v2858_v54  ;;  %v11578_v2 = vpack.c.bf16 %v2861_v25, %v2859_v24 }
 0x2ef   : > { %v2526_v8 = vadd.f32 %v2525_v36, %v2436_v62 }
 0x2f0   : > { %v2636_v33 = vunpack.c.l.bf16 %v2570_v26  ;;  %v2637_v34 = vunpack.c.h.bf16 %v2570_v26 }
 0x2f2   : > { %v2702_v42 = vadd.f32 %v11441_v22, %v2636_v33  ;;  %v2703_v17 = vadd.f32 %v11443_v16, %v2637_v34 }
 0x2f3   : > { %v2258_v35 = vpop.f32.mrf.mxu2  ;;  %v2347_v63 = vpop.f32.mrf.mxu3 }
 0x2f4   : > { %v2348_v44 = vadd.f32 %v2347_v63, %v2258_v35  ;;  %v2862_v14 = vmax.f32 %v2702_v42, 0.0  ;;  %v2863_v48 = vmax.f32 %v2703_v17, 0.0 }
 0x2f6   : > { %v2571_v5 = vpack.c.bf16 %v2526_v8, %v2348_v44  ;;  %v2439_v39 = vpop.f32.mrf.mxu0  ;;  %v2528_v4 = vpop.f32.mrf.mxu1  ;;  %v9736_v8 = vld [vmem:[#allocation2 + $0x3c0] sm:$0xf] }
 0x2f7   : > { %v2529_v43 = vadd.f32 %v2528_v4, %v2439_v39  ;;  %v9737_v30 = vor.u32 %v10551_v29, %v9736_v8 }
 0x2f8   : > { %v2638_v46 = vunpack.c.l.bf16 %v2571_v5  ;;  %v2639_v9 = vunpack.c.h.bf16 %v2571_v5  ;;  %3135 = vmatmul.bf16.gmra.mxu2 %v11501_v28  ;;  %3224 = vmatmul.bf16.gmra.mxu3 %v11503_v53 }
 0x2f9   : > { %3313 = vmatmul.bf16.gmra.mxu0 %v11501_v28  ;;  %3402 = vmatmul.bf16.gmra.mxu1 %v11503_v53 }
 0x2fa   : > { %v2704_v11 = vadd.f32 %v11441_v22, %v2638_v46  ;;  %v2705_v38 = vadd.f32 %v11443_v16, %v2639_v9  ;;  %4114 = vmatpush.bf16.msra.mxu3 %v9737_v30 }
 0x2fb   : > { %v2261_v40 = vpop.f32.mrf.mxu2  ;;  %v2350_v41 = vpop.f32.mrf.mxu3 }
 0x2fc   : > { %v2351_v15 = vadd.f32 %v2350_v41, %v2261_v40  ;;  %v2864_v21 = vmax.f32 %v2704_v11, 0.0  ;;  %v2865_v0 = vmax.f32 %v2705_v38, 0.0 }
 0x2fe   : > { %v2572_v3 = vpack.c.bf16 %v2529_v43, %v2351_v15  ;;  %v2441_v49 = vpop.f32.mrf.mxu0  ;;  %v2530_v28 = vpop.f32.mrf.mxu1  ;;  %v11588_v57 = vpack.c.bf16 %v2864_v21, %v2862_v14  ;;  %v11590_v53 = vpack.c.bf16 %v2865_v0, %v2863_v48 }
 0x2ff   : > { %v2531_v60 = vadd.f32 %v2530_v28, %v2441_v49 }
 0x300   : > { %v2640_v52 = vunpack.c.l.bf16 %v2572_v3  ;;  %v2641_v18 = vunpack.c.h.bf16 %v2572_v3 }
 0x302   : > { %v2706_v26 = vadd.f32 %v11441_v22, %v2640_v52  ;;  %v2707_v13 = vadd.f32 %v11443_v16, %v2641_v18 }
 0x303   : > { %v2263_v55 = vpop.f32.mrf.mxu2  ;;  %v2352_v7 = vpop.f32.mrf.mxu3 }
 0x304   : > { %v2353_v54 = vadd.f32 %v2352_v7, %v2263_v55  ;;  %v2866_v44 = vmax.f32 %v2706_v26, 0.0  ;;  %v2867_v4 = vmax.f32 %v2707_v13, 0.0 }
 0x306   : > { %v2573_v1 = vpack.c.bf16 %v2531_v60, %v2353_v54  ;;  %v2444_v23 = vpop.f32.mrf.mxu0  ;;  %v2533_v24 = vpop.f32.mrf.mxu1 }
 0x307   : > { %v2534_v25 = vadd.f32 %v2533_v24, %v2444_v23 }
 0x308   : > { %v2642_v62 = vunpack.c.l.bf16 %v2573_v1  ;;  %v2643_v36 = vunpack.c.h.bf16 %v2573_v1  ;;  %3140 = vmatmul.bf16.gmra.mxu2 %v11516_v32  ;;  %3229 = vmatmul.bf16.gmra.mxu3 %v11518_v58 }
 0x309   : > { %3318 = vmatmul.bf16.gmra.mxu0 %v11516_v32  ;;  %3407 = vmatmul.bf16.gmra.mxu1 %v11518_v58 }
 0x30a   : > { %v2708_v33 = vadd.f32 %v11441_v22, %v2642_v62  ;;  %v2709_v35 = vadd.f32 %v11443_v16, %v2643_v36 }
 0x30b   : > { %v2266_v63 = vpop.f32.mrf.mxu2  ;;  %v2355_v34 = vpop.f32.mrf.mxu3 }
 0x30c   : > { %v2356_v5 = vadd.f32 %v2355_v34, %v2266_v63  ;;  %v2868_v39 = vmax.f32 %v2708_v33, 0.0  ;;  %v2869_v43 = vmax.f32 %v2709_v35, 0.0  ;;  %v10534_v63 = vld [vmem:[#allocation2 + $0x344] sm:$0xf]  ;;  %v9674_v34 = vld [vmem:[#allocation2 + $0x348] sm:$0xf0] }
 0x30e   : > { %v2574_v42 = vpack.c.bf16 %v2534_v25, %v2356_v5  ;;  %v2446_v46 = vpop.f32.mrf.mxu0  ;;  %v2535_v9 = vpop.f32.mrf.mxu1  ;;  %v11600_v17 = vpack.c.bf16 %v2868_v39, %v2866_v44  ;;  %v11602_v32 = vpack.c.bf16 %v2869_v43, %v2867_v4  ;;  %v9677_v44 = vor.u32 %v10534_v63, %v9674_v34 }
 0x30f   : > { %v2536_v58 = vadd.f32 %v2535_v9, %v2446_v46 }
 0x310   : > { %v2644_v11 = vunpack.c.l.bf16 %v2574_v42  ;;  %v2645_v41 = vunpack.c.h.bf16 %v2574_v42  ;;  %4203 = vmatpush.bf16.msra.mxu0 %v9677_v44 }
 0x312   : > { %v2710_v3 = vadd.f32 %v11441_v22, %v2644_v11  ;;  %v2711_v60 = vadd.f32 %v11443_v16, %v2645_v41 }
 0x313   : > { %v2268_v38 = vpop.f32.mrf.mxu2  ;;  %v2357_v40 = vpop.f32.mrf.mxu3 }
 0x314   : > { %v2358_v14 = vadd.f32 %v2357_v40, %v2268_v38  ;;  %v2870_v54 = vmax.f32 %v2710_v3, 0.0  ;;  %v2871_v24 = vmax.f32 %v2711_v60, 0.0  ;;  %v9728_v3 = vld [vmem:[#allocation2 + $0x3b0] sm:$0xf] }
 0x316   : > { %v2575_v15 = vpack.c.bf16 %v2536_v58, %v2358_v14  ;;  %v2449_v21 = vpop.f32.mrf.mxu0  ;;  %v2538_v48 = vpop.f32.mrf.mxu1 }
 0x317   : > { %v2539_v0 = vadd.f32 %v2538_v48, %v2449_v21 }
 0x318   : > { %v2646_v49 = vunpack.c.l.bf16 %v2575_v15  ;;  %v2647_v28 = vunpack.c.h.bf16 %v2575_v15  ;;  %3145 = vmatmul.bf16.gmra.mxu2 %v11528_v50  ;;  %3234 = vmatmul.bf16.gmra.mxu3 %v11530_v51 }
 0x319   : > { %3323 = vmatmul.bf16.gmra.mxu0 %v11528_v50  ;;  %3412 = vmatmul.bf16.gmra.mxu1 %v11530_v51 }
 0x31a   : > { %v2712_v52 = vadd.f32 %v11441_v22, %v2646_v49  ;;  %v2713_v55 = vadd.f32 %v11443_v16, %v2647_v28  ;;  %v10549_v49 = vld [vmem:[#allocation2 + $0x3b4] sm:$0xf0] }
 0x31b   : > { %v2271_v7 = vpop.f32.mrf.mxu2  ;;  %v2360_v18 = vpop.f32.mrf.mxu3  ;;  %v9729_v60 = vor.u32 %v10549_v49, %v9728_v3 }
 0x31c   : > { %v2361_v1 = vadd.f32 %v2360_v18, %v2271_v7  ;;  %v2872_v23 = vmax.f32 %v2712_v52, 0.0  ;;  %v2873_v25 = vmax.f32 %v2713_v55, 0.0 }
 0x31d   : > { %4115 = vmatpush.bf16.msra.mxu3 %v9729_v60 }
 0x31e   : > { %v2576_v26 = vpack.c.bf16 %v2539_v0, %v2361_v1  ;;  %v2451_v62 = vpop.f32.mrf.mxu0  ;;  %v2540_v50 = vpop.f32.mrf.mxu1  ;;  %v11612_v36 = vpack.c.bf16 %v2872_v23, %v2870_v54  ;;  %v11614_v51 = vpack.c.bf16 %v2873_v25, %v2871_v24 }
 0x31f   : > { %v2541_v8 = vadd.f32 %v2540_v50, %v2451_v62 }
 0x320   : > { %v2648_v29 = vunpack.c.l.bf16 %v2576_v26  ;;  %v2649_v33 = vunpack.c.h.bf16 %v2576_v26 }
 0x322   : > { %v2714_v42 = vadd.f32 %v11441_v22, %v2648_v29  ;;  %v2715_v58 = vadd.f32 %v11443_v16, %v2649_v33  ;;  %v3500_v29 = vld [vmem:[#allocation1 + $0x9] sm:$0xff] }
 0x323   : > { %v2273_v13 = vpop.f32.mrf.mxu2  ;;  %v2362_v30 = vpop.f32.mrf.mxu3  ;;  %v10531_v33 = vld [vmem:[#allocation2 + $0x324] sm:$0xf0] }
 0x324   : > { %v2363_v35 = vadd.f32 %v2362_v30, %v2273_v13  ;;  %v2874_v38 = vmax.f32 %v2714_v42, 0.0  ;;  %v2875_v14 = vmax.f32 %v2715_v58, 0.0  ;;  %v9656_v30 = vld [vmem:[#allocation2 + $0x320] sm:$0xf] }
 0x326   : > { %v2577_v5 = vpack.c.bf16 %v2541_v8, %v2363_v35  ;;  %v2454_v39 = vpop.f32.mrf.mxu0  ;;  %v2543_v4 = vpop.f32.mrf.mxu1  ;;  %v3499_v8 = vld [vmem:[#allocation1] sm:$0xff]  ;;  %v9657_v35 = vor.u32 %v10531_v33, %v9656_v30 }
 0x327   : > { %v2544_v43 = vadd.f32 %v2543_v4, %v2454_v39  ;;  %v3501_v39 = vpack.i.b16 %v3499_v8, %v3499_v8  ;;  %v3504_v4 = vpack.i.b16 %v3500_v29, %v3500_v29 }
 0x328   : > { %v2650_v46 = vunpack.c.l.bf16 %v2577_v5  ;;  %v2651_v9 = vunpack.c.h.bf16 %v2577_v5  ;;  %3150 = vmatmul.bf16.gmra.mxu2 %v11540_v45  ;;  %3239 = vmatmul.bf16.gmra.mxu3 %v11542_v10 }
 0x329   : > { %3328 = vmatmul.bf16.gmra.mxu0 %v11540_v45  ;;  %3417 = vmatmul.bf16.gmra.mxu1 %v11542_v10 }
 0x32a   : > { %v2716_v6 = vadd.f32 %v11441_v22, %v2650_v46  ;;  %v2717_v31 = vadd.f32 %v11443_v16, %v2651_v9  ;;  %4027 = vmatpush.bf16.msra.mxu2 %v9657_v35 }
 0x32b   : > { %v2276_v59 = vpop.f32.mrf.mxu2  ;;  %v2365_v11 = vpop.f32.mrf.mxu3 }
 0x32c   : > { %v2366_v40 = vadd.f32 %v2365_v11, %v2276_v59  ;;  %v2876_v41 = vmax.f32 %v2716_v6, 0.0  ;;  %v2877_v15 = vmax.f32 %v2717_v31, 0.0 }
 0x32e   : > { %v2578_v21 = vpack.c.bf16 %v2544_v43, %v2366_v40  ;;  %v2456_v48 = vpop.f32.mrf.mxu0  ;;  %v2545_v0 = vpop.f32.mrf.mxu1  ;;  %v11624_v28 = vpack.c.bf16 %v2876_v41, %v2874_v38  ;;  %v11626_v45 = vpack.c.bf16 %v2877_v15, %v2875_v14  ;;  %v10532_v38 = vld [vmem:[#allocation2 + $0x334] sm:$0xf]  ;;  %v9666_v40 = vld [vmem:[#allocation2 + $0x338] sm:$0xf0] }
 0x32f   : > { %v2546_v10 = vadd.f32 %v2545_v0, %v2456_v48  ;;  %v9669_v41 = vor.u32 %v10532_v38, %v9666_v40  ;;  %v9648_v38 = vld [vmem:[#allocation2 + $0x310] sm:$0xf]  ;;  %v10529_v40 = vld [vmem:[#allocation2 + $0x314] sm:$0xf0] }
 0x330   : > { %v2652_v52 = vunpack.c.l.bf16 %v2578_v21  ;;  %v2653_v18 = vunpack.c.h.bf16 %v2578_v21 }
 0x331   : > { %4204 = vmatpush.bf16.msra.mxu0 %v9669_v41  ;;  %v9649_v41 = vor.u32 %v10529_v40, %v9648_v38  ;;  %v10544_v38 = vld [vmem:[#allocation2 + $0x394] sm:$0xf]  ;;  %v9714_v40 = vld [vmem:[#allocation2 + $0x398] sm:$0xf0] }
 0x332   : > { %v2718_v26 = vadd.f32 %v11441_v22, %v2652_v52  ;;  %v2719_v13 = vadd.f32 %v11443_v16, %v2653_v18  ;;  %v9720_v18 = vld [vmem:[#allocation2 + $0x3a0] sm:$0xf] }
 0x333   : > { %v2278_v55 = vpop.f32.mrf.mxu2  ;;  %v2367_v7 = vpop.f32.mrf.mxu3  ;;  %4028 = vmatpush.bf16.msra.mxu2 %v9649_v41  ;;  %v9717_v41 = vor.u32 %v10544_v38, %v9714_v40  ;;  %v10543_v38 = vld [vmem:[#allocation2 + $0x384] sm:$0xf0] }
 0x334   : > { %v2368_v54 = vadd.f32 %v2367_v7, %v2278_v55  ;;  %v2878_v43 = vmax.f32 %v2718_v26, 0.0  ;;  %v2879_v9 = vmax.f32 %v2719_v13, 0.0 }
 0x336   : > { %v2579_v1 = vpack.c.bf16 %v2546_v10, %v2368_v54  ;;  %v3294_v23 = vpop.f32.mrf.mxu0  ;;  %v3383_v24 = vpop.f32.mrf.mxu1  ;;  %v10547_v54 = vld [vmem:[#allocation2 + $0x3a4] sm:$0xf0] }
 0x337   : > { %v3384_v25 = vadd.f32 %v3383_v24, %v3294_v23 }
 0x338   : > { %v2654_v62 = vunpack.c.l.bf16 %v2579_v1  ;;  %v2655_v50 = vunpack.c.h.bf16 %v2579_v1  ;;  %3155 = vmatmul.bf16.gmra.mxu2 %v11552_v20  ;;  %3244 = vmatmul.bf16.gmra.mxu3 %v11554_v27  ;;  %v9721_v1 = vor.u32 %v10547_v54, %v9720_v18  ;;  %v10530_v18 = vld [vmem:[#allocation2 + $0x324] sm:$0xf]  ;;  %v9658_v54 = vld [vmem:[#allocation2 + $0x328] sm:$0xf0] }
 0x339   : > { %3333 = vmatmul.bf16.gmra.mxu0 %v11552_v20  ;;  %3422 = vmatmul.bf16.gmra.mxu1 %v11554_v27 }
 0x33a   : > { %v2720_v63 = vadd.f32 %v11441_v22, %v2654_v62  ;;  %v2721_v34 = vadd.f32 %v11443_v16, %v2655_v50  ;;  %v3503_v22 = vperm.slane %v3501_v39, 0  ;;  %v3506_v16 = vperm.slane %v3504_v4, 0  ;;  %4116 = vmatpush.bf16.msra.mxu3 %v9721_v1 }
 0x33b   : > { %v3116_v44 = vpop.f32.mrf.mxu2  ;;  %v3205_v5 = vpop.f32.mrf.mxu3  ;;  %v9661_v1 = vor.u32 %v10530_v18, %v9658_v54  ;;  %v9640_v18 = vld [vmem:[#allocation2 + $0x300] sm:$0xf]  ;;  %v10527_v54 = vld [vmem:[#allocation2 + $0x304] sm:$0xf0] }
 0x33c   : > { %v3206_v42 = vadd.f32 %v3205_v5, %v3116_v44  ;;  %v2880_v46 = vmax.f32 %v2720_v63, 0.0  ;;  %v2881_v58 = vmax.f32 %v2721_v34, 0.0  ;;  %v11640_v15 = vunpack.c.l.bf16 %v3503_v22  ;;  %v10546_v34 = vld [vmem:[#allocation2 + $0x3a4] sm:$0xf]  ;;  %v9722_v44 = vld [vmem:[#allocation2 + $0x3a8] sm:$0xf0] }
 0x33d   : > { %v11642_v3 = vunpack.c.l.bf16 %v3506_v16  ;;  %v9725_v5 = vor.u32 %v10546_v34, %v9722_v44  ;;  %4205 = vmatpush.bf16.msra.mxu0 %v9661_v1  ;;  %v10545_v34 = vld [vmem:[#allocation2 + $0x394] sm:$0xf0]  ;;  %v9641_v1 = vor.u32 %v10527_v54, %v9640_v18  ;;  %v10542_v18 = vld [vmem:[#allocation2 + $0x384] sm:$0xf]  ;;  %v9706_v54 = vld [vmem:[#allocation2 + $0x388] sm:$0xf0] }
 0x33e   : > { %v3463_v20 = vpack.c.bf16 %v3384_v25, %v3206_v42  ;;  %v3296_v6 = vpop.f32.mrf.mxu0  ;;  %v3385_v27 = vpop.f32.mrf.mxu1  ;;  %v11636_v31 = vpack.c.bf16 %v2880_v46, %v2878_v43  ;;  %v11638_v59 = vpack.c.bf16 %v2881_v58, %v2879_v9 }
 0x33f   : > { %v3386_v11 = vadd.f32 %v3385_v27, %v3296_v6  ;;  %4294 = vmatpush.bf16.msra.mxu1 %v9725_v5  ;;  %4029 = vmatpush.bf16.msra.mxu2 %v9641_v1  ;;  %v9709_v1 = vor.u32 %v10542_v18, %v9706_v54  ;;  %v10589_v18 = vld [vmem:[#allocation2 + $0x4f4] sm:$0xf0] }
 0x340   : > { %v3507_v14 = vunpack.c.l.bf16 %v3463_v20  ;;  %v3508_v0 = vunpack.c.h.bf16 %v3463_v20 }
 0x342   : > { %v3573_v37 = vadd.f32 %v11640_v15, %v3507_v14  ;;  %v3574_v52 = vadd.f32 %v11642_v3, %v3508_v0 }
 0x343   : > { %v3118_v21 = vpop.f32.mrf.mxu2  ;;  %v3207_v48 = vpop.f32.mrf.mxu3  ;;  %4295 = vmatpush.bf16.msra.mxu1 %v9717_v41 }
 0x344   : > { %v3208_v49 = vadd.f32 %v3207_v48, %v3118_v21  ;;  %v3733_v25 = vmax.f32 %v3573_v37, 0.0  ;;  %v3734_v50 = vmax.f32 %v3574_v52, 0.0 }
 0x346   : > { %v3464_v10 = vpack.c.bf16 %v3386_v11, %v3208_v49  ;;  %v3299_v60 = vpop.f32.mrf.mxu0  ;;  %v3388_v56 = vpop.f32.mrf.mxu1 }
 0x347   : > { %v3389_v47 = vadd.f32 %v3388_v56, %v3299_v60  ;;  %4296 = vmatpush.bf16.msra.mxu1 %v9709_v1 }
 0x348   : > { %v3509_v55 = vunpack.c.l.bf16 %v3464_v10  ;;  %v3510_v7 = vunpack.c.h.bf16 %v3464_v10  ;;  %3160 = vmatmul.bf16.gmra.mxu2 %v11564_v61  ;;  %3249 = vmatmul.bf16.gmra.mxu3 %v11566_v19 }
 0x349   : > { %3338 = vmatmul.bf16.gmra.mxu0 %v11564_v61  ;;  %3427 = vmatmul.bf16.gmra.mxu1 %v11566_v19 }
 0x34a   : > { %v3575_v23 = vadd.f32 %v11640_v15, %v3509_v55  ;;  %v3576_v24 = vadd.f32 %v11642_v3, %v3510_v7 }
 0x34b   : > { %v3121_v26 = vpop.f32.mrf.mxu2  ;;  %v3210_v62 = vpop.f32.mrf.mxu3 }
 0x34c   : > { %v3735_v8 = vmax.f32 %v3575_v23, 0.0  ;;  %v3736_v29 = vmax.f32 %v3576_v24, 0.0  ;;  %v3211_v13 = vadd.f32 %v3210_v62, %v3121_v26 }
 0x34e   : > { %v11652_v30 = vpack.c.bf16 %v3735_v8, %v3733_v25  ;;  %v11654_v33 = vpack.c.bf16 %v3736_v29, %v3734_v50  ;;  %v3465_v61 = vpack.c.bf16 %v3389_v47, %v3211_v13  ;;  %v3301_v35 = vpop.f32.mrf.mxu0  ;;  %v3390_v19 = vpop.f32.mrf.mxu1 }
 0x34f   : > { %v3391_v63 = vadd.f32 %v3390_v19, %v3301_v35 }
 0x350   : > { %v3511_v39 = vunpack.c.l.bf16 %v3465_v61  ;;  %v3512_v42 = vunpack.c.h.bf16 %v3465_v61 }
 0x352   : > { %v3577_v27 = vadd.f32 %v11640_v15, %v3511_v39  ;;  %v3578_v16 = vadd.f32 %v11642_v3, %v3512_v42 }
 0x353   : > { %v3123_v4 = vpop.f32.mrf.mxu2  ;;  %v3212_v43 = vpop.f32.mrf.mxu3 }
 0x354   : > { %v3213_v46 = vadd.f32 %v3212_v43, %v3123_v4  ;;  %v3737_v49 = vmax.f32 %v3577_v27, 0.0  ;;  %v3738_v56 = vmax.f32 %v3578_v16, 0.0 }
 0x356   : > { %v3466_v9 = vpack.c.bf16 %v3391_v63, %v3213_v46  ;;  %v3304_v58 = vpop.f32.mrf.mxu0  ;;  %v3393_v20 = vpop.f32.mrf.mxu1  ;;  %v9712_v63 = vld [vmem:[#allocation2 + $0x390] sm:$0xf] }
 0x357   : > { %v3394_v6 = vadd.f32 %v3393_v20, %v3304_v58  ;;  %v9713_v5 = vor.u32 %v10545_v34, %v9712_v63  ;;  %v10528_v34 = vld [vmem:[#allocation2 + $0x314] sm:$0xf] }
 0x358   : > { %v3513_v22 = vunpack.c.l.bf16 %v3466_v9  ;;  %v3514_v11 = vunpack.c.h.bf16 %v3466_v9  ;;  %3165 = vmatmul.bf16.gmra.mxu2 %v11576_v12  ;;  %3254 = vmatmul.bf16.gmra.mxu3 %v11578_v2 }
 0x359   : > { %3343 = vmatmul.bf16.gmra.mxu0 %v11576_v12  ;;  %3432 = vmatmul.bf16.gmra.mxu1 %v11578_v2 }
 0x35a   : > { %v3579_v14 = vadd.f32 %v11640_v15, %v3513_v22  ;;  %v3580_v21 = vadd.f32 %v11642_v3, %v3514_v11  ;;  %4117 = vmatpush.bf16.msra.mxu3 %v9713_v5 }
 0x35b   : > { %v3126_v48 = vpop.f32.mrf.mxu2  ;;  %v3215_v0 = vpop.f32.mrf.mxu3 }
 0x35c   : > { %v3216_v10 = vadd.f32 %v3215_v0, %v3126_v48  ;;  %v3739_v60 = vmax.f32 %v3579_v14, 0.0  ;;  %v3740_v37 = vmax.f32 %v3580_v21, 0.0 }
 0x35e   : > { %v3467_v47 = vpack.c.bf16 %v3394_v6, %v3216_v10  ;;  %v3306_v52 = vpop.f32.mrf.mxu0  ;;  %v3395_v12 = vpop.f32.mrf.mxu1  ;;  %v11664_v55 = vpack.c.bf16 %v3739_v60, %v3737_v49  ;;  %v11666_v2 = vpack.c.bf16 %v3740_v37, %v3738_v56 }
 0x35f   : > { %v3396_v7 = vadd.f32 %v3395_v12, %v3306_v52 }
 0x360   : > { %v3515_v23 = vunpack.c.l.bf16 %v3467_v47  ;;  %v3516_v26 = vunpack.c.h.bf16 %v3467_v47 }
 0x362   : > { %v3581_v61 = vadd.f32 %v11640_v15, %v3515_v23  ;;  %v3582_v44 = vadd.f32 %v11642_v3, %v3516_v26 }
 0x363   : > { %v3128_v24 = vpop.f32.mrf.mxu2  ;;  %v3217_v25 = vpop.f32.mrf.mxu3 }
 0x364   : > { %v3218_v62 = vadd.f32 %v3217_v25, %v3128_v24  ;;  %v3741_v46 = vmax.f32 %v3581_v61, 0.0  ;;  %v3742_v20 = vmax.f32 %v3582_v44, 0.0  ;;  %v9650_v44 = vld [vmem:[#allocation2 + $0x318] sm:$0xf0] }
 0x365   : > { %v9653_v5 = vor.u32 %v10528_v34, %v9650_v44 }
 0x366   : > { %v3468_v50 = vpack.c.bf16 %v3396_v7, %v3218_v62  ;;  %v3309_v8 = vpop.f32.mrf.mxu0  ;;  %v3398_v29 = vpop.f32.mrf.mxu1 }
 0x367   : > { %v3399_v13 = vadd.f32 %v3398_v29, %v3309_v8  ;;  %4206 = vmatpush.bf16.msra.mxu0 %v9653_v5 }
 0x368   : > { %v3517_v35 = vunpack.c.l.bf16 %v3468_v50  ;;  %v3518_v19 = vunpack.c.h.bf16 %v3468_v50  ;;  %3170 = vmatmul.bf16.gmra.mxu2 %v11588_v57  ;;  %3259 = vmatmul.bf16.gmra.mxu3 %v11590_v53 }
 0x369   : > { %3348 = vmatmul.bf16.gmra.mxu0 %v11588_v57  ;;  %3437 = vmatmul.bf16.gmra.mxu1 %v11590_v53 }
 0x36a   : > { %v3583_v39 = vadd.f32 %v11640_v15, %v3517_v35  ;;  %v3584_v4 = vadd.f32 %v11642_v3, %v3518_v19 }
 0x36b   : > { %v3131_v43 = vpop.f32.mrf.mxu2  ;;  %v3220_v42 = vpop.f32.mrf.mxu3 }
 0x36c   : > { %v3221_v9 = vadd.f32 %v3220_v42, %v3131_v43  ;;  %v3743_v58 = vmax.f32 %v3583_v39, 0.0  ;;  %v3744_v6 = vmax.f32 %v3584_v4, 0.0 }
 0x36e   : > { %v3469_v27 = vpack.c.bf16 %v3399_v13, %v3221_v9  ;;  %v3311_v22 = vpop.f32.mrf.mxu0  ;;  %v3400_v11 = vpop.f32.mrf.mxu1  ;;  %v11676_v16 = vpack.c.bf16 %v3743_v58, %v3741_v46  ;;  %v11678_v57 = vpack.c.bf16 %v3744_v6, %v3742_v20 }
 0x36f   : > { %v3401_v53 = vadd.f32 %v3400_v11, %v3311_v22 }
 0x370   : > { %v3519_v14 = vunpack.c.l.bf16 %v3469_v27  ;;  %v3520_v0 = vunpack.c.h.bf16 %v3469_v27 }
 0x372   : > { %v3585_v47 = vadd.f32 %v11640_v15, %v3519_v14  ;;  %v3586_v7 = vadd.f32 %v11642_v3, %v3520_v0 }
 0x373   : > { %v3133_v21 = vpop.f32.mrf.mxu2  ;;  %v3222_v48 = vpop.f32.mrf.mxu3 }
 0x374   : > { %v3223_v49 = vadd.f32 %v3222_v48, %v3133_v21  ;;  %v3745_v62 = vmax.f32 %v3585_v47, 0.0  ;;  %v3746_v29 = vmax.f32 %v3586_v7, 0.0 }
 0x376   : > { %v3470_v10 = vpack.c.bf16 %v3401_v53, %v3223_v49  ;;  %v3314_v60 = vpop.f32.mrf.mxu0  ;;  %v3403_v56 = vpop.f32.mrf.mxu1  ;;  %v9704_v53 = vld [vmem:[#allocation2 + $0x380] sm:$0xf] }
 0x377   : > { %v3404_v37 = vadd.f32 %v3403_v56, %v3314_v60  ;;  %v9705_v41 = vor.u32 %v10543_v38, %v9704_v53 }
 0x378   : > { %v3521_v52 = vunpack.c.l.bf16 %v3470_v10  ;;  %v3522_v12 = vunpack.c.h.bf16 %v3470_v10  ;;  %3175 = vmatmul.bf16.gmra.mxu2 %v11600_v17  ;;  %3264 = vmatmul.bf16.gmra.mxu3 %v11602_v32 }
 0x379   : > { %3353 = vmatmul.bf16.gmra.mxu0 %v11600_v17  ;;  %3442 = vmatmul.bf16.gmra.mxu1 %v11602_v32 }
 0x37a   : > { %v3587_v23 = vadd.f32 %v11640_v15, %v3521_v52  ;;  %v3588_v24 = vadd.f32 %v11642_v3, %v3522_v12  ;;  %4118 = vmatpush.bf16.msra.mxu3 %v9705_v41 }
 0x37b   : > { %v3136_v25 = vpop.f32.mrf.mxu2  ;;  %v3225_v26 = vpop.f32.mrf.mxu3 }
 0x37c   : > { %v3226_v50 = vadd.f32 %v3225_v26, %v3136_v25  ;;  %v3747_v8 = vmax.f32 %v3587_v23, 0.0  ;;  %v3748_v13 = vmax.f32 %v3588_v24, 0.0  ;;  %v10526_v26 = vld [vmem:[#allocation2 + $0x304] sm:$0xf] }
 0x37e   : > { %v3471_v61 = vpack.c.bf16 %v3404_v37, %v3226_v50  ;;  %v3316_v35 = vpop.f32.mrf.mxu0  ;;  %v3405_v17 = vpop.f32.mrf.mxu1  ;;  %v11688_v19 = vpack.c.bf16 %v3747_v8, %v3745_v62  ;;  %v11690_v32 = vpack.c.bf16 %v3748_v13, %v3746_v29  ;;  %v9642_v62 = vld [vmem:[#allocation2 + $0x308] sm:$0xf0] }
 0x37f   : > { %v3406_v63 = vadd.f32 %v3405_v17, %v3316_v35  ;;  %v9645_v29 = vor.u32 %v10526_v26, %v9642_v62 }
 0x380   : > { %v3523_v39 = vunpack.c.l.bf16 %v3471_v61  ;;  %v3524_v42 = vunpack.c.h.bf16 %v3471_v61 }
 0x381   : > { %4207 = vmatpush.bf16.msra.mxu0 %v9645_v29 }
 0x382   : > { %v3589_v27 = vadd.f32 %v11640_v15, %v3523_v39  ;;  %v3590_v40 = vadd.f32 %v11642_v3, %v3524_v42  ;;  %v9825_v39 = vld [vmem:[#allocation2 + $0x470] sm:$0xf] }
 0x383   : > { %v3138_v4 = vpop.f32.mrf.mxu2  ;;  %v3227_v43 = vpop.f32.mrf.mxu3 }
 0x384   : > { %v3228_v46 = vadd.f32 %v3227_v43, %v3138_v4  ;;  %v3749_v49 = vmax.f32 %v3589_v27, 0.0  ;;  %v3750_v56 = vmax.f32 %v3590_v40, 0.0  ;;  %v10573_v4 = vld [vmem:[#allocation2 + $0x474] sm:$0xf0] }
 0x385   : > { %v9826_v43 = vor.u32 %v10573_v4, %v9825_v39 }
 0x386   : > { %v3472_v9 = vpack.c.bf16 %v3406_v63, %v3228_v46  ;;  %v3319_v58 = vpop.f32.mrf.mxu0  ;;  %v3408_v20 = vpop.f32.mrf.mxu1 }
 0x387   : > { %v3409_v6 = vadd.f32 %v3408_v20, %v3319_v58  ;;  %4937 = vmatpush.bf16.msrb.mxu2 %v9826_v43 }
 0x388   : > { %v3525_v22 = vunpack.c.l.bf16 %v3472_v9  ;;  %v3526_v11 = vunpack.c.h.bf16 %v3472_v9  ;;  %3180 = vmatmul.bf16.gmra.mxu2 %v11612_v36  ;;  %3269 = vmatmul.bf16.gmra.mxu3 %v11614_v51 }
 0x389   : > { %3358 = vmatmul.bf16.gmra.mxu0 %v11612_v36  ;;  %3447 = vmatmul.bf16.gmra.mxu1 %v11614_v51 }
 0x38a   : > { %v3591_v14 = vadd.f32 %v11640_v15, %v3525_v22  ;;  %v3592_v21 = vadd.f32 %v11642_v3, %v3526_v11 }
 0x38b   : > { %v3141_v48 = vpop.f32.mrf.mxu2  ;;  %v3230_v0 = vpop.f32.mrf.mxu3 }
 0x38c   : > { %v3231_v10 = vadd.f32 %v3230_v0, %v3141_v48  ;;  %v3751_v60 = vmax.f32 %v3591_v14, 0.0  ;;  %v3752_v37 = vmax.f32 %v3592_v21, 0.0 }
 0x38e   : > { %v3473_v47 = vpack.c.bf16 %v3409_v6, %v3231_v10  ;;  %v3321_v52 = vpop.f32.mrf.mxu0  ;;  %v3410_v12 = vpop.f32.mrf.mxu1  ;;  %v11700_v7 = vpack.c.bf16 %v3751_v60, %v3749_v49  ;;  %v11702_v36 = vpack.c.bf16 %v3752_v37, %v3750_v56 }
 0x38f   : > { %v3411_v51 = vadd.f32 %v3410_v12, %v3321_v52 }
 0x390   : > { %v3527_v23 = vunpack.c.l.bf16 %v3473_v47  ;;  %v3528_v50 = vunpack.c.h.bf16 %v3473_v47 }
 0x392   : > { %v3593_v63 = vadd.f32 %v11640_v15, %v3527_v23  ;;  %v3594_v5 = vadd.f32 %v11642_v3, %v3528_v50 }
 0x393   : > { %v3143_v24 = vpop.f32.mrf.mxu2  ;;  %v3232_v25 = vpop.f32.mrf.mxu3 }
 0x394   : > { %v3233_v8 = vadd.f32 %v3232_v25, %v3143_v24  ;;  %v3753_v20 = vmax.f32 %v3593_v63, 0.0  ;;  %v3754_v22 = vmax.f32 %v3594_v5, 0.0 }
 0x396   : > { %v3474_v13 = vpack.c.bf16 %v3411_v51, %v3233_v8  ;;  %v3324_v61 = vpop.f32.mrf.mxu0  ;;  %v3413_v35 = vpop.f32.mrf.mxu1  ;;  %v9889_v51 = vld [vmem:[#allocation2 + $0x4f0] sm:$0xf] }
 0x397   : > { %v3414_v17 = vadd.f32 %v3413_v35, %v3324_v61  ;;  %v9890_v1 = vor.u32 %v10589_v18, %v9889_v51  ;;  %v10572_v18 = vld [vmem:[#allocation2 + $0x474] sm:$0xf] }
 0x398   : > { %v3529_v34 = vunpack.c.l.bf16 %v3474_v13  ;;  %v3530_v44 = vunpack.c.h.bf16 %v3474_v13  ;;  %3185 = vmatmul.bf16.gmra.mxu2 %v11624_v28  ;;  %3274 = vmatmul.bf16.gmra.mxu3 %v11626_v45 }
 0x399   : > { %3363 = vmatmul.bf16.gmra.mxu0 %v11624_v28  ;;  %3452 = vmatmul.bf16.gmra.mxu1 %v11626_v45 }
 0x39a   : > { %v3595_v42 = vadd.f32 %v11640_v15, %v3529_v34  ;;  %v3596_v46 = vadd.f32 %v11642_v3, %v3530_v44  ;;  %5026 = vmatpush.bf16.msrb.mxu3 %v9890_v1  ;;  %v10588_v34 = vld [vmem:[#allocation2 + $0x4f4] sm:$0xf]  ;;  %v9891_v44 = vld [vmem:[#allocation2 + $0x4f8] sm:$0xf0] }
 0x39b   : > { %v3146_v9 = vpop.f32.mrf.mxu2  ;;  %v3235_v58 = vpop.f32.mrf.mxu3  ;;  %v9894_v5 = vor.u32 %v10588_v34, %v9891_v44  ;;  %v10587_v34 = vld [vmem:[#allocation2 + $0x4e4] sm:$0xf0] }
 0x39c   : > { %v3236_v6 = vadd.f32 %v3235_v58, %v3146_v9  ;;  %v3755_v27 = vmax.f32 %v3595_v42, 0.0  ;;  %v3756_v11 = vmax.f32 %v3596_v46, 0.0 }
 0x39d   : > { %5204 = vmatpush.bf16.msrb.mxu1 %v9894_v5 }
 0x39e   : > { %v3475_v53 = vpack.c.bf16 %v3414_v17, %v3236_v6  ;;  %v3326_v38 = vpop.f32.mrf.mxu0  ;;  %v3415_v28 = vpop.f32.mrf.mxu1  ;;  %v11712_v40 = vpack.c.bf16 %v3755_v27, %v3753_v20  ;;  %v11714_v45 = vpack.c.bf16 %v3756_v11, %v3754_v22 }
 0x39f   : > { %v3416_v41 = vadd.f32 %v3415_v28, %v3326_v38  ;;  %v9817_v38 = vld [vmem:[#allocation2 + $0x460] sm:$0xf]  ;;  %v10571_v28 = vld [vmem:[#allocation2 + $0x464] sm:$0xf0] }
 0x3a0   : > { %v3531_v14 = vunpack.c.l.bf16 %v3475_v53  ;;  %v3532_v0 = vunpack.c.h.bf16 %v3475_v53 }
 0x3a2   : > { %v3597_v47 = vadd.f32 %v11640_v15, %v3531_v14  ;;  %v3598_v54 = vadd.f32 %v11642_v3, %v3532_v0 }
 0x3a3   : > { %v3148_v21 = vpop.f32.mrf.mxu2  ;;  %v3237_v48 = vpop.f32.mrf.mxu3 }
 0x3a4   : > { %v3238_v49 = vadd.f32 %v3237_v48, %v3148_v21  ;;  %v3757_v62 = vmax.f32 %v3597_v47, 0.0  ;;  %v3758_v29 = vmax.f32 %v3598_v54, 0.0  ;;  %v9827_v54 = vld [vmem:[#allocation2 + $0x478] sm:$0xf0] }
 0x3a5   : > { %v9830_v1 = vor.u32 %v10572_v18, %v9827_v54  ;;  %v9809_v18 = vld [vmem:[#allocation2 + $0x450] sm:$0xf]  ;;  %v10569_v54 = vld [vmem:[#allocation2 + $0x454] sm:$0xf0] }
 0x3a6   : > { %v3476_v10 = vpack.c.bf16 %v3416_v41, %v3238_v49  ;;  %v3329_v60 = vpop.f32.mrf.mxu0  ;;  %v3418_v56 = vpop.f32.mrf.mxu1  ;;  %v9818_v41 = vor.u32 %v10571_v28, %v9817_v38  ;;  %v10586_v38 = vld [vmem:[#allocation2 + $0x4e4] sm:$0xf]  ;;  %v9883_v28 = vld [vmem:[#allocation2 + $0x4e8] sm:$0xf0] }
 0x3a7   : > { %v3419_v37 = vadd.f32 %v3418_v56, %v3329_v60  ;;  %5115 = vmatpush.bf16.msrb.mxu0 %v9830_v1  ;;  %v9810_v1 = vor.u32 %v10569_v54, %v9809_v18  ;;  %v10584_v18 = vld [vmem:[#allocation2 + $0x4d4] sm:$0xf]  ;;  %v9875_v54 = vld [vmem:[#allocation2 + $0x4d8] sm:$0xf0] }
 0x3a8   : > { %v3533_v52 = vunpack.c.l.bf16 %v3476_v10  ;;  %v3534_v12 = vunpack.c.h.bf16 %v3476_v10  ;;  %3190 = vmatmul.bf16.gmra.mxu2 %v11636_v31  ;;  %3279 = vmatmul.bf16.gmra.mxu3 %v11638_v59 }
 0x3a9   : > { %3368 = vmatmul.bf16.gmra.mxu0 %v11636_v31  ;;  %3457 = vmatmul.bf16.gmra.mxu1 %v11638_v59 }
 0x3aa   : > { %v3599_v23 = vadd.f32 %v11640_v15, %v3533_v52  ;;  %v3600_v24 = vadd.f32 %v11642_v3, %v3534_v12  ;;  %4938 = vmatpush.bf16.msrb.mxu2 %v9818_v41  ;;  %v9886_v41 = vor.u32 %v10586_v38, %v9883_v28  ;;  %v10585_v38 = vld [vmem:[#allocation2 + $0x4d4] sm:$0xf0] }
 0x3ab   : > { %v3151_v25 = vpop.f32.mrf.mxu2  ;;  %v3240_v26 = vpop.f32.mrf.mxu3 }
 0x3ac   : > { %v3241_v50 = vadd.f32 %v3240_v26, %v3151_v25  ;;  %v3759_v8 = vmax.f32 %v3599_v23, 0.0  ;;  %v3760_v13 = vmax.f32 %v3600_v24, 0.0  ;;  %5205 = vmatpush.bf16.msrb.mxu1 %v9886_v41 }
 0x3ae   : > { %v3477_v61 = vpack.c.bf16 %v3419_v37, %v3241_v50  ;;  %v3331_v35 = vpop.f32.mrf.mxu0  ;;  %v3420_v17 = vpop.f32.mrf.mxu1  ;;  %v11724_v63 = vpack.c.bf16 %v3759_v8, %v3757_v62  ;;  %v11726_v31 = vpack.c.bf16 %v3760_v13, %v3758_v29  ;;  %4939 = vmatpush.bf16.msrb.mxu2 %v9810_v1  ;;  %v9878_v1 = vor.u32 %v10584_v18, %v9875_v54  ;;  %v10583_v18 = vld [vmem:[#allocation2 + $0x4c4] sm:$0xf0] }
 0x3af   : > { %v3421_v59 = vadd.f32 %v3420_v17, %v3331_v35 }
 0x3b0   : > { %v3535_v39 = vunpack.c.l.bf16 %v3477_v61  ;;  %v3536_v42 = vunpack.c.h.bf16 %v3477_v61  ;;  %5206 = vmatpush.bf16.msrb.mxu1 %v9878_v1 }
 0x3b2   : > { %v3601_v27 = vadd.f32 %v11640_v15, %v3535_v39  ;;  %v3602_v53 = vadd.f32 %v11642_v3, %v3536_v42 }
 0x3b3   : > { %v3153_v4 = vpop.f32.mrf.mxu2  ;;  %v3242_v43 = vpop.f32.mrf.mxu3 }
 0x3b4   : > { %v3243_v46 = vadd.f32 %v3242_v43, %v3153_v4  ;;  %v3761_v49 = vmax.f32 %v3601_v27, 0.0  ;;  %v3762_v56 = vmax.f32 %v3602_v53, 0.0 }
 0x3b6   : > { %v3478_v9 = vpack.c.bf16 %v3421_v59, %v3243_v46  ;;  %v3334_v58 = vpop.f32.mrf.mxu0  ;;  %v3423_v20 = vpop.f32.mrf.mxu1  ;;  %v9881_v59 = vld [vmem:[#allocation2 + $0x4e0] sm:$0xf] }
 0x3b7   : > { %v3424_v6 = vadd.f32 %v3423_v20, %v3334_v58  ;;  %v9882_v5 = vor.u32 %v10587_v34, %v9881_v59  ;;  %v10570_v34 = vld [vmem:[#allocation2 + $0x464] sm:$0xf] }
 0x3b8   : > { %v3537_v22 = vunpack.c.l.bf16 %v3478_v9  ;;  %v3538_v11 = vunpack.c.h.bf16 %v3478_v9  ;;  %4030 = vmatmul.bf16.vlgmr.msra.gmra.mxu2 %v11652_v30  ;;  %4119 = vmatmul.bf16.vlgmr.msra.gmra.mxu3 %v11654_v33 }
 0x3b9   : > { %4208 = vmatmul.bf16.vlgmr.msra.gmra.mxu0 %v11652_v30  ;;  %4297 = vmatmul.bf16.vlgmr.msra.gmra.mxu1 %v11654_v33 }
 0x3ba   : > { %v3603_v14 = vadd.f32 %v11640_v15, %v3537_v22  ;;  %v3604_v21 = vadd.f32 %v11642_v3, %v3538_v11  ;;  %5027 = vmatpush.bf16.msrb.mxu3 %v9882_v5 }
 0x3bb   : > { %v3156_v48 = vpop.f32.mrf.mxu2  ;;  %v3245_v0 = vpop.f32.mrf.mxu3 }
 0x3bc   : > { %v3246_v10 = vadd.f32 %v3245_v0, %v3156_v48  ;;  %v3763_v60 = vmax.f32 %v3603_v14, 0.0  ;;  %v3764_v37 = vmax.f32 %v3604_v21, 0.0 }
 0x3be   : > { %v3479_v47 = vpack.c.bf16 %v3424_v6, %v3246_v10  ;;  %v3336_v52 = vpop.f32.mrf.mxu0  ;;  %v3425_v30 = vpop.f32.mrf.mxu1  ;;  %v11736_v12 = vpack.c.bf16 %v3763_v60, %v3761_v49  ;;  %v11738_v33 = vpack.c.bf16 %v3764_v37, %v3762_v56 }
 0x3bf   : > { %v3426_v51 = vadd.f32 %v3425_v30, %v3336_v52 }
 0x3c0   : > { %v3539_v23 = vunpack.c.l.bf16 %v3479_v47  ;;  %v3540_v26 = vunpack.c.h.bf16 %v3479_v47 }
 0x3c2   : > { %v3605_v61 = vadd.f32 %v11640_v15, %v3539_v23  ;;  %v3606_v44 = vadd.f32 %v11642_v3, %v3540_v26 }
 0x3c3   : > { %v3158_v24 = vpop.f32.mrf.mxu2  ;;  %v3247_v25 = vpop.f32.mrf.mxu3 }
 0x3c4   : > { %v3248_v62 = vadd.f32 %v3247_v25, %v3158_v24  ;;  %v3765_v46 = vmax.f32 %v3605_v61, 0.0  ;;  %v3766_v20 = vmax.f32 %v3606_v44, 0.0  ;;  %v9819_v44 = vld [vmem:[#allocation2 + $0x468] sm:$0xf0] }
 0x3c5   : > { %v9822_v5 = vor.u32 %v10570_v34, %v9819_v44  ;;  %v9801_v34 = vld [vmem:[#allocation2 + $0x440] sm:$0xf]  ;;  %v10567_v44 = vld [vmem:[#allocation2 + $0x444] sm:$0xf0] }
 0x3c6   : > { %v3480_v50 = vpack.c.bf16 %v3426_v51, %v3248_v62  ;;  %v3339_v8 = vpop.f32.mrf.mxu0  ;;  %v3428_v29 = vpop.f32.mrf.mxu1 }
 0x3c7   : > { %v3429_v13 = vadd.f32 %v3428_v29, %v3339_v8  ;;  %5116 = vmatpush.bf16.msrb.mxu0 %v9822_v5  ;;  %v9802_v5 = vor.u32 %v10567_v44, %v9801_v34  ;;  %v10582_v34 = vld [vmem:[#allocation2 + $0x4c4] sm:$0xf]  ;;  %v9867_v44 = vld [vmem:[#allocation2 + $0x4c8] sm:$0xf0] }
 0x3c8   : > { %v3541_v35 = vunpack.c.l.bf16 %v3480_v50  ;;  %v3542_v17 = vunpack.c.h.bf16 %v3480_v50  ;;  %4035 = vmatmul.bf16.gmra.mxu2 %v11664_v55  ;;  %4124 = vmatmul.bf16.gmra.mxu3 %v11666_v2 }
 0x3c9   : > { %4213 = vmatmul.bf16.gmra.mxu0 %v11664_v55  ;;  %4302 = vmatmul.bf16.gmra.mxu1 %v11666_v2 }
 0x3ca   : > { %v3607_v39 = vadd.f32 %v11640_v15, %v3541_v35  ;;  %v3608_v4 = vadd.f32 %v11642_v3, %v3542_v17  ;;  %4940 = vmatpush.bf16.msrb.mxu2 %v9802_v5  ;;  %v9870_v5 = vor.u32 %v10582_v34, %v9867_v44 }
 0x3cb   : > { %v3161_v43 = vpop.f32.mrf.mxu2  ;;  %v3250_v42 = vpop.f32.mrf.mxu3 }
 0x3cc   : > { %v3251_v9 = vadd.f32 %v3250_v42, %v3161_v43  ;;  %v3767_v58 = vmax.f32 %v3607_v39, 0.0  ;;  %v3768_v6 = vmax.f32 %v3608_v4, 0.0  ;;  %5207 = vmatpush.bf16.msrb.mxu1 %v9870_v5 }
 0x3ce   : > { %v3481_v27 = vpack.c.bf16 %v3429_v13, %v3251_v9  ;;  %v3341_v22 = vpop.f32.mrf.mxu0  ;;  %v3430_v11 = vpop.f32.mrf.mxu1  ;;  %v11748_v53 = vpack.c.bf16 %v3767_v58, %v3765_v46  ;;  %v11750_v55 = vpack.c.bf16 %v3768_v6, %v3766_v20 }
 0x3cf   : > { %v3431_v2 = vadd.f32 %v3430_v11, %v3341_v22 }
 0x3d0   : > { %v3543_v14 = vunpack.c.l.bf16 %v3481_v27  ;;  %v3544_v0 = vunpack.c.h.bf16 %v3481_v27 }
 0x3d2   : > { %v3609_v47 = vadd.f32 %v11640_v15, %v3543_v14  ;;  %v3610_v51 = vadd.f32 %v11642_v3, %v3544_v0 }
 0x3d3   : > { %v3163_v21 = vpop.f32.mrf.mxu2  ;;  %v3252_v48 = vpop.f32.mrf.mxu3 }
 0x3d4   : > { %v3253_v49 = vadd.f32 %v3252_v48, %v3163_v21  ;;  %v3769_v62 = vmax.f32 %v3609_v47, 0.0  ;;  %v3770_v29 = vmax.f32 %v3610_v51, 0.0 }
 0x3d6   : > { %v3482_v10 = vpack.c.bf16 %v3431_v2, %v3253_v49  ;;  %v3344_v60 = vpop.f32.mrf.mxu0  ;;  %v3433_v56 = vpop.f32.mrf.mxu1  ;;  %v9873_v2 = vld [vmem:[#allocation2 + $0x4d0] sm:$0xf] }
 0x3d7   : > { %v3434_v37 = vadd.f32 %v3433_v56, %v3344_v60  ;;  %v9874_v41 = vor.u32 %v10585_v38, %v9873_v2  ;;  %v10568_v38 = vld [vmem:[#allocation2 + $0x454] sm:$0xf] }
 0x3d8   : > { %v3545_v52 = vunpack.c.l.bf16 %v3482_v10  ;;  %v3546_v30 = vunpack.c.h.bf16 %v3482_v10  ;;  %4040 = vmatmul.bf16.gmra.mxu2 %v11676_v16  ;;  %4129 = vmatmul.bf16.gmra.mxu3 %v11678_v57 }
 0x3d9   : > { %4218 = vmatmul.bf16.gmra.mxu0 %v11676_v16  ;;  %4307 = vmatmul.bf16.gmra.mxu1 %v11678_v57 }
 0x3da   : > { %v3611_v23 = vadd.f32 %v11640_v15, %v3545_v52  ;;  %v3612_v24 = vadd.f32 %v11642_v3, %v3546_v30  ;;  %5028 = vmatpush.bf16.msrb.mxu3 %v9874_v41 }
 0x3db   : > { %v3166_v25 = vpop.f32.mrf.mxu2  ;;  %v3255_v26 = vpop.f32.mrf.mxu3 }
 0x3dc   : > { %v3256_v50 = vadd.f32 %v3255_v26, %v3166_v25  ;;  %v3771_v8 = vmax.f32 %v3611_v23, 0.0  ;;  %v3772_v13 = vmax.f32 %v3612_v24, 0.0 }
 0x3de   : > { %v3483_v61 = vpack.c.bf16 %v3434_v37, %v3256_v50  ;;  %v3346_v35 = vpop.f32.mrf.mxu0  ;;  %v3435_v16 = vpop.f32.mrf.mxu1  ;;  %v11760_v17 = vpack.c.bf16 %v3771_v8, %v3769_v62  ;;  %v11762_v57 = vpack.c.bf16 %v3772_v13, %v3770_v29 }
 0x3df   : > { %v3436_v59 = vadd.f32 %v3435_v16, %v3346_v35 }
 0x3e0   : > { %v3547_v39 = vunpack.c.l.bf16 %v3483_v61  ;;  %v3548_v42 = vunpack.c.h.bf16 %v3483_v61 }
 0x3e2   : > { %v3613_v27 = vadd.f32 %v11640_v15, %v3547_v39  ;;  %v3614_v28 = vadd.f32 %v11642_v3, %v3548_v42 }
 0x3e3   : > { %v3168_v4 = vpop.f32.mrf.mxu2  ;;  %v3257_v43 = vpop.f32.mrf.mxu3 }
 0x3e4   : > { %v3258_v46 = vadd.f32 %v3257_v43, %v3168_v4  ;;  %v3773_v49 = vmax.f32 %v3613_v27, 0.0  ;;  %v3774_v56 = vmax.f32 %v3614_v28, 0.0  ;;  %v9811_v28 = vld [vmem:[#allocation2 + $0x458] sm:$0xf0] }
 0x3e5   : > { %v9814_v41 = vor.u32 %v10568_v38, %v9811_v28  ;;  %v9793_v28 = vld [vmem:[#allocation2 + $0x430] sm:$0xf] }
 0x3e6   : > { %v3484_v9 = vpack.c.bf16 %v3436_v59, %v3258_v46  ;;  %v3349_v58 = vpop.f32.mrf.mxu0  ;;  %v3438_v20 = vpop.f32.mrf.mxu1 }
 0x3e7   : > { %v3439_v6 = vadd.f32 %v3438_v20, %v3349_v58  ;;  %5117 = vmatpush.bf16.msrb.mxu0 %v9814_v41  ;;  %v10565_v41 = vld [vmem:[#allocation2 + $0x434] sm:$0xf0] }
 0x3e8   : > { %v3549_v22 = vunpack.c.l.bf16 %v3484_v9  ;;  %v3550_v11 = vunpack.c.h.bf16 %v3484_v9  ;;  %4045 = vmatmul.bf16.gmra.mxu2 %v11688_v19  ;;  %4134 = vmatmul.bf16.gmra.mxu3 %v11690_v32 }
 0x3e9   : > { %4223 = vmatmul.bf16.gmra.mxu0 %v11688_v19  ;;  %4312 = vmatmul.bf16.gmra.mxu1 %v11690_v32 }
 0x3ea   : > { %v3615_v14 = vadd.f32 %v11640_v15, %v3549_v22  ;;  %v3616_v21 = vadd.f32 %v11642_v3, %v3550_v11 }
 0x3eb   : > { %v3171_v48 = vpop.f32.mrf.mxu2  ;;  %v3260_v0 = vpop.f32.mrf.mxu3 }
 0x3ec   : > { %v3261_v10 = vadd.f32 %v3260_v0, %v3171_v48  ;;  %v3775_v60 = vmax.f32 %v3615_v14, 0.0  ;;  %v3776_v37 = vmax.f32 %v3616_v21, 0.0 }
 0x3ee   : > { %v3485_v47 = vpack.c.bf16 %v3439_v6, %v3261_v10  ;;  %v3351_v52 = vpop.f32.mrf.mxu0  ;;  %v3440_v30 = vpop.f32.mrf.mxu1  ;;  %v11772_v51 = vpack.c.bf16 %v3775_v60, %v3773_v49  ;;  %v11774_v19 = vpack.c.bf16 %v3776_v37, %v3774_v56 }
 0x3ef   : > { %v3441_v32 = vadd.f32 %v3440_v30, %v3351_v52 }
 0x3f0   : > { %v3551_v23 = vunpack.c.l.bf16 %v3485_v47  ;;  %v3552_v26 = vunpack.c.h.bf16 %v3485_v47 }
 0x3f2   : > { %v3617_v61 = vadd.f32 %v11640_v15, %v3551_v23  ;;  %v3618_v59 = vadd.f32 %v11642_v3, %v3552_v26 }
 0x3f3   : > { %v3173_v24 = vpop.f32.mrf.mxu2  ;;  %v3262_v25 = vpop.f32.mrf.mxu3 }
 0x3f4   : > { %v3263_v62 = vadd.f32 %v3262_v25, %v3173_v24  ;;  %v3777_v46 = vmax.f32 %v3617_v61, 0.0  ;;  %v3778_v20 = vmax.f32 %v3618_v59, 0.0 }
 0x3f6   : > { %v3486_v50 = vpack.c.bf16 %v3441_v32, %v3263_v62  ;;  %v3354_v8 = vpop.f32.mrf.mxu0  ;;  %v3443_v29 = vpop.f32.mrf.mxu1  ;;  %v9865_v32 = vld [vmem:[#allocation2 + $0x4c0] sm:$0xf] }
 0x3f7   : > { %v3444_v13 = vadd.f32 %v3443_v29, %v3354_v8  ;;  %v9866_v1 = vor.u32 %v10583_v18, %v9865_v32 }
 0x3f8   : > { %v3553_v35 = vunpack.c.l.bf16 %v3486_v50  ;;  %v3554_v16 = vunpack.c.h.bf16 %v3486_v50  ;;  %4050 = vmatmul.bf16.gmra.mxu2 %v11700_v7  ;;  %4139 = vmatmul.bf16.gmra.mxu3 %v11702_v36 }
 0x3f9   : > { %4228 = vmatmul.bf16.gmra.mxu0 %v11700_v7  ;;  %4317 = vmatmul.bf16.gmra.mxu1 %v11702_v36 }
 0x3fa   : > { %v3619_v39 = vadd.f32 %v11640_v15, %v3553_v35  ;;  %v3620_v4 = vadd.f32 %v11642_v3, %v3554_v16  ;;  %5029 = vmatpush.bf16.msrb.mxu3 %v9866_v1 }
 0x3fb   : > { %v3176_v43 = vpop.f32.mrf.mxu2  ;;  %v3265_v42 = vpop.f32.mrf.mxu3 }
 0x3fc   : > { %v3266_v9 = vadd.f32 %v3265_v42, %v3176_v43  ;;  %v3779_v58 = vmax.f32 %v3619_v39, 0.0  ;;  %v3780_v6 = vmax.f32 %v3620_v4, 0.0 }
 0x3fe   : > { %v3487_v27 = vpack.c.bf16 %v3444_v13, %v3266_v9  ;;  %v3356_v22 = vpop.f32.mrf.mxu0  ;;  %v3445_v7 = vpop.f32.mrf.mxu1  ;;  %v11784_v11 = vpack.c.bf16 %v3779_v58, %v3777_v46  ;;  %v11786_v36 = vpack.c.bf16 %v3780_v6, %v3778_v20  ;;  %v9766_v9 = vld [vmem:[%s13088_s4 + $0x6] sm:$0x3] }
 0x3ff   : > { %v3446_v2 = vadd.f32 %v3445_v7, %v3356_v22  ;;  %4413 = vst [vmem:[#allocation1] ss:$9 sm:$0xff] %v9766_v9 }
 0x400   : > { %v3555_v14 = vunpack.c.l.bf16 %v3487_v27  ;;  %v3556_v0 = vunpack.c.h.bf16 %v3487_v27 }
 0x402   : > { %v3621_v47 = vadd.f32 %v11640_v15, %v3555_v14  ;;  %v3622_v54 = vadd.f32 %v11642_v3, %v3556_v0  ;;  %v9794_v14 = vor.u32 %v10565_v41, %v9793_v28  ;;  %v10580_v28 = vld [vmem:[#allocation2 + $0x4b4] sm:$0xf]  ;;  %v9859_v41 = vld [vmem:[#allocation2 + $0x4b8] sm:$0xf0] }
 0x403   : > { %v3178_v21 = vpop.f32.mrf.mxu2  ;;  %v3267_v48 = vpop.f32.mrf.mxu3 }
 0x404   : > { %v3268_v49 = vadd.f32 %v3267_v48, %v3178_v21  ;;  %v3781_v62 = vmax.f32 %v3621_v47, 0.0  ;;  %v3782_v29 = vmax.f32 %v3622_v54, 0.0  ;;  %4941 = vmatpush.bf16.msrb.mxu2 %v9794_v14  ;;  %v9862_v14 = vor.u32 %v10580_v28, %v9859_v41 }
 0x406   : > { %v3488_v10 = vpack.c.bf16 %v3446_v2, %v3268_v49  ;;  %v3359_v60 = vpop.f32.mrf.mxu0  ;;  %v3448_v56 = vpop.f32.mrf.mxu1  ;;  %5208 = vmatpush.bf16.msrb.mxu1 %v9862_v14 }
 0x407   : > { %v3449_v37 = vadd.f32 %v3448_v56, %v3359_v60 }
 0x408   : > { %v3557_v52 = vunpack.c.l.bf16 %v3488_v10  ;;  %v3558_v30 = vunpack.c.h.bf16 %v3488_v10  ;;  %4055 = vmatmul.bf16.gmra.mxu2 %v11712_v40  ;;  %4144 = vmatmul.bf16.gmra.mxu3 %v11714_v45 }
 0x409   : > { %4233 = vmatmul.bf16.gmra.mxu0 %v11712_v40  ;;  %4322 = vmatmul.bf16.gmra.mxu1 %v11714_v45 }
 0x40a   : > { %v3623_v23 = vadd.f32 %v11640_v15, %v3557_v52  ;;  %v3624_v24 = vadd.f32 %v11642_v3, %v3558_v30 }
 0x40b   : > { %v3181_v25 = vpop.f32.mrf.mxu2  ;;  %v3270_v26 = vpop.f32.mrf.mxu3 }
 0x40c   : > { %v3271_v50 = vadd.f32 %v3270_v26, %v3181_v25  ;;  %v3783_v8 = vmax.f32 %v3623_v23, 0.0  ;;  %v3784_v13 = vmax.f32 %v3624_v24, 0.0  ;;  %v10566_v26 = vld [vmem:[#allocation2 + $0x444] sm:$0xf] }
 0x40e   : > { %v3489_v61 = vpack.c.bf16 %v3449_v37, %v3271_v50  ;;  %v3361_v35 = vpop.f32.mrf.mxu0  ;;  %v3450_v16 = vpop.f32.mrf.mxu1  ;;  %v11796_v59 = vpack.c.bf16 %v3783_v8, %v3781_v62  ;;  %v11798_v40 = vpack.c.bf16 %v3784_v13, %v3782_v29  ;;  %v9803_v62 = vld [vmem:[#allocation2 + $0x448] sm:$0xf0] }
 0x40f   : > { %v3451_v45 = vadd.f32 %v3450_v16, %v3361_v35  ;;  %v9806_v50 = vor.u32 %v10566_v26, %v9803_v62 }
 0x410   : > { %v3559_v39 = vunpack.c.l.bf16 %v3489_v61  ;;  %v3560_v42 = vunpack.c.h.bf16 %v3489_v61 }
 0x411   : > { %5118 = vmatpush.bf16.msrb.mxu0 %v9806_v50 }
 0x412   : > { %v3625_v22 = vadd.f32 %v11640_v15, %v3559_v39  ;;  %v3626_v38 = vadd.f32 %v11642_v3, %v3560_v42 }
 0x413   : > { %v3183_v4 = vpop.f32.mrf.mxu2  ;;  %v3272_v43 = vpop.f32.mrf.mxu3 }
 0x414   : > { %v3273_v46 = vadd.f32 %v3272_v43, %v3183_v4  ;;  %v3785_v10 = vmax.f32 %v3625_v22, 0.0  ;;  %v3786_v37 = vmax.f32 %v3626_v38, 0.0  ;;  %v9857_v22 = vld [vmem:[#allocation2 + $0x4b0] sm:$0xf] }
 0x416   : > { %v3490_v58 = vpack.c.bf16 %v3451_v45, %v3273_v46  ;;  %v3364_v20 = vpop.f32.mrf.mxu0  ;;  %v3453_v6 = vpop.f32.mrf.mxu1 }
 0x417   : > { %v3454_v27 = vadd.f32 %v3453_v6, %v3364_v20 }
 0x418   : > { %v3561_v7 = vunpack.c.l.bf16 %v3490_v58  ;;  %v3562_v2 = vunpack.c.h.bf16 %v3490_v58  ;;  %4060 = vmatmul.bf16.gmra.mxu2 %v11724_v63  ;;  %4149 = vmatmul.bf16.gmra.mxu3 %v11726_v31 }
 0x419   : > { %4238 = vmatmul.bf16.gmra.mxu0 %v11724_v63  ;;  %4327 = vmatmul.bf16.gmra.mxu1 %v11726_v31 }
 0x41a   : > { %v3627_v21 = vadd.f32 %v11640_v15, %v3561_v7  ;;  %v3628_v48 = vadd.f32 %v11642_v3, %v3562_v2  ;;  %v10581_v7 = vld [vmem:[#allocation2 + $0x4b4] sm:$0xf0] }
 0x41b   : > { %v3186_v0 = vpop.f32.mrf.mxu2  ;;  %v3275_v49 = vpop.f32.mrf.mxu3  ;;  %v9858_v38 = vor.u32 %v10581_v7, %v9857_v22 }
 0x41c   : > { %v3276_v60 = vadd.f32 %v3275_v49, %v3186_v0  ;;  %v3787_v56 = vmax.f32 %v3627_v21, 0.0  ;;  %v3788_v47 = vmax.f32 %v3628_v48, 0.0 }
 0x41d   : > { %5030 = vmatpush.bf16.msrb.mxu3 %v9858_v38 }
 0x41e   : > { %v3491_v52 = vpack.c.bf16 %v3454_v27, %v3276_v60  ;;  %v3366_v30 = vpop.f32.mrf.mxu0  ;;  %v3455_v63 = vpop.f32.mrf.mxu1  ;;  %v11811_v32 = vpack.c.bf16 %v3787_v56, %v3785_v10  ;;  %v11813_v31 = vpack.c.bf16 %v3788_v47, %v3786_v37 }
 0x41f   : > { %v3456_v18 = vadd.f32 %v3455_v63, %v3366_v30 }
 0x420   : > { %v3563_v54 = vunpack.c.l.bf16 %v3491_v52  ;;  %v3564_v24 = vunpack.c.h.bf16 %v3491_v52 }
 0x422   : > { %v3629_v35 = vadd.f32 %v11640_v15, %v3563_v54  ;;  %v3630_v34 = vadd.f32 %v11642_v3, %v3564_v24  ;;  %v4415_v54 = vld [vmem:[#allocation1 + $0x9] sm:$0xff] }
 0x423   : > { %v3188_v1 = vpop.f32.mrf.mxu2  ;;  %v3277_v23 = vpop.f32.mrf.mxu3  ;;  %v10563_v24 = vld [vmem:[#allocation2 + $0x424] sm:$0xf0] }
 0x424   : > { %v3278_v25 = vadd.f32 %v3277_v23, %v3188_v1  ;;  %v3789_v43 = vmax.f32 %v3629_v35, 0.0  ;;  %v3790_v9 = vmax.f32 %v3630_v34, 0.0  ;;  %v9785_v23 = vld [vmem:[#allocation2 + $0x420] sm:$0xf] }
 0x426   : > { %v3492_v8 = vpack.c.bf16 %v3456_v18, %v3278_v25  ;;  %v3369_v29 = vpop.f32.mrf.mxu0  ;;  %v3458_v13 = vpop.f32.mrf.mxu1  ;;  %v4414_v18 = vld [vmem:[#allocation1] sm:$0xff]  ;;  %v9786_v25 = vor.u32 %v10563_v24, %v9785_v23 }
 0x427   : > { %v3459_v61 = vadd.f32 %v3458_v13, %v3369_v29  ;;  %v4416_v29 = vpack.i.b16 %v4414_v18, %v4414_v18  ;;  %v4419_v13 = vpack.i.b16 %v4415_v54, %v4415_v54 }
 0x428   : > { %v3565_v16 = vunpack.c.l.bf16 %v3492_v8  ;;  %v3566_v45 = vunpack.c.h.bf16 %v3492_v8  ;;  %4065 = vmatmul.bf16.gmra.mxu2 %v11736_v12  ;;  %4154 = vmatmul.bf16.gmra.mxu3 %v11738_v33 }
 0x429   : > { %4243 = vmatmul.bf16.gmra.mxu0 %v11736_v12  ;;  %4332 = vmatmul.bf16.gmra.mxu1 %v11738_v33 }
 0x42a   : > { %v3631_v44 = vadd.f32 %v11640_v15, %v3565_v16  ;;  %v3632_v5 = vadd.f32 %v11642_v3, %v3566_v45  ;;  %4942 = vmatpush.bf16.msrb.mxu2 %v9786_v25 }
 0x42b   : > { %v3191_v39 = vpop.f32.mrf.mxu2  ;;  %v3280_v4 = vpop.f32.mrf.mxu3 }
 0x42c   : > { %v3281_v42 = vadd.f32 %v3280_v4, %v3191_v39  ;;  %v3791_v46 = vmax.f32 %v3631_v44, 0.0  ;;  %v3792_v58 = vmax.f32 %v3632_v5, 0.0 }
 0x42e   : > { %v3493_v20 = vpack.c.bf16 %v3459_v61, %v3281_v42  ;;  %v3371_v6 = vpop.f32.mrf.mxu0  ;;  %v3460_v27 = vpop.f32.mrf.mxu1  ;;  %v11823_v2 = vpack.c.bf16 %v3791_v46, %v3789_v43  ;;  %v11825_v12 = vpack.c.bf16 %v3792_v58, %v3790_v9  ;;  %v10564_v43 = vld [vmem:[#allocation2 + $0x434] sm:$0xf]  ;;  %v9795_v42 = vld [vmem:[#allocation2 + $0x438] sm:$0xf0] }
 0x42f   : > { %v3461_v33 = vadd.f32 %v3460_v27, %v3371_v6  ;;  %v9798_v46 = vor.u32 %v10564_v43, %v9795_v42  ;;  %v9777_v43 = vld [vmem:[#allocation2 + $0x410] sm:$0xf]  ;;  %v10561_v42 = vld [vmem:[#allocation2 + $0x414] sm:$0xf0] }
 0x430   : > { %v3567_v21 = vunpack.c.l.bf16 %v3493_v20  ;;  %v3568_v49 = vunpack.c.h.bf16 %v3493_v20 }
 0x431   : > { %5119 = vmatpush.bf16.msrb.mxu0 %v9798_v46  ;;  %v9778_v46 = vor.u32 %v10561_v42, %v9777_v43  ;;  %v10576_v43 = vld [vmem:[#allocation2 + $0x494] sm:$0xf]  ;;  %v9843_v42 = vld [vmem:[#allocation2 + $0x498] sm:$0xf0] }
 0x432   : > { %v3633_v52 = vadd.f32 %v11640_v15, %v3567_v21  ;;  %v3634_v1 = vadd.f32 %v11642_v3, %v3568_v49  ;;  %v9849_v49 = vld [vmem:[#allocation2 + $0x4a0] sm:$0xf] }
 0x433   : > { %v3193_v48 = vpop.f32.mrf.mxu2  ;;  %v3282_v0 = vpop.f32.mrf.mxu3  ;;  %4943 = vmatpush.bf16.msrb.mxu2 %v9778_v46  ;;  %v9846_v46 = vor.u32 %v10576_v43, %v9843_v42  ;;  %v10575_v43 = vld [vmem:[#allocation2 + $0x484] sm:$0xf0] }
 0x434   : > { %v3283_v10 = vadd.f32 %v3282_v0, %v3193_v48  ;;  %v3793_v61 = vmax.f32 %v3633_v52, 0.0  ;;  %v3794_v45 = vmax.f32 %v3634_v1, 0.0 }
 0x436   : > { %v3494_v60 = vpack.c.bf16 %v3461_v33, %v3283_v10  ;;  %v4209_v56 = vpop.f32.mrf.mxu0  ;;  %v4298_v37 = vpop.f32.mrf.mxu1  ;;  %v10579_v10 = vld [vmem:[#allocation2 + $0x4a4] sm:$0xf0] }
 0x437   : > { %v4299_v47 = vadd.f32 %v4298_v37, %v4209_v56 }
 0x438   : > { %v3569_v30 = vunpack.c.l.bf16 %v3494_v60  ;;  %v3570_v63 = vunpack.c.h.bf16 %v3494_v60  ;;  %4070 = vmatmul.bf16.gmra.mxu2 %v11748_v53  ;;  %4159 = vmatmul.bf16.gmra.mxu3 %v11750_v55  ;;  %v9850_v60 = vor.u32 %v10579_v10, %v9849_v49  ;;  %v10562_v49 = vld [vmem:[#allocation2 + $0x424] sm:$0xf]  ;;  %v9787_v10 = vld [vmem:[#allocation2 + $0x428] sm:$0xf0] }
 0x439   : > { %4248 = vmatmul.bf16.gmra.mxu0 %v11748_v53  ;;  %4337 = vmatmul.bf16.gmra.mxu1 %v11750_v55 }
 0x43a   : > { %v3635_v26 = vadd.f32 %v11640_v15, %v3569_v30  ;;  %v3636_v62 = vadd.f32 %v11642_v3, %v3570_v63  ;;  %v4418_v15 = vperm.slane %v4416_v29, 0  ;;  %v4421_v3 = vperm.slane %v4419_v13, 0  ;;  %5031 = vmatpush.bf16.msrb.mxu3 %v9850_v60 }
 0x43b   : > { %v4031_v50 = vpop.f32.mrf.mxu2  ;;  %v4120_v8 = vpop.f32.mrf.mxu3  ;;  %v9790_v60 = vor.u32 %v10562_v49, %v9787_v10  ;;  %v9769_v49 = vld [vmem:[#allocation2 + $0x400] sm:$0xf]  ;;  %v10559_v10 = vld [vmem:[#allocation2 + $0x404] sm:$0xf0] }
 0x43c   : > { %v4121_v35 = vadd.f32 %v4120_v8, %v4031_v50  ;;  %v3795_v16 = vmax.f32 %v3635_v26, 0.0  ;;  %v3796_v34 = vmax.f32 %v3636_v62, 0.0  ;;  %v11839_v58 = vunpack.c.l.bf16 %v4418_v15  ;;  %v10578_v62 = vld [vmem:[#allocation2 + $0x4a4] sm:$0xf]  ;;  %v9851_v50 = vld [vmem:[#allocation2 + $0x4a8] sm:$0xf0] }
 0x43d   : > { %v11841_v22 = vunpack.c.l.bf16 %v4421_v3  ;;  %v9854_v8 = vor.u32 %v10578_v62, %v9851_v50  ;;  %5120 = vmatpush.bf16.msrb.mxu0 %v9790_v60  ;;  %v10577_v62 = vld [vmem:[#allocation2 + $0x494] sm:$0xf0]  ;;  %v9770_v60 = vor.u32 %v10559_v10, %v9769_v49  ;;  %v10574_v49 = vld [vmem:[#allocation2 + $0x484] sm:$0xf]  ;;  %v9835_v10 = vld [vmem:[#allocation2 + $0x488] sm:$0xf0] }
 0x43e   : > { %v4378_v53 = vpack.c.bf16 %v4299_v47, %v4121_v35  ;;  %v4211_v44 = vpop.f32.mrf.mxu0  ;;  %v4300_v55 = vpop.f32.mrf.mxu1  ;;  %v11835_v5 = vpack.c.bf16 %v3795_v16, %v3793_v61  ;;  %v11837_v39 = vpack.c.bf16 %v3796_v34, %v3794_v45 }
 0x43f   : > { %v4301_v4 = vadd.f32 %v4300_v55, %v4211_v44  ;;  %5209 = vmatpush.bf16.msrb.mxu1 %v9854_v8  ;;  %4944 = vmatpush.bf16.msrb.mxu2 %v9770_v60  ;;  %v9838_v60 = vor.u32 %v10574_v49, %v9835_v10  ;;  %v10621_v49 = vld [vmem:[#allocation2 + $0x5f4] sm:$0xf0] }
 0x440   : > { %v4422_v9 = vunpack.c.l.bf16 %v4378_v53  ;;  %v4423_v27 = vunpack.c.h.bf16 %v4378_v53 }
 0x442   : > { %v4488_v41 = vadd.f32 %v11839_v58, %v4422_v9  ;;  %v4489_v21 = vadd.f32 %v11841_v22, %v4423_v27 }
 0x443   : > { %v4033_v20 = vpop.f32.mrf.mxu2  ;;  %v4122_v6 = vpop.f32.mrf.mxu3  ;;  %5210 = vmatpush.bf16.msrb.mxu1 %v9846_v46 }
 0x444   : > { %v4123_v7 = vadd.f32 %v4122_v6, %v4033_v20  ;;  %v4648_v47 = vmax.f32 %v4488_v41, 0.0  ;;  %v4649_v63 = vmax.f32 %v4489_v21, 0.0 }
 0x446   : > { %v4379_v33 = vpack.c.bf16 %v4301_v4, %v4123_v7  ;;  %v4214_v38 = vpop.f32.mrf.mxu0  ;;  %v4303_v28 = vpop.f32.mrf.mxu1 }
 0x447   : > { %v4304_v14 = vadd.f32 %v4303_v28, %v4214_v38  ;;  %5211 = vmatpush.bf16.msrb.mxu1 %v9838_v60 }
 0x448   : > { %v4424_v48 = vunpack.c.l.bf16 %v4379_v33  ;;  %v4425_v0 = vunpack.c.h.bf16 %v4379_v33  ;;  %4075 = vmatmul.bf16.gmra.mxu2 %v11760_v17  ;;  %4164 = vmatmul.bf16.gmra.mxu3 %v11762_v57 }
 0x449   : > { %4253 = vmatmul.bf16.gmra.mxu0 %v11760_v17  ;;  %4342 = vmatmul.bf16.gmra.mxu1 %v11762_v57 }
 0x44a   : > { %v4490_v56 = vadd.f32 %v11839_v58, %v4424_v48  ;;  %v4491_v37 = vadd.f32 %v11841_v22, %v4425_v0 }
 0x44b   : > { %v4036_v52 = vpop.f32.mrf.mxu2  ;;  %v4125_v30 = vpop.f32.mrf.mxu3 }
 0x44c   : > { %v4650_v18 = vmax.f32 %v4490_v56, 0.0  ;;  %v4651_v54 = vmax.f32 %v4491_v37, 0.0  ;;  %v4126_v1 = vadd.f32 %v4125_v30, %v4036_v52 }
 0x44e   : > { %v11851_v23 = vpack.c.bf16 %v4650_v18, %v4648_v47  ;;  %v11853_v24 = vpack.c.bf16 %v4651_v54, %v4649_v63  ;;  %v4380_v17 = vpack.c.bf16 %v4304_v14, %v4126_v1  ;;  %v4216_v25 = vpop.f32.mrf.mxu0  ;;  %v4305_v57 = vpop.f32.mrf.mxu1 }
 0x44f   : > { %v4306_v26 = vadd.f32 %v4305_v57, %v4216_v25 }
 0x450   : > { %v4426_v29 = vunpack.c.l.bf16 %v4380_v17  ;;  %v4427_v35 = vunpack.c.h.bf16 %v4380_v17 }
 0x452   : > { %v4492_v55 = vadd.f32 %v11839_v58, %v4426_v29  ;;  %v4493_v3 = vadd.f32 %v11841_v22, %v4427_v35 }
 0x453   : > { %v4038_v13 = vpop.f32.mrf.mxu2  ;;  %v4127_v61 = vpop.f32.mrf.mxu3 }
 0x454   : > { %v4128_v16 = vadd.f32 %v4127_v61, %v4038_v13  ;;  %v4652_v7 = vmax.f32 %v4492_v55, 0.0  ;;  %v4653_v28 = vmax.f32 %v4493_v3, 0.0 }
 0x456   : > { %v4381_v45 = vpack.c.bf16 %v4306_v26, %v4128_v16  ;;  %v4219_v34 = vpop.f32.mrf.mxu0  ;;  %v4308_v53 = vpop.f32.mrf.mxu1  ;;  %v9841_v26 = vld [vmem:[#allocation2 + $0x490] sm:$0xf] }
 0x457   : > { %v4309_v44 = vadd.f32 %v4308_v53, %v4219_v34  ;;  %v9842_v8 = vor.u32 %v10577_v62, %v9841_v26  ;;  %v10560_v62 = vld [vmem:[#allocation2 + $0x414] sm:$0xf] }
 0x458   : > { %v4428_v15 = vunpack.c.l.bf16 %v4381_v45  ;;  %v4429_v4 = vunpack.c.h.bf16 %v4381_v45  ;;  %4080 = vmatmul.bf16.gmra.mxu2 %v11772_v51  ;;  %4169 = vmatmul.bf16.gmra.mxu3 %v11774_v19 }
 0x459   : > { %4258 = vmatmul.bf16.gmra.mxu0 %v11772_v51  ;;  %4347 = vmatmul.bf16.gmra.mxu1 %v11774_v19 }
 0x45a   : > { %v4494_v9 = vadd.f32 %v11839_v58, %v4428_v15  ;;  %v4495_v20 = vadd.f32 %v11841_v22, %v4429_v4  ;;  %5032 = vmatpush.bf16.msrb.mxu3 %v9842_v8 }
 0x45b   : > { %v4041_v6 = vpop.f32.mrf.mxu2  ;;  %v4130_v27 = vpop.f32.mrf.mxu3 }
 0x45c   : > { %v4131_v33 = vadd.f32 %v4130_v27, %v4041_v6  ;;  %v4654_v38 = vmax.f32 %v4494_v9, 0.0  ;;  %v4655_v41 = vmax.f32 %v4495_v20, 0.0 }
 0x45e   : > { %v4382_v14 = vpack.c.bf16 %v4309_v44, %v4131_v33  ;;  %v4221_v21 = vpop.f32.mrf.mxu0  ;;  %v4310_v51 = vpop.f32.mrf.mxu1  ;;  %v11863_v48 = vpack.c.bf16 %v4654_v38, %v4652_v7  ;;  %v11865_v19 = vpack.c.bf16 %v4655_v41, %v4653_v28 }
 0x45f   : > { %v4311_v0 = vadd.f32 %v4310_v51, %v4221_v21 }
 0x460   : > { %v4430_v56 = vunpack.c.l.bf16 %v4382_v14  ;;  %v4431_v52 = vunpack.c.h.bf16 %v4382_v14 }
 0x462   : > { %v4496_v17 = vadd.f32 %v11839_v58, %v4430_v56  ;;  %v4497_v50 = vadd.f32 %v11841_v22, %v4431_v52 }
 0x463   : > { %v4043_v37 = vpop.f32.mrf.mxu2  ;;  %v4132_v47 = vpop.f32.mrf.mxu3 }
 0x464   : > { %v4133_v30 = vadd.f32 %v4132_v47, %v4043_v37  ;;  %v4656_v16 = vmax.f32 %v4496_v17, 0.0  ;;  %v4657_v53 = vmax.f32 %v4497_v50, 0.0  ;;  %v9779_v50 = vld [vmem:[#allocation2 + $0x418] sm:$0xf0] }
 0x465   : > { %v9782_v8 = vor.u32 %v10560_v62, %v9779_v50 }
 0x466   : > { %v4383_v63 = vpack.c.bf16 %v4311_v0, %v4133_v30  ;;  %v4224_v18 = vpop.f32.mrf.mxu0  ;;  %v4313_v54 = vpop.f32.mrf.mxu1 }
 0x467   : > { %v4314_v1 = vadd.f32 %v4313_v54, %v4224_v18  ;;  %5121 = vmatpush.bf16.msrb.mxu0 %v9782_v8 }
 0x468   : > { %v4432_v25 = vunpack.c.l.bf16 %v4383_v63  ;;  %v4433_v57 = vunpack.c.h.bf16 %v4383_v63  ;;  %4085 = vmatmul.bf16.gmra.mxu2 %v11784_v11  ;;  %4174 = vmatmul.bf16.gmra.mxu3 %v11786_v36 }
 0x469   : > { %4263 = vmatmul.bf16.gmra.mxu0 %v11784_v11  ;;  %4352 = vmatmul.bf16.gmra.mxu1 %v11786_v36 }
 0x46a   : > { %v4498_v29 = vadd.f32 %v11839_v58, %v4432_v25  ;;  %v4499_v13 = vadd.f32 %v11841_v22, %v4433_v57 }
 0x46b   : > { %v4046_v61 = vpop.f32.mrf.mxu2  ;;  %v4135_v35 = vpop.f32.mrf.mxu3 }
 0x46c   : > { %v4136_v45 = vadd.f32 %v4135_v35, %v4046_v61  ;;  %v4658_v34 = vmax.f32 %v4498_v29, 0.0  ;;  %v4659_v44 = vmax.f32 %v4499_v13, 0.0 }
 0x46e   : > { %v4384_v55 = vpack.c.bf16 %v4314_v1, %v4136_v45  ;;  %v4226_v15 = vpop.f32.mrf.mxu0  ;;  %v4315_v4 = vpop.f32.mrf.mxu1  ;;  %v11875_v3 = vpack.c.bf16 %v4658_v34, %v4656_v16  ;;  %v11877_v11 = vpack.c.bf16 %v4659_v44, %v4657_v53 }
 0x46f   : > { %v4316_v36 = vadd.f32 %v4315_v4, %v4226_v15 }
 0x470   : > { %v4434_v9 = vunpack.c.l.bf16 %v4384_v55  ;;  %v4435_v27 = vunpack.c.h.bf16 %v4384_v55 }
 0x472   : > { %v4500_v14 = vadd.f32 %v11839_v58, %v4434_v9  ;;  %v4501_v0 = vadd.f32 %v11841_v22, %v4435_v27 }
 0x473   : > { %v4048_v20 = vpop.f32.mrf.mxu2  ;;  %v4137_v6 = vpop.f32.mrf.mxu3 }
 0x474   : > { %v4138_v7 = vadd.f32 %v4137_v6, %v4048_v20  ;;  %v4660_v30 = vmax.f32 %v4500_v14, 0.0  ;;  %v4661_v54 = vmax.f32 %v4501_v0, 0.0 }
 0x476   : > { %v4385_v33 = vpack.c.bf16 %v4316_v36, %v4138_v7  ;;  %v4229_v38 = vpop.f32.mrf.mxu0  ;;  %v4318_v28 = vpop.f32.mrf.mxu1  ;;  %v9833_v36 = vld [vmem:[#allocation2 + $0x480] sm:$0xf] }
 0x477   : > { %v4319_v41 = vadd.f32 %v4318_v28, %v4229_v38  ;;  %v9834_v46 = vor.u32 %v10575_v43, %v9833_v36 }
 0x478   : > { %v4436_v21 = vunpack.c.l.bf16 %v4385_v33  ;;  %v4437_v51 = vunpack.c.h.bf16 %v4385_v33  ;;  %4090 = vmatmul.bf16.gmra.mxu2 %v11796_v59  ;;  %4179 = vmatmul.bf16.gmra.mxu3 %v11798_v40 }
 0x479   : > { %4268 = vmatmul.bf16.gmra.mxu0 %v11796_v59  ;;  %4357 = vmatmul.bf16.gmra.mxu1 %v11798_v40 }
 0x47a   : > { %v4502_v56 = vadd.f32 %v11839_v58, %v4436_v21  ;;  %v4503_v37 = vadd.f32 %v11841_v22, %v4437_v51  ;;  %5033 = vmatpush.bf16.msrb.mxu3 %v9834_v46 }
 0x47b   : > { %v4051_v47 = vpop.f32.mrf.mxu2  ;;  %v4140_v52 = vpop.f32.mrf.mxu3 }
 0x47c   : > { %v4141_v63 = vadd.f32 %v4140_v52, %v4051_v47  ;;  %v4662_v18 = vmax.f32 %v4502_v56, 0.0  ;;  %v4663_v1 = vmax.f32 %v4503_v37, 0.0  ;;  %v10558_v52 = vld [vmem:[#allocation2 + $0x404] sm:$0xf] }
 0x47e   : > { %v4386_v17 = vpack.c.bf16 %v4319_v41, %v4141_v63  ;;  %v4231_v25 = vpop.f32.mrf.mxu0  ;;  %v4320_v59 = vpop.f32.mrf.mxu1  ;;  %v11887_v57 = vpack.c.bf16 %v4662_v18, %v4660_v30  ;;  %v11889_v40 = vpack.c.bf16 %v4663_v1, %v4661_v54  ;;  %v9771_v30 = vld [vmem:[#allocation2 + $0x408] sm:$0xf0] }
 0x47f   : > { %v4321_v26 = vadd.f32 %v4320_v59, %v4231_v25  ;;  %v9774_v54 = vor.u32 %v10558_v52, %v9771_v30 }
 0x480   : > { %v4438_v29 = vunpack.c.l.bf16 %v4386_v17  ;;  %v4439_v35 = vunpack.c.h.bf16 %v4386_v17 }
 0x481   : > { %5122 = vmatpush.bf16.msrb.mxu0 %v9774_v54 }
 0x482   : > { %v4504_v55 = vadd.f32 %v11839_v58, %v4438_v29  ;;  %v4505_v42 = vadd.f32 %v11841_v22, %v4439_v35  ;;  %v9954_v29 = vld [vmem:[#allocation2 + $0x570] sm:$0xf] }
 0x483   : > { %v4053_v13 = vpop.f32.mrf.mxu2  ;;  %v4142_v61 = vpop.f32.mrf.mxu3 }
 0x484   : > { %v4143_v16 = vadd.f32 %v4142_v61, %v4053_v13  ;;  %v4664_v7 = vmax.f32 %v4504_v55, 0.0  ;;  %v4665_v28 = vmax.f32 %v4505_v42, 0.0  ;;  %v10605_v13 = vld [vmem:[#allocation2 + $0x574] sm:$0xf0] }
 0x485   : > { %v9955_v61 = vor.u32 %v10605_v13, %v9954_v29 }
 0x486   : > { %v4387_v45 = vpack.c.bf16 %v4321_v26, %v4143_v16  ;;  %v4234_v34 = vpop.f32.mrf.mxu0  ;;  %v4323_v53 = vpop.f32.mrf.mxu1 }
 0x487   : > { %v4324_v44 = vadd.f32 %v4323_v53, %v4234_v34  ;;  %5852 = vmatpush.bf16.msra.mxu2 %v9955_v61 }
 0x488   : > { %v4440_v15 = vunpack.c.l.bf16 %v4387_v45  ;;  %v4441_v4 = vunpack.c.h.bf16 %v4387_v45  ;;  %4095 = vmatmul.bf16.gmra.mxu2 %v11811_v32  ;;  %4184 = vmatmul.bf16.gmra.mxu3 %v11813_v31 }
 0x489   : > { %4273 = vmatmul.bf16.gmra.mxu0 %v11811_v32  ;;  %4362 = vmatmul.bf16.gmra.mxu1 %v11813_v31 }
 0x48a   : > { %v4506_v9 = vadd.f32 %v11839_v58, %v4440_v15  ;;  %v4507_v20 = vadd.f32 %v11841_v22, %v4441_v4 }
 0x48b   : > { %v4056_v6 = vpop.f32.mrf.mxu2  ;;  %v4145_v27 = vpop.f32.mrf.mxu3 }
 0x48c   : > { %v4146_v33 = vadd.f32 %v4145_v27, %v4056_v6  ;;  %v4666_v38 = vmax.f32 %v4506_v9, 0.0  ;;  %v4667_v41 = vmax.f32 %v4507_v20, 0.0 }
 0x48e   : > { %v4388_v14 = vpack.c.bf16 %v4324_v44, %v4146_v33  ;;  %v4236_v21 = vpop.f32.mrf.mxu0  ;;  %v4325_v51 = vpop.f32.mrf.mxu1  ;;  %v11899_v0 = vpack.c.bf16 %v4666_v38, %v4664_v7  ;;  %v11901_v32 = vpack.c.bf16 %v4667_v41, %v4665_v28 }
 0x48f   : > { %v4326_v31 = vadd.f32 %v4325_v51, %v4236_v21 }
 0x490   : > { %v4442_v56 = vunpack.c.l.bf16 %v4388_v14  ;;  %v4443_v63 = vunpack.c.h.bf16 %v4388_v14 }
 0x492   : > { %v4508_v26 = vadd.f32 %v11839_v58, %v4442_v56  ;;  %v4509_v8 = vadd.f32 %v11841_v22, %v4443_v63 }
 0x493   : > { %v4058_v37 = vpop.f32.mrf.mxu2  ;;  %v4147_v47 = vpop.f32.mrf.mxu3 }
 0x494   : > { %v4148_v18 = vadd.f32 %v4147_v47, %v4058_v37  ;;  %v4668_v53 = vmax.f32 %v4508_v26, 0.0  ;;  %v4669_v15 = vmax.f32 %v4509_v8, 0.0 }
 0x496   : > { %v4389_v1 = vpack.c.bf16 %v4326_v31, %v4148_v18  ;;  %v4239_v17 = vpop.f32.mrf.mxu0  ;;  %v4328_v25 = vpop.f32.mrf.mxu1  ;;  %v10018_v31 = vld [vmem:[#allocation2 + $0x5f0] sm:$0xf] }
 0x497   : > { %v4329_v59 = vadd.f32 %v4328_v25, %v4239_v17  ;;  %v10019_v60 = vor.u32 %v10621_v49, %v10018_v31  ;;  %v10604_v49 = vld [vmem:[#allocation2 + $0x574] sm:$0xf] }
 0x498   : > { %v4444_v62 = vunpack.c.l.bf16 %v4389_v1  ;;  %v4445_v50 = vunpack.c.h.bf16 %v4389_v1  ;;  %4100 = vmatmul.bf16.gmra.mxu2 %v11823_v2  ;;  %4189 = vmatmul.bf16.gmra.mxu3 %v11825_v12 }
 0x499   : > { %4278 = vmatmul.bf16.gmra.mxu0 %v11823_v2  ;;  %4367 = vmatmul.bf16.gmra.mxu1 %v11825_v12 }
 0x49a   : > { %v4510_v35 = vadd.f32 %v11839_v58, %v4444_v62  ;;  %v4511_v16 = vadd.f32 %v11841_v22, %v4445_v50  ;;  %5941 = vmatpush.bf16.msra.mxu3 %v10019_v60  ;;  %v10620_v62 = vld [vmem:[#allocation2 + $0x5f4] sm:$0xf]  ;;  %v10020_v50 = vld [vmem:[#allocation2 + $0x5f8] sm:$0xf0] }
 0x49b   : > { %v4061_v45 = vpop.f32.mrf.mxu2  ;;  %v4150_v34 = vpop.f32.mrf.mxu3  ;;  %v10023_v8 = vor.u32 %v10620_v62, %v10020_v50  ;;  %v10619_v62 = vld [vmem:[#allocation2 + $0x5e4] sm:$0xf0] }
 0x49c   : > { %v4151_v44 = vadd.f32 %v4150_v34, %v4061_v45  ;;  %v4670_v55 = vmax.f32 %v4510_v35, 0.0  ;;  %v4671_v4 = vmax.f32 %v4511_v16, 0.0 }
 0x49d   : > { %6119 = vmatpush.bf16.msra.mxu1 %v10023_v8 }
 0x49e   : > { %v4390_v36 = vpack.c.bf16 %v4329_v59, %v4151_v44  ;;  %v4241_v43 = vpop.f32.mrf.mxu0  ;;  %v4330_v2 = vpop.f32.mrf.mxu1  ;;  %v11911_v42 = vpack.c.bf16 %v4670_v55, %v4668_v53  ;;  %v11913_v12 = vpack.c.bf16 %v4671_v4, %v4669_v15 }
 0x49f   : > { %v4331_v46 = vadd.f32 %v4330_v2, %v4241_v43  ;;  %v9946_v43 = vld [vmem:[#allocation2 + $0x560] sm:$0xf]  ;;  %v10603_v2 = vld [vmem:[#allocation2 + $0x564] sm:$0xf0] }
 0x4a0   : > { %v4446_v9 = vunpack.c.l.bf16 %v4390_v36  ;;  %v4447_v27 = vunpack.c.h.bf16 %v4390_v36 }
 0x4a2   : > { %v4512_v14 = vadd.f32 %v11839_v58, %v4446_v9  ;;  %v4513_v10 = vadd.f32 %v11841_v22, %v4447_v27 }
 0x4a3   : > { %v4063_v20 = vpop.f32.mrf.mxu2  ;;  %v4152_v6 = vpop.f32.mrf.mxu3 }
 0x4a4   : > { %v4153_v7 = vadd.f32 %v4152_v6, %v4063_v20  ;;  %v4672_v30 = vmax.f32 %v4512_v14, 0.0  ;;  %v4673_v54 = vmax.f32 %v4513_v10, 0.0  ;;  %v9956_v10 = vld [vmem:[#allocation2 + $0x578] sm:$0xf0] }
 0x4a5   : > { %v9959_v60 = vor.u32 %v10604_v49, %v9956_v10  ;;  %v9938_v49 = vld [vmem:[#allocation2 + $0x550] sm:$0xf]  ;;  %v10601_v10 = vld [vmem:[#allocation2 + $0x554] sm:$0xf0] }
 0x4a6   : > { %v4391_v33 = vpack.c.bf16 %v4331_v46, %v4153_v7  ;;  %v4244_v38 = vpop.f32.mrf.mxu0  ;;  %v4333_v28 = vpop.f32.mrf.mxu1  ;;  %v9947_v46 = vor.u32 %v10603_v2, %v9946_v43  ;;  %v10618_v43 = vld [vmem:[#allocation2 + $0x5e4] sm:$0xf]  ;;  %v10012_v2 = vld [vmem:[#allocation2 + $0x5e8] sm:$0xf0] }
 0x4a7   : > { %v4334_v41 = vadd.f32 %v4333_v28, %v4244_v38  ;;  %6030 = vmatpush.bf16.msra.mxu0 %v9959_v60  ;;  %v9939_v60 = vor.u32 %v10601_v10, %v9938_v49  ;;  %v10616_v49 = vld [vmem:[#allocation2 + $0x5d4] sm:$0xf]  ;;  %v10004_v10 = vld [vmem:[#allocation2 + $0x5d8] sm:$0xf0] }
 0x4a8   : > { %v4448_v21 = vunpack.c.l.bf16 %v4391_v33  ;;  %v4449_v51 = vunpack.c.h.bf16 %v4391_v33  ;;  %4105 = vmatmul.bf16.gmra.mxu2 %v11835_v5  ;;  %4194 = vmatmul.bf16.gmra.mxu3 %v11837_v39 }
 0x4a9   : > { %4283 = vmatmul.bf16.gmra.mxu0 %v11835_v5  ;;  %4372 = vmatmul.bf16.gmra.mxu1 %v11837_v39 }
 0x4aa   : > { %v4514_v56 = vadd.f32 %v11839_v58, %v4448_v21  ;;  %v4515_v37 = vadd.f32 %v11841_v22, %v4449_v51  ;;  %5853 = vmatpush.bf16.msra.mxu2 %v9947_v46  ;;  %v10015_v46 = vor.u32 %v10618_v43, %v10012_v2  ;;  %v10617_v43 = vld [vmem:[#allocation2 + $0x5d4] sm:$0xf0] }
 0x4ab   : > { %v4066_v47 = vpop.f32.mrf.mxu2  ;;  %v4155_v52 = vpop.f32.mrf.mxu3 }
 0x4ac   : > { %v4156_v63 = vadd.f32 %v4155_v52, %v4066_v47  ;;  %v4674_v18 = vmax.f32 %v4514_v56, 0.0  ;;  %v4675_v1 = vmax.f32 %v4515_v37, 0.0  ;;  %6120 = vmatpush.bf16.msra.mxu1 %v10015_v46 }
 0x4ae   : > { %v4392_v17 = vpack.c.bf16 %v4334_v41, %v4156_v63  ;;  %v4246_v25 = vpop.f32.mrf.mxu0  ;;  %v4335_v59 = vpop.f32.mrf.mxu1  ;;  %v11923_v26 = vpack.c.bf16 %v4674_v18, %v4672_v30  ;;  %v11925_v5 = vpack.c.bf16 %v4675_v1, %v4673_v54  ;;  %5854 = vmatpush.bf16.msra.mxu2 %v9939_v60  ;;  %v10007_v60 = vor.u32 %v10616_v49, %v10004_v10  ;;  %v10615_v49 = vld [vmem:[#allocation2 + $0x5c4] sm:$0xf0] }
 0x4af   : > { %v4336_v39 = vadd.f32 %v4335_v59, %v4246_v25 }
 0x4b0   : > { %v4450_v29 = vunpack.c.l.bf16 %v4392_v17  ;;  %v4451_v35 = vunpack.c.h.bf16 %v4392_v17  ;;  %6121 = vmatpush.bf16.msra.mxu1 %v10007_v60 }
 0x4b2   : > { %v4516_v55 = vadd.f32 %v11839_v58, %v4450_v29  ;;  %v4517_v36 = vadd.f32 %v11841_v22, %v4451_v35 }
 0x4b3   : > { %v4068_v13 = vpop.f32.mrf.mxu2  ;;  %v4157_v61 = vpop.f32.mrf.mxu3 }
 0x4b4   : > { %v4158_v16 = vadd.f32 %v4157_v61, %v4068_v13  ;;  %v4676_v7 = vmax.f32 %v4516_v55, 0.0  ;;  %v4677_v28 = vmax.f32 %v4517_v36, 0.0 }
 0x4b6   : > { %v4393_v45 = vpack.c.bf16 %v4336_v39, %v4158_v16  ;;  %v4249_v34 = vpop.f32.mrf.mxu0  ;;  %v4338_v53 = vpop.f32.mrf.mxu1  ;;  %v10010_v39 = vld [vmem:[#allocation2 + $0x5e0] sm:$0xf] }
 0x4b7   : > { %v4339_v44 = vadd.f32 %v4338_v53, %v4249_v34  ;;  %v10011_v8 = vor.u32 %v10619_v62, %v10010_v39  ;;  %v10602_v62 = vld [vmem:[#allocation2 + $0x564] sm:$0xf] }
 0x4b8   : > { %v4452_v15 = vunpack.c.l.bf16 %v4393_v45  ;;  %v4453_v4 = vunpack.c.h.bf16 %v4393_v45  ;;  %4945 = vmatmul.bf16.vlgmr.msrb.gmra.mxu2 %v11851_v23  ;;  %5034 = vmatmul.bf16.vlgmr.msrb.gmra.mxu3 %v11853_v24 }
 0x4b9   : > { %5123 = vmatmul.bf16.vlgmr.msrb.gmra.mxu0 %v11851_v23  ;;  %5212 = vmatmul.bf16.vlgmr.msrb.gmra.mxu1 %v11853_v24 }
 0x4ba   : > { %v4518_v9 = vadd.f32 %v11839_v58, %v4452_v15  ;;  %v4519_v20 = vadd.f32 %v11841_v22, %v4453_v4  ;;  %5942 = vmatpush.bf16.msra.mxu3 %v10011_v8 }
 0x4bb   : > { %v4071_v6 = vpop.f32.mrf.mxu2  ;;  %v4160_v27 = vpop.f32.mrf.mxu3 }
 0x4bc   : > { %v4161_v33 = vadd.f32 %v4160_v27, %v4071_v6  ;;  %v4678_v38 = vmax.f32 %v4518_v9, 0.0  ;;  %v4679_v41 = vmax.f32 %v4519_v20, 0.0 }
 0x4be   : > { %v4394_v14 = vpack.c.bf16 %v4339_v44, %v4161_v33  ;;  %v4251_v21 = vpop.f32.mrf.mxu0  ;;  %v4340_v23 = vpop.f32.mrf.mxu1  ;;  %v11935_v51 = vpack.c.bf16 %v4678_v38, %v4676_v7  ;;  %v11937_v24 = vpack.c.bf16 %v4679_v41, %v4677_v28 }
 0x4bf   : > { %v4341_v31 = vadd.f32 %v4340_v23, %v4251_v21 }
 0x4c0   : > { %v4454_v56 = vunpack.c.l.bf16 %v4394_v14  ;;  %v4455_v52 = vunpack.c.h.bf16 %v4394_v14 }
 0x4c2   : > { %v4520_v17 = vadd.f32 %v11839_v58, %v4454_v56  ;;  %v4521_v50 = vadd.f32 %v11841_v22, %v4455_v52 }
 0x4c3   : > { %v4073_v37 = vpop.f32.mrf.mxu2  ;;  %v4162_v47 = vpop.f32.mrf.mxu3 }
 0x4c4   : > { %v4163_v30 = vadd.f32 %v4162_v47, %v4073_v37  ;;  %v4680_v16 = vmax.f32 %v4520_v17, 0.0  ;;  %v4681_v53 = vmax.f32 %v4521_v50, 0.0  ;;  %v9948_v50 = vld [vmem:[#allocation2 + $0x568] sm:$0xf0] }
 0x4c5   : > { %v9951_v8 = vor.u32 %v10602_v62, %v9948_v50  ;;  %v9930_v62 = vld [vmem:[#allocation2 + $0x540] sm:$0xf]  ;;  %v10599_v50 = vld [vmem:[#allocation2 + $0x544] sm:$0xf0] }
 0x4c6   : > { %v4395_v63 = vpack.c.bf16 %v4341_v31, %v4163_v30  ;;  %v4254_v18 = vpop.f32.mrf.mxu0  ;;  %v4343_v54 = vpop.f32.mrf.mxu1 }
 0x4c7   : > { %v4344_v1 = vadd.f32 %v4343_v54, %v4254_v18  ;;  %6031 = vmatpush.bf16.msra.mxu0 %v9951_v8  ;;  %v9931_v8 = vor.u32 %v10599_v50, %v9930_v62  ;;  %v10614_v62 = vld [vmem:[#allocation2 + $0x5c4] sm:$0xf]  ;;  %v9996_v50 = vld [vmem:[#allocation2 + $0x5c8] sm:$0xf0] }
 0x4c8   : > { %v4456_v25 = vunpack.c.l.bf16 %v4395_v63  ;;  %v4457_v59 = vunpack.c.h.bf16 %v4395_v63  ;;  %4950 = vmatmul.bf16.gmra.mxu2 %v11863_v48  ;;  %5039 = vmatmul.bf16.gmra.mxu3 %v11865_v19 }
 0x4c9   : > { %5128 = vmatmul.bf16.gmra.mxu0 %v11863_v48  ;;  %5217 = vmatmul.bf16.gmra.mxu1 %v11865_v19 }
 0x4ca   : > { %v4522_v29 = vadd.f32 %v11839_v58, %v4456_v25  ;;  %v4523_v13 = vadd.f32 %v11841_v22, %v4457_v59  ;;  %5855 = vmatpush.bf16.msra.mxu2 %v9931_v8  ;;  %v9999_v8 = vor.u32 %v10614_v62, %v9996_v50 }
 0x4cb   : > { %v4076_v61 = vpop.f32.mrf.mxu2  ;;  %v4165_v35 = vpop.f32.mrf.mxu3 }
 0x4cc   : > { %v4166_v45 = vadd.f32 %v4165_v35, %v4076_v61  ;;  %v4682_v34 = vmax.f32 %v4522_v29, 0.0  ;;  %v4683_v44 = vmax.f32 %v4523_v13, 0.0  ;;  %6122 = vmatpush.bf16.msra.mxu1 %v9999_v8 }
 0x4ce   : > { %v4396_v55 = vpack.c.bf16 %v4344_v1, %v4166_v45  ;;  %v4256_v15 = vpop.f32.mrf.mxu0  ;;  %v4345_v4 = vpop.f32.mrf.mxu1  ;;  %v11947_v36 = vpack.c.bf16 %v4682_v34, %v4680_v16  ;;  %v11949_v48 = vpack.c.bf16 %v4683_v44, %v4681_v53 }
 0x4cf   : > { %v4346_v19 = vadd.f32 %v4345_v4, %v4256_v15 }
 0x4d0   : > { %v4458_v9 = vunpack.c.l.bf16 %v4396_v55  ;;  %v4459_v27 = vunpack.c.h.bf16 %v4396_v55 }
 0x4d2   : > { %v4524_v14 = vadd.f32 %v11839_v58, %v4458_v9  ;;  %v4525_v31 = vadd.f32 %v11841_v22, %v4459_v27 }
 0x4d3   : > { %v4078_v20 = vpop.f32.mrf.mxu2  ;;  %v4167_v6 = vpop.f32.mrf.mxu3 }
 0x4d4   : > { %v4168_v7 = vadd.f32 %v4167_v6, %v4078_v20  ;;  %v4684_v30 = vmax.f32 %v4524_v14, 0.0  ;;  %v4685_v54 = vmax.f32 %v4525_v31, 0.0 }
 0x4d6   : > { %v4397_v33 = vpack.c.bf16 %v4346_v19, %v4168_v7  ;;  %v4259_v38 = vpop.f32.mrf.mxu0  ;;  %v4348_v28 = vpop.f32.mrf.mxu1  ;;  %v10002_v19 = vld [vmem:[#allocation2 + $0x5d0] sm:$0xf] }
 0x4d7   : > { %v4349_v41 = vadd.f32 %v4348_v28, %v4259_v38  ;;  %v10003_v46 = vor.u32 %v10617_v43, %v10002_v19  ;;  %v10600_v43 = vld [vmem:[#allocation2 + $0x554] sm:$0xf] }
 0x4d8   : > { %v4460_v21 = vunpack.c.l.bf16 %v4397_v33  ;;  %v4461_v23 = vunpack.c.h.bf16 %v4397_v33  ;;  %4955 = vmatmul.bf16.gmra.mxu2 %v11875_v3  ;;  %5044 = vmatmul.bf16.gmra.mxu3 %v11877_v11 }
 0x4d9   : > { %5133 = vmatmul.bf16.gmra.mxu0 %v11875_v3  ;;  %5222 = vmatmul.bf16.gmra.mxu1 %v11877_v11 }
 0x4da   : > { %v4526_v56 = vadd.f32 %v11839_v58, %v4460_v21  ;;  %v4527_v37 = vadd.f32 %v11841_v22, %v4461_v23  ;;  %5943 = vmatpush.bf16.msra.mxu3 %v10003_v46 }
 0x4db   : > { %v4081_v47 = vpop.f32.mrf.mxu2  ;;  %v4170_v52 = vpop.f32.mrf.mxu3 }
 0x4dc   : > { %v4171_v63 = vadd.f32 %v4170_v52, %v4081_v47  ;;  %v4686_v18 = vmax.f32 %v4526_v56, 0.0  ;;  %v4687_v1 = vmax.f32 %v4527_v37, 0.0 }
 0x4de   : > { %v4398_v17 = vpack.c.bf16 %v4349_v41, %v4171_v63  ;;  %v4261_v25 = vpop.f32.mrf.mxu0  ;;  %v4350_v3 = vpop.f32.mrf.mxu1  ;;  %v11959_v59 = vpack.c.bf16 %v4686_v18, %v4684_v30  ;;  %v11961_v11 = vpack.c.bf16 %v4687_v1, %v4685_v54 }
 0x4df   : > { %v4351_v39 = vadd.f32 %v4350_v3, %v4261_v25 }
 0x4e0   : > { %v4462_v29 = vunpack.c.l.bf16 %v4398_v17  ;;  %v4463_v35 = vunpack.c.h.bf16 %v4398_v17 }
 0x4e2   : > { %v4528_v55 = vadd.f32 %v11839_v58, %v4462_v29  ;;  %v4529_v2 = vadd.f32 %v11841_v22, %v4463_v35 }
 0x4e3   : > { %v4083_v13 = vpop.f32.mrf.mxu2  ;;  %v4172_v61 = vpop.f32.mrf.mxu3 }
 0x4e4   : > { %v4173_v16 = vadd.f32 %v4172_v61, %v4083_v13  ;;  %v4688_v7 = vmax.f32 %v4528_v55, 0.0  ;;  %v4689_v28 = vmax.f32 %v4529_v2, 0.0  ;;  %v9940_v2 = vld [vmem:[#allocation2 + $0x558] sm:$0xf0] }
 0x4e5   : > { %v9943_v46 = vor.u32 %v10600_v43, %v9940_v2  ;;  %v9922_v2 = vld [vmem:[#allocation2 + $0x530] sm:$0xf] }
 0x4e6   : > { %v4399_v45 = vpack.c.bf16 %v4351_v39, %v4173_v16  ;;  %v4264_v34 = vpop.f32.mrf.mxu0  ;;  %v4353_v53 = vpop.f32.mrf.mxu1 }
 0x4e7   : > { %v4354_v44 = vadd.f32 %v4353_v53, %v4264_v34  ;;  %6032 = vmatpush.bf16.msra.mxu0 %v9943_v46  ;;  %v10597_v46 = vld [vmem:[#allocation2 + $0x534] sm:$0xf0] }
 0x4e8   : > { %v4464_v15 = vunpack.c.l.bf16 %v4399_v45  ;;  %v4465_v4 = vunpack.c.h.bf16 %v4399_v45  ;;  %4960 = vmatmul.bf16.gmra.mxu2 %v11887_v57  ;;  %5049 = vmatmul.bf16.gmra.mxu3 %v11889_v40 }
 0x4e9   : > { %5138 = vmatmul.bf16.gmra.mxu0 %v11887_v57  ;;  %5227 = vmatmul.bf16.gmra.mxu1 %v11889_v40 }
 0x4ea   : > { %v4530_v9 = vadd.f32 %v11839_v58, %v4464_v15  ;;  %v4531_v20 = vadd.f32 %v11841_v22, %v4465_v4 }
 0x4eb   : > { %v4086_v6 = vpop.f32.mrf.mxu2  ;;  %v4175_v27 = vpop.f32.mrf.mxu3 }
 0x4ec   : > { %v4176_v33 = vadd.f32 %v4175_v27, %v4086_v6  ;;  %v4690_v38 = vmax.f32 %v4530_v9, 0.0  ;;  %v4691_v41 = vmax.f32 %v4531_v20, 0.0 }
 0x4ee   : > { %v4400_v14 = vpack.c.bf16 %v4354_v44, %v4176_v33  ;;  %v4266_v21 = vpop.f32.mrf.mxu0  ;;  %v4355_v23 = vpop.f32.mrf.mxu1  ;;  %v11971_v31 = vpack.c.bf16 %v4690_v38, %v4688_v7  ;;  %v11973_v57 = vpack.c.bf16 %v4691_v41, %v4689_v28 }
 0x4ef   : > { %v4356_v40 = vadd.f32 %v4355_v23, %v4266_v21 }
 0x4f0   : > { %v4466_v56 = vunpack.c.l.bf16 %v4400_v14  ;;  %v4467_v52 = vunpack.c.h.bf16 %v4400_v14 }
 0x4f2   : > { %v4532_v17 = vadd.f32 %v11839_v58, %v4466_v56  ;;  %v4533_v39 = vadd.f32 %v11841_v22, %v4467_v52 }
 0x4f3   : > { %v4088_v37 = vpop.f32.mrf.mxu2  ;;  %v4177_v47 = vpop.f32.mrf.mxu3 }
 0x4f4   : > { %v4178_v30 = vadd.f32 %v4177_v47, %v4088_v37  ;;  %v4692_v16 = vmax.f32 %v4532_v17, 0.0  ;;  %v4693_v53 = vmax.f32 %v4533_v39, 0.0 }
 0x4f6   : > { %v4401_v63 = vpack.c.bf16 %v4356_v40, %v4178_v30  ;;  %v4269_v18 = vpop.f32.mrf.mxu0  ;;  %v4358_v54 = vpop.f32.mrf.mxu1  ;;  %v9994_v40 = vld [vmem:[#allocation2 + $0x5c0] sm:$0xf] }
 0x4f7   : > { %v4359_v1 = vadd.f32 %v4358_v54, %v4269_v18  ;;  %v9995_v60 = vor.u32 %v10615_v49, %v9994_v40 }
 0x4f8   : > { %v4468_v25 = vunpack.c.l.bf16 %v4401_v63  ;;  %v4469_v3 = vunpack.c.h.bf16 %v4401_v63  ;;  %4965 = vmatmul.bf16.gmra.mxu2 %v11899_v0  ;;  %5054 = vmatmul.bf16.gmra.mxu3 %v11901_v32 }
 0x4f9   : > { %5143 = vmatmul.bf16.gmra.mxu0 %v11899_v0  ;;  %5232 = vmatmul.bf16.gmra.mxu1 %v11901_v32 }
 0x4fa   : > { %v4534_v29 = vadd.f32 %v11839_v58, %v4468_v25  ;;  %v4535_v13 = vadd.f32 %v11841_v22, %v4469_v3  ;;  %5944 = vmatpush.bf16.msra.mxu3 %v9995_v60 }
 0x4fb   : > { %v4091_v61 = vpop.f32.mrf.mxu2  ;;  %v4180_v35 = vpop.f32.mrf.mxu3 }
 0x4fc   : > { %v4181_v45 = vadd.f32 %v4180_v35, %v4091_v61  ;;  %v4694_v34 = vmax.f32 %v4534_v29, 0.0  ;;  %v4695_v44 = vmax.f32 %v4535_v13, 0.0 }
 0x4fe   : > { %v4402_v55 = vpack.c.bf16 %v4359_v1, %v4181_v45  ;;  %v4271_v15 = vpop.f32.mrf.mxu0  ;;  %v4360_v0 = vpop.f32.mrf.mxu1  ;;  %v11983_v4 = vpack.c.bf16 %v4694_v34, %v4692_v16  ;;  %v11985_v32 = vpack.c.bf16 %v4695_v44, %v4693_v53  ;;  %v9895_v45 = vld [vmem:[%s13088_s4 + $0x8] sm:$0x3] }
 0x4ff   : > { %v4361_v19 = vadd.f32 %v4360_v0, %v4271_v15  ;;  %5328 = vst [vmem:[#allocation1] ss:$9 sm:$0xff] %v9895_v45 }
 0x500   : > { %v4470_v9 = vunpack.c.l.bf16 %v4402_v55  ;;  %v4471_v27 = vunpack.c.h.bf16 %v4402_v55 }
 0x502   : > { %v4536_v14 = vadd.f32 %v11839_v58, %v4470_v9  ;;  %v4537_v10 = vadd.f32 %v11841_v22, %v4471_v27  ;;  %v9923_v9 = vor.u32 %v10597_v46, %v9922_v2  ;;  %v10612_v2 = vld [vmem:[#allocation2 + $0x5b4] sm:$0xf]  ;;  %v9988_v46 = vld [vmem:[#allocation2 + $0x5b8] sm:$0xf0] }
 0x503   : > { %v4093_v20 = vpop.f32.mrf.mxu2  ;;  %v4182_v6 = vpop.f32.mrf.mxu3 }
 0x504   : > { %v4183_v7 = vadd.f32 %v4182_v6, %v4093_v20  ;;  %v4696_v30 = vmax.f32 %v4536_v14, 0.0  ;;  %v4697_v54 = vmax.f32 %v4537_v10, 0.0  ;;  %5856 = vmatpush.bf16.msra.mxu2 %v9923_v9  ;;  %v9991_v9 = vor.u32 %v10612_v2, %v9988_v46 }
 0x506   : > { %v4403_v33 = vpack.c.bf16 %v4361_v19, %v4183_v7  ;;  %v4274_v38 = vpop.f32.mrf.mxu0  ;;  %v4363_v28 = vpop.f32.mrf.mxu1  ;;  %6123 = vmatpush.bf16.msra.mxu1 %v9991_v9 }
 0x507   : > { %v4364_v41 = vadd.f32 %v4363_v28, %v4274_v38 }
 0x508   : > { %v4472_v21 = vunpack.c.l.bf16 %v4403_v33  ;;  %v4473_v23 = vunpack.c.h.bf16 %v4403_v33  ;;  %4970 = vmatmul.bf16.gmra.mxu2 %v11911_v42  ;;  %5059 = vmatmul.bf16.gmra.mxu3 %v11913_v12 }
 0x509   : > { %5148 = vmatmul.bf16.gmra.mxu0 %v11911_v42  ;;  %5237 = vmatmul.bf16.gmra.mxu1 %v11913_v12 }
 0x50a   : > { %v4538_v56 = vadd.f32 %v11839_v58, %v4472_v21  ;;  %v4539_v37 = vadd.f32 %v11841_v22, %v4473_v23 }
 0x50b   : > { %v4096_v47 = vpop.f32.mrf.mxu2  ;;  %v4185_v52 = vpop.f32.mrf.mxu3 }
 0x50c   : > { %v4186_v63 = vadd.f32 %v4185_v52, %v4096_v47  ;;  %v4698_v18 = vmax.f32 %v4538_v56, 0.0  ;;  %v4699_v1 = vmax.f32 %v4539_v37, 0.0  ;;  %v10598_v52 = vld [vmem:[#allocation2 + $0x544] sm:$0xf] }
 0x50e   : > { %v4404_v17 = vpack.c.bf16 %v4364_v41, %v4186_v63  ;;  %v4276_v25 = vpop.f32.mrf.mxu0  ;;  %v4365_v3 = vpop.f32.mrf.mxu1  ;;  %v11995_v39 = vpack.c.bf16 %v4698_v18, %v4696_v30  ;;  %v11997_v42 = vpack.c.bf16 %v4699_v1, %v4697_v54  ;;  %v9932_v30 = vld [vmem:[#allocation2 + $0x548] sm:$0xf0] }
 0x50f   : > { %v4366_v12 = vadd.f32 %v4365_v3, %v4276_v25  ;;  %v9935_v63 = vor.u32 %v10598_v52, %v9932_v30 }
 0x510   : > { %v4474_v29 = vunpack.c.l.bf16 %v4404_v17  ;;  %v4475_v35 = vunpack.c.h.bf16 %v4404_v17 }
 0x511   : > { %6033 = vmatpush.bf16.msra.mxu0 %v9935_v63 }
 0x512   : > { %v4540_v15 = vadd.f32 %v11839_v58, %v4474_v29  ;;  %v4541_v43 = vadd.f32 %v11841_v22, %v4475_v35 }
 0x513   : > { %v4098_v13 = vpop.f32.mrf.mxu2  ;;  %v4187_v61 = vpop.f32.mrf.mxu3 }
 0x514   : > { %v4188_v16 = vadd.f32 %v4187_v61, %v4098_v13  ;;  %v4700_v33 = vmax.f32 %v4540_v15, 0.0  ;;  %v4701_v41 = vmax.f32 %v4541_v43, 0.0  ;;  %v9986_v15 = vld [vmem:[#allocation2 + $0x5b0] sm:$0xf] }
 0x516   : > { %v4405_v34 = vpack.c.bf16 %v4366_v12, %v4188_v16  ;;  %v4279_v53 = vpop.f32.mrf.mxu0  ;;  %v4368_v44 = vpop.f32.mrf.mxu1 }
 0x517   : > { %v4369_v55 = vadd.f32 %v4368_v44, %v4279_v53 }
 0x518   : > { %v4476_v0 = vunpack.c.l.bf16 %v4405_v34  ;;  %v4477_v19 = vunpack.c.h.bf16 %v4405_v34  ;;  %4975 = vmatmul.bf16.gmra.mxu2 %v11923_v26  ;;  %5064 = vmatmul.bf16.gmra.mxu3 %v11925_v5 }
 0x519   : > { %5153 = vmatmul.bf16.gmra.mxu0 %v11923_v26  ;;  %5242 = vmatmul.bf16.gmra.mxu1 %v11925_v5 }
 0x51a   : > { %v4542_v20 = vadd.f32 %v11839_v58, %v4476_v0  ;;  %v4543_v6 = vadd.f32 %v11841_v22, %v4477_v19  ;;  %v10613_v0 = vld [vmem:[#allocation2 + $0x5b4] sm:$0xf0] }
 0x51b   : > { %v4101_v27 = vpop.f32.mrf.mxu2  ;;  %v4190_v7 = vpop.f32.mrf.mxu3  ;;  %v9987_v43 = vor.u32 %v10613_v0, %v9986_v15 }
 0x51c   : > { %v4191_v38 = vadd.f32 %v4190_v7, %v4101_v27  ;;  %v4702_v28 = vmax.f32 %v4542_v20, 0.0  ;;  %v4703_v14 = vmax.f32 %v4543_v6, 0.0 }
 0x51d   : > { %5945 = vmatpush.bf16.msra.mxu3 %v9987_v43 }
 0x51e   : > { %v4406_v21 = vpack.c.bf16 %v4369_v55, %v4191_v38  ;;  %v4281_v23 = vpop.f32.mrf.mxu0  ;;  %v4370_v26 = vpop.f32.mrf.mxu1  ;;  %v12010_v40 = vpack.c.bf16 %v4702_v28, %v4700_v33  ;;  %v12012_v5 = vpack.c.bf16 %v4703_v14, %v4701_v41 }
 0x51f   : > { %v4371_v49 = vadd.f32 %v4370_v26, %v4281_v23 }
 0x520   : > { %v4478_v10 = vunpack.c.l.bf16 %v4406_v21  ;;  %v4479_v37 = vunpack.c.h.bf16 %v4406_v21 }
 0x522   : > { %v4544_v25 = vadd.f32 %v11839_v58, %v4478_v10  ;;  %v4545_v62 = vadd.f32 %v11841_v22, %v4479_v37  ;;  %v5330_v10 = vld [vmem:[#allocation1 + $0x9] sm:$0xff] }
 0x523   : > { %v4103_v60 = vpop.f32.mrf.mxu2  ;;  %v4192_v56 = vpop.f32.mrf.mxu3  ;;  %v10595_v37 = vld [vmem:[#allocation2 + $0x524] sm:$0xf0] }
 0x524   : > { %v4193_v47 = vadd.f32 %v4192_v56, %v4103_v60  ;;  %v4704_v61 = vmax.f32 %v4544_v25, 0.0  ;;  %v4705_v45 = vmax.f32 %v4545_v62, 0.0  ;;  %v9914_v56 = vld [vmem:[#allocation2 + $0x520] sm:$0xf] }
 0x526   : > { %v4407_v18 = vpack.c.bf16 %v4371_v49, %v4193_v47  ;;  %v4284_v54 = vpop.f32.mrf.mxu0  ;;  %v4373_v1 = vpop.f32.mrf.mxu1  ;;  %v5329_v49 = vld [vmem:[#allocation1] sm:$0xff]  ;;  %v9915_v47 = vor.u32 %v10595_v37, %v9914_v56 }
 0x527   : > { %v4374_v17 = vadd.f32 %v4373_v1, %v4284_v54  ;;  %v5331_v54 = vpack.i.b16 %v5329_v49, %v5329_v49  ;;  %v5334_v1 = vpack.i.b16 %v5330_v10, %v5330_v10 }
 0x528   : > { %v4480_v3 = vunpack.c.l.bf16 %v4407_v18  ;;  %v4481_v12 = vunpack.c.h.bf16 %v4407_v18  ;;  %4980 = vmatmul.bf16.gmra.mxu2 %v11935_v51  ;;  %5069 = vmatmul.bf16.gmra.mxu3 %v11937_v24 }
 0x529   : > { %5158 = vmatmul.bf16.gmra.mxu0 %v11935_v51  ;;  %5247 = vmatmul.bf16.gmra.mxu1 %v11937_v24 }
 0x52a   : > { %v4546_v50 = vadd.f32 %v11839_v58, %v4480_v3  ;;  %v4547_v8 = vadd.f32 %v11841_v22, %v4481_v12  ;;  %5857 = vmatpush.bf16.msra.mxu2 %v9915_v47 }
 0x52b   : > { %v4106_v29 = vpop.f32.mrf.mxu2  ;;  %v4195_v13 = vpop.f32.mrf.mxu3 }
 0x52c   : > { %v4196_v35 = vadd.f32 %v4195_v13, %v4106_v29  ;;  %v4706_v16 = vmax.f32 %v4546_v50, 0.0  ;;  %v4707_v34 = vmax.f32 %v4547_v8, 0.0 }
 0x52e   : > { %v4408_v53 = vpack.c.bf16 %v4374_v17, %v4196_v35  ;;  %v4286_v44 = vpop.f32.mrf.mxu0  ;;  %v4375_v55 = vpop.f32.mrf.mxu1  ;;  %v12022_v19 = vpack.c.bf16 %v4706_v16, %v4704_v61  ;;  %v12024_v51 = vpack.c.bf16 %v4707_v34, %v4705_v45  ;;  %v10596_v61 = vld [vmem:[#allocation2 + $0x534] sm:$0xf]  ;;  %v9924_v35 = vld [vmem:[#allocation2 + $0x538] sm:$0xf0] }
 0x52f   : > { %v4376_v24 = vadd.f32 %v4375_v55, %v4286_v44  ;;  %v9927_v16 = vor.u32 %v10596_v61, %v9924_v35  ;;  %v9906_v61 = vld [vmem:[#allocation2 + $0x510] sm:$0xf]  ;;  %v10593_v35 = vld [vmem:[#allocation2 + $0x514] sm:$0xf0] }
 0x530   : > { %v4482_v20 = vunpack.c.l.bf16 %v4408_v53  ;;  %v4483_v7 = vunpack.c.h.bf16 %v4408_v53 }
 0x531   : > { %6034 = vmatpush.bf16.msra.mxu0 %v9927_v16  ;;  %v9907_v16 = vor.u32 %v10593_v35, %v9906_v61  ;;  %v10608_v61 = vld [vmem:[#allocation2 + $0x594] sm:$0xf]  ;;  %v9972_v35 = vld [vmem:[#allocation2 + $0x598] sm:$0xf0] }
 0x532   : > { %v4548_v21 = vadd.f32 %v11839_v58, %v4482_v20  ;;  %v4549_v60 = vadd.f32 %v11841_v22, %v4483_v7  ;;  %v9978_v7 = vld [vmem:[#allocation2 + $0x5a0] sm:$0xf] }
 0x533   : > { %v4108_v6 = vpop.f32.mrf.mxu2  ;;  %v4197_v27 = vpop.f32.mrf.mxu3  ;;  %5858 = vmatpush.bf16.msra.mxu2 %v9907_v16  ;;  %v9975_v16 = vor.u32 %v10608_v61, %v9972_v35  ;;  %v10607_v61 = vld [vmem:[#allocation2 + $0x584] sm:$0xf0] }
 0x534   : > { %v4198_v33 = vadd.f32 %v4197_v27, %v4108_v6  ;;  %v4708_v17 = vmax.f32 %v4548_v21, 0.0  ;;  %v4709_v12 = vmax.f32 %v4549_v60, 0.0 }
 0x536   : > { %v4409_v38 = vpack.c.bf16 %v4376_v24, %v4198_v33  ;;  %v5124_v28 = vpop.f32.mrf.mxu0  ;;  %v5213_v41 = vpop.f32.mrf.mxu1  ;;  %v10611_v33 = vld [vmem:[#allocation2 + $0x5a4] sm:$0xf0] }
 0x537   : > { %v5214_v14 = vadd.f32 %v5213_v41, %v5124_v28 }
 0x538   : > { %v4484_v23 = vunpack.c.l.bf16 %v4409_v38  ;;  %v4485_v26 = vunpack.c.h.bf16 %v4409_v38  ;;  %4985 = vmatmul.bf16.gmra.mxu2 %v11947_v36  ;;  %5074 = vmatmul.bf16.gmra.mxu3 %v11949_v48  ;;  %v9979_v38 = vor.u32 %v10611_v33, %v9978_v7  ;;  %v10594_v7 = vld [vmem:[#allocation2 + $0x524] sm:$0xf]  ;;  %v9916_v33 = vld [vmem:[#allocation2 + $0x528] sm:$0xf0] }
 0x539   : > { %5163 = vmatmul.bf16.gmra.mxu0 %v11947_v36  ;;  %5252 = vmatmul.bf16.gmra.mxu1 %v11949_v48 }
 0x53a   : > { %v4550_v52 = vadd.f32 %v11839_v58, %v4484_v23  ;;  %v4551_v30 = vadd.f32 %v11841_v22, %v4485_v26  ;;  %v5333_v58 = vperm.slane %v5331_v54, 0  ;;  %v5336_v22 = vperm.slane %v5334_v1, 0  ;;  %5946 = vmatpush.bf16.msra.mxu3 %v9979_v38 }
 0x53b   : > { %v4946_v63 = vpop.f32.mrf.mxu2  ;;  %v5035_v18 = vpop.f32.mrf.mxu3  ;;  %v9919_v38 = vor.u32 %v10594_v7, %v9916_v33  ;;  %v9898_v7 = vld [vmem:[#allocation2 + $0x500] sm:$0xf]  ;;  %v10591_v33 = vld [vmem:[#allocation2 + $0x504] sm:$0xf0] }
 0x53c   : > { %v5036_v25 = vadd.f32 %v5035_v18, %v4946_v63  ;;  %v4710_v3 = vmax.f32 %v4550_v52, 0.0  ;;  %v4711_v62 = vmax.f32 %v4551_v30, 0.0  ;;  %v12038_v34 = vunpack.c.l.bf16 %v5333_v58  ;;  %v10610_v30 = vld [vmem:[#allocation2 + $0x5a4] sm:$0xf]  ;;  %v9980_v63 = vld [vmem:[#allocation2 + $0x5a8] sm:$0xf0] }
 0x53d   : > { %v12040_v15 = vunpack.c.l.bf16 %v5336_v22  ;;  %v9983_v18 = vor.u32 %v10610_v30, %v9980_v63  ;;  %6035 = vmatpush.bf16.msra.mxu0 %v9919_v38  ;;  %v10609_v30 = vld [vmem:[#allocation2 + $0x594] sm:$0xf0]  ;;  %v9899_v38 = vor.u32 %v10591_v33, %v9898_v7  ;;  %v10606_v7 = vld [vmem:[#allocation2 + $0x584] sm:$0xf]  ;;  %v9964_v33 = vld [vmem:[#allocation2 + $0x588] sm:$0xf0] }
 0x53e   : > { %v5293_v36 = vpack.c.bf16 %v5214_v14, %v5036_v25  ;;  %v5126_v50 = vpop.f32.mrf.mxu0  ;;  %v5215_v48 = vpop.f32.mrf.mxu1  ;;  %v12034_v8 = vpack.c.bf16 %v4710_v3, %v4708_v17  ;;  %v12036_v29 = vpack.c.bf16 %v4711_v62, %v4709_v12 }
 0x53f   : > { %v5216_v13 = vadd.f32 %v5215_v48, %v5126_v50  ;;  %6124 = vmatpush.bf16.msra.mxu1 %v9983_v18  ;;  %5859 = vmatpush.bf16.msra.mxu2 %v9899_v38  ;;  %v9967_v38 = vor.u32 %v10606_v7, %v9964_v33  ;;  %v10684_v7 = vld [vmem:[#allocation5 + $0x1ec] sm:$0xf0] }
 0x540   : > { %v5337_v45 = vunpack.c.l.bf16 %v5293_v36  ;;  %v5338_v55 = vunpack.c.h.bf16 %v5293_v36 }
 0x542   : > { %v5403_v46 = vadd.f32 %v12038_v34, %v5337_v45  ;;  %v5404_v20 = vadd.f32 %v12040_v15, %v5338_v55 }
 0x543   : > { %v4948_v53 = vpop.f32.mrf.mxu2  ;;  %v5037_v44 = vpop.f32.mrf.mxu3  ;;  %6125 = vmatpush.bf16.msra.mxu1 %v9975_v16 }
 0x544   : > { %v5038_v0 = vadd.f32 %v5037_v44, %v4948_v53  ;;  %v5563_v14 = vmax.f32 %v5403_v46, 0.0  ;;  %v5564_v26 = vmax.f32 %v5404_v20, 0.0 }
 0x546   : > { %v5294_v24 = vpack.c.bf16 %v5216_v13, %v5038_v0  ;;  %v5129_v43 = vpop.f32.mrf.mxu0  ;;  %v5218_v2 = vpop.f32.mrf.mxu1 }
 0x547   : > { %v5219_v9 = vadd.f32 %v5218_v2, %v5129_v43  ;;  %6126 = vmatpush.bf16.msra.mxu1 %v9967_v38 }
 0x548   : > { %v5339_v6 = vunpack.c.l.bf16 %v5294_v24  ;;  %v5340_v27 = vunpack.c.h.bf16 %v5294_v24  ;;  %4990 = vmatmul.bf16.gmra.mxu2 %v11959_v59  ;;  %5079 = vmatmul.bf16.gmra.mxu3 %v11961_v11 }
 0x549   : > { %5168 = vmatmul.bf16.gmra.mxu0 %v11959_v59  ;;  %5257 = vmatmul.bf16.gmra.mxu1 %v11961_v11 }
 0x54a   : > { %v5405_v28 = vadd.f32 %v12038_v34, %v5339_v6  ;;  %v5406_v41 = vadd.f32 %v12040_v15, %v5340_v27 }
 0x54b   : > { %v4951_v21 = vpop.f32.mrf.mxu2  ;;  %v5040_v23 = vpop.f32.mrf.mxu3 }
 0x54c   : > { %v5565_v49 = vmax.f32 %v5405_v28, 0.0  ;;  %v5566_v10 = vmax.f32 %v5406_v41, 0.0  ;;  %v5041_v60 = vadd.f32 %v5040_v23, %v4951_v21 }
 0x54e   : > { %v12050_v56 = vpack.c.bf16 %v5565_v49, %v5563_v14  ;;  %v12052_v37 = vpack.c.bf16 %v5566_v10, %v5564_v26  ;;  %v5295_v59 = vpack.c.bf16 %v5219_v9, %v5041_v60  ;;  %v5131_v47 = vpop.f32.mrf.mxu0  ;;  %v5220_v11 = vpop.f32.mrf.mxu1 }
 0x54f   : > { %v5221_v52 = vadd.f32 %v5220_v11, %v5131_v47 }
 0x550   : > { %v5341_v54 = vunpack.c.l.bf16 %v5295_v59  ;;  %v5342_v25 = vunpack.c.h.bf16 %v5295_v59 }
 0x552   : > { %v5407_v48 = vadd.f32 %v12038_v34, %v5341_v54  ;;  %v5408_v22 = vadd.f32 %v12040_v15, %v5342_v25 }
 0x553   : > { %v4953_v1 = vpop.f32.mrf.mxu2  ;;  %v5042_v17 = vpop.f32.mrf.mxu3 }
 0x554   : > { %v5043_v3 = vadd.f32 %v5042_v17, %v4953_v1  ;;  %v5567_v0 = vmax.f32 %v5407_v48, 0.0  ;;  %v5568_v2 = vmax.f32 %v5408_v22, 0.0 }
 0x556   : > { %v5296_v12 = vpack.c.bf16 %v5221_v52, %v5043_v3  ;;  %v5134_v62 = vpop.f32.mrf.mxu0  ;;  %v5223_v36 = vpop.f32.mrf.mxu1  ;;  %v9970_v52 = vld [vmem:[#allocation2 + $0x590] sm:$0xf] }
 0x557   : > { %v5224_v50 = vadd.f32 %v5223_v36, %v5134_v62  ;;  %v9971_v18 = vor.u32 %v10609_v30, %v9970_v52  ;;  %v10592_v30 = vld [vmem:[#allocation2 + $0x514] sm:$0xf] }
 0x558   : > { %v5343_v58 = vunpack.c.l.bf16 %v5296_v12  ;;  %v5344_v13 = vunpack.c.h.bf16 %v5296_v12  ;;  %4995 = vmatmul.bf16.gmra.mxu2 %v11971_v31  ;;  %5084 = vmatmul.bf16.gmra.mxu3 %v11973_v57 }
 0x559   : > { %5173 = vmatmul.bf16.gmra.mxu0 %v11971_v31  ;;  %5262 = vmatmul.bf16.gmra.mxu1 %v11973_v57 }
 0x55a   : > { %v5409_v45 = vadd.f32 %v12038_v34, %v5343_v58  ;;  %v5410_v53 = vadd.f32 %v12040_v15, %v5344_v13  ;;  %5947 = vmatpush.bf16.msra.mxu3 %v9971_v18 }
 0x55b   : > { %v4956_v44 = vpop.f32.mrf.mxu2  ;;  %v5045_v55 = vpop.f32.mrf.mxu3 }
 0x55c   : > { %v5046_v24 = vadd.f32 %v5045_v55, %v4956_v44  ;;  %v5569_v43 = vmax.f32 %v5409_v45, 0.0  ;;  %v5570_v46 = vmax.f32 %v5410_v53, 0.0 }
 0x55e   : > { %v5297_v9 = vpack.c.bf16 %v5224_v50, %v5046_v24  ;;  %v5136_v20 = vpop.f32.mrf.mxu0  ;;  %v5225_v31 = vpop.f32.mrf.mxu1  ;;  %v12062_v6 = vpack.c.bf16 %v5569_v43, %v5567_v0  ;;  %v12064_v57 = vpack.c.bf16 %v5570_v46, %v5568_v2 }
 0x55f   : > { %v5226_v27 = vadd.f32 %v5225_v31, %v5136_v20 }
 0x560   : > { %v5345_v28 = vunpack.c.l.bf16 %v5297_v9  ;;  %v5346_v21 = vunpack.c.h.bf16 %v5297_v9 }
 0x562   : > { %v5411_v59 = vadd.f32 %v12038_v34, %v5345_v28  ;;  %v5412_v63 = vadd.f32 %v12040_v15, %v5346_v21 }
 0x563   : > { %v4958_v41 = vpop.f32.mrf.mxu2  ;;  %v5047_v14 = vpop.f32.mrf.mxu3 }
 0x564   : > { %v5048_v23 = vadd.f32 %v5047_v14, %v4958_v41  ;;  %v5571_v3 = vmax.f32 %v5411_v59, 0.0  ;;  %v5572_v36 = vmax.f32 %v5412_v63, 0.0  ;;  %v9908_v63 = vld [vmem:[#allocation2 + $0x518] sm:$0xf0] }
 0x565   : > { %v9911_v18 = vor.u32 %v10592_v30, %v9908_v63 }
 0x566   : > { %v5298_v26 = vpack.c.bf16 %v5226_v27, %v5048_v23  ;;  %v5139_v49 = vpop.f32.mrf.mxu0  ;;  %v5228_v10 = vpop.f32.mrf.mxu1 }
 0x567   : > { %v5229_v60 = vadd.f32 %v5228_v10, %v5139_v49  ;;  %6036 = vmatpush.bf16.msra.mxu0 %v9911_v18 }
 0x568   : > { %v5347_v47 = vunpack.c.l.bf16 %v5298_v26  ;;  %v5348_v11 = vunpack.c.h.bf16 %v5298_v26  ;;  %5000 = vmatmul.bf16.gmra.mxu2 %v11983_v4  ;;  %5089 = vmatmul.bf16.gmra.mxu3 %v11985_v32 }
 0x569   : > { %5178 = vmatmul.bf16.gmra.mxu0 %v11983_v4  ;;  %5267 = vmatmul.bf16.gmra.mxu1 %v11985_v32 }
 0x56a   : > { %v5413_v54 = vadd.f32 %v12038_v34, %v5347_v47  ;;  %v5414_v1 = vadd.f32 %v12040_v15, %v5348_v11 }
 0x56b   : > { %v4961_v17 = vpop.f32.mrf.mxu2  ;;  %v5050_v25 = vpop.f32.mrf.mxu3 }
 0x56c   : > { %v5051_v12 = vadd.f32 %v5050_v25, %v4961_v17  ;;  %v5573_v62 = vmax.f32 %v5413_v54, 0.0  ;;  %v5574_v50 = vmax.f32 %v5414_v1, 0.0 }
 0x56e   : > { %v5299_v48 = vpack.c.bf16 %v5229_v60, %v5051_v12  ;;  %v5141_v58 = vpop.f32.mrf.mxu0  ;;  %v5230_v13 = vpop.f32.mrf.mxu1  ;;  %v12074_v22 = vpack.c.bf16 %v5573_v62, %v5571_v3  ;;  %v12076_v4 = vpack.c.bf16 %v5574_v50, %v5572_v36 }
 0x56f   : > { %v5231_v32 = vadd.f32 %v5230_v13, %v5141_v58 }
 0x570   : > { %v5349_v45 = vunpack.c.l.bf16 %v5299_v48  ;;  %v5350_v55 = vunpack.c.h.bf16 %v5299_v48 }
 0x572   : > { %v5415_v9 = vadd.f32 %v12038_v34, %v5349_v45  ;;  %v5416_v27 = vadd.f32 %v12040_v15, %v5350_v55 }
 0x573   : > { %v4963_v53 = vpop.f32.mrf.mxu2  ;;  %v5052_v44 = vpop.f32.mrf.mxu3 }
 0x574   : > { %v5053_v0 = vadd.f32 %v5052_v44, %v4963_v53  ;;  %v5575_v23 = vmax.f32 %v5415_v9, 0.0  ;;  %v5576_v10 = vmax.f32 %v5416_v27, 0.0 }
 0x576   : > { %v5300_v24 = vpack.c.bf16 %v5231_v32, %v5053_v0  ;;  %v5144_v43 = vpop.f32.mrf.mxu0  ;;  %v5233_v2 = vpop.f32.mrf.mxu1  ;;  %v9962_v32 = vld [vmem:[#allocation2 + $0x580] sm:$0xf] }
 0x577   : > { %v5234_v46 = vadd.f32 %v5233_v2, %v5144_v43  ;;  %v9963_v16 = vor.u32 %v10607_v61, %v9962_v32 }
 0x578   : > { %v5351_v20 = vunpack.c.l.bf16 %v5300_v24  ;;  %v5352_v31 = vunpack.c.h.bf16 %v5300_v24  ;;  %5005 = vmatmul.bf16.gmra.mxu2 %v11995_v39  ;;  %5094 = vmatmul.bf16.gmra.mxu3 %v11997_v42 }
 0x579   : > { %5183 = vmatmul.bf16.gmra.mxu0 %v11995_v39  ;;  %5272 = vmatmul.bf16.gmra.mxu1 %v11997_v42 }
 0x57a   : > { %v5417_v28 = vadd.f32 %v12038_v34, %v5351_v20  ;;  %v5418_v41 = vadd.f32 %v12040_v15, %v5352_v31  ;;  %5948 = vmatpush.bf16.msra.mxu3 %v9963_v16 }
 0x57b   : > { %v4966_v14 = vpop.f32.mrf.mxu2  ;;  %v5055_v21 = vpop.f32.mrf.mxu3 }
 0x57c   : > { %v5056_v26 = vadd.f32 %v5055_v21, %v4966_v14  ;;  %v5577_v49 = vmax.f32 %v5417_v28, 0.0  ;;  %v5578_v60 = vmax.f32 %v5418_v41, 0.0  ;;  %v10590_v21 = vld [vmem:[#allocation2 + $0x504] sm:$0xf] }
 0x57e   : > { %v5301_v59 = vpack.c.bf16 %v5234_v46, %v5056_v26  ;;  %v5146_v47 = vpop.f32.mrf.mxu0  ;;  %v5235_v39 = vpop.f32.mrf.mxu1  ;;  %v12086_v11 = vpack.c.bf16 %v5577_v49, %v5575_v23  ;;  %v12088_v42 = vpack.c.bf16 %v5578_v60, %v5576_v10  ;;  %v9900_v23 = vld [vmem:[#allocation2 + $0x508] sm:$0xf0] }
 0x57f   : > { %v5236_v52 = vadd.f32 %v5235_v39, %v5146_v47  ;;  %v9903_v10 = vor.u32 %v10590_v21, %v9900_v23 }
 0x580   : > { %v5353_v54 = vunpack.c.l.bf16 %v5301_v59  ;;  %v5354_v25 = vunpack.c.h.bf16 %v5301_v59 }
 0x581   : > { %6037 = vmatpush.bf16.msra.mxu0 %v9903_v10 }
 0x582   : > { %v5419_v48 = vadd.f32 %v12038_v34, %v5353_v54  ;;  %v5420_v35 = vadd.f32 %v12040_v15, %v5354_v25  ;;  %v10139_v54 = vld [vmem:[#allocation5 + $0xe0] sm:$0xf] }
 0x583   : > { %v4968_v1 = vpop.f32.mrf.mxu2  ;;  %v5057_v17 = vpop.f32.mrf.mxu3 }
 0x584   : > { %v5058_v3 = vadd.f32 %v5057_v17, %v4968_v1  ;;  %v5579_v0 = vmax.f32 %v5419_v48, 0.0  ;;  %v5580_v2 = vmax.f32 %v5420_v35, 0.0  ;;  %v10652_v1 = vld [vmem:[#allocation5 + $0xec] sm:$0xf0] }
 0x585   : > { %v10140_v17 = vor.u32 %v10652_v1, %v10139_v54 }
 0x586   : > { %v5302_v12 = vpack.c.bf16 %v5236_v52, %v5058_v3  ;;  %v5149_v62 = vpop.f32.mrf.mxu0  ;;  %v5238_v36 = vpop.f32.mrf.mxu1 }
 0x587   : > { %v5239_v50 = vadd.f32 %v5238_v36, %v5149_v62  ;;  %6958 = vmatpush.bf16.msrb.mxu2 %v10140_v17 }
 0x588   : > { %v5355_v58 = vunpack.c.l.bf16 %v5302_v12  ;;  %v5356_v13 = vunpack.c.h.bf16 %v5302_v12  ;;  %5010 = vmatmul.bf16.gmra.mxu2 %v12010_v40  ;;  %5099 = vmatmul.bf16.gmra.mxu3 %v12012_v5 }
 0x589   : > { %5188 = vmatmul.bf16.gmra.mxu0 %v12010_v40  ;;  %5277 = vmatmul.bf16.gmra.mxu1 %v12012_v5 }
 0x58a   : > { %v5421_v45 = vadd.f32 %v12038_v34, %v5355_v58  ;;  %v5422_v53 = vadd.f32 %v12040_v15, %v5356_v13 }
 0x58b   : > { %v4971_v44 = vpop.f32.mrf.mxu2  ;;  %v5060_v55 = vpop.f32.mrf.mxu3 }
 0x58c   : > { %v5061_v24 = vadd.f32 %v5060_v55, %v4971_v44  ;;  %v5581_v43 = vmax.f32 %v5421_v45, 0.0  ;;  %v5582_v46 = vmax.f32 %v5422_v53, 0.0 }
 0x58e   : > { %v5303_v9 = vpack.c.bf16 %v5239_v50, %v5061_v24  ;;  %v5151_v20 = vpop.f32.mrf.mxu0  ;;  %v5240_v31 = vpop.f32.mrf.mxu1  ;;  %v12098_v27 = vpack.c.bf16 %v5581_v43, %v5579_v0  ;;  %v12100_v40 = vpack.c.bf16 %v5582_v46, %v5580_v2 }
 0x58f   : > { %v5241_v5 = vadd.f32 %v5240_v31, %v5151_v20 }
 0x590   : > { %v5357_v28 = vunpack.c.l.bf16 %v5303_v9  ;;  %v5358_v26 = vunpack.c.h.bf16 %v5303_v9 }
 0x592   : > { %v5423_v52 = vadd.f32 %v12038_v34, %v5357_v28  ;;  %v5424_v18 = vadd.f32 %v12040_v15, %v5358_v26 }
 0x593   : > { %v4973_v41 = vpop.f32.mrf.mxu2  ;;  %v5062_v14 = vpop.f32.mrf.mxu3 }
 0x594   : > { %v5063_v49 = vadd.f32 %v5062_v14, %v4973_v41  ;;  %v5583_v36 = vmax.f32 %v5423_v52, 0.0  ;;  %v5584_v58 = vmax.f32 %v5424_v18, 0.0 }
 0x596   : > { %v5304_v60 = vpack.c.bf16 %v5241_v5, %v5063_v49  ;;  %v5154_v59 = vpop.f32.mrf.mxu0  ;;  %v5243_v47 = vpop.f32.mrf.mxu1  ;;  %v10267_v5 = vld [vmem:[#allocation5 + $0x1e0] sm:$0xf] }
 0x597   : > { %v5244_v39 = vadd.f32 %v5243_v47, %v5154_v59  ;;  %v10268_v38 = vor.u32 %v10684_v7, %v10267_v5  ;;  %v10650_v7 = vld [vmem:[#allocation5 + $0xe4] sm:$0xf] }
 0x598   : > { %v5359_v30 = vunpack.c.l.bf16 %v5304_v60  ;;  %v5360_v63 = vunpack.c.h.bf16 %v5304_v60  ;;  %5015 = vmatmul.bf16.gmra.mxu2 %v12022_v19  ;;  %5104 = vmatmul.bf16.gmra.mxu3 %v12024_v51 }
 0x599   : > { %5193 = vmatmul.bf16.gmra.mxu0 %v12022_v19  ;;  %5282 = vmatmul.bf16.gmra.mxu1 %v12024_v51 }
 0x59a   : > { %v5425_v25 = vadd.f32 %v12038_v34, %v5359_v30  ;;  %v5426_v3 = vadd.f32 %v12040_v15, %v5360_v63  ;;  %7047 = vmatpush.bf16.msrb.mxu3 %v10268_v38  ;;  %v10682_v30 = vld [vmem:[#allocation5 + $0x1e4] sm:$0xf]  ;;  %v10269_v63 = vld [vmem:[#allocation5 + $0x1f0] sm:$0xf0] }
 0x59b   : > { %v4976_v12 = vpop.f32.mrf.mxu2  ;;  %v5065_v62 = vpop.f32.mrf.mxu3  ;;  %v10272_v18 = vor.u32 %v10682_v30, %v10269_v63  ;;  %v10680_v30 = vld [vmem:[#allocation5 + $0x1cc] sm:$0xf0] }
 0x59c   : > { %v5066_v50 = vadd.f32 %v5065_v62, %v4976_v12  ;;  %v5585_v48 = vmax.f32 %v5425_v25, 0.0  ;;  %v5586_v13 = vmax.f32 %v5426_v3, 0.0 }
 0x59d   : > { %7225 = vmatpush.bf16.msrb.mxu1 %v10272_v18 }
 0x59e   : > { %v5305_v32 = vpack.c.bf16 %v5244_v39, %v5066_v50  ;;  %v5156_v61 = vpop.f32.mrf.mxu0  ;;  %v5245_v19 = vpop.f32.mrf.mxu1  ;;  %v12110_v35 = vpack.c.bf16 %v5585_v48, %v5583_v36  ;;  %v12112_v51 = vpack.c.bf16 %v5586_v13, %v5584_v58 }
 0x59f   : > { %v5246_v16 = vadd.f32 %v5245_v19, %v5156_v61  ;;  %v10123_v61 = vld [vmem:[#allocation5 + $0xc0] sm:$0xf]  ;;  %v10648_v19 = vld [vmem:[#allocation5 + $0xcc] sm:$0xf0] }
 0x5a0   : > { %v5361_v45 = vunpack.c.l.bf16 %v5305_v32  ;;  %v5362_v55 = vunpack.c.h.bf16 %v5305_v32 }
 0x5a2   : > { %v5427_v9 = vadd.f32 %v12038_v34, %v5361_v45  ;;  %v5428_v33 = vadd.f32 %v12040_v15, %v5362_v55 }
 0x5a3   : > { %v4978_v53 = vpop.f32.mrf.mxu2  ;;  %v5067_v44 = vpop.f32.mrf.mxu3 }
 0x5a4   : > { %v5068_v0 = vadd.f32 %v5067_v44, %v4978_v53  ;;  %v5587_v23 = vmax.f32 %v5427_v9, 0.0  ;;  %v5588_v10 = vmax.f32 %v5428_v33, 0.0  ;;  %v10141_v33 = vld [vmem:[#allocation5 + $0xf0] sm:$0xf0] }
 0x5a5   : > { %v10144_v38 = vor.u32 %v10650_v7, %v10141_v33  ;;  %v10107_v7 = vld [vmem:[#allocation5 + $0xa0] sm:$0xf]  ;;  %v10644_v33 = vld [vmem:[#allocation5 + $0xac] sm:$0xf0] }
 0x5a6   : > { %v5306_v24 = vpack.c.bf16 %v5246_v16, %v5068_v0  ;;  %v5159_v43 = vpop.f32.mrf.mxu0  ;;  %v5248_v2 = vpop.f32.mrf.mxu1  ;;  %v10124_v16 = vor.u32 %v10648_v19, %v10123_v61  ;;  %v10678_v61 = vld [vmem:[#allocation5 + $0x1c4] sm:$0xf]  ;;  %v10253_v19 = vld [vmem:[#allocation5 + $0x1d0] sm:$0xf0] }
 0x5a7   : > { %v5249_v46 = vadd.f32 %v5248_v2, %v5159_v43  ;;  %7136 = vmatpush.bf16.msrb.mxu0 %v10144_v38  ;;  %v10108_v38 = vor.u32 %v10644_v33, %v10107_v7  ;;  %v10674_v7 = vld [vmem:[#allocation5 + $0x1a4] sm:$0xf]  ;;  %v10237_v33 = vld [vmem:[#allocation5 + $0x1b0] sm:$0xf0] }
 0x5a8   : > { %v5363_v20 = vunpack.c.l.bf16 %v5306_v24  ;;  %v5364_v31 = vunpack.c.h.bf16 %v5306_v24  ;;  %5020 = vmatmul.bf16.gmra.mxu2 %v12034_v8  ;;  %5109 = vmatmul.bf16.gmra.mxu3 %v12036_v29 }
 0x5a9   : > { %5198 = vmatmul.bf16.gmra.mxu0 %v12034_v8  ;;  %5287 = vmatmul.bf16.gmra.mxu1 %v12036_v29 }
 0x5aa   : > { %v5429_v28 = vadd.f32 %v12038_v34, %v5363_v20  ;;  %v5430_v41 = vadd.f32 %v12040_v15, %v5364_v31  ;;  %6959 = vmatpush.bf16.msrb.mxu2 %v10124_v16  ;;  %v10256_v16 = vor.u32 %v10678_v61, %v10253_v19  ;;  %v10676_v61 = vld [vmem:[#allocation5 + $0x1ac] sm:$0xf0] }
 0x5ab   : > { %v4981_v14 = vpop.f32.mrf.mxu2  ;;  %v5070_v21 = vpop.f32.mrf.mxu3 }
 0x5ac   : > { %v5071_v26 = vadd.f32 %v5070_v21, %v4981_v14  ;;  %v5589_v49 = vmax.f32 %v5429_v28, 0.0  ;;  %v5590_v60 = vmax.f32 %v5430_v41, 0.0  ;;  %7226 = vmatpush.bf16.msrb.mxu1 %v10256_v16 }
 0x5ae   : > { %v5307_v59 = vpack.c.bf16 %v5249_v46, %v5071_v26  ;;  %v5161_v47 = vpop.f32.mrf.mxu0  ;;  %v5250_v39 = vpop.f32.mrf.mxu1  ;;  %v12122_v52 = vpack.c.bf16 %v5589_v49, %v5587_v23  ;;  %v12124_v8 = vpack.c.bf16 %v5590_v60, %v5588_v10  ;;  %6960 = vmatpush.bf16.msrb.mxu2 %v10108_v38  ;;  %v10240_v38 = vor.u32 %v10674_v7, %v10237_v33  ;;  %v10672_v7 = vld [vmem:[#allocation5 + $0x18c] sm:$0xf0] }
 0x5af   : > { %v5251_v29 = vadd.f32 %v5250_v39, %v5161_v47 }
 0x5b0   : > { %v5365_v54 = vunpack.c.l.bf16 %v5307_v59  ;;  %v5366_v25 = vunpack.c.h.bf16 %v5307_v59  ;;  %7227 = vmatpush.bf16.msrb.mxu1 %v10240_v38 }
 0x5b2   : > { %v5431_v48 = vadd.f32 %v12038_v34, %v5365_v54  ;;  %v5432_v32 = vadd.f32 %v12040_v15, %v5366_v25 }
 0x5b3   : > { %v4983_v1 = vpop.f32.mrf.mxu2  ;;  %v5072_v17 = vpop.f32.mrf.mxu3 }
 0x5b4   : > { %v5073_v3 = vadd.f32 %v5072_v17, %v4983_v1  ;;  %v5591_v0 = vmax.f32 %v5431_v48, 0.0  ;;  %v5592_v2 = vmax.f32 %v5432_v32, 0.0 }
 0x5b6   : > { %v5308_v12 = vpack.c.bf16 %v5251_v29, %v5073_v3  ;;  %v5164_v62 = vpop.f32.mrf.mxu0  ;;  %v5253_v36 = vpop.f32.mrf.mxu1  ;;  %v10251_v29 = vld [vmem:[#allocation5 + $0x1c0] sm:$0xf] }
 0x5b7   : > { %v5254_v50 = vadd.f32 %v5253_v36, %v5164_v62  ;;  %v10252_v18 = vor.u32 %v10680_v30, %v10251_v29  ;;  %v10646_v30 = vld [vmem:[#allocation5 + $0xc4] sm:$0xf] }
 0x5b8   : > { %v5367_v58 = vunpack.c.l.bf16 %v5308_v12  ;;  %v5368_v13 = vunpack.c.h.bf16 %v5308_v12  ;;  %5860 = vmatmul.bf16.vlgmr.msra.gmra.mxu2 %v12050_v56  ;;  %5949 = vmatmul.bf16.vlgmr.msra.gmra.mxu3 %v12052_v37 }
 0x5b9   : > { %6038 = vmatmul.bf16.vlgmr.msra.gmra.mxu0 %v12050_v56  ;;  %6127 = vmatmul.bf16.vlgmr.msra.gmra.mxu1 %v12052_v37 }
 0x5ba   : > { %v5433_v45 = vadd.f32 %v12038_v34, %v5367_v58  ;;  %v5434_v53 = vadd.f32 %v12040_v15, %v5368_v13  ;;  %7048 = vmatpush.bf16.msrb.mxu3 %v10252_v18 }
 0x5bb   : > { %v4986_v44 = vpop.f32.mrf.mxu2  ;;  %v5075_v55 = vpop.f32.mrf.mxu3 }
 0x5bc   : > { %v5076_v24 = vadd.f32 %v5075_v55, %v4986_v44  ;;  %v5593_v43 = vmax.f32 %v5433_v45, 0.0  ;;  %v5594_v46 = vmax.f32 %v5434_v53, 0.0 }
 0x5be   : > { %v5309_v9 = vpack.c.bf16 %v5254_v50, %v5076_v24  ;;  %v5166_v20 = vpop.f32.mrf.mxu0  ;;  %v5255_v56 = vpop.f32.mrf.mxu1  ;;  %v12134_v31 = vpack.c.bf16 %v5593_v43, %v5591_v0  ;;  %v12136_v37 = vpack.c.bf16 %v5594_v46, %v5592_v2 }
 0x5bf   : > { %v5256_v5 = vadd.f32 %v5255_v56, %v5166_v20 }
 0x5c0   : > { %v5369_v28 = vunpack.c.l.bf16 %v5309_v9  ;;  %v5370_v21 = vunpack.c.h.bf16 %v5309_v9 }
 0x5c2   : > { %v5435_v59 = vadd.f32 %v12038_v34, %v5369_v28  ;;  %v5436_v63 = vadd.f32 %v12040_v15, %v5370_v21 }
 0x5c3   : > { %v4988_v41 = vpop.f32.mrf.mxu2  ;;  %v5077_v14 = vpop.f32.mrf.mxu3 }
 0x5c4   : > { %v5078_v23 = vadd.f32 %v5077_v14, %v4988_v41  ;;  %v5595_v3 = vmax.f32 %v5435_v59, 0.0  ;;  %v5596_v36 = vmax.f32 %v5436_v63, 0.0  ;;  %v10125_v63 = vld [vmem:[#allocation5 + $0xd0] sm:$0xf0] }
 0x5c5   : > { %v10128_v18 = vor.u32 %v10646_v30, %v10125_v63  ;;  %v10091_v30 = vld [vmem:[#allocation5 + $0x80] sm:$0xf]  ;;  %v10640_v63 = vld [vmem:[#allocation5 + $0x8c] sm:$0xf0] }
 0x5c6   : > { %v5310_v26 = vpack.c.bf16 %v5256_v5, %v5078_v23  ;;  %v5169_v49 = vpop.f32.mrf.mxu0  ;;  %v5258_v10 = vpop.f32.mrf.mxu1 }
 0x5c7   : > { %v5259_v60 = vadd.f32 %v5258_v10, %v5169_v49  ;;  %7137 = vmatpush.bf16.msrb.mxu0 %v10128_v18  ;;  %v10092_v18 = vor.u32 %v10640_v63, %v10091_v30  ;;  %v10670_v30 = vld [vmem:[#allocation5 + $0x184] sm:$0xf]  ;;  %v10221_v63 = vld [vmem:[#allocation5 + $0x190] sm:$0xf0] }
 0x5c8   : > { %v5371_v47 = vunpack.c.l.bf16 %v5310_v26  ;;  %v5372_v39 = vunpack.c.h.bf16 %v5310_v26  ;;  %5865 = vmatmul.bf16.gmra.mxu2 %v12062_v6  ;;  %5954 = vmatmul.bf16.gmra.mxu3 %v12064_v57 }
 0x5c9   : > { %6043 = vmatmul.bf16.gmra.mxu0 %v12062_v6  ;;  %6132 = vmatmul.bf16.gmra.mxu1 %v12064_v57 }
 0x5ca   : > { %v5437_v54 = vadd.f32 %v12038_v34, %v5371_v47  ;;  %v5438_v1 = vadd.f32 %v12040_v15, %v5372_v39  ;;  %6961 = vmatpush.bf16.msrb.mxu2 %v10092_v18  ;;  %v10224_v18 = vor.u32 %v10670_v30, %v10221_v63 }
 0x5cb   : > { %v4991_v17 = vpop.f32.mrf.mxu2  ;;  %v5080_v25 = vpop.f32.mrf.mxu3 }
 0x5cc   : > { %v5081_v12 = vadd.f32 %v5080_v25, %v4991_v17  ;;  %v5597_v62 = vmax.f32 %v5437_v54, 0.0  ;;  %v5598_v50 = vmax.f32 %v5438_v1, 0.0  ;;  %7228 = vmatpush.bf16.msrb.mxu1 %v10224_v18 }
 0x5ce   : > { %v5311_v48 = vpack.c.bf16 %v5259_v60, %v5081_v12  ;;  %v5171_v58 = vpop.f32.mrf.mxu0  ;;  %v5260_v13 = vpop.f32.mrf.mxu1  ;;  %v12146_v32 = vpack.c.bf16 %v5597_v62, %v5595_v3  ;;  %v12148_v6 = vpack.c.bf16 %v5598_v50, %v5596_v36 }
 0x5cf   : > { %v5261_v57 = vadd.f32 %v5260_v13, %v5171_v58 }
 0x5d0   : > { %v5373_v45 = vunpack.c.l.bf16 %v5311_v48  ;;  %v5374_v55 = vunpack.c.h.bf16 %v5311_v48 }
 0x5d2   : > { %v5439_v9 = vadd.f32 %v12038_v34, %v5373_v45  ;;  %v5440_v5 = vadd.f32 %v12040_v15, %v5374_v55 }
 0x5d3   : > { %v4993_v53 = vpop.f32.mrf.mxu2  ;;  %v5082_v44 = vpop.f32.mrf.mxu3 }
 0x5d4   : > { %v5083_v0 = vadd.f32 %v5082_v44, %v4993_v53  ;;  %v5599_v23 = vmax.f32 %v5439_v9, 0.0  ;;  %v5600_v10 = vmax.f32 %v5440_v5, 0.0 }
 0x5d6   : > { %v5312_v24 = vpack.c.bf16 %v5261_v57, %v5083_v0  ;;  %v5174_v43 = vpop.f32.mrf.mxu0  ;;  %v5263_v2 = vpop.f32.mrf.mxu1  ;;  %v10235_v57 = vld [vmem:[#allocation5 + $0x1a0] sm:$0xf] }
 0x5d7   : > { %v5264_v46 = vadd.f32 %v5263_v2, %v5174_v43  ;;  %v10236_v16 = vor.u32 %v10676_v61, %v10235_v57  ;;  %v10642_v61 = vld [vmem:[#allocation5 + $0xa4] sm:$0xf] }
 0x5d8   : > { %v5375_v20 = vunpack.c.l.bf16 %v5312_v24  ;;  %v5376_v56 = vunpack.c.h.bf16 %v5312_v24  ;;  %5870 = vmatmul.bf16.gmra.mxu2 %v12074_v22  ;;  %5959 = vmatmul.bf16.gmra.mxu3 %v12076_v4 }
 0x5d9   : > { %6048 = vmatmul.bf16.gmra.mxu0 %v12074_v22  ;;  %6137 = vmatmul.bf16.gmra.mxu1 %v12076_v4 }
 0x5da   : > { %v5441_v28 = vadd.f32 %v12038_v34, %v5375_v20  ;;  %v5442_v41 = vadd.f32 %v12040_v15, %v5376_v56  ;;  %7049 = vmatpush.bf16.msrb.mxu3 %v10236_v16 }
 0x5db   : > { %v4996_v14 = vpop.f32.mrf.mxu2  ;;  %v5085_v21 = vpop.f32.mrf.mxu3 }
 0x5dc   : > { %v5086_v26 = vadd.f32 %v5085_v21, %v4996_v14  ;;  %v5601_v49 = vmax.f32 %v5441_v28, 0.0  ;;  %v5602_v60 = vmax.f32 %v5442_v41, 0.0 }
 0x5de   : > { %v5313_v59 = vpack.c.bf16 %v5264_v46, %v5086_v26  ;;  %v5176_v47 = vpop.f32.mrf.mxu0  ;;  %v5265_v22 = vpop.f32.mrf.mxu1  ;;  %v12158_v39 = vpack.c.bf16 %v5601_v49, %v5599_v23  ;;  %v12160_v4 = vpack.c.bf16 %v5602_v60, %v5600_v10 }
 0x5df   : > { %v5266_v29 = vadd.f32 %v5265_v22, %v5176_v47 }
 0x5e0   : > { %v5377_v54 = vunpack.c.l.bf16 %v5313_v59  ;;  %v5378_v25 = vunpack.c.h.bf16 %v5313_v59 }
 0x5e2   : > { %v5443_v48 = vadd.f32 %v12038_v34, %v5377_v54  ;;  %v5444_v19 = vadd.f32 %v12040_v15, %v5378_v25 }
 0x5e3   : > { %v4998_v1 = vpop.f32.mrf.mxu2  ;;  %v5087_v17 = vpop.f32.mrf.mxu3 }
 0x5e4   : > { %v5088_v3 = vadd.f32 %v5087_v17, %v4998_v1  ;;  %v5603_v0 = vmax.f32 %v5443_v48, 0.0  ;;  %v5604_v2 = vmax.f32 %v5444_v19, 0.0  ;;  %v10109_v19 = vld [vmem:[#allocation5 + $0xb0] sm:$0xf0] }
 0x5e5   : > { %v10112_v16 = vor.u32 %v10642_v61, %v10109_v19  ;;  %v10075_v19 = vld [vmem:[#allocation5 + $0x60] sm:$0xf] }
 0x5e6   : > { %v5314_v12 = vpack.c.bf16 %v5266_v29, %v5088_v3  ;;  %v5179_v62 = vpop.f32.mrf.mxu0  ;;  %v5268_v36 = vpop.f32.mrf.mxu1 }
 0x5e7   : > { %v5269_v50 = vadd.f32 %v5268_v36, %v5179_v62  ;;  %7138 = vmatpush.bf16.msrb.mxu0 %v10112_v16  ;;  %v10636_v16 = vld [vmem:[#allocation5 + $0x6c] sm:$0xf0] }
 0x5e8   : > { %v5379_v58 = vunpack.c.l.bf16 %v5314_v12  ;;  %v5380_v13 = vunpack.c.h.bf16 %v5314_v12  ;;  %5875 = vmatmul.bf16.gmra.mxu2 %v12086_v11  ;;  %5964 = vmatmul.bf16.gmra.mxu3 %v12088_v42 }
 0x5e9   : > { %6053 = vmatmul.bf16.gmra.mxu0 %v12086_v11  ;;  %6142 = vmatmul.bf16.gmra.mxu1 %v12088_v42 }
 0x5ea   : > { %v5445_v45 = vadd.f32 %v12038_v34, %v5379_v58  ;;  %v5446_v53 = vadd.f32 %v12040_v15, %v5380_v13 }
 0x5eb   : > { %v5001_v44 = vpop.f32.mrf.mxu2  ;;  %v5090_v55 = vpop.f32.mrf.mxu3 }
 0x5ec   : > { %v5091_v24 = vadd.f32 %v5090_v55, %v5001_v44  ;;  %v5605_v43 = vmax.f32 %v5445_v45, 0.0  ;;  %v5606_v46 = vmax.f32 %v5446_v53, 0.0 }
 0x5ee   : > { %v5315_v9 = vpack.c.bf16 %v5269_v50, %v5091_v24  ;;  %v5181_v20 = vpop.f32.mrf.mxu0  ;;  %v5270_v56 = vpop.f32.mrf.mxu1  ;;  %v12170_v5 = vpack.c.bf16 %v5605_v43, %v5603_v0  ;;  %v12172_v11 = vpack.c.bf16 %v5606_v46, %v5604_v2 }
 0x5ef   : > { %v5271_v42 = vadd.f32 %v5270_v56, %v5181_v20 }
 0x5f0   : > { %v5381_v28 = vunpack.c.l.bf16 %v5315_v9  ;;  %v5382_v21 = vunpack.c.h.bf16 %v5315_v9 }
 0x5f2   : > { %v5447_v59 = vadd.f32 %v12038_v34, %v5381_v28  ;;  %v5448_v29 = vadd.f32 %v12040_v15, %v5382_v21 }
 0x5f3   : > { %v5003_v41 = vpop.f32.mrf.mxu2  ;;  %v5092_v14 = vpop.f32.mrf.mxu3 }
 0x5f4   : > { %v5093_v23 = vadd.f32 %v5092_v14, %v5003_v41  ;;  %v5607_v3 = vmax.f32 %v5447_v59, 0.0  ;;  %v5608_v36 = vmax.f32 %v5448_v29, 0.0 }
 0x5f6   : > { %v5316_v26 = vpack.c.bf16 %v5271_v42, %v5093_v23  ;;  %v5184_v49 = vpop.f32.mrf.mxu0  ;;  %v5273_v10 = vpop.f32.mrf.mxu1  ;;  %v10219_v42 = vld [vmem:[#allocation5 + $0x180] sm:$0xf] }
 0x5f7   : > { %v5274_v60 = vadd.f32 %v5273_v10, %v5184_v49  ;;  %v10220_v38 = vor.u32 %v10672_v7, %v10219_v42 }
 0x5f8   : > { %v5383_v47 = vunpack.c.l.bf16 %v5316_v26  ;;  %v5384_v22 = vunpack.c.h.bf16 %v5316_v26  ;;  %5880 = vmatmul.bf16.gmra.mxu2 %v12098_v27  ;;  %5969 = vmatmul.bf16.gmra.mxu3 %v12100_v40 }
 0x5f9   : > { %6058 = vmatmul.bf16.gmra.mxu0 %v12098_v27  ;;  %6147 = vmatmul.bf16.gmra.mxu1 %v12100_v40 }
 0x5fa   : > { %v5449_v54 = vadd.f32 %v12038_v34, %v5383_v47  ;;  %v5450_v1 = vadd.f32 %v12040_v15, %v5384_v22  ;;  %7050 = vmatpush.bf16.msrb.mxu3 %v10220_v38 }
 0x5fb   : > { %v5006_v17 = vpop.f32.mrf.mxu2  ;;  %v5095_v25 = vpop.f32.mrf.mxu3 }
 0x5fc   : > { %v5096_v12 = vadd.f32 %v5095_v25, %v5006_v17  ;;  %v5609_v62 = vmax.f32 %v5449_v54, 0.0  ;;  %v5610_v50 = vmax.f32 %v5450_v1, 0.0 }
 0x5fe   : > { %v5317_v48 = vpack.c.bf16 %v5274_v60, %v5096_v12  ;;  %v5186_v58 = vpop.f32.mrf.mxu0  ;;  %v5275_v27 = vpop.f32.mrf.mxu1  ;;  %v12182_v13 = vpack.c.bf16 %v5609_v62, %v5607_v3  ;;  %v12184_v40 = vpack.c.bf16 %v5610_v50, %v5608_v36  ;;  %v10024_v12 = vld [vmem:[%s13088_s4 + $0xa] sm:$0x3] }
 0x5ff   : > { %v5276_v57 = vadd.f32 %v5275_v27, %v5186_v58  ;;  %6243 = vst [vmem:[#allocation1] ss:$9 sm:$0xff] %v10024_v12 }
 0x600   : > { %v5385_v45 = vunpack.c.l.bf16 %v5317_v48  ;;  %v5386_v55 = vunpack.c.h.bf16 %v5317_v48 }
 0x602   : > { %v5451_v9 = vadd.f32 %v12038_v34, %v5385_v45  ;;  %v5452_v33 = vadd.f32 %v12040_v15, %v5386_v55  ;;  %v10076_v45 = vor.u32 %v10636_v16, %v10075_v19 }
 0x603   : > { %v5008_v53 = vpop.f32.mrf.mxu2  ;;  %v5097_v44 = vpop.f32.mrf.mxu3 }
 0x604   : > { %v5098_v0 = vadd.f32 %v5097_v44, %v5008_v53  ;;  %v5611_v23 = vmax.f32 %v5451_v9, 0.0  ;;  %v5612_v10 = vmax.f32 %v5452_v33, 0.0  ;;  %6962 = vmatpush.bf16.msrb.mxu2 %v10076_v45 }
 0x606   : > { %v5318_v24 = vpack.c.bf16 %v5276_v57, %v5098_v0  ;;  %v5189_v43 = vpop.f32.mrf.mxu0  ;;  %v5278_v2 = vpop.f32.mrf.mxu1 }
 0x607   : > { %v5279_v46 = vadd.f32 %v5278_v2, %v5189_v43 }
 0x608   : > { %v5387_v20 = vunpack.c.l.bf16 %v5318_v24  ;;  %v5388_v56 = vunpack.c.h.bf16 %v5318_v24  ;;  %5885 = vmatmul.bf16.gmra.mxu2 %v12110_v35  ;;  %5974 = vmatmul.bf16.gmra.mxu3 %v12112_v51 }
 0x609   : > { %6063 = vmatmul.bf16.gmra.mxu0 %v12110_v35  ;;  %6152 = vmatmul.bf16.gmra.mxu1 %v12112_v51 }
 0x60a   : > { %v5453_v28 = vadd.f32 %v12038_v34, %v5387_v20  ;;  %v5454_v41 = vadd.f32 %v12040_v15, %v5388_v56 }
 0x60b   : > { %v5011_v14 = vpop.f32.mrf.mxu2  ;;  %v5100_v21 = vpop.f32.mrf.mxu3 }
 0x60c   : > { %v5101_v26 = vadd.f32 %v5100_v21, %v5011_v14  ;;  %v5613_v49 = vmax.f32 %v5453_v28, 0.0  ;;  %v5614_v60 = vmax.f32 %v5454_v41, 0.0  ;;  %v10638_v21 = vld [vmem:[#allocation5 + $0x84] sm:$0xf] }
 0x60e   : > { %v5319_v59 = vpack.c.bf16 %v5279_v46, %v5101_v26  ;;  %v5191_v47 = vpop.f32.mrf.mxu0  ;;  %v5280_v22 = vpop.f32.mrf.mxu1  ;;  %v12194_v29 = vpack.c.bf16 %v5613_v49, %v5611_v23  ;;  %v12196_v35 = vpack.c.bf16 %v5614_v60, %v5612_v10  ;;  %v10093_v23 = vld [vmem:[#allocation5 + $0x90] sm:$0xf0] }
 0x60f   : > { %v5281_v51 = vadd.f32 %v5280_v22, %v5191_v47  ;;  %v10096_v26 = vor.u32 %v10638_v21, %v10093_v23 }
 0x610   : > { %v5389_v54 = vunpack.c.l.bf16 %v5319_v59  ;;  %v5390_v25 = vunpack.c.h.bf16 %v5319_v59 }
 0x611   : > { %7139 = vmatpush.bf16.msrb.mxu0 %v10096_v26 }
 0x612   : > { %v5455_v58 = vadd.f32 %v12038_v34, %v5389_v54  ;;  %v5456_v61 = vadd.f32 %v12040_v15, %v5390_v25 }
 0x613   : > { %v5013_v1 = vpop.f32.mrf.mxu2  ;;  %v5102_v17 = vpop.f32.mrf.mxu3 }
 0x614   : > { %v5103_v3 = vadd.f32 %v5102_v17, %v5013_v1  ;;  %v5615_v24 = vmax.f32 %v5455_v58, 0.0  ;;  %v5616_v46 = vmax.f32 %v5456_v61, 0.0  ;;  %v10203_v58 = vld [vmem:[#allocation5 + $0x160] sm:$0xf] }
 0x616   : > { %v5320_v62 = vpack.c.bf16 %v5281_v51, %v5103_v3  ;;  %v5194_v36 = vpop.f32.mrf.mxu0  ;;  %v5283_v50 = vpop.f32.mrf.mxu1 }
 0x617   : > { %v5284_v48 = vadd.f32 %v5283_v50, %v5194_v36 }
 0x618   : > { %v5391_v27 = vunpack.c.l.bf16 %v5320_v62  ;;  %v5392_v57 = vunpack.c.h.bf16 %v5320_v62  ;;  %5890 = vmatmul.bf16.gmra.mxu2 %v12122_v52  ;;  %5979 = vmatmul.bf16.gmra.mxu3 %v12124_v8 }
 0x619   : > { %6068 = vmatmul.bf16.gmra.mxu0 %v12122_v52  ;;  %6157 = vmatmul.bf16.gmra.mxu1 %v12124_v8 }
 0x61a   : > { %v5457_v53 = vadd.f32 %v12038_v34, %v5391_v27  ;;  %v5458_v44 = vadd.f32 %v12040_v15, %v5392_v57  ;;  %v10668_v27 = vld [vmem:[#allocation5 + $0x16c] sm:$0xf0] }
 0x61b   : > { %v5016_v55 = vpop.f32.mrf.mxu2  ;;  %v5105_v0 = vpop.f32.mrf.mxu3  ;;  %v10204_v61 = vor.u32 %v10668_v27, %v10203_v58  ;;  %v10077_v58 = vld [vmem:[#allocation5 + $0x70] sm:$0xf0] }
 0x61c   : > { %v5106_v43 = vadd.f32 %v5105_v0, %v5016_v55  ;;  %v5617_v2 = vmax.f32 %v5457_v53, 0.0  ;;  %v5618_v9 = vmax.f32 %v5458_v44, 0.0  ;;  %v10666_v55 = vld [vmem:[#allocation5 + $0x164] sm:$0xf]  ;;  %v10205_v0 = vld [vmem:[#allocation5 + $0x170] sm:$0xf0] }
 0x61d   : > { %7051 = vmatpush.bf16.msrb.mxu3 %v10204_v61 }
 0x61e   : > { %v5321_v20 = vpack.c.bf16 %v5284_v48, %v5106_v43  ;;  %v5196_v56 = vpop.f32.mrf.mxu0  ;;  %v5285_v52 = vpop.f32.mrf.mxu1  ;;  %v12209_v42 = vpack.c.bf16 %v5617_v2, %v5615_v24  ;;  %v12211_v8 = vpack.c.bf16 %v5618_v9, %v5616_v46  ;;  %v10208_v24 = vor.u32 %v10666_v55, %v10205_v0 }
 0x61f   : > { %v5286_v7 = vadd.f32 %v5285_v52, %v5196_v56 }
 0x620   : > { %v5393_v33 = vunpack.c.l.bf16 %v5321_v20  ;;  %v5394_v41 = vunpack.c.h.bf16 %v5321_v20  ;;  %7229 = vmatpush.bf16.msrb.mxu1 %v10208_v24 }
 0x622   : > { %v5459_v47 = vadd.f32 %v12038_v34, %v5393_v33  ;;  %v5460_v30 = vadd.f32 %v12040_v15, %v5394_v41  ;;  %v6244_v33 = vld [vmem:[#allocation1] sm:$0xff] }
 0x623   : > { %v5018_v38 = vpop.f32.mrf.mxu2  ;;  %v5107_v28 = vpop.f32.mrf.mxu3  ;;  %v6246_v23 = vpack.i.b16 %v6244_v33, %v6244_v33  ;;  %v10664_v33 = vld [vmem:[#allocation5 + $0x14c] sm:$0xf0] }
 0x624   : > { %v5108_v14 = vadd.f32 %v5107_v28, %v5018_v38  ;;  %v5619_v17 = vmax.f32 %v5459_v47, 0.0  ;;  %v5620_v12 = vmax.f32 %v5460_v30, 0.0  ;;  %v6245_v38 = vld [vmem:[#allocation1 + $0x9] sm:$0xff]  ;;  %v10632_v47 = vld [vmem:[#allocation5 + $0x4c] sm:$0xf0] }
 0x625   : > { %v6249_v26 = vpack.i.b16 %v6245_v38, %v6245_v38 }
 0x626   : > { %v5322_v49 = vpack.c.bf16 %v5286_v7, %v5108_v14  ;;  %v5199_v10 = vpop.f32.mrf.mxu0  ;;  %v5288_v60 = vpop.f32.mrf.mxu1 }
 0x627   : > { %v5289_v59 = vadd.f32 %v5288_v60, %v5199_v10 }
 0x628   : > { %v5395_v22 = vunpack.c.l.bf16 %v5322_v49  ;;  %v5396_v51 = vunpack.c.h.bf16 %v5322_v49  ;;  %5895 = vmatmul.bf16.gmra.mxu2 %v12134_v31  ;;  %5984 = vmatmul.bf16.gmra.mxu3 %v12136_v37 }
 0x629   : > { %6073 = vmatmul.bf16.gmra.mxu0 %v12134_v31  ;;  %6162 = vmatmul.bf16.gmra.mxu1 %v12136_v37 }
 0x62a   : > { %v5461_v63 = vadd.f32 %v12038_v34, %v5395_v22  ;;  %v5462_v18 = vadd.f32 %v12040_v15, %v5396_v51 }
 0x62b   : > { %v5021_v54 = vpop.f32.mrf.mxu2  ;;  %v5110_v1 = vpop.f32.mrf.mxu3 }
 0x62c   : > { %v5111_v25 = vadd.f32 %v5110_v1, %v5021_v54  ;;  %v5621_v3 = vmax.f32 %v5461_v63, 0.0  ;;  %v5622_v62 = vmax.f32 %v5462_v18, 0.0  ;;  %v6251_v54 = vperm.slane %v6249_v26, 0 }
 0x62e   : > { %v5323_v36 = vpack.c.bf16 %v5289_v59, %v5111_v25  ;;  %v5201_v50 = vpop.f32.mrf.mxu0  ;;  %v5290_v48 = vpop.f32.mrf.mxu1  ;;  %v12221_v57 = vpack.c.bf16 %v5621_v3, %v5619_v17  ;;  %v12223_v31 = vpack.c.bf16 %v5622_v62, %v5620_v12  ;;  %v10059_v59 = vld [vmem:[#allocation5 + $0x40] sm:$0xf]  ;;  %v12239_v12 = vunpack.c.l.bf16 %v6251_v54 }
 0x62f   : > { %v5291_v37 = vadd.f32 %v5290_v48, %v5201_v50  ;;  %v10060_v30 = vor.u32 %v10632_v47, %v10059_v59  ;;  %v10634_v48 = vld [vmem:[#allocation5 + $0x64] sm:$0xf]  ;;  %v10189_v47 = vld [vmem:[#allocation5 + $0x150] sm:$0xf0] }
 0x630   : > { %v5397_v19 = vunpack.c.l.bf16 %v5323_v36  ;;  %v5398_v16 = vunpack.c.h.bf16 %v5323_v36  ;;  %v10080_v27 = vor.u32 %v10634_v48, %v10077_v58  ;;  %v10662_v59 = vld [vmem:[#allocation5 + $0x144] sm:$0xf] }
 0x631   : > { %6963 = vmatpush.bf16.msrb.mxu2 %v10060_v30 }
 0x632   : > { %v5463_v20 = vadd.f32 %v12038_v34, %v5397_v19  ;;  %v5464_v56 = vadd.f32 %v12040_v15, %v5398_v16  ;;  %7140 = vmatpush.bf16.msrb.mxu0 %v10080_v27 }
 0x633   : > { %v5023_v45 = vpop.f32.mrf.mxu2  ;;  %v5112_v53 = vpop.f32.mrf.mxu3 }
 0x634   : > { %v5113_v44 = vadd.f32 %v5112_v53, %v5023_v45  ;;  %v5623_v49 = vmax.f32 %v5463_v20, 0.0  ;;  %v5624_v10 = vmax.f32 %v5464_v56, 0.0 }
 0x636   : > { %v5324_v43 = vpack.c.bf16 %v5291_v37, %v5113_v44  ;;  %v6039_v2 = vpop.f32.mrf.mxu0  ;;  %v6128_v46 = vpop.f32.mrf.mxu1 }
 0x637   : > { %v6129_v9 = vadd.f32 %v6128_v46, %v6039_v2 }
 0x638   : > { %v5399_v52 = vunpack.c.l.bf16 %v5324_v43  ;;  %v5400_v7 = vunpack.c.h.bf16 %v5324_v43  ;;  %5900 = vmatmul.bf16.gmra.mxu2 %v12146_v32  ;;  %5989 = vmatmul.bf16.gmra.mxu3 %v12148_v6 }
 0x639   : > { %6078 = vmatmul.bf16.gmra.mxu0 %v12146_v32  ;;  %6167 = vmatmul.bf16.gmra.mxu1 %v12148_v6 }
 0x63a   : > { %v5465_v28 = vadd.f32 %v12038_v34, %v5399_v52  ;;  %v5466_v41 = vadd.f32 %v12040_v15, %v5400_v7  ;;  %v6248_v15 = vperm.slane %v6246_v23, 0  ;;  %v10187_v7 = vld [vmem:[#allocation5 + $0x140] sm:$0xf] }
 0x63b   : > { %v5861_v14 = vpop.f32.mrf.mxu2  ;;  %v5950_v21 = vpop.f32.mrf.mxu3  ;;  %v10188_v38 = vor.u32 %v10664_v33, %v10187_v7 }
 0x63c   : > { %v5951_v60 = vadd.f32 %v5950_v21, %v5861_v14  ;;  %v5625_v22 = vmax.f32 %v5465_v28, 0.0  ;;  %v5626_v51 = vmax.f32 %v5466_v41, 0.0  ;;  %v12237_v3 = vunpack.c.l.bf16 %v6248_v15 }
 0x63d   : > { %7052 = vmatpush.bf16.msrb.mxu3 %v10188_v38 }
 0x63e   : > { %v6208_v63 = vpack.c.bf16 %v6129_v9, %v5951_v60  ;;  %v6041_v32 = vpop.f32.mrf.mxu0  ;;  %v6130_v18 = vpop.f32.mrf.mxu1  ;;  %v12233_v6 = vpack.c.bf16 %v5625_v22, %v5623_v49  ;;  %v12235_v34 = vpack.c.bf16 %v5626_v51, %v5624_v10  ;;  %v10192_v22 = vor.u32 %v10662_v59, %v10189_v47 }
 0x63f   : > { %v6131_v1 = vadd.f32 %v6130_v18, %v6041_v32 }
 0x640   : > { %v6252_v17 = vunpack.c.l.bf16 %v6208_v63  ;;  %v6253_v25 = vunpack.c.h.bf16 %v6208_v63  ;;  %7230 = vmatpush.bf16.msrb.mxu1 %v10192_v22 }
 0x642   : > { %v6318_v16 = vadd.f32 %v12237_v3, %v6252_v17  ;;  %v6319_v45 = vadd.f32 %v12239_v12, %v6253_v25 }
 0x643   : > { %v5863_v62 = vpop.f32.mrf.mxu2  ;;  %v5952_v36 = vpop.f32.mrf.mxu3 }
 0x644   : > { %v5953_v50 = vadd.f32 %v5952_v36, %v5863_v62  ;;  %v6478_v43 = vmax.f32 %v6318_v16, 0.0  ;;  %v6479_v2 = vmax.f32 %v6319_v45, 0.0 }
 0x646   : > { %v6209_v37 = vpack.c.bf16 %v6131_v1, %v5953_v50  ;;  %v6044_v61 = vpop.f32.mrf.mxu0  ;;  %v6133_v19 = vpop.f32.mrf.mxu1 }
 0x647   : > { %v6134_v53 = vadd.f32 %v6133_v19, %v6044_v61  ;;  %v10043_v61 = vld [vmem:[#allocation5 + $0x20] sm:$0xf]  ;;  %v10628_v19 = vld [vmem:[#allocation5 + $0x2c] sm:$0xf0] }
 0x648   : > { %v6254_v44 = vunpack.c.l.bf16 %v6209_v37  ;;  %v6255_v55 = vunpack.c.h.bf16 %v6209_v37  ;;  %5905 = vmatmul.bf16.gmra.mxu2 %v12158_v39  ;;  %5994 = vmatmul.bf16.gmra.mxu3 %v12160_v4  ;;  %v10044_v16 = vor.u32 %v10628_v19, %v10043_v61 }
 0x649   : > { %6083 = vmatmul.bf16.gmra.mxu0 %v12158_v39  ;;  %6172 = vmatmul.bf16.gmra.mxu1 %v12160_v4 }
 0x64a   : > { %v6320_v0 = vadd.f32 %v12237_v3, %v6254_v44  ;;  %v6321_v24 = vadd.f32 %v12239_v12, %v6255_v55  ;;  %6964 = vmatpush.bf16.msrb.mxu2 %v10044_v16 }
 0x64b   : > { %v5866_v46 = vpop.f32.mrf.mxu2  ;;  %v5955_v9 = vpop.f32.mrf.mxu3 }
 0x64c   : > { %v6480_v20 = vmax.f32 %v6320_v0, 0.0  ;;  %v6481_v56 = vmax.f32 %v6321_v24, 0.0  ;;  %v5956_v52 = vadd.f32 %v5955_v9, %v5866_v46  ;;  %v10630_v9 = vld [vmem:[#allocation5 + $0x44] sm:$0xf] }
 0x64e   : > { %v12249_v28 = vpack.c.bf16 %v6480_v20, %v6478_v43  ;;  %v12251_v41 = vpack.c.bf16 %v6481_v56, %v6479_v2  ;;  %v6210_v39 = vpack.c.bf16 %v6134_v53, %v5956_v52  ;;  %v6046_v4 = vpop.f32.mrf.mxu0  ;;  %v6135_v14 = vpop.f32.mrf.mxu1  ;;  %v10061_v20 = vld [vmem:[#allocation5 + $0x50] sm:$0xf0] }
 0x64f   : > { %v6136_v21 = vadd.f32 %v6135_v14, %v6046_v4  ;;  %v10064_v56 = vor.u32 %v10630_v9, %v10061_v20 }
 0x650   : > { %v6256_v23 = vunpack.c.l.bf16 %v6210_v39  ;;  %v6257_v26 = vunpack.c.h.bf16 %v6210_v39 }
 0x651   : > { %7141 = vmatpush.bf16.msrb.mxu0 %v10064_v56 }
 0x652   : > { %v6322_v32 = vadd.f32 %v12237_v3, %v6256_v23  ;;  %v6323_v18 = vadd.f32 %v12239_v12, %v6257_v26 }
 0x653   : > { %v5868_v49 = vpop.f32.mrf.mxu2  ;;  %v5957_v10 = vpop.f32.mrf.mxu3 }
 0x654   : > { %v5958_v60 = vadd.f32 %v5957_v10, %v5868_v49  ;;  %v6482_v62 = vmax.f32 %v6322_v32, 0.0  ;;  %v6483_v36 = vmax.f32 %v6323_v18, 0.0 }
 0x656   : > { %v6211_v51 = vpack.c.bf16 %v6136_v21, %v5958_v60  ;;  %v6049_v30 = vpop.f32.mrf.mxu0  ;;  %v6138_v63 = vpop.f32.mrf.mxu1 }
 0x657   : > { %v6139_v15 = vadd.f32 %v6138_v63, %v6049_v30  ;;  %v10171_v30 = vld [vmem:[#allocation5 + $0x120] sm:$0xf]  ;;  %v10660_v63 = vld [vmem:[#allocation5 + $0x12c] sm:$0xf0] }
 0x658   : > { %v6258_v54 = vunpack.c.l.bf16 %v6211_v51  ;;  %v6259_v1 = vunpack.c.h.bf16 %v6211_v51  ;;  %5910 = vmatmul.bf16.gmra.mxu2 %v12170_v5  ;;  %5999 = vmatmul.bf16.gmra.mxu3 %v12172_v11  ;;  %v10172_v32 = vor.u32 %v10660_v63, %v10171_v30 }
 0x659   : > { %6088 = vmatmul.bf16.gmra.mxu0 %v12170_v5  ;;  %6177 = vmatmul.bf16.gmra.mxu1 %v12172_v11 }
 0x65a   : > { %v6324_v17 = vadd.f32 %v12237_v3, %v6258_v54  ;;  %v6325_v25 = vadd.f32 %v12239_v12, %v6259_v1  ;;  %7053 = vmatpush.bf16.msrb.mxu3 %v10172_v32 }
 0x65b   : > { %v5871_v50 = vpop.f32.mrf.mxu2  ;;  %v5960_v48 = vpop.f32.mrf.mxu3 }
 0x65c   : > { %v6484_v58 = vmax.f32 %v6324_v17, 0.0  ;;  %v6485_v27 = vmax.f32 %v6325_v25, 0.0  ;;  %v5961_v37 = vadd.f32 %v5960_v48, %v5871_v50  ;;  %v10658_v48 = vld [vmem:[#allocation5 + $0x124] sm:$0xf] }
 0x65e   : > { %v6212_v45 = vpack.c.bf16 %v6139_v15, %v5961_v37  ;;  %v6051_v53 = vpop.f32.mrf.mxu0  ;;  %v6140_v44 = vpop.f32.mrf.mxu1  ;;  %v12261_v5 = vpack.c.bf16 %v6484_v58, %v6482_v62  ;;  %v12263_v11 = vpack.c.bf16 %v6485_v27, %v6483_v36  ;;  %v10173_v58 = vld [vmem:[#allocation5 + $0x130] sm:$0xf0] }
 0x65f   : > { %v6141_v55 = vadd.f32 %v6140_v44, %v6051_v53  ;;  %v10176_v27 = vor.u32 %v10658_v48, %v10173_v58 }
 0x660   : > { %v6260_v0 = vunpack.c.l.bf16 %v6212_v45  ;;  %v6261_v24 = vunpack.c.h.bf16 %v6212_v45 }
 0x661   : > { %7231 = vmatpush.bf16.msrb.mxu1 %v10176_v27 }
 0x662   : > { %v6326_v38 = vadd.f32 %v12237_v3, %v6260_v0  ;;  %v6327_v39 = vadd.f32 %v12239_v12, %v6261_v24 }
 0x663   : > { %v5873_v43 = vpop.f32.mrf.mxu2  ;;  %v5962_v2 = vpop.f32.mrf.mxu3 }
 0x664   : > { %v5963_v46 = vadd.f32 %v5962_v2, %v5873_v43  ;;  %v6486_v49 = vmax.f32 %v6326_v38, 0.0  ;;  %v6487_v10 = vmax.f32 %v6327_v39, 0.0 }
 0x666   : > { %v6213_v52 = vpack.c.bf16 %v6141_v55, %v5963_v46  ;;  %v6054_v7 = vpop.f32.mrf.mxu0  ;;  %v6143_v33 = vpop.f32.mrf.mxu1 }
 0x667   : > { %v6144_v4 = vadd.f32 %v6143_v33, %v6054_v7  ;;  %v10027_v7 = vld [vmem:[#allocation5] sm:$0xf]  ;;  %v10624_v33 = vld [vmem:[#allocation5 + $0xc] sm:$0xf0] }
 0x668   : > { %v6262_v14 = vunpack.c.l.bf16 %v6213_v52  ;;  %v6263_v21 = vunpack.c.h.bf16 %v6213_v52  ;;  %5915 = vmatmul.bf16.gmra.mxu2 %v12182_v13  ;;  %6004 = vmatmul.bf16.gmra.mxu3 %v12184_v40  ;;  %v10028_v38 = vor.u32 %v10624_v33, %v10027_v7  ;;  %v10029_v7 = vld [vmem:[#allocation5 + $0x10] sm:$0xf0] }
 0x669   : > { %6093 = vmatmul.bf16.gmra.mxu0 %v12182_v13  ;;  %6182 = vmatmul.bf16.gmra.mxu1 %v12184_v40 }
 0x66a   : > { %v6328_v23 = vadd.f32 %v12237_v3, %v6262_v14  ;;  %v6329_v26 = vadd.f32 %v12239_v12, %v6263_v21  ;;  %6965 = vmatpush.bf16.msrb.mxu2 %v10028_v38 }
 0x66b   : > { %v5876_v60 = vpop.f32.mrf.mxu2  ;;  %v5965_v59 = vpop.f32.mrf.mxu3 }
 0x66c   : > { %v6488_v47 = vmax.f32 %v6328_v23, 0.0  ;;  %v6489_v22 = vmax.f32 %v6329_v26, 0.0  ;;  %v5966_v51 = vadd.f32 %v5965_v59, %v5876_v60  ;;  %v10626_v59 = vld [vmem:[#allocation5 + $0x24] sm:$0xf] }
 0x66e   : > { %v6214_v18 = vpack.c.bf16 %v6144_v4, %v5966_v51  ;;  %v6056_v15 = vpop.f32.mrf.mxu0  ;;  %v6145_v54 = vpop.f32.mrf.mxu1  ;;  %v12273_v13 = vpack.c.bf16 %v6488_v47, %v6486_v49  ;;  %v12275_v40 = vpack.c.bf16 %v6489_v22, %v6487_v10  ;;  %v10045_v47 = vld [vmem:[#allocation5 + $0x30] sm:$0xf0] }
 0x66f   : > { %v6146_v1 = vadd.f32 %v6145_v54, %v6056_v15  ;;  %v10048_v22 = vor.u32 %v10626_v59, %v10045_v47 }
 0x670   : > { %v6264_v17 = vunpack.c.l.bf16 %v6214_v18  ;;  %v6265_v25 = vunpack.c.h.bf16 %v6214_v18 }
 0x671   : > { %7142 = vmatpush.bf16.msrb.mxu0 %v10048_v22 }
 0x672   : > { %v6330_v16 = vadd.f32 %v12237_v3, %v6264_v17  ;;  %v6331_v45 = vadd.f32 %v12239_v12, %v6265_v25 }
 0x673   : > { %v5878_v62 = vpop.f32.mrf.mxu2  ;;  %v5967_v36 = vpop.f32.mrf.mxu3 }
 0x674   : > { %v5968_v50 = vadd.f32 %v5967_v36, %v5878_v62  ;;  %v6490_v43 = vmax.f32 %v6330_v16, 0.0  ;;  %v6491_v2 = vmax.f32 %v6331_v45, 0.0 }
 0x676   : > { %v6215_v37 = vpack.c.bf16 %v6146_v1, %v5968_v50  ;;  %v6059_v61 = vpop.f32.mrf.mxu0  ;;  %v6148_v19 = vpop.f32.mrf.mxu1 }
 0x677   : > { %v6149_v53 = vadd.f32 %v6148_v19, %v6059_v61  ;;  %v10155_v61 = vld [vmem:[#allocation5 + $0x100] sm:$0xf]  ;;  %v10656_v19 = vld [vmem:[#allocation5 + $0x10c] sm:$0xf0] }
 0x678   : > { %v6266_v44 = vunpack.c.l.bf16 %v6215_v37  ;;  %v6267_v55 = vunpack.c.h.bf16 %v6215_v37  ;;  %5920 = vmatmul.bf16.gmra.mxu2 %v12194_v29  ;;  %6009 = vmatmul.bf16.gmra.mxu3 %v12196_v35  ;;  %v10156_v16 = vor.u32 %v10656_v19, %v10155_v61 }
 0x679   : > { %6098 = vmatmul.bf16.gmra.mxu0 %v12194_v29  ;;  %6187 = vmatmul.bf16.gmra.mxu1 %v12196_v35 }
 0x67a   : > { %v6332_v0 = vadd.f32 %v12237_v3, %v6266_v44  ;;  %v6333_v24 = vadd.f32 %v12239_v12, %v6267_v55  ;;  %7054 = vmatpush.bf16.msrb.mxu3 %v10156_v16 }
 0x67b   : > { %v5881_v46 = vpop.f32.mrf.mxu2  ;;  %v5970_v9 = vpop.f32.mrf.mxu3 }
 0x67c   : > { %v6492_v20 = vmax.f32 %v6332_v0, 0.0  ;;  %v6493_v56 = vmax.f32 %v6333_v24, 0.0  ;;  %v5971_v52 = vadd.f32 %v5970_v9, %v5881_v46  ;;  %v10654_v46 = vld [vmem:[#allocation5 + $0x104] sm:$0xf]  ;;  %v10157_v9 = vld [vmem:[#allocation5 + $0x110] sm:$0xf0] }
 0x67e   : > { %v6216_v39 = vpack.c.bf16 %v6149_v53, %v5971_v52  ;;  %v6061_v4 = vpop.f32.mrf.mxu0  ;;  %v6150_v14 = vpop.f32.mrf.mxu1  ;;  %v12285_v29 = vpack.c.bf16 %v6492_v20, %v6490_v43  ;;  %v12287_v35 = vpack.c.bf16 %v6493_v56, %v6491_v2  ;;  %v10622_v20 = vld [vmem:[#allocation5 + $0x4] sm:$0xf]  ;;  %v10160_v52 = vor.u32 %v10654_v46, %v10157_v9 }
 0x67f   : > { %v6151_v21 = vadd.f32 %v6150_v14, %v6061_v4  ;;  %v10032_v33 = vor.u32 %v10622_v20, %v10029_v7  ;;  %v10275_v7 = vld [vmem:[#allocation5 + $0x1e8] sm:$0xf] }
 0x680   : > { %v6268_v23 = vunpack.c.l.bf16 %v6216_v39  ;;  %v6269_v26 = vunpack.c.h.bf16 %v6216_v39  ;;  %7232 = vmatpush.bf16.msrb.mxu1 %v10160_v52 }
 0x681   : > { %7143 = vmatpush.bf16.msrb.mxu0 %v10032_v33  ;;  %v10685_v33 = vld [vmem:[#allocation5 + $0x1f4] sm:$0xf0] }
 0x682   : > { %v6334_v32 = vadd.f32 %v12237_v3, %v6268_v23  ;;  %v6335_v18 = vadd.f32 %v12239_v12, %v6269_v26 }
 0x683   : > { %v5883_v49 = vpop.f32.mrf.mxu2  ;;  %v5972_v10 = vpop.f32.mrf.mxu3 }
 0x684   : > { %v5973_v60 = vadd.f32 %v5972_v10, %v5883_v49  ;;  %v6494_v62 = vmax.f32 %v6334_v32, 0.0  ;;  %v6495_v36 = vmax.f32 %v6335_v18, 0.0  ;;  %v10147_v18 = vld [vmem:[#allocation5 + $0xe8] sm:$0xf] }
 0x686   : > { %v6217_v51 = vpack.c.bf16 %v6151_v21, %v5973_v60  ;;  %v6064_v30 = vpop.f32.mrf.mxu0  ;;  %v6153_v63 = vpop.f32.mrf.mxu1 }
 0x687   : > { %v6154_v15 = vadd.f32 %v6153_v63, %v6064_v30 }
 0x688   : > { %v6270_v54 = vunpack.c.l.bf16 %v6217_v51  ;;  %v6271_v1 = vunpack.c.h.bf16 %v6217_v51  ;;  %5925 = vmatmul.bf16.gmra.mxu2 %v12209_v42  ;;  %6014 = vmatmul.bf16.gmra.mxu3 %v12211_v8 }
 0x689   : > { %6103 = vmatmul.bf16.gmra.mxu0 %v12209_v42  ;;  %6192 = vmatmul.bf16.gmra.mxu1 %v12211_v8 }
 0x68a   : > { %v6336_v17 = vadd.f32 %v12237_v3, %v6270_v54  ;;  %v6337_v25 = vadd.f32 %v12239_v12, %v6271_v1 }
 0x68b   : > { %v5886_v50 = vpop.f32.mrf.mxu2  ;;  %v5975_v48 = vpop.f32.mrf.mxu3 }
 0x68c   : > { %v6496_v58 = vmax.f32 %v6336_v17, 0.0  ;;  %v6497_v27 = vmax.f32 %v6337_v25, 0.0  ;;  %v5976_v37 = vadd.f32 %v5975_v48, %v5886_v50 }
 0x68e   : > { %v6218_v45 = vpack.c.bf16 %v6154_v15, %v5976_v37  ;;  %v6066_v53 = vpop.f32.mrf.mxu0  ;;  %v6155_v44 = vpop.f32.mrf.mxu1  ;;  %v12297_v42 = vpack.c.bf16 %v6496_v58, %v6494_v62  ;;  %v12299_v8 = vpack.c.bf16 %v6497_v27, %v6495_v36  ;;  %v10653_v15 = vld [vmem:[#allocation5 + $0xf4] sm:$0xf0] }
 0x68f   : > { %v6156_v55 = vadd.f32 %v6155_v44, %v6066_v53  ;;  %v10148_v54 = vor.u32 %v10653_v15, %v10147_v18 }
 0x690   : > { %v6272_v0 = vunpack.c.l.bf16 %v6218_v45  ;;  %v6273_v24 = vunpack.c.h.bf16 %v6218_v45 }
 0x691   : > { %7314 = vmatpush.bf16.msra.mxu2 %v10148_v54 }
 0x692   : > { %v6338_v14 = vadd.f32 %v12237_v3, %v6272_v0  ;;  %v6339_v21 = vadd.f32 %v12239_v12, %v6273_v24 }
 0x693   : > { %v5888_v43 = vpop.f32.mrf.mxu2  ;;  %v5977_v2 = vpop.f32.mrf.mxu3 }
 0x694   : > { %v5978_v56 = vadd.f32 %v5977_v2, %v5888_v43  ;;  %v6498_v59 = vmax.f32 %v6338_v14, 0.0  ;;  %v6499_v47 = vmax.f32 %v6339_v21, 0.0 }
 0x696   : > { %v6219_v38 = vpack.c.bf16 %v6156_v55, %v5978_v56  ;;  %v6069_v39 = vpop.f32.mrf.mxu0  ;;  %v6158_v4 = vpop.f32.mrf.mxu1 }
 0x697   : > { %v6159_v23 = vadd.f32 %v6158_v4, %v6069_v39 }
 0x698   : > { %v6274_v26 = vunpack.c.l.bf16 %v6219_v38  ;;  %v6275_v49 = vunpack.c.h.bf16 %v6219_v38  ;;  %5930 = vmatmul.bf16.gmra.mxu2 %v12221_v57  ;;  %6019 = vmatmul.bf16.gmra.mxu3 %v12223_v31  ;;  %v10276_v38 = vor.u32 %v10685_v33, %v10275_v7 }
 0x699   : > { %6108 = vmatmul.bf16.gmra.mxu0 %v12221_v57  ;;  %6197 = vmatmul.bf16.gmra.mxu1 %v12223_v31 }
 0x69a   : > { %v6340_v10 = vadd.f32 %v12237_v3, %v6274_v26  ;;  %v6341_v60 = vadd.f32 %v12239_v12, %v6275_v49  ;;  %7403 = vmatpush.bf16.msra.mxu3 %v10276_v38 }
 0x69b   : > { %v5891_v22 = vpop.f32.mrf.mxu2  ;;  %v5980_v51 = vpop.f32.mrf.mxu3 }
 0x69c   : > { %v6500_v30 = vmax.f32 %v6340_v10, 0.0  ;;  %v6501_v63 = vmax.f32 %v6341_v60, 0.0  ;;  %v5981_v32 = vadd.f32 %v5980_v51, %v5891_v22 }
 0x69e   : > { %v6220_v1 = vpack.c.bf16 %v6159_v23, %v5981_v32  ;;  %v6071_v17 = vpop.f32.mrf.mxu0  ;;  %v6160_v25 = vpop.f32.mrf.mxu1  ;;  %v12309_v57 = vpack.c.bf16 %v6500_v30, %v6498_v59  ;;  %v12311_v31 = vpack.c.bf16 %v6501_v63, %v6499_v47  ;;  %v10683_v59 = vld [vmem:[#allocation5 + $0x1ec] sm:$0xf]  ;;  %v10277_v47 = vld [vmem:[#allocation5 + $0x1f8] sm:$0xf0] }
 0x69f   : > { %v6161_v62 = vadd.f32 %v6160_v25, %v6071_v17  ;;  %v10280_v22 = vor.u32 %v10683_v59, %v10277_v47 }
 0x6a0   : > { %v6276_v36 = vunpack.c.l.bf16 %v6220_v1  ;;  %v6277_v50 = vunpack.c.h.bf16 %v6220_v1 }
 0x6a1   : > { %7581 = vmatpush.bf16.msra.mxu1 %v10280_v22 }
 0x6a2   : > { %v6342_v16 = vadd.f32 %v12237_v3, %v6276_v36  ;;  %v6343_v45 = vadd.f32 %v12239_v12, %v6277_v50 }
 0x6a3   : > { %v5893_v48 = vpop.f32.mrf.mxu2  ;;  %v5982_v58 = vpop.f32.mrf.mxu3 }
 0x6a4   : > { %v5983_v27 = vadd.f32 %v5982_v58, %v5893_v48  ;;  %v6502_v43 = vmax.f32 %v6342_v16, 0.0  ;;  %v6503_v2 = vmax.f32 %v6343_v45, 0.0 }
 0x6a6   : > { %v6221_v37 = vpack.c.bf16 %v6161_v62, %v5983_v27  ;;  %v6074_v61 = vpop.f32.mrf.mxu0  ;;  %v6163_v19 = vpop.f32.mrf.mxu1 }
 0x6a7   : > { %v6164_v53 = vadd.f32 %v6163_v19, %v6074_v61  ;;  %v10131_v61 = vld [vmem:[#allocation5 + $0xc8] sm:$0xf]  ;;  %v10649_v19 = vld [vmem:[#allocation5 + $0xd4] sm:$0xf0] }
 0x6a8   : > { %v6278_v44 = vunpack.c.l.bf16 %v6221_v37  ;;  %v6279_v55 = vunpack.c.h.bf16 %v6221_v37  ;;  %5935 = vmatmul.bf16.gmra.mxu2 %v12233_v6  ;;  %6024 = vmatmul.bf16.gmra.mxu3 %v12235_v34  ;;  %v10132_v16 = vor.u32 %v10649_v19, %v10131_v61  ;;  %v10679_v61 = vld [vmem:[#allocation5 + $0x1cc] sm:$0xf]  ;;  %v10261_v19 = vld [vmem:[#allocation5 + $0x1d8] sm:$0xf0] }
 0x6a9   : > { %6113 = vmatmul.bf16.gmra.mxu0 %v12233_v6  ;;  %6202 = vmatmul.bf16.gmra.mxu1 %v12235_v34 }
 0x6aa   : > { %v6344_v0 = vadd.f32 %v12237_v3, %v6278_v44  ;;  %v6345_v24 = vadd.f32 %v12239_v12, %v6279_v55  ;;  %7315 = vmatpush.bf16.msra.mxu2 %v10132_v16  ;;  %v10264_v16 = vor.u32 %v10679_v61, %v10261_v19 }
 0x6ab   : > { %v5896_v46 = vpop.f32.mrf.mxu2  ;;  %v5985_v9 = vpop.f32.mrf.mxu3 }
 0x6ac   : > { %v6504_v20 = vmax.f32 %v6344_v0, 0.0  ;;  %v6505_v56 = vmax.f32 %v6345_v24, 0.0  ;;  %v5986_v52 = vadd.f32 %v5985_v9, %v5896_v46  ;;  %7582 = vmatpush.bf16.msra.mxu1 %v10264_v16 }
 0x6ae   : > { %v6222_v39 = vpack.c.bf16 %v6164_v53, %v5986_v52  ;;  %v6076_v4 = vpop.f32.mrf.mxu0  ;;  %v6165_v14 = vpop.f32.mrf.mxu1  ;;  %v12321_v6 = vpack.c.bf16 %v6504_v20, %v6502_v43  ;;  %v12323_v34 = vpack.c.bf16 %v6505_v56, %v6503_v2  ;;  %v10651_v56 = vld [vmem:[#allocation5 + $0xec] sm:$0xf]  ;;  %v10149_v52 = vld [vmem:[#allocation5 + $0xf8] sm:$0xf0] }
 0x6af   : > { %v6166_v21 = vadd.f32 %v6165_v14, %v6076_v4  ;;  %v10152_v7 = vor.u32 %v10651_v56, %v10149_v52 }
 0x6b0   : > { %v6280_v23 = vunpack.c.l.bf16 %v6222_v39  ;;  %v6281_v26 = vunpack.c.h.bf16 %v6222_v39 }
 0x6b1   : > { %7492 = vmatpush.bf16.msra.mxu0 %v10152_v7 }
 0x6b2   : > { %v6346_v32 = vadd.f32 %v12237_v3, %v6280_v23  ;;  %v6347_v18 = vadd.f32 %v12239_v12, %v6281_v26 }
 0x6b3   : > { %v5898_v49 = vpop.f32.mrf.mxu2  ;;  %v5987_v10 = vpop.f32.mrf.mxu3 }
 0x6b4   : > { %v5988_v60 = vadd.f32 %v5987_v10, %v5898_v49  ;;  %v6506_v62 = vmax.f32 %v6346_v32, 0.0  ;;  %v6507_v36 = vmax.f32 %v6347_v18, 0.0  ;;  %v10259_v32 = vld [vmem:[#allocation5 + $0x1c8] sm:$0xf]  ;;  %v10681_v18 = vld [vmem:[#allocation5 + $0x1d4] sm:$0xf0] }
 0x6b6   : > { %v6223_v51 = vpack.c.bf16 %v6166_v21, %v5988_v60  ;;  %v6079_v30 = vpop.f32.mrf.mxu0  ;;  %v6168_v63 = vpop.f32.mrf.mxu1 }
 0x6b7   : > { %v6169_v15 = vadd.f32 %v6168_v63, %v6079_v30 }
 0x6b8   : > { %v6282_v54 = vunpack.c.l.bf16 %v6223_v51  ;;  %v6283_v1 = vunpack.c.h.bf16 %v6223_v51  ;;  %6966 = vmatmul.bf16.vlgmr.msrb.gmra.mxu2 %v12249_v28  ;;  %7055 = vmatmul.bf16.vlgmr.msrb.gmra.mxu3 %v12251_v41 }
 0x6b9   : > { %7144 = vmatmul.bf16.vlgmr.msrb.gmra.mxu0 %v12249_v28  ;;  %7233 = vmatmul.bf16.vlgmr.msrb.gmra.mxu1 %v12251_v41 }
 0x6ba   : > { %v6348_v17 = vadd.f32 %v12237_v3, %v6282_v54  ;;  %v6349_v25 = vadd.f32 %v12239_v12, %v6283_v1 }
 0x6bb   : > { %v5901_v50 = vpop.f32.mrf.mxu2  ;;  %v5990_v48 = vpop.f32.mrf.mxu3 }
 0x6bc   : > { %v6508_v58 = vmax.f32 %v6348_v17, 0.0  ;;  %v6509_v27 = vmax.f32 %v6349_v25, 0.0  ;;  %v5991_v37 = vadd.f32 %v5990_v48, %v5901_v50 }
 0x6be   : > { %v6224_v45 = vpack.c.bf16 %v6169_v15, %v5991_v37  ;;  %v6081_v53 = vpop.f32.mrf.mxu0  ;;  %v6170_v44 = vpop.f32.mrf.mxu1  ;;  %v12333_v55 = vpack.c.bf16 %v6508_v58, %v6506_v62  ;;  %v12335_v0 = vpack.c.bf16 %v6509_v27, %v6507_v36  ;;  %v10260_v15 = vor.u32 %v10681_v18, %v10259_v32 }
 0x6bf   : > { %v6171_v24 = vadd.f32 %v6170_v44, %v6081_v53 }
 0x6c0   : > { %v6284_v43 = vunpack.c.l.bf16 %v6224_v45  ;;  %v6285_v2 = vunpack.c.h.bf16 %v6224_v45  ;;  %7404 = vmatpush.bf16.msra.mxu3 %v10260_v15  ;;  %v10647_v15 = vld [vmem:[#allocation5 + $0xcc] sm:$0xf] }
 0x6c2   : > { %v6350_v4 = vadd.f32 %v12237_v3, %v6284_v43  ;;  %v6351_v14 = vadd.f32 %v12239_v12, %v6285_v2 }
 0x6c3   : > { %v5903_v46 = vpop.f32.mrf.mxu2  ;;  %v5992_v9 = vpop.f32.mrf.mxu3 }
 0x6c4   : > { %v5993_v20 = vadd.f32 %v5992_v9, %v5903_v46  ;;  %v6510_v60 = vmax.f32 %v6350_v4, 0.0  ;;  %v6511_v59 = vmax.f32 %v6351_v14, 0.0 }
 0x6c6   : > { %v6225_v33 = vpack.c.bf16 %v6171_v24, %v5993_v20  ;;  %v6084_v38 = vpop.f32.mrf.mxu0  ;;  %v6173_v39 = vpop.f32.mrf.mxu1 }
 0x6c7   : > { %v6174_v21 = vadd.f32 %v6173_v39, %v6084_v38 }
 0x6c8   : > { %v6286_v23 = vunpack.c.l.bf16 %v6225_v33  ;;  %v6287_v26 = vunpack.c.h.bf16 %v6225_v33  ;;  %6971 = vmatmul.bf16.gmra.mxu2 %v12261_v5  ;;  %7060 = vmatmul.bf16.gmra.mxu3 %v12263_v11 }
 0x6c9   : > { %7149 = vmatmul.bf16.gmra.mxu0 %v12261_v5  ;;  %7238 = vmatmul.bf16.gmra.mxu1 %v12263_v11 }
 0x6ca   : > { %v6352_v49 = vadd.f32 %v12237_v3, %v6286_v23  ;;  %v6353_v10 = vadd.f32 %v12239_v12, %v6287_v26  ;;  %v10645_v23 = vld [vmem:[#allocation5 + $0xb4] sm:$0xf0] }
 0x6cb   : > { %v5906_v47 = vpop.f32.mrf.mxu2  ;;  %v5995_v22 = vpop.f32.mrf.mxu3 }
 0x6cc   : > { %v6512_v51 = vmax.f32 %v6352_v49, 0.0  ;;  %v6513_v30 = vmax.f32 %v6353_v10, 0.0  ;;  %v5996_v63 = vadd.f32 %v5995_v22, %v5906_v47 }
 0x6ce   : > { %v6226_v54 = vpack.c.bf16 %v6174_v21, %v5996_v63  ;;  %v6086_v1 = vpop.f32.mrf.mxu0  ;;  %v6175_v17 = vpop.f32.mrf.mxu1  ;;  %v12345_v25 = vpack.c.bf16 %v6512_v51, %v6510_v60  ;;  %v12347_v62 = vpack.c.bf16 %v6513_v30, %v6511_v59  ;;  %v10115_v21 = vld [vmem:[#allocation5 + $0xa8] sm:$0xf] }
 0x6cf   : > { %v6176_v36 = vadd.f32 %v6175_v17, %v6086_v1  ;;  %v10116_v26 = vor.u32 %v10645_v23, %v10115_v21 }
 0x6d0   : > { %v6288_v50 = vunpack.c.l.bf16 %v6226_v54  ;;  %v6289_v48 = vunpack.c.h.bf16 %v6226_v54  ;;  %v10133_v54 = vld [vmem:[#allocation5 + $0xd8] sm:$0xf0] }
 0x6d1   : > { %7316 = vmatpush.bf16.msra.mxu2 %v10116_v26  ;;  %v10136_v1 = vor.u32 %v10647_v15, %v10133_v54 }
 0x6d2   : > { %v6354_v24 = vadd.f32 %v12237_v3, %v6288_v50  ;;  %v6355_v43 = vadd.f32 %v12239_v12, %v6289_v48 }
 0x6d3   : > { %v5908_v58 = vpop.f32.mrf.mxu2  ;;  %v5997_v27 = vpop.f32.mrf.mxu3  ;;  %7493 = vmatpush.bf16.msra.mxu0 %v10136_v1 }
 0x6d4   : > { %v5998_v37 = vadd.f32 %v5997_v27, %v5908_v58  ;;  %v6514_v52 = vmax.f32 %v6354_v24, 0.0  ;;  %v6515_v7 = vmax.f32 %v6355_v43, 0.0 }
 0x6d6   : > { %v6227_v45 = vpack.c.bf16 %v6176_v36, %v5998_v37  ;;  %v6089_v53 = vpop.f32.mrf.mxu0  ;;  %v6178_v44 = vpop.f32.mrf.mxu1 }
 0x6d7   : > { %v6179_v2 = vadd.f32 %v6178_v44, %v6089_v53 }
 0x6d8   : > { %v6290_v46 = vunpack.c.l.bf16 %v6227_v45  ;;  %v6291_v9 = vunpack.c.h.bf16 %v6227_v45  ;;  %6976 = vmatmul.bf16.gmra.mxu2 %v12273_v13  ;;  %7065 = vmatmul.bf16.gmra.mxu3 %v12275_v40 }
 0x6d9   : > { %7154 = vmatmul.bf16.gmra.mxu0 %v12273_v13  ;;  %7243 = vmatmul.bf16.gmra.mxu1 %v12275_v40 }
 0x6da   : > { %v6356_v20 = vadd.f32 %v12237_v3, %v6290_v46  ;;  %v6357_v56 = vadd.f32 %v12239_v12, %v6291_v9  ;;  %v10243_v9 = vld [vmem:[#allocation5 + $0x1a8] sm:$0xf] }
 0x6db   : > { %v5911_v33 = vpop.f32.mrf.mxu2  ;;  %v6000_v38 = vpop.f32.mrf.mxu3 }
 0x6dc   : > { %v6516_v39 = vmax.f32 %v6356_v20, 0.0  ;;  %v6517_v4 = vmax.f32 %v6357_v56, 0.0  ;;  %v6001_v14 = vadd.f32 %v6000_v38, %v5911_v33  ;;  %v10677_v20 = vld [vmem:[#allocation5 + $0x1b4] sm:$0xf0] }
 0x6dd   : > { %v10244_v56 = vor.u32 %v10677_v20, %v10243_v9 }
 0x6de   : > { %v6228_v49 = vpack.c.bf16 %v6179_v2, %v6001_v14  ;;  %v6091_v10 = vpop.f32.mrf.mxu0  ;;  %v6180_v60 = vpop.f32.mrf.mxu1  ;;  %v12357_v59 = vpack.c.bf16 %v6516_v39, %v6514_v52  ;;  %v12359_v47 = vpack.c.bf16 %v6517_v4, %v6515_v7 }
 0x6df   : > { %v6181_v22 = vadd.f32 %v6180_v60, %v6091_v10  ;;  %7405 = vmatpush.bf16.msra.mxu3 %v10244_v56  ;;  %v10675_v10 = vld [vmem:[#allocation5 + $0x1ac] sm:$0xf]  ;;  %v10245_v60 = vld [vmem:[#allocation5 + $0x1b8] sm:$0xf0] }
 0x6e0   : > { %v6292_v51 = vunpack.c.l.bf16 %v6228_v49  ;;  %v6293_v30 = vunpack.c.h.bf16 %v6228_v49 }
 0x6e2   : > { %v6358_v48 = vadd.f32 %v12237_v3, %v6292_v51  ;;  %v6359_v58 = vadd.f32 %v12239_v12, %v6293_v30 }
 0x6e3   : > { %v5913_v63 = vpop.f32.mrf.mxu2  ;;  %v6002_v32 = vpop.f32.mrf.mxu3 }
 0x6e4   : > { %v6003_v18 = vadd.f32 %v6002_v32, %v5913_v63  ;;  %v6518_v45 = vmax.f32 %v6358_v48, 0.0  ;;  %v6519_v53 = vmax.f32 %v6359_v58, 0.0 }
 0x6e6   : > { %v6229_v17 = vpack.c.bf16 %v6181_v22, %v6003_v18  ;;  %v6094_v36 = vpop.f32.mrf.mxu0  ;;  %v6183_v50 = vpop.f32.mrf.mxu1  ;;  %v10248_v22 = vor.u32 %v10675_v10, %v10245_v60 }
 0x6e7   : > { %v6184_v27 = vadd.f32 %v6183_v50, %v6094_v36 }
 0x6e8   : > { %v6294_v37 = vunpack.c.l.bf16 %v6229_v17  ;;  %v6295_v61 = vunpack.c.h.bf16 %v6229_v17  ;;  %6981 = vmatmul.bf16.gmra.mxu2 %v12285_v29  ;;  %7070 = vmatmul.bf16.gmra.mxu3 %v12287_v35 }
 0x6e9   : > { %7159 = vmatmul.bf16.gmra.mxu0 %v12285_v29  ;;  %7248 = vmatmul.bf16.gmra.mxu1 %v12287_v35 }
 0x6ea   : > { %v6360_v19 = vadd.f32 %v12237_v3, %v6294_v37  ;;  %v6361_v16 = vadd.f32 %v12239_v12, %v6295_v61  ;;  %7583 = vmatpush.bf16.msra.mxu1 %v10248_v22 }
 0x6eb   : > { %v5916_v44 = vpop.f32.mrf.mxu2  ;;  %v6005_v24 = vpop.f32.mrf.mxu3 }
 0x6ec   : > { %v6520_v43 = vmax.f32 %v6360_v19, 0.0  ;;  %v6521_v2 = vmax.f32 %v6361_v16, 0.0  ;;  %v6006_v46 = vadd.f32 %v6005_v24, %v5916_v44  ;;  %v10099_v16 = vld [vmem:[#allocation5 + $0x88] sm:$0xf] }
 0x6ee   : > { %v6230_v52 = vpack.c.bf16 %v6184_v27, %v6006_v46  ;;  %v6096_v7 = vpop.f32.mrf.mxu0  ;;  %v6185_v33 = vpop.f32.mrf.mxu1  ;;  %v12369_v38 = vpack.c.bf16 %v6520_v43, %v6518_v45  ;;  %v12371_v39 = vpack.c.bf16 %v6521_v2, %v6519_v53  ;;  %v10641_v45 = vld [vmem:[#allocation5 + $0x94] sm:$0xf0] }
 0x6ef   : > { %v6186_v4 = vadd.f32 %v6185_v33, %v6096_v7  ;;  %v10100_v53 = vor.u32 %v10641_v45, %v10099_v16 }
 0x6f0   : > { %v6296_v14 = vunpack.c.l.bf16 %v6230_v52  ;;  %v6297_v21 = vunpack.c.h.bf16 %v6230_v52 }
 0x6f1   : > { %7317 = vmatpush.bf16.msra.mxu2 %v10100_v53 }
 0x6f2   : > { %v6362_v32 = vadd.f32 %v12237_v3, %v6296_v14  ;;  %v6363_v18 = vadd.f32 %v12239_v12, %v6297_v21  ;;  %v10117_v14 = vld [vmem:[#allocation5 + $0xb8] sm:$0xf0] }
 0x6f3   : > { %v5918_v23 = vpop.f32.mrf.mxu2  ;;  %v6007_v26 = vpop.f32.mrf.mxu3 }
 0x6f4   : > { %v6008_v49 = vadd.f32 %v6007_v26, %v5918_v23  ;;  %v6522_v50 = vmax.f32 %v6362_v32, 0.0  ;;  %v6523_v48 = vmax.f32 %v6363_v18, 0.0 }
 0x6f6   : > { %v6231_v51 = vpack.c.bf16 %v6186_v4, %v6008_v49  ;;  %v6099_v30 = vpop.f32.mrf.mxu0  ;;  %v6188_v63 = vpop.f32.mrf.mxu1  ;;  %v10643_v4 = vld [vmem:[#allocation5 + $0xac] sm:$0xf] }
 0x6f7   : > { %v6189_v15 = vadd.f32 %v6188_v63, %v6099_v30  ;;  %v10120_v21 = vor.u32 %v10643_v4, %v10117_v14 }
 0x6f8   : > { %v6298_v54 = vunpack.c.l.bf16 %v6231_v51  ;;  %v6299_v1 = vunpack.c.h.bf16 %v6231_v51  ;;  %6986 = vmatmul.bf16.gmra.mxu2 %v12297_v42  ;;  %7075 = vmatmul.bf16.gmra.mxu3 %v12299_v8 }
 0x6f9   : > { %7164 = vmatmul.bf16.gmra.mxu0 %v12297_v42  ;;  %7253 = vmatmul.bf16.gmra.mxu1 %v12299_v8 }
 0x6fa   : > { %v6364_v17 = vadd.f32 %v12237_v3, %v6298_v54  ;;  %v6365_v36 = vadd.f32 %v12239_v12, %v6299_v1  ;;  %7494 = vmatpush.bf16.msra.mxu0 %v10120_v21 }
 0x6fb   : > { %v5921_v58 = vpop.f32.mrf.mxu2  ;;  %v6010_v27 = vpop.f32.mrf.mxu3 }
 0x6fc   : > { %v6524_v37 = vmax.f32 %v6364_v17, 0.0  ;;  %v6525_v61 = vmax.f32 %v6365_v36, 0.0  ;;  %v6011_v19 = vadd.f32 %v6010_v27, %v5921_v58  ;;  %v10673_v58 = vld [vmem:[#allocation5 + $0x194] sm:$0xf0] }
 0x6fe   : > { %v6232_v44 = vpack.c.bf16 %v6189_v15, %v6011_v19  ;;  %v6101_v24 = vpop.f32.mrf.mxu0  ;;  %v6190_v43 = vpop.f32.mrf.mxu1  ;;  %v12381_v2 = vpack.c.bf16 %v6524_v37, %v6522_v50  ;;  %v12383_v46 = vpack.c.bf16 %v6525_v61, %v6523_v48  ;;  %v10227_v48 = vld [vmem:[#allocation5 + $0x188] sm:$0xf] }
 0x6ff   : > { %v6191_v9 = vadd.f32 %v6190_v43, %v6101_v24  ;;  %v10228_v27 = vor.u32 %v10673_v58, %v10227_v48 }
 0x700   : > { %v6300_v20 = vunpack.c.l.bf16 %v6232_v44  ;;  %v6301_v56 = vunpack.c.h.bf16 %v6232_v44 }
 0x701   : > { %7406 = vmatpush.bf16.msra.mxu3 %v10228_v27 }
 0x702   : > { %v6366_v10 = vadd.f32 %v12237_v3, %v6300_v20  ;;  %v6367_v60 = vadd.f32 %v12239_v12, %v6301_v56  ;;  %v10671_v20 = vld [vmem:[#allocation5 + $0x18c] sm:$0xf]  ;;  %v10229_v56 = vld [vmem:[#allocation5 + $0x198] sm:$0xf0] }
 0x703   : > { %v5923_v52 = vpop.f32.mrf.mxu2  ;;  %v6012_v7 = vpop.f32.mrf.mxu3 }
 0x704   : > { %v6013_v33 = vadd.f32 %v6012_v7, %v5923_v52  ;;  %v6526_v18 = vmax.f32 %v6366_v10, 0.0  ;;  %v6527_v15 = vmax.f32 %v6367_v60, 0.0  ;;  %v10232_v7 = vor.u32 %v10671_v20, %v10229_v56  ;;  %v10639_v20 = vld [vmem:[#allocation5 + $0x8c] sm:$0xf]  ;;  %v10101_v56 = vld [vmem:[#allocation5 + $0x98] sm:$0xf0] }
 0x706   : > { %v6233_v23 = vpack.c.bf16 %v6191_v9, %v6013_v33  ;;  %v6104_v26 = vpop.f32.mrf.mxu0  ;;  %v6193_v49 = vpop.f32.mrf.mxu1  ;;  %v7734_v33 = vld [vmem:[%s13090_s6] sm:$0xf]  ;;  %7584 = vmatpush.bf16.msra.mxu1 %v10232_v7 }
 0x707   : > { %v6194_v22 = vadd.f32 %v6193_v49, %v6104_v26  ;;  %7736 = vst [vmem:[#allocation1] ss:$9 sm:$0xff] %v7734_v33 }
 0x708   : > { %v6302_v51 = vunpack.c.l.bf16 %v6233_v23  ;;  %v6303_v30 = vunpack.c.h.bf16 %v6233_v23  ;;  %6991 = vmatmul.bf16.gmra.mxu2 %v12309_v57  ;;  %7080 = vmatmul.bf16.gmra.mxu3 %v12311_v31 }
 0x709   : > { %7169 = vmatmul.bf16.gmra.mxu0 %v12309_v57  ;;  %7258 = vmatmul.bf16.gmra.mxu1 %v12311_v31 }
 0x70a   : > { %v6368_v63 = vadd.f32 %v12237_v3, %v6302_v51  ;;  %v6369_v32 = vadd.f32 %v12239_v12, %v6303_v30 }
 0x70b   : > { %v5926_v54 = vpop.f32.mrf.mxu2  ;;  %v6015_v1 = vpop.f32.mrf.mxu3 }
 0x70c   : > { %v6528_v17 = vmax.f32 %v6368_v63, 0.0  ;;  %v6529_v36 = vmax.f32 %v6369_v32, 0.0  ;;  %v6016_v50 = vadd.f32 %v6015_v1, %v5926_v54  ;;  %v10083_v1 = vld [vmem:[#allocation5 + $0x68] sm:$0xf] }
 0x70e   : > { %v6234_v37 = vpack.c.bf16 %v6194_v22, %v6016_v50  ;;  %v6106_v61 = vpop.f32.mrf.mxu0  ;;  %v6195_v19 = vpop.f32.mrf.mxu1  ;;  %v12393_v16 = vpack.c.bf16 %v6528_v17, %v6526_v18  ;;  %v12395_v45 = vpack.c.bf16 %v6529_v36, %v6527_v15  ;;  %v10637_v17 = vld [vmem:[#allocation5 + $0x74] sm:$0xf0] }
 0x70f   : > { %v6196_v53 = vadd.f32 %v6195_v19, %v6106_v61  ;;  %v10084_v50 = vor.u32 %v10637_v17, %v10083_v1 }
 0x710   : > { %v6304_v44 = vunpack.c.l.bf16 %v6234_v37  ;;  %v6305_v52 = vunpack.c.h.bf16 %v6234_v37 }
 0x711   : > { %7318 = vmatpush.bf16.msra.mxu2 %v10084_v50  ;;  %v10669_v50 = vld [vmem:[#allocation5 + $0x174] sm:$0xf0] }
 0x712   : > { %v6370_v23 = vadd.f32 %v12237_v3, %v6304_v44  ;;  %v6371_v60 = vadd.f32 %v12239_v12, %v6305_v52  ;;  %v10104_v52 = vor.u32 %v10639_v20, %v10101_v56 }
 0x713   : > { %v5928_v24 = vpop.f32.mrf.mxu2  ;;  %v6017_v43 = vpop.f32.mrf.mxu3 }
 0x714   : > { %v6018_v9 = vadd.f32 %v6017_v43, %v5928_v24  ;;  %v6530_v30 = vmax.f32 %v6370_v23, 0.0  ;;  %v6531_v36 = vmax.f32 %v6371_v60, 0.0  ;;  %7495 = vmatpush.bf16.msra.mxu0 %v10104_v52 }
 0x716   : > { %v6235_v4 = vpack.c.bf16 %v6196_v53, %v6018_v9  ;;  %v6109_v14 = vpop.f32.mrf.mxu0  ;;  %v6198_v21 = vpop.f32.mrf.mxu1 }
 0x717   : > { %v6199_v26 = vadd.f32 %v6198_v21, %v6109_v14 }
 0x718   : > { %v6306_v49 = vunpack.c.l.bf16 %v6235_v4  ;;  %v6307_v10 = vunpack.c.h.bf16 %v6235_v4  ;;  %6996 = vmatmul.bf16.gmra.mxu2 %v12321_v6  ;;  %7085 = vmatmul.bf16.gmra.mxu3 %v12323_v34 }
 0x719   : > { %7174 = vmatmul.bf16.gmra.mxu0 %v12321_v6  ;;  %7263 = vmatmul.bf16.gmra.mxu1 %v12323_v34 }
 0x71a   : > { %v6372_v22 = vadd.f32 %v12237_v3, %v6306_v49  ;;  %v6373_v51 = vadd.f32 %v12239_v12, %v6307_v10 }
 0x71b   : > { %v5931_v63 = vpop.f32.mrf.mxu2  ;;  %v6020_v32 = vpop.f32.mrf.mxu3 }
 0x71c   : > { %v6532_v18 = vmax.f32 %v6372_v22, 0.0  ;;  %v6533_v15 = vmax.f32 %v6373_v51, 0.0  ;;  %v6021_v54 = vadd.f32 %v6020_v32, %v5931_v63 }
 0x71e   : > { %v6236_v48 = vpack.c.bf16 %v6199_v26, %v6021_v54  ;;  %v6111_v58 = vpop.f32.mrf.mxu0  ;;  %v6200_v27 = vpop.f32.mrf.mxu1  ;;  %v12408_v37 = vpack.c.bf16 %v6532_v18, %v6530_v30  ;;  %v12410_v19 = vpack.c.bf16 %v6533_v15, %v6531_v36  ;;  %v10211_v36 = vld [vmem:[#allocation5 + $0x168] sm:$0xf] }
 0x71f   : > { %v6201_v61 = vadd.f32 %v6200_v27, %v6111_v58 }
 0x720   : > { %v6308_v53 = vunpack.c.l.bf16 %v6236_v48  ;;  %v6309_v43 = vunpack.c.h.bf16 %v6236_v48 }
 0x722   : > { %v6374_v14 = vadd.f32 %v12237_v3, %v6308_v53  ;;  %v6375_v23 = vadd.f32 %v12239_v12, %v6309_v43  ;;  %v10667_v53 = vld [vmem:[#allocation5 + $0x16c] sm:$0xf] }
 0x723   : > { %v5933_v44 = vpop.f32.mrf.mxu2  ;;  %v6022_v24 = vpop.f32.mrf.mxu3 }
 0x724   : > { %v6023_v9 = vadd.f32 %v6022_v24, %v5933_v44  ;;  %v6534_v22 = vmax.f32 %v6374_v14, 0.0  ;;  %v6535_v63 = vmax.f32 %v6375_v23, 0.0  ;;  %v10213_v44 = vld [vmem:[#allocation5 + $0x178] sm:$0xf0] }
 0x725   : > { %v10216_v24 = vor.u32 %v10667_v53, %v10213_v44 }
 0x726   : > { %v6237_v7 = vpack.c.bf16 %v6201_v61, %v6023_v9  ;;  %v6114_v33 = vpop.f32.mrf.mxu0  ;;  %v6203_v4 = vpop.f32.mrf.mxu1  ;;  %v10212_v61 = vor.u32 %v10669_v50, %v10211_v36 }
 0x727   : > { %v6204_v21 = vadd.f32 %v6203_v4, %v6114_v33  ;;  %7585 = vmatpush.bf16.msra.mxu1 %v10216_v24 }
 0x728   : > { %v6310_v26 = vunpack.c.l.bf16 %v6237_v7  ;;  %v6311_v49 = vunpack.c.h.bf16 %v6237_v7  ;;  %7001 = vmatmul.bf16.gmra.mxu2 %v12333_v55  ;;  %7090 = vmatmul.bf16.gmra.mxu3 %v12335_v0 }
 0x729   : > { %7179 = vmatmul.bf16.gmra.mxu0 %v12333_v55  ;;  %7268 = vmatmul.bf16.gmra.mxu1 %v12335_v0 }
 0x72a   : > { %v6376_v10 = vadd.f32 %v12237_v3, %v6310_v26  ;;  %v6377_v60 = vadd.f32 %v12239_v12, %v6311_v49  ;;  %7407 = vmatpush.bf16.msra.mxu3 %v10212_v61 }
 0x72b   : > { %v5936_v51 = vpop.f32.mrf.mxu2  ;;  %v6025_v30 = vpop.f32.mrf.mxu3 }
 0x72c   : > { %v6536_v32 = vmax.f32 %v6376_v10, 0.0  ;;  %v6537_v18 = vmax.f32 %v6377_v60, 0.0  ;;  %v6026_v15 = vadd.f32 %v6025_v30, %v5936_v51  ;;  %v7737_v10 = vld [vmem:[#allocation1] sm:$0xff]  ;;  %v7738_v60 = vld [vmem:[#allocation1 + $0x9] sm:$0xff] }
 0x72d   : > { %v10633_v51 = vld [vmem:[#allocation5 + $0x54] sm:$0xf0] }
 0x72e   : > { %v6238_v54 = vpack.c.bf16 %v6204_v21, %v6026_v15  ;;  %v6116_v1 = vpop.f32.mrf.mxu0  ;;  %v6205_v17 = vpop.f32.mrf.mxu1  ;;  %v12420_v48 = vpack.c.bf16 %v6536_v32, %v6534_v22  ;;  %v12422_v58 = vpack.c.bf16 %v6537_v18, %v6535_v63  ;;  %v10067_v22 = vld [vmem:[#allocation5 + $0x48] sm:$0xf] }
 0x72f   : > { %v6206_v27 = vadd.f32 %v6205_v17, %v6116_v1  ;;  %v10068_v32 = vor.u32 %v10633_v51, %v10067_v22  ;;  %v7741_v1 = vpack.i.b16 %v7737_v10, %v7737_v10  ;;  %v7744_v17 = vpack.i.b16 %v7738_v60, %v7738_v60 }
 0x730   : > { %v6312_v43 = vunpack.c.l.bf16 %v6238_v54  ;;  %v6313_v56 = vunpack.c.h.bf16 %v6238_v54 }
 0x731   : > { %7319 = vmatpush.bf16.msra.mxu2 %v10068_v32 }
 0x732   : > { %v6378_v14 = vadd.f32 %v12237_v3, %v6312_v43  ;;  %v6379_v23 = vadd.f32 %v12239_v12, %v6313_v56  ;;  %v10635_v56 = vld [vmem:[#allocation5 + $0x6c] sm:$0xf] }
 0x733   : > { %v5938_v9 = vpop.f32.mrf.mxu2  ;;  %v6027_v20 = vpop.f32.mrf.mxu3 }
 0x734   : > { %v6028_v52 = vadd.f32 %v6027_v20, %v5938_v9  ;;  %v6538_v18 = vmax.f32 %v6378_v14, 0.0  ;;  %v6539_v36 = vmax.f32 %v6379_v23, 0.0  ;;  %v7746_v20 = vperm.slane %v7744_v17, 0 }
 0x736   : > { %v6239_v7 = vpack.c.bf16 %v6206_v27, %v6028_v52  ;;  %v7145_v33 = vpop.f32.mrf.mxu0  ;;  %v7234_v4 = vpop.f32.mrf.mxu1  ;;  %v10085_v52 = vld [vmem:[#allocation5 + $0x78] sm:$0xf0] }
 0x737   : > { %v7235_v21 = vadd.f32 %v7234_v4, %v7145_v33 }
 0x738   : > { %v6314_v26 = vunpack.c.l.bf16 %v6239_v7  ;;  %v6315_v49 = vunpack.c.h.bf16 %v6239_v7  ;;  %7006 = vmatmul.bf16.gmra.mxu2 %v12345_v25  ;;  %7095 = vmatmul.bf16.gmra.mxu3 %v12347_v62  ;;  %v10088_v7 = vor.u32 %v10635_v56, %v10085_v52 }
 0x739   : > { %7184 = vmatmul.bf16.gmra.mxu0 %v12345_v25  ;;  %7273 = vmatmul.bf16.gmra.mxu1 %v12347_v62 }
 0x73a   : > { %v6380_v30 = vadd.f32 %v12237_v3, %v6314_v26  ;;  %v6381_v63 = vadd.f32 %v12239_v12, %v6315_v49  ;;  %v7743_v3 = vperm.slane %v7741_v1, 0  ;;  %7496 = vmatpush.bf16.msra.mxu0 %v10088_v7 }
 0x73b   : > { %v6967_v15 = vpop.f32.mrf.mxu2  ;;  %v7056_v54 = vpop.f32.mrf.mxu3 }
 0x73c   : > { %v6540_v50 = vmax.f32 %v6380_v30, 0.0  ;;  %v6541_v27 = vmax.f32 %v6381_v63, 0.0  ;;  %v7057_v61 = vadd.f32 %v7056_v54, %v6967_v15  ;;  %v12436_v4 = vunpack.c.l.bf16 %v7743_v3  ;;  %v10195_v15 = vld [vmem:[#allocation5 + $0x148] sm:$0xf]  ;;  %v10665_v54 = vld [vmem:[#allocation5 + $0x154] sm:$0xf0] }
 0x73d   : > { %v10196_v1 = vor.u32 %v10665_v54, %v10195_v15 }
 0x73e   : > { %v7670_v53 = vpack.c.bf16 %v7235_v21, %v7057_v61  ;;  %v7147_v44 = vpop.f32.mrf.mxu0  ;;  %v7236_v24 = vpop.f32.mrf.mxu1  ;;  %v12432_v43 = vpack.c.bf16 %v6540_v50, %v6538_v18  ;;  %v12434_v9 = vpack.c.bf16 %v6541_v27, %v6539_v36  ;;  %v12438_v21 = vunpack.c.l.bf16 %v7746_v20 }
 0x73f   : > { %v7237_v12 = vadd.f32 %v7236_v24, %v7147_v44  ;;  %7408 = vmatpush.bf16.msra.mxu3 %v10196_v1 }
 0x740   : > { %v7753_v33 = vunpack.c.l.bf16 %v7670_v53  ;;  %v7754_v26 = vunpack.c.h.bf16 %v7670_v53 }
 0x742   : > { %v7885_v51 = vadd.f32 %v12436_v4, %v7753_v33  ;;  %v7886_v63 = vadd.f32 %v12438_v21, %v7754_v26 }
 0x743   : > { %v6969_v14 = vpop.f32.mrf.mxu2  ;;  %v7058_v23 = vpop.f32.mrf.mxu3 }
 0x744   : > { %v7059_v49 = vadd.f32 %v7058_v23, %v6969_v14  ;;  %v8205_v50 = vmax.f32 %v7885_v51, 0.0  ;;  %v8206_v53 = vmax.f32 %v7886_v63, 0.0  ;;  %v10663_v14 = vld [vmem:[#allocation5 + $0x14c] sm:$0xf]  ;;  %v10197_v23 = vld [vmem:[#allocation5 + $0x158] sm:$0xf0] }
 0x745   : > { %v10200_v26 = vor.u32 %v10663_v14, %v10197_v23 }
 0x746   : > { %v7672_v10 = vpack.c.bf16 %v7237_v12, %v7059_v49  ;;  %v7150_v60 = vpop.f32.mrf.mxu0  ;;  %v7239_v22 = vpop.f32.mrf.mxu1 }
 0x747   : > { %v7240_v30 = vadd.f32 %v7239_v22, %v7150_v60  ;;  %7586 = vmatpush.bf16.msra.mxu1 %v10200_v26 }
 0x748   : > { %v7757_v32 = vunpack.c.l.bf16 %v7672_v10  ;;  %v7758_v18 = vunpack.c.h.bf16 %v7672_v10  ;;  %7011 = vmatmul.bf16.gmra.mxu2 %v12357_v59  ;;  %7100 = vmatmul.bf16.gmra.mxu3 %v12359_v47 }
 0x749   : > { %7189 = vmatmul.bf16.gmra.mxu0 %v12357_v59  ;;  %7278 = vmatmul.bf16.gmra.mxu1 %v12359_v47 }
 0x74a   : > { %v7889_v17 = vadd.f32 %v12436_v4, %v7757_v32  ;;  %v7890_v36 = vadd.f32 %v12438_v21, %v7758_v18 }
 0x74b   : > { %v6972_v27 = vpop.f32.mrf.mxu2  ;;  %v7061_v61 = vpop.f32.mrf.mxu3 }
 0x74c   : > { %v8209_v44 = vmax.f32 %v7889_v17, 0.0  ;;  %v8210_v24 = vmax.f32 %v7890_v36, 0.0  ;;  %v7062_v3 = vadd.f32 %v7061_v61, %v6972_v27  ;;  %v10051_v36 = vld [vmem:[#allocation5 + $0x28] sm:$0xf] }
 0x74e   : > { %v12448_v12 = vpack.c.bf16 %v8209_v44, %v8205_v50  ;;  %v12450_v20 = vpack.c.bf16 %v8210_v24, %v8206_v53  ;;  %v7674_v56 = vpack.c.bf16 %v7240_v30, %v7062_v3  ;;  %v7152_v52 = vpop.f32.mrf.mxu0  ;;  %v7241_v7 = vpop.f32.mrf.mxu1  ;;  %v10629_v50 = vld [vmem:[#allocation5 + $0x34] sm:$0xf0] }
 0x74f   : > { %v7242_v33 = vadd.f32 %v7241_v7, %v7152_v52  ;;  %v10052_v27 = vor.u32 %v10629_v50, %v10051_v36 }
 0x750   : > { %v7761_v49 = vunpack.c.l.bf16 %v7674_v56  ;;  %v7762_v22 = vunpack.c.h.bf16 %v7674_v56 }
 0x751   : > { %7320 = vmatpush.bf16.msra.mxu2 %v10052_v27 }
 0x752   : > { %v7893_v54 = vadd.f32 %v12436_v4, %v7761_v49  ;;  %v7894_v17 = vadd.f32 %v12438_v21, %v7762_v22  ;;  %v10631_v22 = vld [vmem:[#allocation5 + $0x4c] sm:$0xf] }
 0x753   : > { %v6974_v10 = vpop.f32.mrf.mxu2  ;;  %v7063_v60 = vpop.f32.mrf.mxu3 }
 0x754   : > { %v7064_v51 = vadd.f32 %v7063_v60, %v6974_v10  ;;  %v8213_v3 = vmax.f32 %v7893_v54, 0.0  ;;  %v8214_v7 = vmax.f32 %v7894_v17, 0.0 }
 0x756   : > { %v7676_v63 = vpack.c.bf16 %v7242_v33, %v7064_v51  ;;  %v7155_v32 = vpop.f32.mrf.mxu0  ;;  %v7244_v18 = vpop.f32.mrf.mxu1  ;;  %v10069_v51 = vld [vmem:[#allocation5 + $0x58] sm:$0xf0] }
 0x757   : > { %v7245_v15 = vadd.f32 %v7244_v18, %v7155_v32 }
 0x758   : > { %v7765_v1 = vunpack.c.l.bf16 %v7676_v63  ;;  %v7766_v30 = vunpack.c.h.bf16 %v7676_v63  ;;  %7016 = vmatmul.bf16.gmra.mxu2 %v12369_v38  ;;  %7105 = vmatmul.bf16.gmra.mxu3 %v12371_v39  ;;  %v10072_v63 = vor.u32 %v10631_v22, %v10069_v51 }
 0x759   : > { %7194 = vmatmul.bf16.gmra.mxu0 %v12369_v38  ;;  %7283 = vmatmul.bf16.gmra.mxu1 %v12371_v39 }
 0x75a   : > { %v7897_v61 = vadd.f32 %v12436_v4, %v7765_v1  ;;  %v7898_v53 = vadd.f32 %v12438_v21, %v7766_v30  ;;  %7497 = vmatpush.bf16.msra.mxu0 %v10072_v63 }
 0x75b   : > { %v6977_v44 = vpop.f32.mrf.mxu2  ;;  %v7066_v24 = vpop.f32.mrf.mxu3 }
 0x75c   : > { %v7067_v56 = vadd.f32 %v7066_v24, %v6977_v44  ;;  %v8217_v52 = vmax.f32 %v7897_v61, 0.0  ;;  %v8218_v33 = vmax.f32 %v7898_v53, 0.0  ;;  %v10179_v44 = vld [vmem:[#allocation5 + $0x128] sm:$0xf]  ;;  %v10661_v24 = vld [vmem:[#allocation5 + $0x134] sm:$0xf0] }
 0x75e   : > { %v7678_v14 = vpack.c.bf16 %v7245_v15, %v7067_v56  ;;  %v7157_v23 = vpop.f32.mrf.mxu0  ;;  %v7246_v26 = vpop.f32.mrf.mxu1  ;;  %v12460_v49 = vpack.c.bf16 %v8217_v52, %v8213_v3  ;;  %v12462_v10 = vpack.c.bf16 %v8218_v33, %v8214_v7  ;;  %v10180_v56 = vor.u32 %v10661_v24, %v10179_v44 }
 0x75f   : > { %v7247_v60 = vadd.f32 %v7246_v26, %v7157_v23 }
 0x760   : > { %v7769_v32 = vunpack.c.l.bf16 %v7678_v14  ;;  %v7770_v54 = vunpack.c.h.bf16 %v7678_v14  ;;  %7409 = vmatpush.bf16.msra.mxu3 %v10180_v56 }
 0x762   : > { %v7901_v27 = vadd.f32 %v12436_v4, %v7769_v32  ;;  %v7902_v3 = vadd.f32 %v12438_v21, %v7770_v54 }
 0x763   : > { %v6979_v18 = vpop.f32.mrf.mxu2  ;;  %v7068_v1 = vpop.f32.mrf.mxu3 }
 0x764   : > { %v7069_v30 = vadd.f32 %v7068_v1, %v6979_v18  ;;  %v8221_v23 = vmax.f32 %v7901_v27, 0.0  ;;  %v8222_v22 = vmax.f32 %v7902_v3, 0.0 }
 0x766   : > { %v7680_v36 = vpack.c.bf16 %v7247_v60, %v7069_v30  ;;  %v7160_v17 = vpop.f32.mrf.mxu0  ;;  %v7249_v50 = vpop.f32.mrf.mxu1 }
 0x767   : > { %v7250_v15 = vadd.f32 %v7249_v50, %v7160_v17  ;;  %v10181_v17 = vld [vmem:[#allocation5 + $0x138] sm:$0xf0] }
 0x768   : > { %v7773_v61 = vunpack.c.l.bf16 %v7680_v36  ;;  %v7774_v53 = vunpack.c.h.bf16 %v7680_v36  ;;  %7021 = vmatmul.bf16.gmra.mxu2 %v12381_v2  ;;  %7110 = vmatmul.bf16.gmra.mxu3 %v12383_v46  ;;  %v10659_v36 = vld [vmem:[#allocation5 + $0x12c] sm:$0xf] }
 0x769   : > { %7199 = vmatmul.bf16.gmra.mxu0 %v12381_v2  ;;  %7288 = vmatmul.bf16.gmra.mxu1 %v12383_v46  ;;  %v10184_v50 = vor.u32 %v10659_v36, %v10181_v17 }
 0x76a   : > { %v7905_v52 = vadd.f32 %v12436_v4, %v7773_v61  ;;  %v7906_v7 = vadd.f32 %v12438_v21, %v7774_v53 }
 0x76b   : > { %v6982_v33 = vpop.f32.mrf.mxu2  ;;  %v7071_v14 = vpop.f32.mrf.mxu3  ;;  %7587 = vmatpush.bf16.msra.mxu1 %v10184_v50 }
 0x76c   : > { %v7072_v26 = vadd.f32 %v7071_v14, %v6982_v33  ;;  %v8225_v60 = vmax.f32 %v7905_v52, 0.0  ;;  %v8226_v51 = vmax.f32 %v7906_v7, 0.0 }
 0x76e   : > { %v7682_v63 = vpack.c.bf16 %v7250_v15, %v7072_v26  ;;  %v7162_v32 = vpop.f32.mrf.mxu0  ;;  %v7251_v18 = vpop.f32.mrf.mxu1  ;;  %v12472_v1 = vpack.c.bf16 %v8225_v60, %v8221_v23  ;;  %v12474_v54 = vpack.c.bf16 %v8226_v51, %v8222_v22  ;;  %v10035_v26 = vld [vmem:[#allocation5 + $0x8] sm:$0xf]  ;;  %v10625_v60 = vld [vmem:[#allocation5 + $0x14] sm:$0xf0] }
 0x76f   : > { %v7252_v30 = vadd.f32 %v7251_v18, %v7162_v32  ;;  %v10036_v22 = vor.u32 %v10625_v60, %v10035_v26 }
 0x770   : > { %13099 = vst [vmem:[#allocation11_spill] sm:$0xff] %v12474_v54  ;;  %v7777_v61 = vunpack.c.l.bf16 %v7682_v63  ;;  %v7778_v27 = vunpack.c.h.bf16 %v7682_v63 }
 0x771   : > { %7321 = vmatpush.bf16.msra.mxu2 %v10036_v22 }
 0x772   : > { %v7909_v7 = vadd.f32 %v12436_v4, %v7777_v61  ;;  %v7910_v23 = vadd.f32 %v12438_v21, %v7778_v27 }
 0x773   : > { %v6984_v53 = vpop.f32.mrf.mxu2  ;;  %v7073_v44 = vpop.f32.mrf.mxu3 }
 0x774   : > { %v7074_v24 = vadd.f32 %v7073_v44, %v6984_v53  ;;  %v8230_v50 = vmax.f32 %v7910_v23, 0.0 }
 0x776   : > { %v7684_v56 = vpack.c.bf16 %v7252_v30, %v7074_v24  ;;  %v7165_v3 = vpop.f32.mrf.mxu0  ;;  %v7254_v52 = vpop.f32.mrf.mxu1  ;;  %v8229_v30 = vmax.f32 %v7909_v7, 0.0 }
 0x777   : > { %v7255_v15 = vadd.f32 %v7254_v52, %v7165_v3  ;;  %v10627_v52 = vld [vmem:[#allocation5 + $0x2c] sm:$0xf] }
 0x778   : > { %v7781_v33 = vunpack.c.l.bf16 %v7684_v56  ;;  %v7782_v14 = vunpack.c.h.bf16 %v7684_v56  ;;  %7026 = vmatmul.bf16.gmra.mxu2 %v12393_v16  ;;  %7115 = vmatmul.bf16.gmra.mxu3 %v12395_v45 }
 0x779   : > { %7204 = vmatmul.bf16.gmra.mxu0 %v12393_v16  ;;  %7293 = vmatmul.bf16.gmra.mxu1 %v12395_v45 }
 0x77a   : > { %v7913_v51 = vadd.f32 %v12436_v4, %v7781_v33  ;;  %v7914_v63 = vadd.f32 %v12438_v21, %v7782_v14  ;;  %v10053_v33 = vld [vmem:[#allocation5 + $0x38] sm:$0xf0] }
 0x77b   : > { %v6987_v32 = vpop.f32.mrf.mxu2  ;;  %v7076_v18 = vpop.f32.mrf.mxu3  ;;  %v10056_v26 = vor.u32 %v10627_v52, %v10053_v33 }
 0x77c   : > { %v7077_v36 = vadd.f32 %v7076_v18, %v6987_v32  ;;  %v8233_v17 = vmax.f32 %v7913_v51, 0.0  ;;  %v8234_v61 = vmax.f32 %v7914_v63, 0.0 }
 0x77d   : > { %7498 = vmatpush.bf16.msra.mxu0 %v10056_v26 }
 0x77e   : > { %v7686_v53 = vpack.c.bf16 %v7255_v15, %v7077_v36  ;;  %v7167_v44 = vpop.f32.mrf.mxu0  ;;  %v7256_v27 = vpop.f32.mrf.mxu1  ;;  %v12484_v24 = vpack.c.bf16 %v8233_v17, %v8229_v30  ;;  %v12486_v56 = vpack.c.bf16 %v8234_v61, %v8230_v50  ;;  %v10163_v36 = vld [vmem:[#allocation5 + $0x108] sm:$0xf]  ;;  %v10657_v17 = vld [vmem:[#allocation5 + $0x114] sm:$0xf0] }
 0x77f   : > { %v7257_v3 = vadd.f32 %v7256_v27, %v7167_v44 }
 0x780   : > { %13100 = vst [vmem:[#allocation12_spill] sm:$0xff] %v12484_v24  ;;  %v7785_v14 = vunpack.c.l.bf16 %v7686_v53  ;;  %v7786_v7 = vunpack.c.h.bf16 %v7686_v53 }
 0x781   : > { %13101 = vst [vmem:[#allocation13_spill] sm:$0xff] %v12486_v56 }
 0x782   : > { %v7917_v32 = vadd.f32 %v12436_v4, %v7785_v14  ;;  %v7918_v50 = vadd.f32 %v12438_v21, %v7786_v7 }
 0x783   : > { %v6989_v60 = vpop.f32.mrf.mxu2  ;;  %v7078_v54 = vpop.f32.mrf.mxu3 }
 0x784   : > { %v7079_v22 = vadd.f32 %v7078_v54, %v6989_v60  ;;  %v10164_v54 = vor.u32 %v10657_v17, %v10163_v36  ;;  %v8238_v26 = vmax.f32 %v7918_v50, 0.0  ;;  %v10655_v36 = vld [vmem:[#allocation5 + $0x10c] sm:$0xf] }
 0x786   : > { %v7688_v51 = vpack.c.bf16 %v7257_v3, %v7079_v22  ;;  %v7170_v23 = vpop.f32.mrf.mxu0  ;;  %v7259_v63 = vpop.f32.mrf.mxu1  ;;  %7410 = vmatpush.bf16.msra.mxu3 %v10164_v54  ;;  %v8237_v3 = vmax.f32 %v7917_v32, 0.0  ;;  %v10623_v32 = vld [vmem:[#allocation5 + $0xc] sm:$0xf]  ;;  %v10037_v54 = vld [vmem:[#allocation5 + $0x18] sm:$0xf0] }
 0x787   : > { %v7260_v15 = vadd.f32 %v7259_v63, %v7170_v23 }
 0x788   : > { %v7789_v18 = vunpack.c.l.bf16 %v7688_v51  ;;  %v7790_v30 = vunpack.c.h.bf16 %v7688_v51  ;;  %7031 = vmatmul.bf16.gmra.mxu2 %v12408_v37  ;;  %7120 = vmatmul.bf16.gmra.mxu3 %v12410_v19 }
 0x789   : > { %7209 = vmatmul.bf16.gmra.mxu0 %v12408_v37  ;;  %7298 = vmatmul.bf16.gmra.mxu1 %v12410_v19 }
 0x78a   : > { %v7921_v61 = vadd.f32 %v12436_v4, %v7789_v18  ;;  %v7922_v53 = vadd.f32 %v12438_v21, %v7790_v30  ;;  %v10165_v18 = vld [vmem:[#allocation5 + $0x118] sm:$0xf0] }
 0x78b   : > { %v6992_v44 = vpop.f32.mrf.mxu2  ;;  %v7081_v27 = vpop.f32.mrf.mxu3  ;;  %v10168_v17 = vor.u32 %v10655_v36, %v10165_v18 }
 0x78c   : > { %v7082_v52 = vadd.f32 %v7081_v27, %v6992_v44  ;;  %v8241_v33 = vmax.f32 %v7921_v61, 0.0  ;;  %v8242_v14 = vmax.f32 %v7922_v53, 0.0  ;;  %v10040_v53 = vor.u32 %v10623_v32, %v10037_v54 }
 0x78d   : > { %7588 = vmatpush.bf16.msra.mxu1 %v10168_v17 }
 0x78e   : > { %v7690_v60 = vpack.c.bf16 %v7260_v15, %v7082_v52  ;;  %v7172_v22 = vpop.f32.mrf.mxu0  ;;  %v7261_v7 = vpop.f32.mrf.mxu1  ;;  %v12496_v51 = vpack.c.bf16 %v8241_v33, %v8237_v3  ;;  %v12498_v23 = vpack.c.bf16 %v8242_v14, %v8238_v26  ;;  %7499 = vmatpush.bf16.msra.mxu0 %v10040_v53 }
 0x78f   : > { %v7262_v63 = vadd.f32 %v7261_v7, %v7172_v22 }
 0x790   : > { %13102 = vst [vmem:[#allocation14_spill] sm:$0xff] %v12496_v51  ;;  %v7793_v30 = vunpack.c.l.bf16 %v7690_v60  ;;  %v7794_v61 = vunpack.c.h.bf16 %v7690_v60 }
 0x791   : > { %13103 = vst [vmem:[#allocation15_spill] sm:$0xff] %v12498_v23 }
 0x792   : > { %v7925_v52 = vadd.f32 %v12436_v4, %v7793_v30  ;;  %v7926_v14 = vadd.f32 %v12438_v21, %v7794_v61 }
 0x793   : > { %v6994_v56 = vpop.f32.mrf.mxu2  ;;  %v7083_v24 = vpop.f32.mrf.mxu3 }
 0x794   : > { %v7084_v50 = vadd.f32 %v7083_v24, %v6994_v56  ;;  %v10693_v24 = vld [vmem:[%s13091_s7 + $0x38] sm:$0xff]  ;;  %v8246_v17 = vmax.f32 %v7926_v14, 0.0 }
 0x795   : > { %8657 = vmatpush.bf16.msrb.mxu2 %v10693_v24 }
 0x796   : > { %v7692_v15 = vpack.c.bf16 %v7262_v63, %v7084_v50  ;;  %v7175_v44 = vpop.f32.mrf.mxu0  ;;  %v7264_v27 = vpop.f32.mrf.mxu1  ;;  %v8245_v63 = vmax.f32 %v7925_v52, 0.0 }
 0x797   : > { %v7265_v3 = vadd.f32 %v7264_v27, %v7175_v44 }
 0x798   : > { %v7797_v33 = vunpack.c.l.bf16 %v7692_v15  ;;  %v7798_v26 = vunpack.c.h.bf16 %v7692_v15  ;;  %7036 = vmatmul.bf16.gmra.mxu2 %v12420_v48  ;;  %7125 = vmatmul.bf16.gmra.mxu3 %v12422_v58 }
 0x799   : > { %7214 = vmatmul.bf16.gmra.mxu0 %v12420_v48  ;;  %7303 = vmatmul.bf16.gmra.mxu1 %v12422_v58 }
 0x79a   : > { %v7929_v56 = vadd.f32 %v12436_v4, %v7797_v33  ;;  %v7930_v60 = vadd.f32 %v12438_v21, %v7798_v26 }
 0x79b   : > { %v6997_v22 = vpop.f32.mrf.mxu2  ;;  %v7086_v7 = vpop.f32.mrf.mxu3 }
 0x79c   : > { %v7087_v36 = vadd.f32 %v7086_v7, %v6997_v22  ;;  %v8249_v18 = vmax.f32 %v7929_v56, 0.0  ;;  %v8250_v30 = vmax.f32 %v7930_v60, 0.0  ;;  %v10701_v60 = vld [vmem:[%s13091_s7 + $0x78] sm:$0xff] }
 0x79d   : > { %8746 = vmatpush.bf16.msrb.mxu3 %v10701_v60 }
 0x79e   : > { %v7694_v32 = vpack.c.bf16 %v7265_v3, %v7087_v36  ;;  %v7177_v54 = vpop.f32.mrf.mxu0  ;;  %v7266_v61 = vpop.f32.mrf.mxu1  ;;  %v12511_v50 = vpack.c.bf16 %v8249_v18, %v8245_v63  ;;  %v12513_v53 = vpack.c.bf16 %v8250_v30, %v8246_v17 }
 0x79f   : > { %v7267_v15 = vadd.f32 %v7266_v61, %v7177_v54 }
 0x7a0   : > { %v7801_v44 = vunpack.c.l.bf16 %v7694_v32  ;;  %v7802_v26 = vunpack.c.h.bf16 %v7694_v32 }
 0x7a2   : > { %v7933_v14 = vadd.f32 %v12436_v4, %v7801_v44  ;;  %v7934_v7 = vadd.f32 %v12438_v21, %v7802_v26 }
 0x7a3   : > { %v6999_v27 = vpop.f32.mrf.mxu2  ;;  %v7088_v33 = vpop.f32.mrf.mxu3 }
 0x7a4   : > { %v7089_v23 = vadd.f32 %v7088_v33, %v6999_v27  ;;  %v8253_v18 = vmax.f32 %v7933_v14, 0.0  ;;  %v8254_v32 = vmax.f32 %v7934_v7, 0.0 }
 0x7a6   : > { %v7696_v51 = vpack.c.bf16 %v7267_v15, %v7089_v23  ;;  %v7180_v24 = vpop.f32.mrf.mxu0  ;;  %v7269_v52 = vpop.f32.mrf.mxu1 }
 0x7a7   : > { %v7270_v22 = vadd.f32 %v7269_v52, %v7180_v24  ;;  %v10717_v24 = vld [vmem:[%s13091_s7 + $0xf8] sm:$0xff] }
 0x7a8   : > { %v7805_v56 = vunpack.c.l.bf16 %v7696_v51  ;;  %v7806_v3 = vunpack.c.h.bf16 %v7696_v51  ;;  %7041 = vmatmul.bf16.gmra.mxu2 %v12432_v43  ;;  %7130 = vmatmul.bf16.gmra.mxu3 %v12434_v9 }
 0x7a9   : > { %7219 = vmatmul.bf16.gmra.mxu0 %v12432_v43  ;;  %7308 = vmatmul.bf16.gmra.mxu1 %v12434_v9 }
 0x7aa   : > { %v7937_v23 = vadd.f32 %v12436_v4, %v7805_v56  ;;  %v7938_v63 = vadd.f32 %v12438_v21, %v7806_v3  ;;  %8924 = vmatpush.bf16.msrb.mxu1 %v10717_v24 }
 0x7ab   : > { %v7002_v51 = vpop.f32.mrf.mxu2  ;;  %v7091_v36 = vpop.f32.mrf.mxu3 }
 0x7ac   : > { %v7092_v17 = vadd.f32 %v7091_v36, %v7002_v51  ;;  %v8257_v30 = vmax.f32 %v7937_v23, 0.0  ;;  %v8258_v54 = vmax.f32 %v7938_v63, 0.0 }
 0x7ae   : > { %v7698_v61 = vpack.c.bf16 %v7270_v22, %v7092_v17  ;;  %v7182_v15 = vpop.f32.mrf.mxu0  ;;  %v7271_v44 = vpop.f32.mrf.mxu1  ;;  %v12526_v27 = vpack.c.bf16 %v8257_v30, %v8253_v18  ;;  %v12528_v33 = vpack.c.bf16 %v8258_v54, %v8254_v32  ;;  %v10692_v30 = vld [vmem:[%s13091_s7 + $0x30] sm:$0xff] }
 0x7af   : > { %v7272_v26 = vadd.f32 %v7271_v44, %v7182_v15  ;;  %8658 = vmatpush.bf16.msrb.mxu2 %v10692_v30 }
 0x7b0   : > { %v7809_v52 = vunpack.c.l.bf16 %v7698_v61  ;;  %v7810_v3 = vunpack.c.h.bf16 %v7698_v61 }
 0x7b2   : > { %v7941_v51 = vadd.f32 %v12436_v4, %v7809_v52  ;;  %v7942_v17 = vadd.f32 %v12438_v21, %v7810_v3 }
 0x7b3   : > { %v7004_v56 = vpop.f32.mrf.mxu2  ;;  %v7093_v14 = vpop.f32.mrf.mxu3 }
 0x7b4   : > { %v7094_v60 = vadd.f32 %v7093_v14, %v7004_v56  ;;  %v8261_v44 = vmax.f32 %v7941_v51, 0.0  ;;  %v8262_v52 = vmax.f32 %v7942_v17, 0.0 }
 0x7b6   : > { %v7700_v7 = vpack.c.bf16 %v7272_v26, %v7094_v60  ;;  %v7185_v23 = vpop.f32.mrf.mxu0  ;;  %v7274_v22 = vpop.f32.mrf.mxu1 }
 0x7b7   : > { %v7275_v63 = vadd.f32 %v7274_v22, %v7185_v23  ;;  %v12551_v23 = vld [vmem:[%s13091_s7 + $0xb8] sm:$0xff] }
 0x7b8   : > { %v7813_v36 = vunpack.c.l.bf16 %v7700_v7  ;;  %v7814_v18 = vunpack.c.h.bf16 %v7700_v7  ;;  %7322 = vmatmul.bf16.vlgmr.msra.gmra.mxu2 %v12249_v28  ;;  %7411 = vmatmul.bf16.vlgmr.msra.gmra.mxu3 %v12251_v41 }
 0x7b9   : > { %7500 = vmatmul.bf16.vlgmr.msra.gmra.mxu0 %v12249_v28  ;;  %7589 = vmatmul.bf16.vlgmr.msra.gmra.mxu1 %v12251_v41 }
 0x7ba   : > { %v7945_v32 = vadd.f32 %v12436_v4, %v7813_v36  ;;  %v7946_v54 = vadd.f32 %v12438_v21, %v7814_v18  ;;  %8835 = vmatpush.bf16.msrb.mxu0 %v12551_v23 }
 0x7bb   : > { %v7007_v61 = vpop.f32.mrf.mxu2  ;;  %v7096_v15 = vpop.f32.mrf.mxu3 }
 0x7bc   : > { %v7097_v26 = vadd.f32 %v7096_v15, %v7007_v61  ;;  %v8265_v24 = vmax.f32 %v7945_v32, 0.0  ;;  %v8266_v56 = vmax.f32 %v7946_v54, 0.0 }
 0x7be   : > { %v7702_v14 = vpack.c.bf16 %v7275_v63, %v7097_v26  ;;  %v7187_v28 = vpop.f32.mrf.mxu0  ;;  %v7276_v3 = vpop.f32.mrf.mxu1  ;;  %v12544_v41 = vpack.c.bf16 %v8265_v24, %v8261_v44  ;;  %v12546_v60 = vpack.c.bf16 %v8266_v56, %v8262_v52  ;;  %v10700_v26 = vld [vmem:[%s13091_s7 + $0x70] sm:$0xff] }
 0x7bf   : > { %v7277_v7 = vadd.f32 %v7276_v3, %v7187_v28  ;;  %8747 = vmatpush.bf16.msrb.mxu3 %v10700_v26 }
 0x7c0   : > { %v7817_v22 = vunpack.c.l.bf16 %v7702_v14  ;;  %v7818_v18 = vunpack.c.h.bf16 %v7702_v14 }
 0x7c2   : > { %v7949_v61 = vadd.f32 %v12436_v4, %v7817_v22  ;;  %v7950_v24 = vadd.f32 %v12438_v21, %v7818_v18 }
 0x7c3   : > { %v7009_v51 = vpop.f32.mrf.mxu2  ;;  %v7098_v36 = vpop.f32.mrf.mxu3 }
 0x7c4   : > { %v7099_v17 = vadd.f32 %v7098_v36, %v7009_v51  ;;  %v8269_v3 = vmax.f32 %v7949_v61, 0.0  ;;  %v8270_v51 = vmax.f32 %v7950_v24, 0.0 }
 0x7c6   : > { %v7704_v63 = vpack.c.bf16 %v7277_v7, %v7099_v17  ;;  %v7190_v30 = vpop.f32.mrf.mxu0  ;;  %v7279_v32 = vpop.f32.mrf.mxu1 }
 0x7c7   : > { %v7280_v54 = vadd.f32 %v7279_v32, %v7190_v30  ;;  %v10716_v32 = vld [vmem:[%s13091_s7 + $0xf0] sm:$0xff] }
 0x7c8   : > { %v7821_v15 = vunpack.c.l.bf16 %v7704_v63  ;;  %v7822_v44 = vunpack.c.h.bf16 %v7704_v63  ;;  %7327 = vmatmul.bf16.gmra.mxu2 %v12261_v5  ;;  %7416 = vmatmul.bf16.gmra.mxu3 %v12263_v11 }
 0x7c9   : > { %7505 = vmatmul.bf16.gmra.mxu0 %v12261_v5  ;;  %7594 = vmatmul.bf16.gmra.mxu1 %v12263_v11 }
 0x7ca   : > { %v7953_v52 = vadd.f32 %v12436_v4, %v7821_v15  ;;  %v7954_v56 = vadd.f32 %v12438_v21, %v7822_v44  ;;  %8925 = vmatpush.bf16.msrb.mxu1 %v10716_v32 }
 0x7cb   : > { %v7012_v14 = vpop.f32.mrf.mxu2  ;;  %v7101_v28 = vpop.f32.mrf.mxu3 }
 0x7cc   : > { %v7102_v7 = vadd.f32 %v7101_v28, %v7012_v14  ;;  %v8273_v22 = vmax.f32 %v7953_v52, 0.0  ;;  %v8274_v36 = vmax.f32 %v7954_v56, 0.0 }
 0x7ce   : > { %v7706_v17 = vpack.c.bf16 %v7280_v54, %v7102_v7  ;;  %v7192_v63 = vpop.f32.mrf.mxu0  ;;  %v7281_v30 = vpop.f32.mrf.mxu1  ;;  %v12565_v18 = vpack.c.bf16 %v8273_v22, %v8269_v3  ;;  %v12567_v5 = vpack.c.bf16 %v8274_v36, %v8270_v51  ;;  %v10691_v51 = vld [vmem:[%s13091_s7 + $0x28] sm:$0xff] }
 0x7cf   : > { %v7282_v11 = vadd.f32 %v7281_v30, %v7192_v63  ;;  %8659 = vmatpush.bf16.msrb.mxu2 %v10691_v51 }
 0x7d0   : > { %v7825_v15 = vunpack.c.l.bf16 %v7706_v17  ;;  %v7826_v26 = vunpack.c.h.bf16 %v7706_v17 }
 0x7d2   : > { %v7957_v28 = vadd.f32 %v12436_v4, %v7825_v15  ;;  %v7958_v22 = vadd.f32 %v12438_v21, %v7826_v26 }
 0x7d3   : > { %v7014_v44 = vpop.f32.mrf.mxu2  ;;  %v7103_v61 = vpop.f32.mrf.mxu3 }
 0x7d4   : > { %v7104_v52 = vadd.f32 %v7103_v61, %v7014_v44  ;;  %v8278_v44 = vmax.f32 %v7958_v22, 0.0 }
 0x7d6   : > { %v7708_v24 = vpack.c.bf16 %v7282_v11, %v7104_v52  ;;  %v7195_v56 = vpop.f32.mrf.mxu0  ;;  %v7284_v54 = vpop.f32.mrf.mxu1  ;;  %v8277_v11 = vmax.f32 %v7957_v28, 0.0 }
 0x7d7   : > { %v7285_v14 = vadd.f32 %v7284_v54, %v7195_v56  ;;  %v12590_v54 = vld [vmem:[%s13091_s7 + $0xb0] sm:$0xff] }
 0x7d8   : > { %v7829_v3 = vunpack.c.l.bf16 %v7708_v24  ;;  %v7830_v7 = vunpack.c.h.bf16 %v7708_v24  ;;  %7332 = vmatmul.bf16.gmra.mxu2 %v12273_v13  ;;  %7421 = vmatmul.bf16.gmra.mxu3 %v12275_v40 }
 0x7d9   : > { %7510 = vmatmul.bf16.gmra.mxu0 %v12273_v13  ;;  %7599 = vmatmul.bf16.gmra.mxu1 %v12275_v40 }
 0x7da   : > { %v7961_v36 = vadd.f32 %v12436_v4, %v7829_v3  ;;  %v7962_v17 = vadd.f32 %v12438_v21, %v7830_v7  ;;  %8836 = vmatpush.bf16.msrb.mxu0 %v12590_v54 }
 0x7db   : > { %v7017_v63 = vpop.f32.mrf.mxu2  ;;  %v7106_v30 = vpop.f32.mrf.mxu3 }
 0x7dc   : > { %v7107_v32 = vadd.f32 %v7106_v30, %v7017_v63  ;;  %v8281_v15 = vmax.f32 %v7961_v36, 0.0  ;;  %v8282_v61 = vmax.f32 %v7962_v17, 0.0 }
 0x7de   : > { %v7710_v26 = vpack.c.bf16 %v7285_v14, %v7107_v32  ;;  %v7197_v13 = vpop.f32.mrf.mxu0  ;;  %v7286_v52 = vpop.f32.mrf.mxu1  ;;  %v12583_v40 = vpack.c.bf16 %v8281_v15, %v8277_v11  ;;  %v12585_v24 = vpack.c.bf16 %v8282_v61, %v8278_v44  ;;  %v10699_v15 = vld [vmem:[%s13091_s7 + $0x68] sm:$0xff] }
 0x7df   : > { %v7287_v56 = vadd.f32 %v7286_v52, %v7197_v13  ;;  %8748 = vmatpush.bf16.msrb.mxu3 %v10699_v15 }
 0x7e0   : > { %v7833_v28 = vunpack.c.l.bf16 %v7710_v26  ;;  %v7834_v22 = vunpack.c.h.bf16 %v7710_v26 }
 0x7e2   : > { %v7965_v30 = vadd.f32 %v12436_v4, %v7833_v28  ;;  %v7966_v44 = vadd.f32 %v12438_v21, %v7834_v22 }
 0x7e3   : > { %v7019_v3 = vpop.f32.mrf.mxu2  ;;  %v7108_v7 = vpop.f32.mrf.mxu3 }
 0x7e4   : > { %v7109_v51 = vadd.f32 %v7108_v7, %v7019_v3  ;;  %v8286_v7 = vmax.f32 %v7966_v44, 0.0 }
 0x7e6   : > { %v7712_v14 = vpack.c.bf16 %v7287_v56, %v7109_v51  ;;  %v7200_v36 = vpop.f32.mrf.mxu0  ;;  %v7289_v17 = vpop.f32.mrf.mxu1  ;;  %v8285_v56 = vmax.f32 %v7965_v30, 0.0 }
 0x7e7   : > { %v7290_v63 = vadd.f32 %v7289_v17, %v7200_v36 }
 0x7e8   : > { %v7837_v11 = vunpack.c.l.bf16 %v7712_v14  ;;  %v7838_v32 = vunpack.c.h.bf16 %v7712_v14  ;;  %7337 = vmatmul.bf16.gmra.mxu2 %v12285_v29  ;;  %7426 = vmatmul.bf16.gmra.mxu3 %v12287_v35 }
 0x7e9   : > { %7515 = vmatmul.bf16.gmra.mxu0 %v12285_v29  ;;  %7604 = vmatmul.bf16.gmra.mxu1 %v12287_v35 }
 0x7ea   : > { %v7969_v61 = vadd.f32 %v12436_v4, %v7837_v11  ;;  %v7970_v26 = vadd.f32 %v12438_v21, %v7838_v32  ;;  %v10715_v11 = vld [vmem:[%s13091_s7 + $0xe8] sm:$0xff] }
 0x7eb   : > { %v7022_v13 = vpop.f32.mrf.mxu2  ;;  %v7111_v52 = vpop.f32.mrf.mxu3  ;;  %8926 = vmatpush.bf16.msrb.mxu1 %v10715_v11 }
 0x7ec   : > { %v7112_v28 = vadd.f32 %v7111_v52, %v7022_v13  ;;  %v8289_v3 = vmax.f32 %v7969_v61, 0.0  ;;  %v8290_v51 = vmax.f32 %v7970_v26, 0.0 }
 0x7ee   : > { %v7714_v14 = vpack.c.bf16 %v7290_v63, %v7112_v28  ;;  %v7202_v36 = vpop.f32.mrf.mxu0  ;;  %v7291_v17 = vpop.f32.mrf.mxu1  ;;  %v12604_v22 = vpack.c.bf16 %v8289_v3, %v8285_v56  ;;  %v12606_v29 = vpack.c.bf16 %v8290_v51, %v8286_v7  ;;  %v10690_v51 = vld [vmem:[%s13091_s7 + $0x20] sm:$0xff] }
 0x7ef   : > { %v7292_v35 = vadd.f32 %v7291_v17, %v7202_v36  ;;  %8660 = vmatpush.bf16.msrb.mxu2 %v10690_v51 }
 0x7f0   : > { %v7841_v32 = vunpack.c.l.bf16 %v7714_v14  ;;  %v7842_v13 = vunpack.c.h.bf16 %v7714_v14 }
 0x7f2   : > { %v7973_v56 = vadd.f32 %v12436_v4, %v7841_v32  ;;  %v7974_v7 = vadd.f32 %v12438_v21, %v7842_v13 }
 0x7f3   : > { %v7024_v15 = vpop.f32.mrf.mxu2  ;;  %v7113_v30 = vpop.f32.mrf.mxu3 }
 0x7f4   : > { %v7114_v61 = vadd.f32 %v7113_v30, %v7024_v15  ;;  %v8293_v11 = vmax.f32 %v7973_v56, 0.0  ;;  %v8294_v30 = vmax.f32 %v7974_v7, 0.0 }
 0x7f6   : > { %v7716_v44 = vpack.c.bf16 %v7292_v35, %v7114_v61  ;;  %v7205_v26 = vpop.f32.mrf.mxu0  ;;  %v7294_v63 = vpop.f32.mrf.mxu1 }
 0x7f7   : > { %v7295_v52 = vadd.f32 %v7294_v63, %v7205_v26 }
 0x7f8   : > { %v7845_v28 = vunpack.c.l.bf16 %v7716_v44  ;;  %v7846_v3 = vunpack.c.h.bf16 %v7716_v44  ;;  %7342 = vmatmul.bf16.gmra.mxu2 %v12297_v42  ;;  %7431 = vmatmul.bf16.gmra.mxu3 %v12299_v8 }
 0x7f9   : > { %7520 = vmatmul.bf16.gmra.mxu0 %v12297_v42  ;;  %7609 = vmatmul.bf16.gmra.mxu1 %v12299_v8 }
 0x7fa   : > { %v7977_v14 = vadd.f32 %v12436_v4, %v7845_v28  ;;  %v7978_v36 = vadd.f32 %v12438_v21, %v7846_v3  ;;  %v12629_v28 = vld [vmem:[%s13091_s7 + $0xa8] sm:$0xff] }
 0x7fb   : > { %v7027_v17 = vpop.f32.mrf.mxu2  ;;  %v7116_v35 = vpop.f32.mrf.mxu3  ;;  %8837 = vmatpush.bf16.msrb.mxu0 %v12629_v28 }
 0x7fc   : > { %v7117_v32 = vadd.f32 %v7116_v35, %v7027_v17  ;;  %v8297_v15 = vmax.f32 %v7977_v14, 0.0  ;;  %v8298_v13 = vmax.f32 %v7978_v36, 0.0 }
 0x7fe   : > { %v7718_v61 = vpack.c.bf16 %v7295_v52, %v7117_v32  ;;  %v7207_v42 = vpop.f32.mrf.mxu0  ;;  %v7296_v44 = vpop.f32.mrf.mxu1  ;;  %v12622_v8 = vpack.c.bf16 %v8297_v15, %v8293_v11  ;;  %v12624_v26 = vpack.c.bf16 %v8298_v13, %v8294_v30  ;;  %v10698_v30 = vld [vmem:[%s13091_s7 + $0x60] sm:$0xff] }
 0x7ff   : > { %v7297_v63 = vadd.f32 %v7296_v44, %v7207_v42  ;;  %8749 = vmatpush.bf16.msrb.mxu3 %v10698_v30 }
 0x800   : > { %13104 = vst [vmem:[#allocation16_spill] sm:$0xff] %v12622_v8  ;;  %v7849_v56 = vunpack.c.l.bf16 %v7718_v61  ;;  %v7850_v7 = vunpack.c.h.bf16 %v7718_v61 }
 0x801   : > { %13105 = vst [vmem:[#allocation17_spill] sm:$0xff] %v12624_v26 }
 0x802   : > { %v7981_v11 = vadd.f32 %v12436_v4, %v7849_v56  ;;  %v7982_v13 = vadd.f32 %v12438_v21, %v7850_v7 }
 0x803   : > { %v7029_v3 = vpop.f32.mrf.mxu2  ;;  %v7118_v51 = vpop.f32.mrf.mxu3 }
 0x804   : > { %v7119_v14 = vadd.f32 %v7118_v51, %v7029_v3  ;;  %v8301_v56 = vmax.f32 %v7981_v11, 0.0 }
 0x806   : > { %v7720_v52 = vpack.c.bf16 %v7297_v63, %v7119_v14  ;;  %v7210_v36 = vpop.f32.mrf.mxu0  ;;  %v7299_v17 = vpop.f32.mrf.mxu1  ;;  %v8302_v14 = vmax.f32 %v7982_v13, 0.0 }
 0x807   : > { %v7300_v35 = vadd.f32 %v7299_v17, %v7210_v36 }
 0x808   : > { %v7853_v32 = vunpack.c.l.bf16 %v7720_v52  ;;  %v7854_v15 = vunpack.c.h.bf16 %v7720_v52  ;;  %7347 = vmatmul.bf16.gmra.mxu2 %v12309_v57  ;;  %7436 = vmatmul.bf16.gmra.mxu3 %v12311_v31 }
 0x809   : > { %7525 = vmatmul.bf16.gmra.mxu0 %v12309_v57  ;;  %7614 = vmatmul.bf16.gmra.mxu1 %v12311_v31 }
 0x80a   : > { %v7985_v61 = vadd.f32 %v12436_v4, %v7853_v32  ;;  %v7986_v42 = vadd.f32 %v12438_v21, %v7854_v15  ;;  %v10714_v32 = vld [vmem:[%s13091_s7 + $0xe0] sm:$0xff] }
 0x80b   : > { %v7032_v44 = vpop.f32.mrf.mxu2  ;;  %v7121_v63 = vpop.f32.mrf.mxu3  ;;  %8927 = vmatpush.bf16.msrb.mxu1 %v10714_v32 }
 0x80c   : > { %v7122_v3 = vadd.f32 %v7121_v63, %v7032_v44  ;;  %v8305_v51 = vmax.f32 %v7985_v61, 0.0  ;;  %v8306_v52 = vmax.f32 %v7986_v42, 0.0 }
 0x80e   : > { %v7722_v36 = vpack.c.bf16 %v7300_v35, %v7122_v3  ;;  %v7212_v17 = vpop.f32.mrf.mxu0  ;;  %v7301_v26 = vpop.f32.mrf.mxu1  ;;  %v12643_v7 = vpack.c.bf16 %v8305_v51, %v8301_v56  ;;  %v12645_v57 = vpack.c.bf16 %v8306_v52, %v8302_v14  ;;  %v10689_v14 = vld [vmem:[%s13091_s7 + $0x18] sm:$0xff] }
 0x80f   : > { %v7302_v31 = vadd.f32 %v7301_v26, %v7212_v17  ;;  %8661 = vmatpush.bf16.msrb.mxu2 %v10689_v14 }
 0x810   : > { %13106 = vst [vmem:[#allocation18_spill] sm:$0xff] %v12643_v7  ;;  %v7857_v15 = vunpack.c.l.bf16 %v7722_v36  ;;  %v7858_v44 = vunpack.c.h.bf16 %v7722_v36 }
 0x811   : > { %13107 = vst [vmem:[#allocation19_spill] sm:$0xff] %v12645_v57 }
 0x812   : > { %v7989_v56 = vadd.f32 %v12436_v4, %v7857_v15  ;;  %v7990_v26 = vadd.f32 %v12438_v21, %v7858_v44 }
 0x813   : > { %v7034_v30 = vpop.f32.mrf.mxu2  ;;  %v7123_v11 = vpop.f32.mrf.mxu3 }
 0x814   : > { %v7124_v61 = vadd.f32 %v7123_v11, %v7034_v30  ;;  %v8309_v32 = vmax.f32 %v7989_v56, 0.0  ;;  %v8310_v11 = vmax.f32 %v7990_v26, 0.0  ;;  %v12668_v56 = vld [vmem:[%s13091_s7 + $0xa0] sm:$0xff] }
 0x815   : > { %8838 = vmatpush.bf16.msrb.mxu0 %v12668_v56 }
 0x816   : > { %v7724_v13 = vpack.c.bf16 %v7302_v31, %v7124_v61  ;;  %v7215_v42 = vpop.f32.mrf.mxu0  ;;  %v7304_v35 = vpop.f32.mrf.mxu1 }
 0x817   : > { %v7305_v63 = vadd.f32 %v7304_v35, %v7215_v42 }
 0x818   : > { %v7861_v3 = vunpack.c.l.bf16 %v7724_v13  ;;  %v7862_v51 = vunpack.c.h.bf16 %v7724_v13  ;;  %7352 = vmatmul.bf16.gmra.mxu2 %v12321_v6  ;;  %7441 = vmatmul.bf16.gmra.mxu3 %v12323_v34 }
 0x819   : > { %7530 = vmatmul.bf16.gmra.mxu0 %v12321_v6  ;;  %7619 = vmatmul.bf16.gmra.mxu1 %v12323_v34 }
 0x81a   : > { %v7993_v52 = vadd.f32 %v12436_v4, %v7861_v3  ;;  %v7994_v36 = vadd.f32 %v12438_v21, %v7862_v51 }
 0x81b   : > { %v7037_v17 = vpop.f32.mrf.mxu2  ;;  %v7126_v31 = vpop.f32.mrf.mxu3 }
 0x81c   : > { %v7127_v15 = vadd.f32 %v7126_v31, %v7037_v17  ;;  %v8313_v30 = vmax.f32 %v7993_v52, 0.0  ;;  %v8314_v44 = vmax.f32 %v7994_v36, 0.0 }
 0x81e   : > { %v7726_v61 = vpack.c.bf16 %v7305_v63, %v7127_v15  ;;  %v7217_v6 = vpop.f32.mrf.mxu0  ;;  %v7306_v13 = vpop.f32.mrf.mxu1  ;;  %v12661_v34 = vpack.c.bf16 %v8313_v30, %v8309_v32  ;;  %v12663_v42 = vpack.c.bf16 %v8314_v44, %v8310_v11 }
 0x81f   : > { %v7307_v35 = vadd.f32 %v7306_v13, %v7217_v6 }
 0x820   : > { %v7865_v57 = vunpack.c.l.bf16 %v7726_v61  ;;  %v7866_v51 = vunpack.c.h.bf16 %v7726_v61 }
 0x822   : > { %v7997_v36 = vadd.f32 %v12436_v4, %v7865_v57 }
 0x823   : > { %v7039_v3 = vpop.f32.mrf.mxu2  ;;  %v7128_v7 = vpop.f32.mrf.mxu3 }
 0x824   : > { %v7129_v8 = vadd.f32 %v7128_v7, %v7039_v3  ;;  %v7998_v7 = vadd.f32 %v12438_v21, %v7866_v51  ;;  %v8317_v11 = vmax.f32 %v7997_v36, 0.0 }
 0x826   : > { %v7728_v26 = vpack.c.bf16 %v7307_v35, %v7129_v8  ;;  %v7220_v14 = vpop.f32.mrf.mxu0  ;;  %v7309_v63 = vpop.f32.mrf.mxu1  ;;  %v8318_v61 = vmax.f32 %v7998_v7, 0.0 }
 0x827   : > { %v7310_v52 = vadd.f32 %v7309_v63, %v7220_v14  ;;  %v10713_v14 = vld [vmem:[%s13091_s7 + $0xd8] sm:$0xff] }
 0x828   : > { %v7869_v17 = vunpack.c.l.bf16 %v7728_v26  ;;  %v7870_v31 = vunpack.c.h.bf16 %v7728_v26  ;;  %7357 = vmatmul.bf16.gmra.mxu2 %v12333_v55  ;;  %7446 = vmatmul.bf16.gmra.mxu3 %v12335_v0 }
 0x829   : > { %7535 = vmatmul.bf16.gmra.mxu0 %v12333_v55  ;;  %7624 = vmatmul.bf16.gmra.mxu1 %v12335_v0  ;;  %v10697_v55 = vld [vmem:[%s13091_s7 + $0x58] sm:$0xff] }
 0x82a   : > { %v8001_v8 = vadd.f32 %v12436_v4, %v7869_v17  ;;  %v8002_v32 = vadd.f32 %v12438_v21, %v7870_v31  ;;  %8750 = vmatpush.bf16.msrb.mxu3 %v10697_v55  ;;  %8928 = vmatpush.bf16.msrb.mxu1 %v10713_v14 }
 0x82b   : > { %v7042_v15 = vpop.f32.mrf.mxu2  ;;  %v7131_v30 = vpop.f32.mrf.mxu3 }
 0x82c   : > { %v7132_v57 = vadd.f32 %v7131_v30, %v7042_v15  ;;  %v8321_v44 = vmax.f32 %v8001_v8, 0.0  ;;  %v8322_v6 = vmax.f32 %v8002_v32, 0.0 }
 0x82e   : > { %v7730_v13 = vpack.c.bf16 %v7310_v52, %v7132_v57  ;;  %v7222_v35 = vpop.f32.mrf.mxu0  ;;  %v7311_v3 = vpop.f32.mrf.mxu1  ;;  %v12682_v51 = vpack.c.bf16 %v8321_v44, %v8317_v11  ;;  %v12684_v0 = vpack.c.bf16 %v8322_v6, %v8318_v61  ;;  %v7739_v44 = vld [vmem:[#allocation1 + $0x12] sm:$0xff]  ;;  %v7740_v61 = vld [vmem:[#allocation1 + $0x1b] sm:$0xff] }
 0x82f   : > { %v7312_v26 = vadd.f32 %v7311_v3, %v7222_v35  ;;  %v7747_v14 = vpack.i.b16 %v7739_v44, %v7739_v44 }
 0x830   : > { %13108 = vst [vmem:[#allocation20_spill] sm:$0xff] %v12684_v0  ;;  %v7873_v63 = vunpack.c.l.bf16 %v7730_v13  ;;  %v7874_v17 = vunpack.c.h.bf16 %v7730_v13  ;;  %v10688_v13 = vld [vmem:[%s13091_s7 + $0x10] sm:$0xff] }
 0x831   : > { %8662 = vmatpush.bf16.msrb.mxu2 %v10688_v13 }
 0x832   : > { %v8005_v30 = vadd.f32 %v12436_v4, %v7873_v63  ;;  %v8006_v6 = vadd.f32 %v12438_v21, %v7874_v17  ;;  %v7750_v63 = vpack.i.b16 %v7740_v61, %v7740_v61 }
 0x833   : > { %v7044_v36 = vpop.f32.mrf.mxu2  ;;  %v7133_v52 = vpop.f32.mrf.mxu3 }
 0x834   : > { %v7134_v31 = vadd.f32 %v7133_v52, %v7044_v36  ;;  %v8325_v36 = vmax.f32 %v8005_v30, 0.0 }
 0x836   : > { %v7732_v7 = vpack.c.bf16 %v7312_v26, %v7134_v31  ;;  %v7501_v8 = vpop.f32.mrf.mxu0  ;;  %v7590_v32 = vpop.f32.mrf.mxu1  ;;  %v8326_v31 = vmax.f32 %v8006_v6, 0.0 }
 0x837   : > { %v7591_v15 = vadd.f32 %v7590_v32, %v7501_v8 }
 0x838   : > { %v7877_v11 = vunpack.c.l.bf16 %v7732_v7  ;;  %v7878_v57 = vunpack.c.h.bf16 %v7732_v7  ;;  %7362 = vmatmul.bf16.gmra.mxu2 %v12345_v25  ;;  %7451 = vmatmul.bf16.gmra.mxu3 %v12347_v62 }
 0x839   : > { %7540 = vmatmul.bf16.gmra.mxu0 %v12345_v25  ;;  %7629 = vmatmul.bf16.gmra.mxu1 %v12347_v62 }
 0x83a   : > { %v8009_v35 = vadd.f32 %v12436_v4, %v7877_v11  ;;  %v8010_v3 = vadd.f32 %v12438_v21, %v7878_v57  ;;  %v7749_v4 = vperm.slane %v7747_v14, 0  ;;  %v7752_v21 = vperm.slane %v7750_v63, 0  ;;  %v12707_v57 = vld [vmem:[%s13091_s7 + $0x98] sm:$0xff] }
 0x83b   : > { %v7323_v55 = vpop.f32.mrf.mxu2  ;;  %v7412_v26 = vpop.f32.mrf.mxu3  ;;  %8839 = vmatpush.bf16.msrb.mxu0 %v12707_v57 }
 0x83c   : > { %v7413_v52 = vadd.f32 %v7412_v26, %v7323_v55  ;;  %v8329_v17 = vmax.f32 %v8009_v35, 0.0  ;;  %v8330_v25 = vmax.f32 %v8010_v3, 0.0  ;;  %v12710_v44 = vunpack.c.l.bf16 %v7749_v4 }
 0x83d   : > { %v12712_v13 = vunpack.c.l.bf16 %v7752_v21 }
 0x83e   : > { %v7671_v7 = vpack.c.bf16 %v7591_v15, %v7413_v52  ;;  %v7503_v62 = vpop.f32.mrf.mxu0  ;;  %v7592_v8 = vpop.f32.mrf.mxu1  ;;  %v12700_v32 = vpack.c.bf16 %v8329_v17, %v8325_v36  ;;  %v12702_v0 = vpack.c.bf16 %v8330_v25, %v8326_v31  ;;  %v10696_v31 = vld [vmem:[%s13091_s7 + $0x50] sm:$0xff] }
 0x83f   : > { %v7593_v11 = vadd.f32 %v7592_v8, %v7503_v62  ;;  %8751 = vmatpush.bf16.msrb.mxu3 %v10696_v31 }
 0x840   : > { %v7755_v30 = vunpack.c.l.bf16 %v7671_v7  ;;  %v7756_v6 = vunpack.c.h.bf16 %v7671_v7 }
 0x842   : > { %v7887_v14 = vadd.f32 %v12710_v44, %v7755_v30  ;;  %v7888_v36 = vadd.f32 %v12712_v13, %v7756_v6 }
 0x843   : > { %v7325_v15 = vpop.f32.mrf.mxu2  ;;  %v7414_v61 = vpop.f32.mrf.mxu3 }
 0x844   : > { %v7415_v35 = vadd.f32 %v7414_v61, %v7325_v15  ;;  %v8207_v62 = vmax.f32 %v7887_v14, 0.0 }
 0x846   : > { %v7673_v3 = vpack.c.bf16 %v7593_v11, %v7415_v35  ;;  %v7506_v55 = vpop.f32.mrf.mxu0  ;;  %v7595_v26 = vpop.f32.mrf.mxu1  ;;  %v8208_v11 = vmax.f32 %v7888_v36, 0.0 }
 0x847   : > { %v7596_v63 = vadd.f32 %v7595_v26, %v7506_v55  ;;  %v10712_v55 = vld [vmem:[%s13091_s7 + $0xd0] sm:$0xff] }
 0x848   : > { %v7759_v52 = vunpack.c.l.bf16 %v7673_v3  ;;  %v7760_v17 = vunpack.c.h.bf16 %v7673_v3  ;;  %7367 = vmatmul.bf16.gmra.mxu2 %v12357_v59  ;;  %7456 = vmatmul.bf16.gmra.mxu3 %v12359_v47 }
 0x849   : > { %7545 = vmatmul.bf16.gmra.mxu0 %v12357_v59  ;;  %7634 = vmatmul.bf16.gmra.mxu1 %v12359_v47 }
 0x84a   : > { %v7891_v25 = vadd.f32 %v12710_v44, %v7759_v52  ;;  %v7892_v7 = vadd.f32 %v12712_v13, %v7760_v17  ;;  %8929 = vmatpush.bf16.msrb.mxu1 %v10712_v55 }
 0x84b   : > { %v7328_v8 = vpop.f32.mrf.mxu2  ;;  %v7417_v4 = vpop.f32.mrf.mxu3 }
 0x84c   : > { %v8211_v21 = vmax.f32 %v7891_v25, 0.0  ;;  %v8212_v30 = vmax.f32 %v7892_v7, 0.0  ;;  %v7418_v15 = vadd.f32 %v7417_v4, %v7328_v8 }
 0x84e   : > { %v12725_v61 = vpack.c.bf16 %v8211_v21, %v8207_v62  ;;  %v12727_v6 = vpack.c.bf16 %v8212_v30, %v8208_v11  ;;  %v7675_v35 = vpack.c.bf16 %v7596_v63, %v7418_v15  ;;  %v7508_v59 = vpop.f32.mrf.mxu0  ;;  %v7597_v3 = vpop.f32.mrf.mxu1  ;;  %v10687_v21 = vld [vmem:[%s13091_s7 + $0x8] sm:$0xff] }
 0x84f   : > { %v7598_v47 = vadd.f32 %v7597_v3, %v7508_v59  ;;  %8663 = vmatpush.bf16.msrb.mxu2 %v10687_v21 }
 0x850   : > { %v7763_v26 = vunpack.c.l.bf16 %v7675_v35  ;;  %v7764_v36 = vunpack.c.h.bf16 %v7675_v35 }
 0x852   : > { %v7895_v8 = vadd.f32 %v12710_v44, %v7763_v26  ;;  %v7896_v11 = vadd.f32 %v12712_v13, %v7764_v36 }
 0x853   : > { %v7330_v14 = vpop.f32.mrf.mxu2  ;;  %v7419_v52 = vpop.f32.mrf.mxu3 }
 0x854   : > { %v7420_v17 = vadd.f32 %v7419_v52, %v7330_v14  ;;  %v8215_v3 = vmax.f32 %v7895_v8, 0.0  ;;  %v8216_v26 = vmax.f32 %v7896_v11, 0.0 }
 0x856   : > { %v7677_v31 = vpack.c.bf16 %v7598_v47, %v7420_v17  ;;  %v7511_v25 = vpop.f32.mrf.mxu0  ;;  %v7600_v7 = vpop.f32.mrf.mxu1 }
 0x857   : > { %v7601_v62 = vadd.f32 %v7600_v7, %v7511_v25  ;;  %v12750_v25 = vld [vmem:[%s13091_s7 + $0x90] sm:$0xff] }
 0x858   : > { %v7767_v63 = vunpack.c.l.bf16 %v7677_v31  ;;  %v7768_v4 = vunpack.c.h.bf16 %v7677_v31  ;;  %7372 = vmatmul.bf16.gmra.mxu2 %v12369_v38  ;;  %7461 = vmatmul.bf16.gmra.mxu3 %v12371_v39 }
 0x859   : > { %7550 = vmatmul.bf16.gmra.mxu0 %v12369_v38  ;;  %7639 = vmatmul.bf16.gmra.mxu1 %v12371_v39 }
 0x85a   : > { %v7899_v30 = vadd.f32 %v12710_v44, %v7767_v63  ;;  %v7900_v15 = vadd.f32 %v12712_v13, %v7768_v4  ;;  %8840 = vmatpush.bf16.msrb.mxu0 %v12750_v25 }
 0x85b   : > { %v7333_v35 = vpop.f32.mrf.mxu2  ;;  %v7422_v59 = vpop.f32.mrf.mxu3 }
 0x85c   : > { %v7423_v47 = vadd.f32 %v7422_v59, %v7333_v35  ;;  %v8219_v55 = vmax.f32 %v7899_v30, 0.0  ;;  %v8220_v14 = vmax.f32 %v7900_v15, 0.0 }
 0x85e   : > { %v7679_v52 = vpack.c.bf16 %v7601_v62, %v7423_v47  ;;  %v7513_v38 = vpop.f32.mrf.mxu0  ;;  %v7602_v36 = vpop.f32.mrf.mxu1  ;;  %v12743_v39 = vpack.c.bf16 %v8219_v55, %v8215_v3  ;;  %v12745_v17 = vpack.c.bf16 %v8220_v14, %v8216_v26  ;;  %v10695_v47 = vld [vmem:[%s13091_s7 + $0x48] sm:$0xff] }
 0x85f   : > { %v7603_v31 = vadd.f32 %v7602_v36, %v7513_v38  ;;  %8752 = vmatpush.bf16.msrb.mxu3 %v10695_v47 }
 0x860   : > { %v7771_v7 = vunpack.c.l.bf16 %v7679_v52  ;;  %v7772_v4 = vunpack.c.h.bf16 %v7679_v52 }
 0x862   : > { %v7903_v35 = vadd.f32 %v12710_v44, %v7771_v7  ;;  %v7904_v55 = vadd.f32 %v12712_v13, %v7772_v4 }
 0x863   : > { %v7335_v8 = vpop.f32.mrf.mxu2  ;;  %v7424_v63 = vpop.f32.mrf.mxu3 }
 0x864   : > { %v7425_v11 = vadd.f32 %v7424_v63, %v7335_v8  ;;  %v8223_v36 = vmax.f32 %v7903_v35, 0.0  ;;  %v8224_v8 = vmax.f32 %v7904_v55, 0.0 }
 0x866   : > { %v7681_v62 = vpack.c.bf16 %v7603_v31, %v7425_v11  ;;  %v7516_v21 = vpop.f32.mrf.mxu0  ;;  %v7605_v30 = vpop.f32.mrf.mxu1 }
 0x867   : > { %v7606_v15 = vadd.f32 %v7605_v30, %v7516_v21  ;;  %v10711_v30 = vld [vmem:[%s13091_s7 + $0xc8] sm:$0xff] }
 0x868   : > { %v7775_v59 = vunpack.c.l.bf16 %v7681_v62  ;;  %v7776_v3 = vunpack.c.h.bf16 %v7681_v62  ;;  %7377 = vmatmul.bf16.gmra.mxu2 %v12381_v2  ;;  %7466 = vmatmul.bf16.gmra.mxu3 %v12383_v46 }
 0x869   : > { %7555 = vmatmul.bf16.gmra.mxu0 %v12381_v2  ;;  %7644 = vmatmul.bf16.gmra.mxu1 %v12383_v46 }
 0x86a   : > { %v7907_v26 = vadd.f32 %v12710_v44, %v7775_v59  ;;  %v7908_v14 = vadd.f32 %v12712_v13, %v7776_v3  ;;  %8930 = vmatpush.bf16.msrb.mxu1 %v10711_v30 }
 0x86b   : > { %v7338_v52 = vpop.f32.mrf.mxu2  ;;  %v7427_v38 = vpop.f32.mrf.mxu3 }
 0x86c   : > { %v7428_v31 = vadd.f32 %v7427_v38, %v7338_v52  ;;  %v8227_v7 = vmax.f32 %v7907_v26, 0.0  ;;  %v8228_v63 = vmax.f32 %v7908_v14, 0.0 }
 0x86e   : > { %v7683_v11 = vpack.c.bf16 %v7606_v15, %v7428_v31  ;;  %v7518_v62 = vpop.f32.mrf.mxu0  ;;  %v7607_v21 = vpop.f32.mrf.mxu1  ;;  %v12764_v4 = vpack.c.bf16 %v8227_v7, %v8223_v36  ;;  %v12766_v2 = vpack.c.bf16 %v8228_v63, %v8224_v8  ;;  %v10686_v8 = vld [vmem:[%s13091_s7] sm:$0xff] }
 0x86f   : > { %v7608_v46 = vadd.f32 %v7607_v21, %v7518_v62  ;;  %8664 = vmatpush.bf16.msrb.mxu2 %v10686_v8 }
 0x870   : > { %v7779_v59 = vunpack.c.l.bf16 %v7683_v11  ;;  %v7780_v47 = vunpack.c.h.bf16 %v7683_v11 }
 0x872   : > { %v7911_v38 = vadd.f32 %v12710_v44, %v7779_v59  ;;  %v7912_v7 = vadd.f32 %v12712_v13, %v7780_v47 }
 0x873   : > { %v7340_v3 = vpop.f32.mrf.mxu2  ;;  %v7429_v35 = vpop.f32.mrf.mxu3  ;;  %10721 = vmatpush.bf16.msra.mxu2 %v12551_v23 }
 0x874   : > { %v7430_v26 = vadd.f32 %v7429_v35, %v7340_v3  ;;  %v8232_v3 = vmax.f32 %v7912_v7, 0.0 }
 0x876   : > { %v7685_v55 = vpack.c.bf16 %v7608_v46, %v7430_v26  ;;  %v7521_v14 = vpop.f32.mrf.mxu0  ;;  %v7610_v15 = vpop.f32.mrf.mxu1  ;;  %v8231_v46 = vmax.f32 %v7911_v38, 0.0 }
 0x877   : > { %v7611_v52 = vadd.f32 %v7610_v15, %v7521_v14  ;;  %v10703_v15 = vld [vmem:[%s13091_s7 + $0x88] sm:$0xff]  ;;  %10722 = vmatpush.bf16.msra.mxu2 %v12590_v54  ;;  %v10694_v54 = vld [vmem:[%s13091_s7 + $0x40] sm:$0xff] }
 0x878   : > { %v7783_v36 = vunpack.c.l.bf16 %v7685_v55  ;;  %v7784_v31 = vunpack.c.h.bf16 %v7685_v55  ;;  %7382 = vmatmul.bf16.gmra.mxu2 %v12393_v16  ;;  %7471 = vmatmul.bf16.gmra.mxu3 %v12395_v45 }
 0x879   : > { %7560 = vmatmul.bf16.gmra.mxu0 %v12393_v16  ;;  %7649 = vmatmul.bf16.gmra.mxu1 %v12395_v45 }
 0x87a   : > { %v7915_v63 = vadd.f32 %v12710_v44, %v7783_v36  ;;  %v7916_v11 = vadd.f32 %v12712_v13, %v7784_v31  ;;  %8841 = vmatpush.bf16.msrb.mxu0 %v10703_v15  ;;  %8753 = vmatpush.bf16.msrb.mxu3 %v10694_v54 }
 0x87b   : > { %v7343_v62 = vpop.f32.mrf.mxu2  ;;  %v7432_v21 = vpop.f32.mrf.mxu3  ;;  %10723 = vmatpush.bf16.msra.mxu2 %v12629_v28 }
 0x87c   : > { %v7433_v30 = vadd.f32 %v7432_v21, %v7343_v62  ;;  %v8235_v59 = vmax.f32 %v7915_v63, 0.0  ;;  %v8236_v16 = vmax.f32 %v7916_v11, 0.0 }
 0x87e   : > { %v7687_v35 = vpack.c.bf16 %v7611_v52, %v7433_v30  ;;  %v7523_v45 = vpop.f32.mrf.mxu0  ;;  %v7612_v47 = vpop.f32.mrf.mxu1  ;;  %v12783_v26 = vpack.c.bf16 %v8235_v59, %v8231_v46  ;;  %v12785_v55 = vpack.c.bf16 %v8236_v16, %v8232_v3 }
 0x87f   : > { %v7613_v14 = vadd.f32 %v7612_v47, %v7523_v45  ;;  %10724 = vmatpush.bf16.msra.mxu2 %v12668_v56  ;;  %v10710_v56 = vld [vmem:[%s13091_s7 + $0xc0] sm:$0xff] }
 0x880   : > { %v7787_v38 = vunpack.c.l.bf16 %v7687_v35  ;;  %v7788_v31 = vunpack.c.h.bf16 %v7687_v35  ;;  %8931 = vmatpush.bf16.msrb.mxu1 %v10710_v56 }
 0x882   : > { %v7919_v62 = vadd.f32 %v12710_v44, %v7787_v38  ;;  %v7920_v30 = vadd.f32 %v12712_v13, %v7788_v31 }
 0x883   : > { %v7345_v23 = vpop.f32.mrf.mxu2  ;;  %v7434_v36 = vpop.f32.mrf.mxu3  ;;  %10725 = vmatpush.bf16.msra.mxu2 %v12707_v57 }
 0x884   : > { %v7435_v7 = vadd.f32 %v7434_v36, %v7345_v23  ;;  %v8239_v35 = vmax.f32 %v7919_v62, 0.0 }
 0x886   : > { %v7689_v52 = vpack.c.bf16 %v7613_v14, %v7435_v7  ;;  %v7526_v8 = vpop.f32.mrf.mxu0  ;;  %v7615_v63 = vpop.f32.mrf.mxu1  ;;  %v8240_v14 = vmax.f32 %v7920_v30, 0.0 }
 0x887   : > { %v7616_v11 = vadd.f32 %v7615_v63, %v7526_v8  ;;  %10726 = vmatpush.bf16.msra.mxu2 %v12750_v25 }
 0x888   : > { %v7791_v21 = vunpack.c.l.bf16 %v7689_v52  ;;  %v7792_v46 = vunpack.c.h.bf16 %v7689_v52  ;;  %7387 = vmatmul.bf16.gmra.mxu2 %v12408_v37  ;;  %7476 = vmatmul.bf16.gmra.mxu3 %v12410_v19 }
 0x889   : > { %7565 = vmatmul.bf16.gmra.mxu0 %v12408_v37  ;;  %7654 = vmatmul.bf16.gmra.mxu1 %v12410_v19 }
 0x88a   : > { %v7923_v28 = vadd.f32 %v12710_v44, %v7791_v21  ;;  %v7924_v59 = vadd.f32 %v12712_v13, %v7792_v46  ;;  %v10702_v21 = vld [vmem:[%s13091_s7 + $0x80] sm:$0xff] }
 0x88b   : > { %v7348_v3 = vpop.f32.mrf.mxu2  ;;  %v7437_v16 = vpop.f32.mrf.mxu3  ;;  %8842 = vmatpush.bf16.msrb.mxu0 %v10702_v21  ;;  %10727 = vmatpush.bf16.msra.mxu2 %v10703_v15 }
 0x88c   : > { %v7438_v45 = vadd.f32 %v7437_v16, %v7348_v3  ;;  %v8243_v47 = vmax.f32 %v7923_v28, 0.0  ;;  %v8244_v38 = vmax.f32 %v7924_v59, 0.0 }
 0x88e   : > { %v7691_v23 = vpack.c.bf16 %v7616_v11, %v7438_v45  ;;  %v7528_v36 = vpop.f32.mrf.mxu0  ;;  %v7617_v31 = vpop.f32.mrf.mxu1  ;;  %v12804_v37 = vpack.c.bf16 %v8243_v47, %v8239_v35  ;;  %v12806_v19 = vpack.c.bf16 %v8244_v38, %v8240_v14 }
 0x88f   : > { %v7618_v7 = vadd.f32 %v7617_v31, %v7528_v36  ;;  %10728 = vmatpush.bf16.msra.mxu2 %v10702_v21 }
 0x890   : > { %v7795_v52 = vunpack.c.l.bf16 %v7691_v23  ;;  %v7796_v11 = vunpack.c.h.bf16 %v7691_v23 }
 0x892   : > { %v7927_v28 = vadd.f32 %v12710_v44, %v7795_v52  ;;  %v7928_v25 = vadd.f32 %v12712_v13, %v7796_v11 }
 0x893   : > { %v7350_v8 = vpop.f32.mrf.mxu2  ;;  %v7439_v63 = vpop.f32.mrf.mxu3 }
 0x894   : > { %v7440_v62 = vadd.f32 %v7439_v63, %v7350_v8  ;;  %v8247_v47 = vmax.f32 %v7927_v28, 0.0  ;;  %v8248_v23 = vmax.f32 %v7928_v25, 0.0 }
 0x896   : > { %v7693_v46 = vpack.c.bf16 %v7618_v7, %v7440_v62  ;;  %v7531_v54 = vpop.f32.mrf.mxu0  ;;  %v7620_v57 = vpop.f32.mrf.mxu1 }
 0x897   : > { %v7621_v30 = vadd.f32 %v7620_v57, %v7531_v54 }
 0x898   : > { %v7799_v59 = vunpack.c.l.bf16 %v7693_v46  ;;  %v7800_v3 = vunpack.c.h.bf16 %v7693_v46  ;;  %7392 = vmatmul.bf16.gmra.mxu2 %v12420_v48  ;;  %7481 = vmatmul.bf16.gmra.mxu3 %v12422_v58 }
 0x899   : > { %7570 = vmatmul.bf16.gmra.mxu0 %v12420_v48  ;;  %7659 = vmatmul.bf16.gmra.mxu1 %v12422_v58 }
 0x89a   : > { %v7931_v16 = vadd.f32 %v12710_v44, %v7799_v59  ;;  %v7932_v35 = vadd.f32 %v12712_v13, %v7800_v3 }
 0x89b   : > { %v7353_v15 = vpop.f32.mrf.mxu2  ;;  %v7442_v45 = vpop.f32.mrf.mxu3 }
 0x89c   : > { %v7443_v14 = vadd.f32 %v7442_v45, %v7353_v15  ;;  %v8251_v38 = vmax.f32 %v7931_v16, 0.0  ;;  %v8252_v36 = vmax.f32 %v7932_v35, 0.0 }
 0x89e   : > { %v7695_v31 = vpack.c.bf16 %v7621_v30, %v7443_v14  ;;  %v7533_v7 = vpop.f32.mrf.mxu0  ;;  %v7622_v56 = vpop.f32.mrf.mxu1  ;;  %v12824_v52 = vpack.c.bf16 %v8251_v38, %v8247_v47  ;;  %v12826_v48 = vpack.c.bf16 %v8252_v36, %v8248_v23 }
 0x89f   : > { %v7623_v58 = vadd.f32 %v7622_v56, %v7533_v7 }
 0x8a0   : > { %v7803_v8 = vunpack.c.l.bf16 %v7695_v31  ;;  %v7804_v62 = vunpack.c.h.bf16 %v7695_v31 }
 0x8a2   : > { %v7935_v59 = vadd.f32 %v12710_v44, %v7803_v8  ;;  %v7936_v25 = vadd.f32 %v12712_v13, %v7804_v62 }
 0x8a3   : > { %v7355_v63 = vpop.f32.mrf.mxu2  ;;  %v7444_v11 = vpop.f32.mrf.mxu3 }
 0x8a4   : > { %v7445_v21 = vadd.f32 %v7444_v11, %v7355_v63  ;;  %v8255_v47 = vmax.f32 %v7935_v59, 0.0  ;;  %v8256_v23 = vmax.f32 %v7936_v25, 0.0 }
 0x8a6   : > { %v7697_v46 = vpack.c.bf16 %v7623_v58, %v7445_v21  ;;  %v7536_v54 = vpop.f32.mrf.mxu0  ;;  %v7625_v57 = vpop.f32.mrf.mxu1 }
 0x8a7   : > { %v7626_v28 = vadd.f32 %v7625_v57, %v7536_v54 }
 0x8a8   : > { %v7807_v3 = vunpack.c.l.bf16 %v7697_v46  ;;  %v7808_v30 = vunpack.c.h.bf16 %v7697_v46  ;;  %7397 = vmatmul.bf16.gmra.mxu2 %v12432_v43  ;;  %7486 = vmatmul.bf16.gmra.mxu3 %v12434_v9 }
 0x8a9   : > { %7575 = vmatmul.bf16.gmra.mxu0 %v12432_v43  ;;  %7664 = vmatmul.bf16.gmra.mxu1 %v12434_v9 }
 0x8aa   : > { %v7939_v16 = vadd.f32 %v12710_v44, %v7807_v3  ;;  %v7940_v35 = vadd.f32 %v12712_v13, %v7808_v30 }
 0x8ab   : > { %v7358_v15 = vpop.f32.mrf.mxu2  ;;  %v7447_v45 = vpop.f32.mrf.mxu3 }
 0x8ac   : > { %v7448_v14 = vadd.f32 %v7447_v45, %v7358_v15  ;;  %v8259_v38 = vmax.f32 %v7939_v16, 0.0  ;;  %v8260_v36 = vmax.f32 %v7940_v35, 0.0 }
 0x8ae   : > { %v7699_v31 = vpack.c.bf16 %v7626_v28, %v7448_v14  ;;  %v7538_v7 = vpop.f32.mrf.mxu0  ;;  %v7627_v56 = vpop.f32.mrf.mxu1  ;;  %v12836_v58 = vpack.c.bf16 %v8259_v38, %v8255_v47  ;;  %v12838_v8 = vpack.c.bf16 %v8260_v36, %v8256_v23 }
 0x8af   : > { %v7628_v43 = vadd.f32 %v7627_v56, %v7538_v7 }
 0x8b0   : > { %v7811_v9 = vunpack.c.l.bf16 %v7699_v31  ;;  %v7812_v62 = vunpack.c.h.bf16 %v7699_v31 }
 0x8b2   : > { %v7943_v3 = vadd.f32 %v12710_v44, %v7811_v9  ;;  %v7944_v25 = vadd.f32 %v12712_v13, %v7812_v62 }
 0x8b3   : > { %v7360_v63 = vpop.f32.mrf.mxu2  ;;  %v7449_v11 = vpop.f32.mrf.mxu3 }
 0x8b4   : > { %v7450_v21 = vadd.f32 %v7449_v11, %v7360_v63  ;;  %v8263_v47 = vmax.f32 %v7943_v3, 0.0  ;;  %v8264_v23 = vmax.f32 %v7944_v25, 0.0 }
 0x8b6   : > { %v7701_v46 = vpack.c.bf16 %v7628_v43, %v7450_v21  ;;  %v7541_v54 = vpop.f32.mrf.mxu0  ;;  %v7630_v57 = vpop.f32.mrf.mxu1 }
 0x8b7   : > { %v7631_v59 = vadd.f32 %v7630_v57, %v7541_v54 }
 0x8b8   : > { %v7815_v30 = vunpack.c.l.bf16 %v7701_v46  ;;  %v7816_v28 = vunpack.c.h.bf16 %v7701_v46  ;;  %8665 = vmatmul.bf16.vlgmr.msrb.gmra.mxu2 %v12448_v12  ;;  %8754 = vmatmul.bf16.vlgmr.msrb.gmra.mxu3 %v12450_v20 }
 0x8b9   : > { %8843 = vmatmul.bf16.vlgmr.msrb.gmra.mxu0 %v12725_v61  ;;  %8932 = vmatmul.bf16.vlgmr.msrb.gmra.mxu1 %v12727_v6 }
 0x8ba   : > { %v7947_v16 = vadd.f32 %v12710_v44, %v7815_v30  ;;  %v7948_v35 = vadd.f32 %v12712_v13, %v7816_v28 }
 0x8bb   : > { %v7363_v15 = vpop.f32.mrf.mxu2  ;;  %v7452_v45 = vpop.f32.mrf.mxu3 }
 0x8bc   : > { %v7453_v14 = vadd.f32 %v7452_v45, %v7363_v15  ;;  %v8267_v38 = vmax.f32 %v7947_v16, 0.0  ;;  %v8268_v36 = vmax.f32 %v7948_v35, 0.0 }
 0x8be   : > { %v7703_v12 = vpack.c.bf16 %v7631_v59, %v7453_v14  ;;  %v7543_v31 = vpop.f32.mrf.mxu0  ;;  %v7632_v20 = vpop.f32.mrf.mxu1  ;;  %v12848_v7 = vpack.c.bf16 %v8267_v38, %v8263_v47  ;;  %v12850_v56 = vpack.c.bf16 %v8268_v36, %v8264_v23 }
 0x8bf   : > { %v7633_v61 = vadd.f32 %v7632_v20, %v7543_v31 }
 0x8c0   : > { %v7819_v6 = vunpack.c.l.bf16 %v7703_v12  ;;  %v7820_v63 = vunpack.c.h.bf16 %v7703_v12 }
 0x8c2   : > { %v7951_v57 = vadd.f32 %v12710_v44, %v7819_v6  ;;  %v7952_v30 = vadd.f32 %v12712_v13, %v7820_v63 }
 0x8c3   : > { %v7365_v43 = vpop.f32.mrf.mxu2  ;;  %v7454_v9 = vpop.f32.mrf.mxu3 }
 0x8c4   : > { %v7455_v11 = vadd.f32 %v7454_v9, %v7365_v43  ;;  %v8271_v15 = vmax.f32 %v7951_v57, 0.0  ;;  %v8272_v14 = vmax.f32 %v7952_v30, 0.0 }
 0x8c6   : > { %v7705_v62 = vpack.c.bf16 %v7633_v61, %v7455_v11  ;;  %v7546_v21 = vpop.f32.mrf.mxu0  ;;  %v7635_v46 = vpop.f32.mrf.mxu1 }
 0x8c7   : > { %v7636_v54 = vadd.f32 %v7635_v46, %v7546_v21 }
 0x8c8   : > { %v7823_v3 = vunpack.c.l.bf16 %v7705_v62  ;;  %v7824_v59 = vunpack.c.h.bf16 %v7705_v62  ;;  %8670 = vmatmul.bf16.gmra.mxu2 %v12460_v49  ;;  %8759 = vmatmul.bf16.gmra.mxu3 %v12462_v10 }
 0x8c9   : > { %8848 = vmatmul.bf16.gmra.mxu0 %v12743_v39  ;;  %8937 = vmatmul.bf16.gmra.mxu1 %v12745_v17 }
 0x8ca   : > { %v7955_v28 = vadd.f32 %v12710_v44, %v7823_v3  ;;  %v7956_v25 = vadd.f32 %v12712_v13, %v7824_v59 }
 0x8cb   : > { %v7368_v16 = vpop.f32.mrf.mxu2  ;;  %v7457_v35 = vpop.f32.mrf.mxu3 }
 0x8cc   : > { %v7458_v45 = vadd.f32 %v7457_v35, %v7368_v16  ;;  %v8275_v47 = vmax.f32 %v7955_v28, 0.0  ;;  %v8276_v38 = vmax.f32 %v7956_v25, 0.0 }
 0x8ce   : > { %v7707_v49 = vpack.c.bf16 %v7636_v54, %v7458_v45  ;;  %v7548_v23 = vpop.f32.mrf.mxu0  ;;  %v7637_v10 = vpop.f32.mrf.mxu1  ;;  %v12860_v36 = vpack.c.bf16 %v8275_v47, %v8271_v15  ;;  %v12862_v12 = vpack.c.bf16 %v8276_v38, %v8272_v14  ;;  %v13109_v54 = vld [vmem:[#allocation11_spill] sm:$0xff] }
 0x8cf   : > { %v7638_v39 = vadd.f32 %v7637_v10, %v7548_v23 }
 0x8d0   : > { %v7827_v17 = vunpack.c.l.bf16 %v7707_v49  ;;  %v7828_v61 = vunpack.c.h.bf16 %v7707_v49 }
 0x8d2   : > { %v7959_v62 = vadd.f32 %v12710_v44, %v7827_v17  ;;  %v7960_v57 = vadd.f32 %v12712_v13, %v7828_v61 }
 0x8d3   : > { %v7370_v31 = vpop.f32.mrf.mxu2  ;;  %v7459_v20 = vpop.f32.mrf.mxu3 }
 0x8d4   : > { %v7460_v6 = vadd.f32 %v7459_v20, %v7370_v31  ;;  %v8279_v25 = vmax.f32 %v7959_v62, 0.0  ;;  %v8280_v15 = vmax.f32 %v7960_v57, 0.0  ;;  %v13111_v62 = vld [vmem:[#allocation13_spill] sm:$0xff] }
 0x8d6   : > { %v7709_v43 = vpack.c.bf16 %v7638_v39, %v7460_v6  ;;  %v7551_v9 = vpop.f32.mrf.mxu0  ;;  %v7640_v63 = vpop.f32.mrf.mxu1 }
 0x8d7   : > { %v7641_v11 = vadd.f32 %v7640_v63, %v7551_v9 }
 0x8d8   : > { %v7831_v21 = vunpack.c.l.bf16 %v7709_v43  ;;  %v7832_v46 = vunpack.c.h.bf16 %v7709_v43  ;;  %8675 = vmatmul.bf16.gmra.mxu2 %v12472_v1  ;;  %8764 = vmatmul.bf16.gmra.mxu3 %v13109_v54 }
 0x8d9   : > { %8853 = vmatmul.bf16.gmra.mxu0 %v12764_v4  ;;  %8942 = vmatmul.bf16.gmra.mxu1 %v12766_v2 }
 0x8da   : > { %v7963_v3 = vadd.f32 %v12710_v44, %v7831_v21  ;;  %v7964_v59 = vadd.f32 %v12712_v13, %v7832_v46 }
 0x8db   : > { %v7373_v30 = vpop.f32.mrf.mxu2  ;;  %v7462_v28 = vpop.f32.mrf.mxu3 }
 0x8dc   : > { %v7463_v16 = vadd.f32 %v7462_v28, %v7373_v30  ;;  %v8283_v35 = vmax.f32 %v7963_v3, 0.0  ;;  %v8284_v45 = vmax.f32 %v7964_v59, 0.0 }
 0x8de   : > { %v7711_v1 = vpack.c.bf16 %v7641_v11, %v7463_v16  ;;  %v7553_v47 = vpop.f32.mrf.mxu0  ;;  %v7642_v14 = vpop.f32.mrf.mxu1  ;;  %v12872_v38 = vpack.c.bf16 %v8283_v35, %v8279_v25  ;;  %v12874_v49 = vpack.c.bf16 %v8284_v45, %v8280_v15  ;;  %v13110_v11 = vld [vmem:[#allocation12_spill] sm:$0xff] }
 0x8df   : > { %v7643_v4 = vadd.f32 %v7642_v14, %v7553_v47 }
 0x8e0   : > { %v7835_v2 = vunpack.c.l.bf16 %v7711_v1  ;;  %v7836_v39 = vunpack.c.h.bf16 %v7711_v1 }
 0x8e2   : > { %v7967_v43 = vadd.f32 %v12710_v44, %v7835_v2  ;;  %v7968_v21 = vadd.f32 %v12712_v13, %v7836_v39 }
 0x8e3   : > { %v7375_v23 = vpop.f32.mrf.mxu2  ;;  %v7464_v10 = vpop.f32.mrf.mxu3 }
 0x8e4   : > { %v7465_v17 = vadd.f32 %v7464_v10, %v7375_v23  ;;  %v8287_v59 = vmax.f32 %v7967_v43, 0.0  ;;  %v8288_v25 = vmax.f32 %v7968_v21, 0.0  ;;  %v13112_v43 = vld [vmem:[#allocation14_spill] sm:$0xff] }
 0x8e6   : > { %v7713_v31 = vpack.c.bf16 %v7643_v4, %v7465_v17  ;;  %v7556_v20 = vpop.f32.mrf.mxu0  ;;  %v7645_v61 = vpop.f32.mrf.mxu1 }
 0x8e7   : > { %v7646_v6 = vadd.f32 %v7645_v61, %v7556_v20 }
 0x8e8   : > { %v7839_v9 = vunpack.c.l.bf16 %v7713_v31  ;;  %v7840_v63 = vunpack.c.h.bf16 %v7713_v31  ;;  %8680 = vmatmul.bf16.gmra.mxu2 %v13110_v11  ;;  %8769 = vmatmul.bf16.gmra.mxu3 %v13111_v62 }
 0x8e9   : > { %8858 = vmatmul.bf16.gmra.mxu0 %v12783_v26  ;;  %8947 = vmatmul.bf16.gmra.mxu1 %v12785_v55 }
 0x8ea   : > { %v7971_v46 = vadd.f32 %v12710_v44, %v7839_v9  ;;  %v7972_v54 = vadd.f32 %v12712_v13, %v7840_v63  ;;  %v13113_v9 = vld [vmem:[#allocation15_spill] sm:$0xff] }
 0x8eb   : > { %v7378_v57 = vpop.f32.mrf.mxu2  ;;  %v7467_v3 = vpop.f32.mrf.mxu3 }
 0x8ec   : > { %v7468_v30 = vadd.f32 %v7467_v3, %v7378_v57  ;;  %v8291_v28 = vmax.f32 %v7971_v46, 0.0  ;;  %v8292_v16 = vmax.f32 %v7972_v54, 0.0 }
 0x8ee   : > { %v7715_v35 = vpack.c.bf16 %v7646_v6, %v7468_v30  ;;  %v7558_v15 = vpop.f32.mrf.mxu0  ;;  %v7647_v45 = vpop.f32.mrf.mxu1  ;;  %v12884_v1 = vpack.c.bf16 %v8291_v28, %v8287_v59  ;;  %v12886_v47 = vpack.c.bf16 %v8292_v16, %v8288_v25 }
 0x8ef   : > { %v7648_v26 = vadd.f32 %v7647_v45, %v7558_v15 }
 0x8f0   : > { %v7843_v55 = vunpack.c.l.bf16 %v7715_v35  ;;  %v7844_v2 = vunpack.c.h.bf16 %v7715_v35 }
 0x8f2   : > { %v7975_v20 = vadd.f32 %v12710_v44, %v7843_v55  ;;  %v7976_v63 = vadd.f32 %v12712_v13, %v7844_v2 }
 0x8f3   : > { %v7380_v14 = vpop.f32.mrf.mxu2  ;;  %v7469_v4 = vpop.f32.mrf.mxu3 }
 0x8f4   : > { %v7470_v23 = vadd.f32 %v7469_v4, %v7380_v14  ;;  %v8295_v54 = vmax.f32 %v7975_v20, 0.0  ;;  %v8296_v59 = vmax.f32 %v7976_v63, 0.0 }
 0x8f6   : > { %v7717_v10 = vpack.c.bf16 %v7648_v26, %v7470_v23  ;;  %v7561_v39 = vpop.f32.mrf.mxu0  ;;  %v7650_v17 = vpop.f32.mrf.mxu1 }
 0x8f7   : > { %v7651_v31 = vadd.f32 %v7650_v17, %v7561_v39 }
 0x8f8   : > { %v7847_v61 = vunpack.c.l.bf16 %v7717_v10  ;;  %v7848_v6 = vunpack.c.h.bf16 %v7717_v10  ;;  %8685 = vmatmul.bf16.gmra.mxu2 %v13112_v43  ;;  %8774 = vmatmul.bf16.gmra.mxu3 %v13113_v9 }
 0x8f9   : > { %8863 = vmatmul.bf16.gmra.mxu0 %v12804_v37  ;;  %8952 = vmatmul.bf16.gmra.mxu1 %v12806_v19 }
 0x8fa   : > { %v7979_v11 = vadd.f32 %v12710_v44, %v7847_v61  ;;  %v7980_v62 = vadd.f32 %v12712_v13, %v7848_v6 }
 0x8fb   : > { %v7383_v21 = vpop.f32.mrf.mxu2  ;;  %v7472_v46 = vpop.f32.mrf.mxu3 }
 0x8fc   : > { %v7473_v57 = vadd.f32 %v7472_v46, %v7383_v21  ;;  %v8299_v3 = vmax.f32 %v7979_v11, 0.0  ;;  %v8300_v30 = vmax.f32 %v7980_v62, 0.0 }
 0x8fe   : > { %v7719_v28 = vpack.c.bf16 %v7651_v31, %v7473_v57  ;;  %v7563_v25 = vpop.f32.mrf.mxu0  ;;  %v7652_v16 = vpop.f32.mrf.mxu1  ;;  %v12896_v35 = vpack.c.bf16 %v8299_v3, %v8295_v54  ;;  %v12898_v15 = vpack.c.bf16 %v8300_v30, %v8296_v59 }
 0x8ff   : > { %v7653_v37 = vadd.f32 %v7652_v16, %v7563_v25 }
 0x900   : > { %v7851_v19 = vunpack.c.l.bf16 %v7719_v28  ;;  %v7852_v55 = vunpack.c.h.bf16 %v7719_v28 }
 0x902   : > { %v7983_v39 = vadd.f32 %v12710_v44, %v7851_v19  ;;  %v7984_v20 = vadd.f32 %v12712_v13, %v7852_v55 }
 0x903   : > { %v7385_v45 = vpop.f32.mrf.mxu2  ;;  %v7474_v26 = vpop.f32.mrf.mxu3 }
 0x904   : > { %v7475_v14 = vadd.f32 %v7474_v26, %v7385_v45  ;;  %v8303_v63 = vmax.f32 %v7983_v39, 0.0  ;;  %v8304_v21 = vmax.f32 %v7984_v20, 0.0 }
 0x906   : > { %v7721_v4 = vpack.c.bf16 %v7653_v37, %v7475_v14  ;;  %v7566_v2 = vpop.f32.mrf.mxu0  ;;  %v7655_v23 = vpop.f32.mrf.mxu1 }
 0x907   : > { %v7656_v10 = vadd.f32 %v7655_v23, %v7566_v2 }
 0x908   : > { %v7855_v17 = vunpack.c.l.bf16 %v7721_v4  ;;  %v7856_v31 = vunpack.c.h.bf16 %v7721_v4  ;;  %8690 = vmatmul.bf16.gmra.mxu2 %v12511_v50  ;;  %8779 = vmatmul.bf16.gmra.mxu3 %v12513_v53 }
 0x909   : > { %8868 = vmatmul.bf16.gmra.mxu0 %v12824_v52  ;;  %8957 = vmatmul.bf16.gmra.mxu1 %v12826_v48 }
 0x90a   : > { %v7987_v61 = vadd.f32 %v12710_v44, %v7855_v17  ;;  %v7988_v6 = vadd.f32 %v12712_v13, %v7856_v31 }
 0x90b   : > { %v7388_v43 = vpop.f32.mrf.mxu2  ;;  %v7477_v9 = vpop.f32.mrf.mxu3 }
 0x90c   : > { %v7478_v11 = vadd.f32 %v7477_v9, %v7388_v43  ;;  %v8307_v62 = vmax.f32 %v7987_v61, 0.0  ;;  %v8308_v46 = vmax.f32 %v7988_v6, 0.0 }
 0x90e   : > { %v7723_v50 = vpack.c.bf16 %v7656_v10, %v7478_v11  ;;  %v7568_v54 = vpop.f32.mrf.mxu0  ;;  %v7657_v53 = vpop.f32.mrf.mxu1  ;;  %v12908_v57 = vpack.c.bf16 %v8307_v62, %v8303_v63  ;;  %v12910_v3 = vpack.c.bf16 %v8308_v46, %v8304_v21 }
 0x90f   : > { %v7658_v52 = vadd.f32 %v7657_v53, %v7568_v54 }
 0x910   : > { %v7859_v48 = vunpack.c.l.bf16 %v7723_v50  ;;  %v7860_v28 = vunpack.c.h.bf16 %v7723_v50 }
 0x912   : > { %v7991_v26 = vadd.f32 %v12710_v44, %v7859_v48  ;;  %v7992_v4 = vadd.f32 %v12712_v13, %v7860_v28 }
 0x913   : > { %v7390_v59 = vpop.f32.mrf.mxu2  ;;  %v7479_v30 = vpop.f32.mrf.mxu3 }
 0x914   : > { %v7480_v25 = vadd.f32 %v7479_v30, %v7390_v59  ;;  %v8311_v17 = vmax.f32 %v7991_v26, 0.0  ;;  %v8312_v61 = vmax.f32 %v7992_v4, 0.0 }
 0x916   : > { %v7725_v16 = vpack.c.bf16 %v7658_v52, %v7480_v25  ;;  %v7571_v37 = vpop.f32.mrf.mxu0  ;;  %v7660_v19 = vpop.f32.mrf.mxu1 }
 0x917   : > { %v7661_v45 = vadd.f32 %v7660_v19, %v7571_v37 }
 0x918   : > { %v7863_v55 = vunpack.c.l.bf16 %v7725_v16  ;;  %v7864_v14 = vunpack.c.h.bf16 %v7725_v16  ;;  %8695 = vmatmul.bf16.gmra.mxu2 %v12526_v27  ;;  %8784 = vmatmul.bf16.gmra.mxu3 %v12528_v33 }
 0x919   : > { %8873 = vmatmul.bf16.gmra.mxu0 %v12836_v58  ;;  %8962 = vmatmul.bf16.gmra.mxu1 %v12838_v8 }
 0x91a   : > { %v7995_v2 = vadd.f32 %v12710_v44, %v7863_v55  ;;  %v7996_v23 = vadd.f32 %v12712_v13, %v7864_v14 }
 0x91b   : > { %v7393_v10 = vpop.f32.mrf.mxu2  ;;  %v7482_v39 = vpop.f32.mrf.mxu3 }
 0x91c   : > { %v7483_v31 = vadd.f32 %v7482_v39, %v7393_v10  ;;  %v8315_v20 = vmax.f32 %v7995_v2, 0.0  ;;  %v8316_v6 = vmax.f32 %v7996_v23, 0.0 }
 0x91e   : > { %v7727_v27 = vpack.c.bf16 %v7661_v45, %v7483_v31  ;;  %v7573_v43 = vpop.f32.mrf.mxu0  ;;  %v7662_v33 = vpop.f32.mrf.mxu1  ;;  %v12920_v9 = vpack.c.bf16 %v8315_v20, %v8311_v17  ;;  %v12922_v63 = vpack.c.bf16 %v8316_v6, %v8312_v61 }
 0x91f   : > { %v7663_v58 = vadd.f32 %v7662_v33, %v7573_v43 }
 0x920   : > { %v7867_v8 = vunpack.c.l.bf16 %v7727_v27  ;;  %v7868_v21 = vunpack.c.h.bf16 %v7727_v27 }
 0x922   : > { %v7999_v48 = vadd.f32 %v12710_v44, %v7867_v8  ;;  %v8000_v28 = vadd.f32 %v12712_v13, %v7868_v21  ;;  %v12942_v8 = vld [vmem:[%s13092_s8] ss:$0 sm:$0xff] }
 0x923   : > { %v7395_v11 = vpop.f32.mrf.mxu2  ;;  %v7484_v62 = vpop.f32.mrf.mxu3 }
 0x924   : > { %v7485_v46 = vadd.f32 %v7484_v62, %v7395_v11  ;;  %v8319_v45 = vmax.f32 %v7999_v48, 0.0  ;;  %v8320_v14 = vmax.f32 %v8000_v28, 0.0 }
 0x926   : > { %v7729_v50 = vpack.c.bf16 %v7663_v58, %v7485_v46  ;;  %v7576_v54 = vpop.f32.mrf.mxu0  ;;  %v7665_v53 = vpop.f32.mrf.mxu1 }
 0x927   : > { %v7666_v52 = vadd.f32 %v7665_v53, %v7576_v54 }
 0x928   : > { %v7871_v59 = vunpack.c.l.bf16 %v7729_v50  ;;  %v7872_v30 = vunpack.c.h.bf16 %v7729_v50  ;;  %8700 = vmatmul.bf16.gmra.mxu2 %v12544_v41  ;;  %8789 = vmatmul.bf16.gmra.mxu3 %v12546_v60 }
 0x929   : > { %8878 = vmatmul.bf16.gmra.mxu0 %v12848_v7  ;;  %8967 = vmatmul.bf16.gmra.mxu1 %v12850_v56 }
 0x92a   : > { %v8003_v25 = vadd.f32 %v12710_v44, %v7871_v59  ;;  %v8004_v16 = vadd.f32 %v12712_v13, %v7872_v30 }
 0x92b   : > { %v7398_v37 = vpop.f32.mrf.mxu2  ;;  %v7487_v19 = vpop.f32.mrf.mxu3 }
 0x92c   : > { %v7488_v26 = vadd.f32 %v7487_v19, %v7398_v37  ;;  %v8323_v55 = vmax.f32 %v8003_v25, 0.0  ;;  %v8324_v4 = vmax.f32 %v8004_v16, 0.0 }
 0x92e   : > { %v7731_v41 = vpack.c.bf16 %v7666_v52, %v7488_v26  ;;  %v7578_v2 = vpop.f32.mrf.mxu0  ;;  %v7667_v60 = vpop.f32.mrf.mxu1  ;;  %v12932_v23 = vpack.c.bf16 %v8323_v55, %v8319_v45  ;;  %v12934_v10 = vpack.c.bf16 %v8324_v4, %v8320_v14 }
 0x92f   : > { %v7668_v7 = vadd.f32 %v7667_v60, %v7578_v2 }
 0x930   : > { %v7875_v56 = vunpack.c.l.bf16 %v7731_v41  ;;  %v7876_v31 = vunpack.c.h.bf16 %v7731_v41 }
 0x932   : > { %v8007_v43 = vadd.f32 %v12710_v44, %v7875_v56  ;;  %v8008_v11 = vadd.f32 %v12712_v13, %v7876_v31 }
 0x933   : > { %v7400_v39 = vpop.f32.mrf.mxu2  ;;  %v7489_v17 = vpop.f32.mrf.mxu3 }
 0x934   : > { %v7490_v20 = vadd.f32 %v7489_v17, %v7400_v39  ;;  %v8327_v46 = vmax.f32 %v8007_v43, 0.0  ;;  %v8328_v53 = vmax.f32 %v8008_v11, 0.0 }
 0x936   : > { %v7733_v61 = vpack.c.bf16 %v7668_v7, %v7490_v20  ;;  %v8844_v6 = vpop.f32.mrf.mxu0  ;;  %v8933_v27 = vpop.f32.mrf.mxu1 }
 0x938   : > { %v7879_v33 = vunpack.c.l.bf16 %v7733_v61  ;;  %v7880_v58 = vunpack.c.h.bf16 %v7733_v61  ;;  %8705 = vmatmul.bf16.gmra.mxu2 %v12565_v18  ;;  %8794 = vmatmul.bf16.gmra.mxu3 %v12567_v5 }
 0x939   : > { %8883 = vmatmul.bf16.gmra.mxu0 %v12860_v36  ;;  %8972 = vmatmul.bf16.gmra.mxu1 %v12862_v12 }
 0x93a   : > { %v8011_v62 = vadd.f32 %v12710_v44, %v7879_v33  ;;  %v8012_v21 = vadd.f32 %v12712_v13, %v7880_v58 }
 0x93b   : > { %v8666_v18 = vpop.f32.mrf.mxu2  ;;  %v8755_v5 = vpop.f32.mrf.mxu3 }
 0x93c   : > { %v8331_v50 = vmax.f32 %v8011_v62, 0.0  ;;  %v8667_v54 = vadd.f32 %v12942_v8, %v8666_v18  ;;  %v8332_v52 = vmax.f32 %v8012_v21, 0.0 }
 0x93e   : > { %v12951_v48 = vpack.c.bf16 %v8331_v50, %v8327_v46  ;;  %v8756_v36 = vadd.f32 %v8755_v5, %v8667_v54  ;;  %v8846_v59 = vpop.f32.mrf.mxu0  ;;  %v8935_v12 = vpop.f32.mrf.mxu1  ;;  %v12955_v30 = vpack.c.bf16 %v8332_v52, %v8328_v53  ;;  %v13114_v50 = vld [vmem:[#allocation16_spill] sm:$0xff]  ;;  %v13115_v54 = vld [vmem:[#allocation17_spill] sm:$0xff] }
 0x940   : > { %v8845_v44 = vadd.f32 %v8844_v6, %v8756_v36 }
 0x942   : > { %v8934_v13 = vadd.f32 %v8933_v27, %v8845_v44 }
 0x943   : > { %v8668_v28 = vpop.f32.mrf.mxu2  ;;  %v8757_v25 = vpop.f32.mrf.mxu3 }
 0x944   : > { %9013 = vst [vmem:[%s12957_s24] sm:$0xff] %v8934_v13  ;;  %v8669_v16 = vadd.f32 %v12942_v8, %v8668_v28 }
 0x946   : > { %v8758_v37 = vadd.f32 %v8757_v25, %v8669_v16  ;;  %v8849_v19 = vpop.f32.mrf.mxu0  ;;  %v8938_v45 = vpop.f32.mrf.mxu1 }
 0x948   : > { %v8847_v26 = vadd.f32 %v8846_v59, %v8758_v37  ;;  %8710 = vmatmul.bf16.gmra.mxu2 %v12583_v40  ;;  %8799 = vmatmul.bf16.gmra.mxu3 %v12585_v24 }
 0x949   : > { %8888 = vmatmul.bf16.gmra.mxu0 %v12872_v38  ;;  %8977 = vmatmul.bf16.gmra.mxu1 %v12874_v49 }
 0x94a   : > { %v8936_v55 = vadd.f32 %v8935_v12, %v8847_v26 }
 0x94b   : > { %v8671_v14 = vpop.f32.mrf.mxu2  ;;  %v8760_v4 = vpop.f32.mrf.mxu3 }
 0x94c   : > { %9014 = vst [vmem:[%s12957_s24 + $0x8] sm:$0xff] %v8936_v55  ;;  %v8672_v41 = vadd.f32 %v12942_v8, %v8671_v14  ;;  %v13116_v55 = vld [vmem:[#allocation18_spill] sm:$0xff]  ;;  %v13117_v14 = vld [vmem:[#allocation19_spill] sm:$0xff] }
 0x94e   : > { %v8761_v2 = vadd.f32 %v8760_v4, %v8672_v41  ;;  %v8851_v60 = vpop.f32.mrf.mxu0  ;;  %v8940_v7 = vpop.f32.mrf.mxu1 }
 0x950   : > { %v8850_v56 = vadd.f32 %v8849_v19, %v8761_v2 }
 0x952   : > { %v8939_v39 = vadd.f32 %v8938_v45, %v8850_v56 }
 0x953   : > { %v8673_v40 = vpop.f32.mrf.mxu2  ;;  %v8762_v17 = vpop.f32.mrf.mxu3 }
 0x954   : > { %9015 = vst [vmem:[%s12957_s24 + $0x10] sm:$0xff] %v8939_v39  ;;  %v8674_v24 = vadd.f32 %v12942_v8, %v8673_v40 }
 0x956   : > { %v8763_v38 = vadd.f32 %v8762_v17, %v8674_v24  ;;  %v8854_v31 = vpop.f32.mrf.mxu0  ;;  %v8943_v49 = vpop.f32.mrf.mxu1 }
 0x958   : > { %v8852_v20 = vadd.f32 %v8851_v60, %v8763_v38  ;;  %8715 = vmatmul.bf16.gmra.mxu2 %v12604_v22  ;;  %8804 = vmatmul.bf16.gmra.mxu3 %v12606_v29 }
 0x959   : > { %8893 = vmatmul.bf16.gmra.mxu0 %v12884_v1  ;;  %8982 = vmatmul.bf16.gmra.mxu1 %v12886_v47 }
 0x95a   : > { %v8941_v61 = vadd.f32 %v8940_v7, %v8852_v20 }
 0x95b   : > { %v8676_v6 = vpop.f32.mrf.mxu2  ;;  %v8765_v27 = vpop.f32.mrf.mxu3 }
 0x95c   : > { %9016 = vst [vmem:[%s12957_s24 + $0x18] sm:$0xff] %v8941_v61  ;;  %v8677_v43 = vadd.f32 %v12942_v8, %v8676_v6 }
 0x95e   : > { %v8766_v33 = vadd.f32 %v8765_v27, %v8677_v43  ;;  %v8856_v58 = vpop.f32.mrf.mxu0  ;;  %v8945_v11 = vpop.f32.mrf.mxu1 }
 0x960   : > { %v8855_v62 = vadd.f32 %v8854_v31, %v8766_v33 }
 0x962   : > { %v8944_v21 = vadd.f32 %v8943_v49, %v8855_v62 }
 0x963   : > { %v8678_v22 = vpop.f32.mrf.mxu2  ;;  %v8767_v46 = vpop.f32.mrf.mxu3 }
 0x964   : > { %9017 = vst [vmem:[%s12957_s24 + $0x20] sm:$0xff] %v8944_v21  ;;  %v8679_v29 = vadd.f32 %v12942_v8, %v8678_v22 }
 0x966   : > { %v8768_v1 = vadd.f32 %v8767_v46, %v8679_v29  ;;  %v8859_v18 = vpop.f32.mrf.mxu0  ;;  %v8948_v47 = vpop.f32.mrf.mxu1 }
 0x968   : > { %v8857_v5 = vadd.f32 %v8856_v58, %v8768_v1  ;;  %8720 = vmatmul.bf16.gmra.mxu2 %v13114_v50  ;;  %8809 = vmatmul.bf16.gmra.mxu3 %v13115_v54  ;;  %v13118_v1 = vld [vmem:[#allocation20_spill] sm:$0xff] }
 0x969   : > { %8898 = vmatmul.bf16.gmra.mxu0 %v12896_v35  ;;  %8987 = vmatmul.bf16.gmra.mxu1 %v12898_v15 }
 0x96a   : > { %v8946_v53 = vadd.f32 %v8945_v11, %v8857_v5 }
 0x96b   : > { %v8681_v52 = vpop.f32.mrf.mxu2  ;;  %v8770_v36 = vpop.f32.mrf.mxu3 }
 0x96c   : > { %9018 = vst [vmem:[%s12957_s24 + $0x28] sm:$0xff] %v8946_v53  ;;  %v8682_v59 = vadd.f32 %v12942_v8, %v8681_v52 }
 0x96e   : > { %v8771_v12 = vadd.f32 %v8770_v36, %v8682_v59  ;;  %v8861_v44 = vpop.f32.mrf.mxu0  ;;  %v8950_v13 = vpop.f32.mrf.mxu1 }
 0x970   : > { %v8860_v28 = vadd.f32 %v8859_v18, %v8771_v12 }
 0x972   : > { %v8949_v25 = vadd.f32 %v8948_v47, %v8860_v28 }
 0x973   : > { %v8683_v16 = vpop.f32.mrf.mxu2  ;;  %v8772_v37 = vpop.f32.mrf.mxu3 }
 0x974   : > { %9019 = vst [vmem:[%s12957_s24 + $0x30] sm:$0xff] %v8949_v25  ;;  %v8684_v19 = vadd.f32 %v12942_v8, %v8683_v16 }
 0x976   : > { %v8773_v35 = vadd.f32 %v8772_v37, %v8684_v19  ;;  %v8864_v45 = vpop.f32.mrf.mxu0  ;;  %v8953_v15 = vpop.f32.mrf.mxu1 }
 0x978   : > { %v8862_v26 = vadd.f32 %v8861_v44, %v8773_v35  ;;  %8725 = vmatmul.bf16.gmra.mxu2 %v13116_v55  ;;  %8814 = vmatmul.bf16.gmra.mxu3 %v13117_v14 }
 0x979   : > { %8903 = vmatmul.bf16.gmra.mxu0 %v12908_v57  ;;  %8992 = vmatmul.bf16.gmra.mxu1 %v12910_v3 }
 0x97a   : > { %v8951_v4 = vadd.f32 %v8950_v13, %v8862_v26 }
 0x97b   : > { %v8686_v41 = vpop.f32.mrf.mxu2  ;;  %v8775_v2 = vpop.f32.mrf.mxu3 }
 0x97c   : > { %9020 = vst [vmem:[%s12957_s24 + $0x38] sm:$0xff] %v8951_v4  ;;  %v8687_v60 = vadd.f32 %v12942_v8, %v8686_v41 }
 0x97e   : > { %v8776_v7 = vadd.f32 %v8775_v2, %v8687_v60  ;;  %v8866_v56 = vpop.f32.mrf.mxu0  ;;  %v8955_v39 = vpop.f32.mrf.mxu1 }
 0x980   : > { %v8865_v40 = vadd.f32 %v8864_v45, %v8776_v7 }
 0x982   : > { %v8954_v17 = vadd.f32 %v8953_v15, %v8865_v40 }
 0x983   : > { %v8688_v24 = vpop.f32.mrf.mxu2  ;;  %v8777_v38 = vpop.f32.mrf.mxu3 }
 0x984   : > { %9021 = vst [vmem:[%s12957_s24 + $0x40] sm:$0xff] %v8954_v17  ;;  %v8689_v31 = vadd.f32 %v12942_v8, %v8688_v24 }
 0x986   : > { %v8778_v57 = vadd.f32 %v8777_v38, %v8689_v31  ;;  %v8869_v49 = vpop.f32.mrf.mxu0  ;;  %v8958_v3 = vpop.f32.mrf.mxu1 }
 0x988   : > { %v8867_v20 = vadd.f32 %v8866_v56, %v8778_v57  ;;  %8730 = vmatmul.bf16.gmra.mxu2 %v12661_v34  ;;  %8819 = vmatmul.bf16.gmra.mxu3 %v12663_v42 }
 0x989   : > { %8908 = vmatmul.bf16.gmra.mxu0 %v12920_v9  ;;  %8997 = vmatmul.bf16.gmra.mxu1 %v12922_v63 }
 0x98a   : > { %v8956_v61 = vadd.f32 %v8955_v39, %v8867_v20 }
 0x98b   : > { %v8691_v6 = vpop.f32.mrf.mxu2  ;;  %v8780_v27 = vpop.f32.mrf.mxu3 }
 0x98c   : > { %9022 = vst [vmem:[%s12957_s24 + $0x48] sm:$0xff] %v8956_v61  ;;  %v8692_v43 = vadd.f32 %v12942_v8, %v8691_v6 }
 0x98e   : > { %v8781_v33 = vadd.f32 %v8780_v27, %v8692_v43  ;;  %v8871_v58 = vpop.f32.mrf.mxu0  ;;  %v8960_v11 = vpop.f32.mrf.mxu1 }
 0x990   : > { %v8870_v62 = vadd.f32 %v8869_v49, %v8781_v33 }
 0x992   : > { %v8959_v21 = vadd.f32 %v8958_v3, %v8870_v62 }
 0x993   : > { %v8693_v34 = vpop.f32.mrf.mxu2  ;;  %v8782_v22 = vpop.f32.mrf.mxu3 }
 0x994   : > { %9023 = vst [vmem:[%s12957_s24 + $0x50] sm:$0xff] %v8959_v21  ;;  %v8694_v42 = vadd.f32 %v12942_v8, %v8693_v34 }
 0x996   : > { %v8783_v9 = vadd.f32 %v8782_v22, %v8694_v42  ;;  %v8874_v46 = vpop.f32.mrf.mxu0  ;;  %v8963_v63 = vpop.f32.mrf.mxu1 }
 0x998   : > { %v8872_v29 = vadd.f32 %v8871_v58, %v8783_v9  ;;  %8735 = vmatmul.bf16.gmra.mxu2 %v12682_v51  ;;  %8824 = vmatmul.bf16.gmra.mxu3 %v13118_v1 }
 0x999   : > { %8913 = vmatmul.bf16.gmra.mxu0 %v12932_v23  ;;  %9002 = vmatmul.bf16.gmra.mxu1 %v12934_v10 }
 0x99a   : > { %v8961_v18 = vadd.f32 %v8960_v11, %v8872_v29 }
 0x99b   : > { %v8696_v47 = vpop.f32.mrf.mxu2  ;;  %v8785_v5 = vpop.f32.mrf.mxu3 }
 0x99c   : > { %9024 = vst [vmem:[%s12957_s24 + $0x58] sm:$0xff] %v8961_v18  ;;  %v8697_v50 = vadd.f32 %v12942_v8, %v8696_v47 }
 0x99e   : > { %v8786_v54 = vadd.f32 %v8785_v5, %v8697_v50  ;;  %v8876_v53 = vpop.f32.mrf.mxu0  ;;  %v8965_v52 = vpop.f32.mrf.mxu1 }
 0x9a0   : > { %v8875_v36 = vadd.f32 %v8874_v46, %v8786_v54 }
 0x9a2   : > { %v8964_v59 = vadd.f32 %v8963_v63, %v8875_v36 }
 0x9a3   : > { %v8698_v51 = vpop.f32.mrf.mxu2  ;;  %v8787_v12 = vpop.f32.mrf.mxu3 }
 0x9a4   : > { %9025 = vst [vmem:[%s12957_s24 + $0x60] sm:$0xff] %v8964_v59  ;;  %v8699_v44 = vadd.f32 %v12942_v8, %v8698_v51 }
 0x9a6   : > { %v8788_v23 = vadd.f32 %v8787_v12, %v8699_v44  ;;  %v8879_v13 = vpop.f32.mrf.mxu0  ;;  %v8968_v10 = vpop.f32.mrf.mxu1 }
 0x9a8   : > { %v8877_v28 = vadd.f32 %v8876_v53, %v8788_v23  ;;  %8740 = vmatmul.bf16.gmra.mxu2 %v12700_v32  ;;  %8829 = vmatmul.bf16.gmra.mxu3 %v12702_v0 }
 0x9a9   : > { %9007 = vmatmul.bf16.gmra.mxu1 %v12955_v30 }
 0x9aa   : > { %v8966_v25 = vadd.f32 %v8965_v52, %v8877_v28 }
 0x9ab   : > { %v8701_v16 = vpop.f32.mrf.mxu2  ;;  %v8790_v37 = vpop.f32.mrf.mxu3 }
 0x9ac   : > { %9026 = vst [vmem:[%s12957_s24 + $0x68] sm:$0xff] %v8966_v25  ;;  %v8702_v19 = vadd.f32 %v12942_v8, %v8701_v16 }
 0x9ae   : > { %v8791_v35 = vadd.f32 %v8790_v37, %v8702_v19  ;;  %v8881_v45 = vpop.f32.mrf.mxu0  ;;  %v8970_v15 = vpop.f32.mrf.mxu1 }
 0x9b0   : > { %v8880_v26 = vadd.f32 %v8879_v13, %v8791_v35 }
 0x9b2   : > { %v8969_v55 = vadd.f32 %v8968_v10, %v8880_v26 }
 0x9b3   : > { %v8703_v14 = vpop.f32.mrf.mxu2  ;;  %v8792_v4 = vpop.f32.mrf.mxu3 }
 0x9b4   : > { %9027 = vst [vmem:[%s12957_s24 + $0x70] sm:$0xff] %v8969_v55  ;;  %v8704_v32 = vadd.f32 %v12942_v8, %v8703_v14 }
 0x9b6   : > { %v8793_v0 = vadd.f32 %v8792_v4, %v8704_v32  ;;  %v8884_v41 = vpop.f32.mrf.mxu0  ;;  %v8973_v30 = vpop.f32.mrf.mxu1 }
 0x9b8   : > { %v8882_v2 = vadd.f32 %v8881_v45, %v8793_v0  ;;  %8918 = vmatmul.bf16.vlgmr.msra.gmra.mxu2 %v12951_v48 }
 0x9ba   : > { %v8971_v60 = vadd.f32 %v8970_v15, %v8882_v2 }
 0x9bb   : > { %v8706_v7 = vpop.f32.mrf.mxu2  ;;  %v8795_v56 = vpop.f32.mrf.mxu3 }
 0x9bc   : > { %9028 = vst [vmem:[%s12957_s24 + $0x78] sm:$0xff] %v8971_v60  ;;  %v8707_v39 = vadd.f32 %v12942_v8, %v8706_v7 }
 0x9be   : > { %v8796_v40 = vadd.f32 %v8795_v56, %v8707_v39  ;;  %v8886_v17 = vpop.f32.mrf.mxu0  ;;  %v8975_v24 = vpop.f32.mrf.mxu1 }
 0x9c0   : > { %v8885_v38 = vadd.f32 %v8884_v41, %v8796_v40 }
 0x9c2   : > { %v8974_v31 = vadd.f32 %v8973_v30, %v8885_v38 }
 0x9c3   : > { %v8708_v57 = vpop.f32.mrf.mxu2  ;;  %v8797_v49 = vpop.f32.mrf.mxu3 }
 0x9c4   : > { %9029 = vst [vmem:[%s12957_s24 + $0x80] sm:$0xff] %v8974_v31  ;;  %v8709_v3 = vadd.f32 %v12942_v8, %v8708_v57 }
 0x9c6   : > { %v8798_v20 = vadd.f32 %v8797_v49, %v8709_v3  ;;  %v8889_v48 = vpop.f32.mrf.mxu0  ;;  %v8978_v61 = vpop.f32.mrf.mxu1 }
 0x9c8   : > { %v8887_v6 = vadd.f32 %v8886_v17, %v8798_v20 }
 0x9ca   : > { %v8976_v27 = vadd.f32 %v8975_v24, %v8887_v6 }
 0x9cb   : > { %v8711_v43 = vpop.f32.mrf.mxu2  ;;  %v8800_v33 = vpop.f32.mrf.mxu3 }
 0x9cc   : > { %9030 = vst [vmem:[%s12957_s24 + $0x88] sm:$0xff] %v8976_v27  ;;  %v8712_v58 = vadd.f32 %v12942_v8, %v8711_v43 }
 0x9ce   : > { %v8801_v11 = vadd.f32 %v8800_v33, %v8712_v58  ;;  %v8891_v62 = vpop.f32.mrf.mxu0  ;;  %v8980_v21 = vpop.f32.mrf.mxu1 }
 0x9d0   : > { %v8890_v34 = vadd.f32 %v8889_v48, %v8801_v11 }
 0x9d2   : > { %v8979_v22 = vadd.f32 %v8978_v61, %v8890_v34 }
 0x9d3   : > { %v8713_v42 = vpop.f32.mrf.mxu2  ;;  %v8802_v9 = vpop.f32.mrf.mxu3 }
 0x9d4   : > { %9031 = vst [vmem:[%s12957_s24 + $0x90] sm:$0xff] %v8979_v22  ;;  %v8714_v46 = vadd.f32 %v12942_v8, %v8713_v42 }
 0x9d6   : > { %v8803_v63 = vadd.f32 %v8802_v9, %v8714_v46  ;;  %v8894_v29 = vpop.f32.mrf.mxu0  ;;  %v8983_v1 = vpop.f32.mrf.mxu1 }
 0x9d8   : > { %v8892_v18 = vadd.f32 %v8891_v62, %v8803_v63 }
 0x9da   : > { %v8981_v47 = vadd.f32 %v8980_v21, %v8892_v18 }
 0x9db   : > { %v8716_v5 = vpop.f32.mrf.mxu2  ;;  %v8805_v50 = vpop.f32.mrf.mxu3 }
 0x9dc   : > { %9032 = vst [vmem:[%s12957_s24 + $0x98] sm:$0xff] %v8981_v47  ;;  %v8717_v54 = vadd.f32 %v12942_v8, %v8716_v5 }
 0x9de   : > { %v8806_v53 = vadd.f32 %v8805_v50, %v8717_v54  ;;  %v8896_v52 = vpop.f32.mrf.mxu0  ;;  %v8985_v36 = vpop.f32.mrf.mxu1 }
 0x9e0   : > { %v8895_v59 = vadd.f32 %v8894_v29, %v8806_v53 }
 0x9e2   : > { %v8984_v51 = vadd.f32 %v8983_v1, %v8895_v59 }
 0x9e3   : > { %v8718_v12 = vpop.f32.mrf.mxu2  ;;  %v8807_v44 = vpop.f32.mrf.mxu3 }
 0x9e4   : > { %9033 = vst [vmem:[%s12957_s24 + $0xa0] sm:$0xff] %v8984_v51  ;;  %v8719_v23 = vadd.f32 %v12942_v8, %v8718_v12 }
 0x9e6   : > { %v8808_v13 = vadd.f32 %v8807_v44, %v8719_v23  ;;  %v8899_v10 = vpop.f32.mrf.mxu0  ;;  %v8988_v28 = vpop.f32.mrf.mxu1 }
 0x9e8   : > { %v8897_v25 = vadd.f32 %v8896_v52, %v8808_v13 }
 0x9ea   : > { %v8986_v16 = vadd.f32 %v8985_v36, %v8897_v25 }
 0x9eb   : > { %v8721_v37 = vpop.f32.mrf.mxu2  ;;  %v8810_v19 = vpop.f32.mrf.mxu3 }
 0x9ec   : > { %9034 = vst [vmem:[%s12957_s24 + $0xa8] sm:$0xff] %v8986_v16  ;;  %v8722_v35 = vadd.f32 %v12942_v8, %v8721_v37 }
 0x9ee   : > { %v8811_v45 = vadd.f32 %v8810_v19, %v8722_v35  ;;  %v8901_v15 = vpop.f32.mrf.mxu0  ;;  %v8990_v26 = vpop.f32.mrf.mxu1 }
 0x9f0   : > { %v8900_v55 = vadd.f32 %v8899_v10, %v8811_v45 }
 0x9f2   : > { %v8989_v14 = vadd.f32 %v8988_v28, %v8900_v55 }
 0x9f3   : > { %v8723_v4 = vpop.f32.mrf.mxu2  ;;  %v8812_v32 = vpop.f32.mrf.mxu3 }
 0x9f4   : > { %9035 = vst [vmem:[%s12957_s24 + $0xb0] sm:$0xff] %v8989_v14  ;;  %v8724_v0 = vadd.f32 %v12942_v8, %v8723_v4 }
 0x9f6   : > { %v8813_v41 = vadd.f32 %v8812_v32, %v8724_v0  ;;  %v8904_v30 = vpop.f32.mrf.mxu0  ;;  %v8993_v2 = vpop.f32.mrf.mxu1 }
 0x9f8   : > { %v8902_v60 = vadd.f32 %v8901_v15, %v8813_v41 }
 0x9fa   : > { %v8991_v7 = vadd.f32 %v8990_v26, %v8902_v60 }
 0x9fb   : > { %v8726_v56 = vpop.f32.mrf.mxu2  ;;  %v8815_v39 = vpop.f32.mrf.mxu3 }
 0x9fc   : > { %9036 = vst [vmem:[%s12957_s24 + $0xb8] sm:$0xff] %v8991_v7  ;;  %v8727_v40 = vadd.f32 %v12942_v8, %v8726_v56 }
 0x9fe   : > { %v8816_v17 = vadd.f32 %v8815_v39, %v8727_v40  ;;  %v8906_v24 = vpop.f32.mrf.mxu0  ;;  %v8995_v31 = vpop.f32.mrf.mxu1 }
 0xa00   : > { %v8905_v38 = vadd.f32 %v8904_v30, %v8816_v17 }
 0xa02   : > { %v8994_v57 = vadd.f32 %v8993_v2, %v8905_v38 }
 0xa03   : > { %v8728_v49 = vpop.f32.mrf.mxu2  ;;  %v8817_v3 = vpop.f32.mrf.mxu3 }
 0xa04   : > { %9037 = vst [vmem:[%s12957_s24 + $0xc0] sm:$0xff] %v8994_v57  ;;  %v8729_v20 = vadd.f32 %v12942_v8, %v8728_v49 }
 0xa06   : > { %v8818_v48 = vadd.f32 %v8817_v3, %v8729_v20  ;;  %v8909_v6 = vpop.f32.mrf.mxu0  ;;  %v8998_v43 = vpop.f32.mrf.mxu1 }
 0xa08   : > { %v8907_v61 = vadd.f32 %v8906_v24, %v8818_v48 }
 0xa0a   : > { %v8996_v27 = vadd.f32 %v8995_v31, %v8907_v61 }
 0xa0b   : > { %v8731_v33 = vpop.f32.mrf.mxu2  ;;  %v8820_v58 = vpop.f32.mrf.mxu3 }
 0xa0c   : > { %9038 = vst [vmem:[%s12957_s24 + $0xc8] sm:$0xff] %v8996_v27  ;;  %v8732_v11 = vadd.f32 %v12942_v8, %v8731_v33 }
 0xa0e   : > { %v8821_v62 = vadd.f32 %v8820_v58, %v8732_v11  ;;  %v8911_v22 = vpop.f32.mrf.mxu0  ;;  %v9000_v63 = vpop.f32.mrf.mxu1 }
 0xa10   : > { %v8910_v21 = vadd.f32 %v8909_v6, %v8821_v62 }
 0xa12   : > { %v8999_v34 = vadd.f32 %v8998_v43, %v8910_v21 }
 0xa13   : > { %v8733_v42 = vpop.f32.mrf.mxu2  ;;  %v8822_v9 = vpop.f32.mrf.mxu3 }
 0xa14   : > { %9039 = vst [vmem:[%s12957_s24 + $0xd0] sm:$0xff] %v8999_v34  ;;  %v8734_v46 = vadd.f32 %v12942_v8, %v8733_v42 }
 0xa16   : > { %v8823_v29 = vadd.f32 %v8822_v9, %v8734_v46  ;;  %v8914_v54 = vpop.f32.mrf.mxu0  ;;  %v9003_v52 = vpop.f32.mrf.mxu1 }
 0xa18   : > { %v8912_v1 = vadd.f32 %v8911_v22, %v8823_v29 }
 0xa1a   : > { %v9001_v18 = vadd.f32 %v9000_v63, %v8912_v1 }
 0xa1b   : > { %v8736_v47 = vpop.f32.mrf.mxu2  ;;  %v8825_v5 = vpop.f32.mrf.mxu3 }
 0xa1c   : > { %9040 = vst [vmem:[%s12957_s24 + $0xd8] sm:$0xff] %v9001_v18  ;;  %v8737_v50 = vadd.f32 %v12942_v8, %v8736_v47 }
 0xa1e   : > { %v8826_v53 = vadd.f32 %v8825_v5, %v8737_v50  ;;  %v8916_v13 = vpop.f32.mrf.mxu0  ;;  %v9005_v28 = vpop.f32.mrf.mxu1 }
 0xa20   : > { %v8915_v36 = vadd.f32 %v8914_v54, %v8826_v53 }
 0xa22   : > { %v9004_v59 = vadd.f32 %v9003_v52, %v8915_v36 }
 0xa23   : > { %v8738_v51 = vpop.f32.mrf.mxu2  ;;  %v8827_v44 = vpop.f32.mrf.mxu3 }
 0xa24   : > { %9041 = vst [vmem:[%s12957_s24 + $0xe0] sm:$0xff] %v9004_v59  ;;  %v8739_v12 = vadd.f32 %v12942_v8, %v8738_v51 }
 0xa26   : > { %v8828_v23 = vadd.f32 %v8827_v44, %v8739_v12  ;;  %v9008_v15 = vpop.f32.mrf.mxu1 }
 0xa28   : > { %v8917_v10 = vadd.f32 %v8916_v13, %v8828_v23 }
 0xa2a   : > { %v9006_v25 = vadd.f32 %v9005_v28, %v8917_v10 }
 0xa2b   : > { %v8741_v16 = vpop.f32.mrf.mxu2  ;;  %v8830_v35 = vpop.f32.mrf.mxu3 }
 0xa2c   : > { %9042 = vst [vmem:[%s12957_s24 + $0xe8] sm:$0xff] %v9006_v25  ;;  %v8742_v19 = vadd.f32 %v12942_v8, %v8741_v16 }
 0xa2e   : > { %v8831_v45 = vadd.f32 %v8830_v35, %v8742_v19  ;;  %v9010_v2 = vpop.f32.mrf.mxu1 }
 0xa33   : > { %v8743_v37 = vpop.f32.mrf.mxu2  ;;  %v8832_v32 = vpop.f32.mrf.mxu3 }
 0xa34   : > { %v8744_v14 = vadd.f32 %v12942_v8, %v8743_v37 }
 0xa36   : > { %v8833_v0 = vadd.f32 %v8832_v32, %v8744_v14 }
 0xa3b   : > { %v8919_v26 = vpop.f32.mrf.mxu2 }
 0xa3c   : > { %v8920_v55 = vadd.f32 %v8919_v26, %v8831_v45 }
 0xa3e   : > { %v9009_v4 = vadd.f32 %v9008_v15, %v8920_v55 }
 0xa40   : > { %9043 = vst [vmem:[%s12957_s24 + $0xf0] sm:$0xff] %v9009_v4 }
 0xa43   : > { %v8921_v41 = vpop.f32.mrf.mxu2 }
 0xa44   : > { %v8922_v30 = vadd.f32 %v8921_v41, %v8833_v0 }
 0xa46   : > { %v9011_v60 = vadd.f32 %v9010_v2, %v8922_v30 }
 0xa48   : > { %9044 = vst [vmem:[%s12957_s24 + $0xf8] sm:$0xff] %v9011_v60 }
 0xa49   : > { %10883 = shalt.err (!%p10880_p8)
}
 0xa4a   : > { %s10934_s22 = smov 128   ;;  %s10935_s24 = smov 8  }
 0xa4b   : > { %10737 = dma.vmem_to_hbm [thread:$0]  (%p11024_p5), %s9059_s27, 4096, %s9061_s28, %s9046_s13, %s10934_s22, %s10934_s22, %s10935_s24  }
 0xa4c PF: > { %p10754_p9 = scmp.ge.s32.totalorder %s10926_s12, 2  ;;  %s9075_s21 = sand.u32 1, %s10914_s30  }
 0xa4d   : > { %s9076_s26 = scalar_lea.sflag [#allocation4], %s9075_s21 }
 0xa4e   : > { %p10747_p10 = pnand %p10754_p9, %p11028_p6 }
 0xa50   : > { %p10748_p11 = pneg %p10747_p10 }
 0xa52   : > { %10909 = dma.done.wait (%p10748_p11), %s9076_s26, 4096  }
 0xa53   : > { %10911 = vsyncadd (%p10748_p11), %s9076_s26, 4294963200  ;;  %p21_p12 = scmp.ge.s32.totalorder %s11011_s15, 4   ;;  %s13119_s30 = smov %s10918_s10 }
 0xa54   : > { %s13120_s10 = smov %s10922_s11  ;;  %s13121_s11 = smov %s11022_s18 }
 0xa55   : > { %s13122_s12 = smov %s11011_s15  ;;  %23 = sbr.rel (!%p21_p12) target bundleno = 7 (0x7), region = 110 }
 0xa5a   :  { %9082 = vsyncpa [#allocation3], 1 }
 0xa5b   :  { %9084 = vsyncpa [#allocation3 + $0x1], 1 }
 0xa5c   :  { %9085 = vsyncpa [#allocation6], 1 }
 0xa5d   :  { %9086 = vsyncpa [#allocation4], 1 }
 0xa5e   :  { %9088 = vsyncpa [#allocation4 + $0x1], 1 }

</bundles_post_ra>
